<compile_context>
chip_gen: v7x
topology: tpu7x:2x2x1
jax: 0.10.0
libtpu: 0.0.40
codegen_flags: <defaults>
</compile_context>

<pallas_src>
import functools

import jax
import jax.numpy as jnp
from jax.experimental import pallas as pl
from jax.experimental.pallas import tpu as pltpu

_VMEM_LIMIT = 48 * 1024 * 1024   # explicit scoped-VMEM limit (v5e default is 16 MiB)


# ----------------------------- Pallas kernels -----------------------------

def _affine_kernel(x_ref, scale_ref, shift_ref, o_ref):
    # inference BatchNorm1d as affine: y = x * scale + shift
    o_ref[...] = x_ref[...] * scale_ref[...] + shift_ref[...]


def _avgpool_kernel(x_ref, o_ref, *, k, C):
    # x: (r, k, Wo, k*C)  ->  o: (r, Wo, C), k x k mean with stride k.
    x = x_ref[...].astype(jnp.float32)
    xs = jnp.sum(x, axis=1)                      # (r, Wo, k*C)
    acc = xs[:, :, 0:C]
    for dj in range(1, k):
        acc = acc + xs[:, :, dj * C:(dj + 1) * C]
    o_ref[...] = (acc * (1.0 / (k * k))).astype(o_ref.dtype)


def _mean_pool_kernel(x_ref, o_ref, acc_ref, *, inv_s):
    # x: (B, ts, C) spatial chunk; accumulate spatial sum, normalize at end.
    s = pl.program_id(0)
    part = jnp.sum(x_ref[...].astype(jnp.float32), axis=1)

    @pl.when(s == 0)
    def _():
        acc_ref[...] = part

    @pl.when(s > 0)
    def _():
        acc_ref[...] += part

    @pl.when(s == pl.num_programs(0) - 1)
    def _():
        o_ref[...] = acc_ref[...] * inv_s


def _pool_cls_kernel(x_ref, w_ref, b_ref, gf_ref, cls_ref, acc_ref, *, inv_s):
    # Fused AdaptiveAvgPool2d(1) + (BNNeck-folded) classifier (training path).
    s = pl.program_id(0)
    part = jnp.sum(x_ref[...].astype(jnp.float32), axis=1)

    @pl.when(s == 0)
    def _():
        acc_ref[...] = part

    @pl.when(s > 0)
    def _():
        acc_ref[...] += part

    @pl.when(s == pl.num_programs(0) - 1)
    def _():
        gf = acc_ref[...] * inv_s
        gf_ref[...] = gf
        cls_ref[...] = (jnp.dot(gf.astype(w_ref.dtype), w_ref[...],
                                preferred_element_type=jnp.float32)
                        + b_ref[...])


def _matmul_kernel_1k(x_ref, w_ref, b_ref, o_ref, *, apply_relu):
    # Single-K fast path: y = relu?(x @ W + b) in one pass (no accumulator).
    y = jnp.dot(x_ref[...], w_ref[...], preferred_element_type=jnp.float32) + b_ref[...]
    if apply_relu:
        y = jnp.maximum(y, 0.0)
    o_ref[...] = y.astype(o_ref.dtype)


def _matmul_kernel_mk_f32(x_ref, w_ref, b_ref, o_ref, *, apply_relu):
    # Multi-K, f32 output: write-first accumulate directly into o_ref.
    k = pl.program_id(2)
    part = jnp.dot(x_ref[...], w_ref[...], preferred_element_type=jnp.float32)

    @pl.when(k == 0)
    def _():
        o_ref[...] = part

    @pl.when(k > 0)
    def _():
        o_ref[...] += part

    @pl.when(k == pl.num_programs(2) - 1)
    def _():
        y = o_ref[...] + b_ref[...]
        if apply_relu:
            y = jnp.maximum(y, 0.0)
        o_ref[...] = y


def _matmul_kernel_mk_cast(x_ref, w_ref, b_ref, o_ref, acc_ref, *, apply_relu):
    # Multi-K, narrow (bf16) output: write-first into f32 scratch, cast at end.
    k = pl.program_id(2)
    part = jnp.dot(x_ref[...], w_ref[...], preferred_element_type=jnp.float32)

    @pl.when(k == 0)
    def _():
        acc_ref[...] = part

    @pl.when(k > 0)
    def _():
        acc_ref[...] += part

    @pl.when(k == pl.num_programs(2) - 1)
    def _():
        y = acc_ref[...] + b_ref[...]
        if apply_relu:
            y = jnp.maximum(y, 0.0)
        o_ref[...] = y.astype(o_ref.dtype)


# ----------------------------- kernel wrappers -----------------------------

def _pick_tile(dim, cap, quanta):
    """Largest multiple of a preferred quantum <= cap that divides dim, else dim."""
    if dim <= cap:
        return dim
    for q in quanta:
        t = (cap // q) * q
        while t >= q:
            if dim % t == 0:
                return t
            t -= q
    return dim   # fallback: single block (call sites keep shapes divisible)


def fused_matmul(x2d, w, b2, *, relu=False, out_dtype=jnp.float32,
                 tm_cap=512, tn_cap=512, tk_cap=512):
    """y = relu?(x @ w + b2), tiled over a (Cout, M[, K]) grid on the MXU.

    BN affines / normalization are pre-folded into (w, b2); b2 is (1, Cout) f32.
    """
    M, Cin = x2d.shape
    Cin_w, Cout = w.shape
    assert Cin == Cin_w and b2.shape == (1, Cout)
    tm = _pick_tile(M, tm_cap, (16, 8))
    tk = _pick_tile(Cin, tk_cap, (256, 128))
    tn = _pick_tile(Cout, tn_cap, (256, 128))
    nk = Cin // tk

    if nk == 1:
        grid = (Cout // tn, M // tm)                 # (j, i): Cout leads
        in_specs = [
            pl.BlockSpec((tm, tk), lambda j, i: (i, 0)),
            pl.BlockSpec((tk, tn), lambda j, i: (0, j)),
            pl.BlockSpec((1, tn), lambda j, i: (0, j)),
        ]
        out_spec = pl.BlockSpec((tm, tn), lambda j, i: (i, j))
        kernel = functools.partial(_matmul_kernel_1k, apply_relu=relu)
        grid_spec = pltpu.PrefetchScalarGridSpec(
            num_scalar_prefetch=0, grid=grid,
            in_specs=in_specs, out_specs=out_spec)
        semantics = ("parallel", "parallel")
    else:
        grid = (Cout // tn, M // tm, nk)             # (j, i, k): K innermost
        in_specs = [
            pl.BlockSpec((tm, tk), lambda j, i, k: (i, k)),
            pl.BlockSpec((tk, tn), lambda j, i, k: (k, j)),
            pl.BlockSpec((1, tn), lambda j, i, k: (0, j)),
        ]
        out_spec = pl.BlockSpec((tm, tn), lambda j, i, k: (i, j))
        if jnp.dtype(out_dtype) == jnp.dtype(jnp.float32):
            kernel = functools.partial(_matmul_kernel_mk_f32, apply_relu=relu)
            scratch = []
        else:
            kernel = functools.partial(_matmul_kernel_mk_cast, apply_relu=relu)
            scratch = [pltpu.VMEM((tm, tn), jnp.float32)]
        grid_spec = pltpu.PrefetchScalarGridSpec(
            num_scalar_prefetch=0, grid=grid,
            in_specs=in_specs, out_specs=out_spec,
            scratch_shapes=scratch)
        semantics = ("parallel", "parallel", "arbitrary")

    return pl.pallas_call(
        kernel,
        out_shape=jax.ShapeDtypeStruct((M, Cout), out_dtype),
        grid_spec=grid_spec,
        compiler_params=pltpu.CompilerParams(
            dimension_semantics=semantics,
            vmem_limit_bytes=_VMEM_LIMIT),
    )(x2d, w, b2)


def avg_pool_nhwc(x, k, *, block_bytes=2 * 1024 * 1024):
    """k x k average pool, stride k, NHWC.  Contiguous reshape to
    (B*Ho, k, Wo, k*C), then a row-tiled Pallas reduction kernel."""
    B, H, W, C = x.shape
    Ho, Wo = H // k, W // k
    R = B * Ho
    xr = x.reshape(R, k, Wo, k * C)                 # contiguous (bitcast) reshape
    row_bytes = k * Wo * k * C * x.dtype.itemsize
    rblk = max(1, min(R, block_bytes // max(row_bytes, 1)))
    while R % rblk:                                  # keep the grid exact
        rblk -= 1
    out = pl.pallas_call(
        functools.partial(_avgpool_kernel, k=k, C=C),
        out_shape=jax.ShapeDtypeStruct((R, Wo, C), x.dtype),
        grid_spec=pltpu.PrefetchScalarGridSpec(
            num_scalar_prefetch=0,
            grid=(R // rblk,),
            in_specs=[pl.BlockSpec((rblk, k, Wo, k * C), lambda i: (i, 0, 0, 0))],
            out_specs=pl.BlockSpec((rblk, Wo, C), lambda i: (i, 0, 0)),
        ),
        compiler_params=pltpu.CompilerParams(
            dimension_semantics=("parallel",),
            vmem_limit_bytes=_VMEM_LIMIT),
    )(xr)
    return out.reshape(B, Ho, Wo, C)


def global_mean_pool(x3d, *, s_cap=512):
    # x3d: (B, S, C) -> (B, C) f32, tiled over spatial chunks (eval path).
    B, S, C = x3d.shape
    ts = _pick_tile(S, s_cap, (8,))
    return pl.pallas_call(
        functools.partial(_mean_pool_kernel, inv_s=1.0 / S),
        out_shape=jax.ShapeDtypeStruct((B, C), jnp.float32),
        grid_spec=pltpu.PrefetchScalarGridSpec(
            num_scalar_prefetch=0,
            grid=(S // ts,),
            in_specs=[pl.BlockSpec((B, ts, C), lambda s: (0, s, 0))],
            out_specs=pl.BlockSpec((B, C), lambda s: (0, 0)),
            scratch_shapes=[pltpu.VMEM((B, C), jnp.float32)]),
        compiler_params=pltpu.CompilerParams(
            dimension_semantics=("arbitrary",),
            vmem_limit_bytes=_VMEM_LIMIT),
    )(x3d)


def global_pool_classify(x3d, w, b2, *, s_cap=512):
    # Fused mean-pool + (BNNeck-folded) classifier: returns (global_feat, cls).
    B, S, C = x3d.shape
    _, Ncls = w.shape
    ts = _pick_tile(S, s_cap, (8,))
    return pl.pallas_call(
        functools.partial(_pool_cls_kernel, inv_s=1.0 / S),
        out_shape=(jax.ShapeDtypeStruct((B, C), jnp.float32),
                   jax.ShapeDtypeStruct((B, Ncls), jnp.float32)),
        grid_spec=pltpu.PrefetchScalarGridSpec(
            num_scalar_prefetch=0,
            grid=(S // ts,),
            in_specs=[pl.BlockSpec((B, ts, C), lambda s: (0, s, 0)),
                      pl.BlockSpec((C, Ncls), lambda s: (0, 0)),
                      pl.BlockSpec((1, Ncls), lambda s: (0, 0))],
            out_specs=(pl.BlockSpec((B, C), lambda s: (0, 0)),
                       pl.BlockSpec((B, Ncls), lambda s: (0, 0))),
            scratch_shapes=[pltpu.VMEM((B, C), jnp.float32)]),
        compiler_params=pltpu.CompilerParams(
            dimension_semantics=("arbitrary",),
            vmem_limit_bytes=_VMEM_LIMIT),
    )(x3d, w, b2)


def bn1d(x2d, scale, shift):
    # tiny (B, C) affine -- eval path only
    M, C = x2d.shape
    return pl.pallas_call(
        _affine_kernel,
        out_shape=jax.ShapeDtypeStruct((M, C), jnp.float32),
        compiler_params=pltpu.CompilerParams(vmem_limit_bytes=_VMEM_LIMIT),
    )(x2d, scale, shift)


# ----------------------------- parameters -----------------------------

def _bn_affine(c, eps=1e-5):
    # BatchNorm inference affine with default init (gamma=1, beta=0, rm=0, rv=1)
    gamma = jnp.ones((c,), jnp.float32)
    beta = jnp.zeros((c,), jnp.float32)
    running_mean = jnp.zeros((c,), jnp.float32)
    running_var = jnp.ones((c,), jnp.float32)
    scale = gamma / jnp.sqrt(running_var + eps)
    shift = beta - running_mean * scale
    return scale, shift


def init_params(key, num_classes):
    keys = jax.random.split(key, 8)

    def kaiming(k, cin, cout):
        return (jax.random.normal(k, (cin, cout), jnp.float32)
                * jnp.sqrt(2.0 / cin))

    p = {}
    p['img_mean'] = jnp.array([0.485, 0.456, 0.406], jnp.float32)
    p['img_std'] = jnp.array([0.229, 0.224, 0.225], jnp.float32)

    # surrogate base (stand-in for ResNet50; see TODO(synk) above)
    p['stem_w'], p['stem_b'] = kaiming(keys[0], 3, 64), jnp.zeros((64,), jnp.float32)
    p['c2_w'], p['c2_b'] = kaiming(keys[1], 64, 256), jnp.zeros((256,), jnp.float32)
    p['c3_w'], p['c3_b'] = kaiming(keys[2], 256, 512), jnp.zeros((512,), jnp.float32)
    p['c5_w'], p['c5_b'] = kaiming(keys[3], 512, 2048), jnp.zeros((2048,), jnp.float32)

    # BatchNorm layers (bn2/tx2 exist in __init__ but are unused in forward)
    p['bn3_scale'], p['bn3_shift'] = _bn_affine(512)
    p['bn__scale'], p['bn__shift'] = _bn_affine(2048)
    p['bnneck_scale'], p['bnneck_shift'] = _bn_affine(2048)

    # 1x1 convs tx3 / tx5 / tx5x (weights stored as (Cin, Cout))
    p['tx3_w'], p['tx3_b'] = kaiming(keys[4], 512, 512), jnp.zeros((512,), jnp.float32)
    p['tx5_w'], p['tx5_b'] = kaiming(keys[5], 2048, 2048), jnp.zeros((2048,), jnp.float32)
    p['tx5x_w'], p['tx5x_b'] = kaiming(keys[6], 2048, 512), jnp.zeros((512,), jnp.float32)

    # classifier Linear(2048, num_classes, bias=False), normal std=0.001
    p['cls_w'] = jax.random.normal(keys[7], (2048, num_classes), jnp.float32) * 0.001
    return p


def _fold_affine(w, b, scale, shift):
    # y = (x*scale + shift) @ w + b == x @ (scale[:,None]*w) + (shift @ w + b)
    return w * scale[:, None], b + shift @ w


def prepare_params(p):
    """Fold BN affines / input normalization into the matmul weights, hoist
    bias reshapes, and cast heavy operands to bf16 (once, outside jit)."""
    bf16 = jnp.bfloat16
    q = {}

    # fold (x - mean)/std into the stem weights, then pad Cout 64 -> 128
    n_scale = 1.0 / p['img_std']
    n_shift = -p['img_mean'] / p['img_std']
    stem_w, stem_b = _fold_affine(p['stem_w'], p['stem_b'], n_scale, n_shift)
    q['stem_w'] = jnp.pad(stem_w, ((0, 0), (0, 64))).astype(bf16)      # (3, 128)
    q['stem_b'] = jnp.pad(stem_b, (0, 64)).reshape(1, -1).astype(jnp.float32)

    # c2 input rows padded 64 -> 128 (zero rows) to match the padded stem output
    q['c2_w'] = jnp.pad(p['c2_w'], ((0, 64), (0, 0))).astype(bf16)
    q['c2_b'] = p['c2_b'].reshape(1, -1)
    q['c3_w'] = p['c3_w'].astype(bf16)
    q['c3_b'] = p['c3_b'].reshape(1, -1)
    q['c5_w'] = p['c5_w'].astype(bf16)
    q['c5_b'] = p['c5_b'].reshape(1, -1)

    # tx3: fold bn3 affine
    w3, b3 = _fold_affine(p['tx3_w'], p['tx3_b'], p['bn3_scale'], p['bn3_shift'])
    q['tx3_w'] = w3.astype(bf16)
    q['tx3_b'] = b3.reshape(1, -1)

    # tx5 + tx5x share x5 and the bn_ affine -> fold and concat along Cout
    w5, b5 = _fold_affine(p['tx5_w'], p['tx5_b'], p['bn__scale'], p['bn__shift'])
    w5x, b5x = _fold_affine(p['tx5x_w'], p['tx5x_b'], p['bn__scale'], p['bn__shift'])
    q['tx55x_w'] = jnp.concatenate([w5, w5x], axis=1).astype(bf16)     # (2048, 2560)
    q['tx55x_b'] = jnp.concatenate([b5, b5x], axis=0).reshape(1, -1)

    # BNNeck affine kept for the eval `feat` output
    q['bnneck_scale'] = p['bnneck_scale'].reshape(1, -1)
    q['bnneck_shift'] = p['bnneck_shift'].reshape(1, -1)

    # classifier: fold BNNeck (cls(bn(gf)) == gf @ w' + b'), pad Cout to 128 lanes
    ncls = p['cls_w'].shape[1]
    wc, bc = _fold_affine(p['cls_w'], jnp.zeros((ncls,), jnp.float32),
                          p['bnneck_scale'], p['bnneck_shift'])
    pad = (-ncls) % 128
    q['cls_w'] = jnp.pad(wc, ((0, 0), (0, pad))).astype(bf16)
    q['cls_b'] = jnp.pad(bc, (0, pad)).reshape(1, -1).astype(jnp.float32)
    return q


# ----------------------------- forward -----------------------------

def backbone_forward(params, x_nchw, *, num_classes, training=True, is_hr=False):
    del is_hr  # .detach() only; no effect on forward values
    B, C, H, W = x_nchw.shape
    bf16 = jnp.bfloat16
    x = jnp.transpose(x_nchw, (0, 2, 3, 1)).astype(bf16)     # NHWC, bf16

    # ---- surrogate ResNet50 feature pyramid (Pallas matmul/relu/pool) ----
    h = fused_matmul(x.reshape(B * H * W, C), params['stem_w'], params['stem_b'],
                     relu=True, out_dtype=bf16)
    h = avg_pool_nhwc(h.reshape(B, H, W, 128), 4)            # (B, H/4, W/4, 128)
    x2 = fused_matmul(h.reshape(-1, 128), params['c2_w'], params['c2_b'],
                      relu=True, out_dtype=bf16)
    x2 = x2.reshape(B, H // 4, W // 4, 256)                  # x2: 256 @ /4
    h3 = avg_pool_nhwc(x2, 2)
    x3 = fused_matmul(h3.reshape(-1, 256), params['c3_w'], params['c3_b'],
                      relu=True, out_dtype=bf16)
    x3 = x3.reshape(B, H // 8, W // 8, 512)                  # x3: 512 @ /8
    h5 = avg_pool_nhwc(x3, 2)
    x5 = fused_matmul(h5.reshape(-1, 512), params['c5_w'], params['c5_b'],
                      relu=True, out_dtype=bf16, tn_cap=1024)
    x5 = x5.reshape(B, H // 16, W // 16, 2048)               # x5: 2048 @ /16

    h5s, w5s = x5.shape[1], x5.shape[2]
    x5_3d = x5.reshape(B, h5s * w5s, 2048)

    # ---- tx heads: BN folded into 1x1-conv weights; tx5/tx5x fused ----
    tx3 = fused_matmul(x3.reshape(-1, 512), params['tx3_w'], params['tx3_b'])
    tx55x = fused_matmul(x5.reshape(-1, 2048), params['tx55x_w'], params['tx55x_b'],
                         tn_cap=1280)
    tx5, tx5x = tx55x[:, :2048], tx55x[:, 2048:]
    tx3 = jnp.transpose(tx3.reshape(B, H // 8, W // 8, 512), (0, 3, 1, 2))   # NCHW out
    tx5 = jnp.transpose(tx5.reshape(B, h5s, w5s, 2048), (0, 3, 1, 2))
    tx5x = jnp.transpose(tx5x.reshape(B, h5s, w5s, 512), (0, 3, 1, 2))

    if training:
        # fused global mean pool + (BNNeck-folded) classifier
        global_feat, cls = global_pool_classify(x5_3d, params['cls_w'], params['cls_b'])
        cls_score = cls[:, :num_classes]
        return cls_score, global_feat, tx3, tx5, tx5x

    # eval: feat = BNNeck(global average pool(x5))
    global_feat = global_mean_pool(x5_3d)
    feat = bn1d(global_feat, params['bnneck_scale'], params['bnneck_shift'])
    return feat


# ----------------------------- main -----------------------------

if __name__ == "__main__":
    num_classes = 16
    B, H, W = 2, 32, 32

    root = jax.random.PRNGKey(0)
    kp, kx = jax.random.split(root)
    raw_params = init_params(kp, num_classes)
    params = prepare_params(raw_params)
    x = jax.random.uniform(kx, (B, 3, H, W), jnp.float32)

    fwd_train = jax.jit(functools.partial(
        backbone_forward, num_classes=num_classes, training=True))
    outs = fwd_train(params, x)
    jax.block_until_ready(outs)
    cls_score, global_feat, tx3, tx5, tx5x = outs
    assert cls_score.shape == (B, num_classes)
    assert global_feat.shape == (B, 2048)
    assert tx3.shape == (B, 512, H // 8, W // 8)
    assert tx5.shape == (B, 2048, H // 16, W // 16)
    assert tx5x.shape == (B, 512, H // 16, W // 16)

    fwd_eval = jax.jit(functools.partial(
        backbone_forward, num_classes=num_classes, training=False))
    feat = fwd_eval(params, x)
    jax.block_until_ready(feat)
    assert feat.shape == (B, 2048)

    print("KERNEL_OK")
</pallas_src>

<mosaic_0001>
module attributes {stable_mosaic.version = 11 : i64} {
  func.func @_matmul_kernel_1k(%arg0: i32, %arg1: i32, %arg2: memref<512x3xbf16, #tpu.memory_space<vmem>>, %arg3: memref<3x128xbf16, #tpu.memory_space<vmem>>, %arg4: memref<1x128xf32, #tpu.memory_space<vmem>>, %arg5: memref<512x128xbf16, #tpu.memory_space<vmem>>) attributes {dimension_semantics = [#tpu.dimension_semantics<parallel>, #tpu.dimension_semantics<parallel>], iteration_bounds = array<i64: 1, 4>, scalar_prefetch = 0 : i64, scratch_operands = 0 : i64, tpu.core_type = #tpu.core_type<tc>, window_params = [{transform_indices = @transform_0, window_bounds = array<i64: 512, 3>}, {transform_indices = @transform_1, window_bounds = array<i64: 3, 128>}, {transform_indices = @transform_2, window_bounds = array<i64: 1, 128>}, {transform_indices = @transform_3, window_bounds = array<i64: 512, 128>}]} {
    %c0 = arith.constant 0 : index
    %c0_0 = arith.constant 0 : index
    %0 = vector.load %arg2[%c0, %c0_0] : memref<512x3xbf16, #tpu.memory_space<vmem>>, vector<512x3xbf16>
    %c0_1 = arith.constant 0 : index
    %c0_2 = arith.constant 0 : index
    %1 = vector.load %arg3[%c0_1, %c0_2] : memref<3x128xbf16, #tpu.memory_space<vmem>>, vector<3x128xbf16>
    %cst = arith.constant dense<0.000000e+00> : vector<512x128xf32>
    %2 = tpu.matmul %0, %1, %cst {dimension_numbers = #tpu.dot_dimension_numbers<[1], [0], [0], [1], [0, 0, 1, 1], [], []>} : vector<512x3xbf16>, vector<3x128xbf16>, vector<512x128xf32> -> vector<512x128xf32>
    %c0_3 = arith.constant 0 : index
    %c0_4 = arith.constant 0 : index
    %3 = vector.load %arg4[%c0_3, %c0_4] : memref<1x128xf32, #tpu.memory_space<vmem>>, vector<1x128xf32>
    %4 = vector.broadcast %3 : vector<1x128xf32> to vector<512x128xf32>
    %5 = arith.addf %2, %4 : vector<512x128xf32>
    %cst_5 = arith.constant 0.000000e+00 : f32
    %6 = vector.broadcast %cst_5 : f32 to vector<512x128xf32>
    %7 = arith.maximumf %5, %6 : vector<512x128xf32>
    %8 = arith.truncf %7 : vector<512x128xf32> to vector<512x128xbf16>
    %c0_6 = arith.constant 0 : index
    %c0_7 = arith.constant 0 : index
    %9 = vector.load %arg5[%c0_6, %c0_7] : memref<512x128xbf16, #tpu.memory_space<vmem>>, vector<512x128xbf16>
    tpu.vector_store %arg5[%c0_6, %c0_7], %8 {strides = array<i32>} : memref<512x128xbf16, #tpu.memory_space<vmem>>, vector<512x128xbf16>,
    return
  }
  func.func @transform_0(%arg0: i32, %arg1: i32) -> (i32, i32) {
    %c0_i32 = arith.constant 0 : i32
    %c0_i32_0 = arith.constant 0 : i32
    return %arg1, %c0_i32 : i32, i32
  }
  func.func @transform_1(%arg0: i32, %arg1: i32) -> (i32, i32) {
    %c0_i32 = arith.constant 0 : i32
    %c0_i32_0 = arith.constant 0 : i32
    return %c0_i32, %arg0 : i32, i32
  }
  func.func @transform_2(%arg0: i32, %arg1: i32) -> (i32, i32) {
    %c0_i32 = arith.constant 0 : i32
    %c0_i32_0 = arith.constant 0 : i32
    return %c0_i32, %arg0 : i32, i32
  }
  func.func @transform_3(%arg0: i32, %arg1: i32) -> (i32, i32) {
    %c0_i32 = arith.constant 0 : i32
    return %arg1, %arg0 : i32, i32
  }
}

module attributes {stable_mosaic.version = 11 : i64} {
  func.func @_avgpool_kernel(%arg0: i32, %arg1: memref<16x4x8x512xbf16, #tpu.memory_space<vmem>>, %arg2: memref<16x8x128xbf16, #tpu.memory_space<vmem>>) attributes {dimension_semantics = [#tpu.dimension_semantics<parallel>], iteration_bounds = array<i64: 1>, scalar_prefetch = 0 : i64, scratch_operands = 0 : i64, tpu.core_type = #tpu.core_type<tc>, window_params = [{transform_indices = @transform_0, window_bounds = array<i64: 16, 4, 8, 512>}, {transform_indices = @transform_1, window_bounds = array<i64: 16, 8, 128>}]} {
    %c0 = arith.constant 0 : index
    %c0_0 = arith.constant 0 : index
    %c0_1 = arith.constant 0 : index
    %c0_2 = arith.constant 0 : index
    %0 = vector.load %arg1[%c0, %c0_0, %c0_1, %c0_2] : memref<16x4x8x512xbf16, #tpu.memory_space<vmem>>, vector<16x4x8x512xbf16>
    %1 = arith.extf %0 : vector<16x4x8x512xbf16> to vector<16x4x8x512xf32>
    %cst = arith.constant dense<0.000000e+00> : vector<16x8x512xf32>
    %2 = vector.multi_reduction <add>, %1, %cst [1] : vector<16x4x8x512xf32> to vector<16x8x512xf32>
    %3 = vector.extract_strided_slice %2 {offsets = [0, 0, 0], sizes = [16, 8, 128], strides = [1, 1, 1]} : vector<16x8x512xf32> to vector<16x8x128xf32>
    %4 = vector.extract_strided_slice %2 {offsets = [0, 0, 128], sizes = [16, 8, 128], strides = [1, 1, 1]} : vector<16x8x512xf32> to vector<16x8x128xf32>
    %5 = arith.addf %3, %4 : vector<16x8x128xf32>
    %6 = vector.extract_strided_slice %2 {offsets = [0, 0, 256], sizes = [16, 8, 128], strides = [1, 1, 1]} : vector<16x8x512xf32> to vector<16x8x128xf32>
    %7 = arith.addf %5, %6 : vector<16x8x128xf32>
    %8 = vector.extract_strided_slice %2 {offsets = [0, 0, 384], sizes = [16, 8, 128], strides = [1, 1, 1]} : vector<16x8x512xf32> to vector<16x8x128xf32>
    %9 = arith.addf %7, %8 : vector<16x8x128xf32>
    %cst_3 = arith.constant 6.250000e-02 : f32
    %10 = vector.broadcast %cst_3 : f32 to vector<16x8x128xf32>
    %11 = arith.mulf %9, %10 : vector<16x8x128xf32>
    %12 = arith.truncf %11 : vector<16x8x128xf32> to vector<16x8x128xbf16>
    %c0_4 = arith.constant 0 : index
    %c0_5 = arith.constant 0 : index
    %c0_6 = arith.constant 0 : index
    %13 = vector.load %arg2[%c0_4, %c0_5, %c0_6] : memref<16x8x128xbf16, #tpu.memory_space<vmem>>, vector<16x8x128xbf16>
    tpu.vector_store %arg2[%c0_4, %c0_5, %c0_6], %12 {strides = array<i32>} : memref<16x8x128xbf16, #tpu.memory_space<vmem>>, vector<16x8x128xbf16>,
    return
  }
  func.func @transform_0(%arg0: i32) -> (i32, i32, i32, i32) {
    %c0_i32 = arith.constant 0 : i32
    %c0_i32_0 = arith.constant 0 : i32
    %c0_i32_1 = arith.constant 0 : i32
    %c0_i32_2 = arith.constant 0 : i32
    return %arg0, %c0_i32, %c0_i32_0, %c0_i32_1 : i32, i32, i32, i32
  }
  func.func @transform_1(%arg0: i32) -> (i32, i32, i32) {
    %c0_i32 = arith.constant 0 : i32
    %c0_i32_0 = arith.constant 0 : i32
    %c0_i32_1 = arith.constant 0 : i32
    return %arg0, %c0_i32, %c0_i32_0 : i32, i32, i32
  }
}

module attributes {stable_mosaic.version = 11 : i64} {
  func.func @_matmul_kernel_1k(%arg0: i32, %arg1: i32, %arg2: memref<128x128xbf16, #tpu.memory_space<vmem>>, %arg3: memref<128x256xbf16, #tpu.memory_space<vmem>>, %arg4: memref<1x256xf32, #tpu.memory_space<vmem>>, %arg5: memref<128x256xbf16, #tpu.memory_space<vmem>>) attributes {dimension_semantics = [#tpu.dimension_semantics<parallel>, #tpu.dimension_semantics<parallel>], iteration_bounds = array<i64: 1, 1>, scalar_prefetch = 0 : i64, scratch_operands = 0 : i64, tpu.core_type = #tpu.core_type<tc>, window_params = [{transform_indices = @transform_0, window_bounds = array<i64: 128, 128>}, {transform_indices = @transform_1, window_bounds = array<i64: 128, 256>}, {transform_indices = @transform_2, window_bounds = array<i64: 1, 256>}, {transform_indices = @transform_3, window_bounds = array<i64: 128, 256>}]} {
    %c0 = arith.constant 0 : index
    %c0_0 = arith.constant 0 : index
    %0 = vector.load %arg2[%c0, %c0_0] : memref<128x128xbf16, #tpu.memory_space<vmem>>, vector<128x128xbf16>
    %c0_1 = arith.constant 0 : index
    %c0_2 = arith.constant 0 : index
    %1 = vector.load %arg3[%c0_1, %c0_2] : memref<128x256xbf16, #tpu.memory_space<vmem>>, vector<128x256xbf16>
    %cst = arith.constant dense<0.000000e+00> : vector<128x256xf32>
    %2 = tpu.matmul %0, %1, %cst {dimension_numbers = #tpu.dot_dimension_numbers<[1], [0], [0], [1], [0, 0, 1, 1], [], []>} : vector<128x128xbf16>, vector<128x256xbf16>, vector<128x256xf32> -> vector<128x256xf32>
    %c0_3 = arith.constant 0 : index
    %c0_4 = arith.constant 0 : index
    %3 = vector.load %arg4[%c0_3, %c0_4] : memref<1x256xf32, #tpu.memory_space<vmem>>, vector<1x256xf32>
    %4 = vector.broadcast %3 : vector<1x256xf32> to vector<128x256xf32>
    %5 = arith.addf %2, %4 : vector<128x256xf32>
    %cst_5 = arith.constant 0.000000e+00 : f32
    %6 = vector.broadcast %cst_5 : f32 to vector<128x256xf32>
    %7 = arith.maximumf %5, %6 : vector<128x256xf32>
    %8 = arith.truncf %7 : vector<128x256xf32> to vector<128x256xbf16>
    %c0_6 = arith.constant 0 : index
    %c0_7 = arith.constant 0 : index
    %9 = vector.load %arg5[%c0_6, %c0_7] : memref<128x256xbf16, #tpu.memory_space<vmem>>, vector<128x256xbf16>
    tpu.vector_store %arg5[%c0_6, %c0_7], %8 {strides = array<i32>} : memref<128x256xbf16, #tpu.memory_space<vmem>>, vector<128x256xbf16>,
    return
  }
  func.func @transform_0(%arg0: i32, %arg1: i32) -> (i32, i32) {
    %c0_i32 = arith.constant 0 : i32
    %c0_i32_0 = arith.constant 0 : i32
    return %arg1, %c0_i32 : i32, i32
  }
  func.func @transform_1(%arg0: i32, %arg1: i32) -> (i32, i32) {
    %c0_i32 = arith.constant 0 : i32
    %c0_i32_0 = arith.constant 0 : i32
    return %c0_i32, %arg0 : i32, i32
  }
  func.func @transform_2(%arg0: i32, %arg1: i32) -> (i32, i32) {
    %c0_i32 = arith.constant 0 : i32
    %c0_i32_0 = arith.constant 0 : i32
    return %c0_i32, %arg0 : i32, i32
  }
  func.func @transform_3(%arg0: i32, %arg1: i32) -> (i32, i32) {
    %c0_i32 = arith.constant 0 : i32
    return %arg1, %arg0 : i32, i32
  }
}

module attributes {stable_mosaic.version = 11 : i64} {
  func.func @_avgpool_kernel(%arg0: i32, %arg1: memref<8x2x4x512xbf16, #tpu.memory_space<vmem>>, %arg2: memref<8x4x256xbf16, #tpu.memory_space<vmem>>) attributes {dimension_semantics = [#tpu.dimension_semantics<parallel>], iteration_bounds = array<i64: 1>, scalar_prefetch = 0 : i64, scratch_operands = 0 : i64, tpu.core_type = #tpu.core_type<tc>, window_params = [{transform_indices = @transform_0, window_bounds = array<i64: 8, 2, 4, 512>}, {transform_indices = @transform_1, window_bounds = array<i64: 8, 4, 256>}]} {
    %c0 = arith.constant 0 : index
    %c0_0 = arith.constant 0 : index
    %c0_1 = arith.constant 0 : index
    %c0_2 = arith.constant 0 : index
    %0 = vector.load %arg1[%c0, %c0_0, %c0_1, %c0_2] : memref<8x2x4x512xbf16, #tpu.memory_space<vmem>>, vector<8x2x4x512xbf16>
    %1 = arith.extf %0 : vector<8x2x4x512xbf16> to vector<8x2x4x512xf32>
    %cst = arith.constant dense<0.000000e+00> : vector<8x4x512xf32>
    %2 = vector.multi_reduction <add>, %1, %cst [1] : vector<8x2x4x512xf32> to vector<8x4x512xf32>
    %3 = vector.extract_strided_slice %2 {offsets = [0, 0, 0], sizes = [8, 4, 256], strides = [1, 1, 1]} : vector<8x4x512xf32> to vector<8x4x256xf32>
    %4 = vector.extract_strided_slice %2 {offsets = [0, 0, 256], sizes = [8, 4, 256], strides = [1, 1, 1]} : vector<8x4x512xf32> to vector<8x4x256xf32>
    %5 = arith.addf %3, %4 : vector<8x4x256xf32>
    %cst_3 = arith.constant 2.500000e-01 : f32
    %6 = vector.broadcast %cst_3 : f32 to vector<8x4x256xf32>
    %7 = arith.mulf %5, %6 : vector<8x4x256xf32>
    %8 = arith.truncf %7 : vector<8x4x256xf32> to vector<8x4x256xbf16>
    %c0_4 = arith.constant 0 : index
    %c0_5 = arith.constant 0 : index
    %c0_6 = arith.constant 0 : index
    %9 = vector.load %arg2[%c0_4, %c0_5, %c0_6] : memref<8x4x256xbf16, #tpu.memory_space<vmem>>, vector<8x4x256xbf16>
    tpu.vector_store %arg2[%c0_4, %c0_5, %c0_6], %8 {strides = array<i32>} : memref<8x4x256xbf16, #tpu.memory_space<vmem>>, vector<8x4x256xbf16>,
    return
  }
  func.func @transform_0(%arg0: i32) -> (i32, i32, i32, i32) {
    %c0_i32 = arith.constant 0 : i32
    %c0_i32_0 = arith.constant 0 : i32
    %c0_i32_1 = arith.constant 0 : i32
    %c0_i32_2 = arith.constant 0 : i32
    return %arg0, %c0_i32, %c0_i32_0, %c0_i32_1 : i32, i32, i32, i32
  }
  func.func @transform_1(%arg0: i32) -> (i32, i32, i32) {
    %c0_i32 = arith.constant 0 : i32
    %c0_i32_0 = arith.constant 0 : i32
    %c0_i32_1 = arith.constant 0 : i32
    return %arg0, %c0_i32, %c0_i32_0 : i32, i32, i32
  }
}

module attributes {stable_mosaic.version = 11 : i64} {
  func.func @_matmul_kernel_1k(%arg0: i32, %arg1: i32, %arg2: memref<32x256xbf16, #tpu.memory_space<vmem>>, %arg3: memref<256x512xbf16, #tpu.memory_space<vmem>>, %arg4: memref<1x512xf32, #tpu.memory_space<vmem>>, %arg5: memref<32x512xbf16, #tpu.memory_space<vmem>>) attributes {dimension_semantics = [#tpu.dimension_semantics<parallel>, #tpu.dimension_semantics<parallel>], iteration_bounds = array<i64: 1, 1>, scalar_prefetch = 0 : i64, scratch_operands = 0 : i64, tpu.core_type = #tpu.core_type<tc>, window_params = [{transform_indices = @transform_0, window_bounds = array<i64: 32, 256>}, {transform_indices = @transform_1, window_bounds = array<i64: 256, 512>}, {transform_indices = @transform_2, window_bounds = array<i64: 1, 512>}, {transform_indices = @transform_3, window_bounds = array<i64: 32, 512>}]} {
    %c0 = arith.constant 0 : index
    %c0_0 = arith.constant 0 : index
    %0 = vector.load %arg2[%c0, %c0_0] : memref<32x256xbf16, #tpu.memory_space<vmem>>, vector<32x256xbf16>
    %c0_1 = arith.constant 0 : index
    %c0_2 = arith.constant 0 : index
    %1 = vector.load %arg3[%c0_1, %c0_2] : memref<256x512xbf16, #tpu.memory_space<vmem>>, vector<256x512xbf16>
    %cst = arith.constant dense<0.000000e+00> : vector<32x512xf32>
    %2 = tpu.matmul %0, %1, %cst {dimension_numbers = #tpu.dot_dimension_numbers<[1], [0], [0], [1], [0, 0, 1, 1], [], []>} : vector<32x256xbf16>, vector<256x512xbf16>, vector<32x512xf32> -> vector<32x512xf32>
    %c0_3 = arith.constant 0 : index
    %c0_4 = arith.constant 0 : index
    %3 = vector.load %arg4[%c0_3, %c0_4] : memref<1x512xf32, #tpu.memory_space<vmem>>, vector<1x512xf32>
    %4 = vector.broadcast %3 : vector<1x512xf32> to vector<32x512xf32>
    %5 = arith.addf %2, %4 : vector<32x512xf32>
    %cst_5 = arith.constant 0.000000e+00 : f32
    %6 = vector.broadcast %cst_5 : f32 to vector<32x512xf32>
    %7 = arith.maximumf %5, %6 : vector<32x512xf32>
    %8 = arith.truncf %7 : vector<32x512xf32> to vector<32x512xbf16>
    %c0_6 = arith.constant 0 : index
    %c0_7 = arith.constant 0 : index
    %9 = vector.load %arg5[%c0_6, %c0_7] : memref<32x512xbf16, #tpu.memory_space<vmem>>, vector<32x512xbf16>
    tpu.vector_store %arg5[%c0_6, %c0_7], %8 {strides = array<i32>} : memref<32x512xbf16, #tpu.memory_space<vmem>>, vector<32x512xbf16>,
    return
  }
  func.func @transform_0(%arg0: i32, %arg1: i32) -> (i32, i32) {
    %c0_i32 = arith.constant 0 : i32
    %c0_i32_0 = arith.constant 0 : i32
    return %arg1, %c0_i32 : i32, i32
  }
  func.func @transform_1(%arg0: i32, %arg1: i32) -> (i32, i32) {
    %c0_i32 = arith.constant 0 : i32
    %c0_i32_0 = arith.constant 0 : i32
    return %c0_i32, %arg0 : i32, i32
  }
  func.func @transform_2(%arg0: i32, %arg1: i32) -> (i32, i32) {
    %c0_i32 = arith.constant 0 : i32
    %c0_i32_0 = arith.constant 0 : i32
    return %c0_i32, %arg0 : i32, i32
  }
  func.func @transform_3(%arg0: i32, %arg1: i32) -> (i32, i32) {
    %c0_i32 = arith.constant 0 : i32
    return %arg1, %arg0 : i32, i32
  }
}

module attributes {stable_mosaic.version = 11 : i64} {
  func.func @_avgpool_kernel(%arg0: i32, %arg1: memref<4x2x2x1024xbf16, #tpu.memory_space<vmem>>, %arg2: memref<4x2x512xbf16, #tpu.memory_space<vmem>>) attributes {dimension_semantics = [#tpu.dimension_semantics<parallel>], iteration_bounds = array<i64: 1>, scalar_prefetch = 0 : i64, scratch_operands = 0 : i64, tpu.core_type = #tpu.core_type<tc>, window_params = [{transform_indices = @transform_0, window_bounds = array<i64: 4, 2, 2, 1024>}, {transform_indices = @transform_1, window_bounds = array<i64: 4, 2, 512>}]} {
    %c0 = arith.constant 0 : index
    %c0_0 = arith.constant 0 : index
    %c0_1 = arith.constant 0 : index
    %c0_2 = arith.constant 0 : index
    %0 = vector.load %arg1[%c0, %c0_0, %c0_1, %c0_2] : memref<4x2x2x1024xbf16, #tpu.memory_space<vmem>>, vector<4x2x2x1024xbf16>
    %1 = arith.extf %0 : vector<4x2x2x1024xbf16> to vector<4x2x2x1024xf32>
    %cst = arith.constant dense<0.000000e+00> : vector<4x2x1024xf32>
    %2 = vector.multi_reduction <add>, %1, %cst [1] : vector<4x2x2x1024xf32> to vector<4x2x1024xf32>
    %3 = vector.extract_strided_slice %2 {offsets = [0, 0, 0], sizes = [4, 2, 512], strides = [1, 1, 1]} : vector<4x2x1024xf32> to vector<4x2x512xf32>
    %4 = vector.extract_strided_slice %2 {offsets = [0, 0, 512], sizes = [4, 2, 512], strides = [1, 1, 1]} : vector<4x2x1024xf32> to vector<4x2x512xf32>
    %5 = arith.addf %3, %4 : vector<4x2x512xf32>
    %cst_3 = arith.constant 2.500000e-01 : f32
    %6 = vector.broadcast %cst_3 : f32 to vector<4x2x512xf32>
    %7 = arith.mulf %5, %6 : vector<4x2x512xf32>
    %8 = arith.truncf %7 : vector<4x2x512xf32> to vector<4x2x512xbf16>
    %c0_4 = arith.constant 0 : index
    %c0_5 = arith.constant 0 : index
    %c0_6 = arith.constant 0 : index
    %9 = vector.load %arg2[%c0_4, %c0_5, %c0_6] : memref<4x2x512xbf16, #tpu.memory_space<vmem>>, vector<4x2x512xbf16>
    tpu.vector_store %arg2[%c0_4, %c0_5, %c0_6], %8 {strides = array<i32>} : memref<4x2x512xbf16, #tpu.memory_space<vmem>>, vector<4x2x512xbf16>,
    return
  }
  func.func @transform_0(%arg0: i32) -> (i32, i32, i32, i32) {
    %c0_i32 = arith.constant 0 : i32
    %c0_i32_0 = arith.constant 0 : i32
    %c0_i32_1 = arith.constant 0 : i32
    %c0_i32_2 = arith.constant 0 : i32
    return %arg0, %c0_i32, %c0_i32_0, %c0_i32_1 : i32, i32, i32, i32
  }
  func.func @transform_1(%arg0: i32) -> (i32, i32, i32) {
    %c0_i32 = arith.constant 0 : i32
    %c0_i32_0 = arith.constant 0 : i32
    %c0_i32_1 = arith.constant 0 : i32
    return %arg0, %c0_i32, %c0_i32_0 : i32, i32, i32
  }
}

module attributes {stable_mosaic.version = 11 : i64} {
  func.func @_matmul_kernel_1k(%arg0: i32, %arg1: i32, %arg2: memref<8x512xbf16, #tpu.memory_space<vmem>>, %arg3: memref<512x1024xbf16, #tpu.memory_space<vmem>>, %arg4: memref<1x1024xf32, #tpu.memory_space<vmem>>, %arg5: memref<8x1024xbf16, #tpu.memory_space<vmem>>) attributes {dimension_semantics = [#tpu.dimension_semantics<parallel>, #tpu.dimension_semantics<parallel>], iteration_bounds = array<i64: 2, 1>, scalar_prefetch = 0 : i64, scratch_operands = 0 : i64, tpu.core_type = #tpu.core_type<tc>, window_params = [{transform_indices = @transform_0, window_bounds = array<i64: 8, 512>}, {transform_indices = @transform_1, window_bounds = array<i64: 512, 1024>}, {transform_indices = @transform_2, window_bounds = array<i64: 1, 1024>}, {transform_indices = @transform_3, window_bounds = array<i64: 8, 1024>}]} {
    %c0 = arith.constant 0 : index
    %c0_0 = arith.constant 0 : index
    %0 = vector.load %arg2[%c0, %c0_0] : memref<8x512xbf16, #tpu.memory_space<vmem>>, vector<8x512xbf16>
    %c0_1 = arith.constant 0 : index
    %c0_2 = arith.constant 0 : index
    %1 = vector.load %arg3[%c0_1, %c0_2] : memref<512x1024xbf16, #tpu.memory_space<vmem>>, vector<512x1024xbf16>
    %cst = arith.constant dense<0.000000e+00> : vector<8x1024xf32>
    %2 = tpu.matmul %0, %1, %cst {dimension_numbers = #tpu.dot_dimension_numbers<[1], [0], [0], [1], [0, 0, 1, 1], [], []>} : vector<8x512xbf16>, vector<512x1024xbf16>, vector<8x1024xf32> -> vector<8x1024xf32>
    %c0_3 = arith.constant 0 : index
    %c0_4 = arith.constant 0 : index
    %3 = vector.load %arg4[%c0_3, %c0_4] : memref<1x1024xf32, #tpu.memory_space<vmem>>, vector<1x1024xf32>
    %4 = vector.broadcast %3 : vector<1x1024xf32> to vector<8x1024xf32>
    %5 = arith.addf %2, %4 : vector<8x1024xf32>
    %cst_5 = arith.constant 0.000000e+00 : f32
    %6 = vector.broadcast %cst_5 : f32 to vector<8x1024xf32>
    %7 = arith.maximumf %5, %6 : vector<8x1024xf32>
    %8 = arith.truncf %7 : vector<8x1024xf32> to vector<8x1024xbf16>
    %c0_6 = arith.constant 0 : index
    %c0_7 = arith.constant 0 : index
    %9 = vector.load %arg5[%c0_6, %c0_7] : memref<8x1024xbf16, #tpu.memory_space<vmem>>, vector<8x1024xbf16>
    tpu.vector_store %arg5[%c0_6, %c0_7], %8 {strides = array<i32>} : memref<8x1024xbf16, #tpu.memory_space<vmem>>, vector<8x1024xbf16>,
    return
  }
  func.func @transform_0(%arg0: i32, %arg1: i32) -> (i32, i32) {
    %c0_i32 = arith.constant 0 : i32
    %c0_i32_0 = arith.constant 0 : i32
    return %arg1, %c0_i32 : i32, i32
  }
  func.func @transform_1(%arg0: i32, %arg1: i32) -> (i32, i32) {
    %c0_i32 = arith.constant 0 : i32
    %c0_i32_0 = arith.constant 0 : i32
    return %c0_i32, %arg0 : i32, i32
  }
  func.func @transform_2(%arg0: i32, %arg1: i32) -> (i32, i32) {
    %c0_i32 = arith.constant 0 : i32
    %c0_i32_0 = arith.constant 0 : i32
    return %c0_i32, %arg0 : i32, i32
  }
  func.func @transform_3(%arg0: i32, %arg1: i32) -> (i32, i32) {
    %c0_i32 = arith.constant 0 : i32
    return %arg1, %arg0 : i32, i32
  }
}

module attributes {stable_mosaic.version = 11 : i64} {
  func.func @_pool_cls_kernel(%arg0: i32, %arg1: memref<2x4x2048xbf16, #tpu.memory_space<vmem>>, %arg2: memref<2048x128xbf16, #tpu.memory_space<vmem>>, %arg3: memref<1x128xf32, #tpu.memory_space<vmem>>, %arg4: memref<2x2048xf32, #tpu.memory_space<vmem>>, %arg5: memref<2x128xf32, #tpu.memory_space<vmem>>, %arg6: memref<2x2048xf32, #tpu.memory_space<vmem>>) attributes {dimension_semantics = [#tpu.dimension_semantics<arbitrary>], iteration_bounds = array<i64: 1>, scalar_prefetch = 0 : i64, scratch_operands = 1 : i64, tpu.core_type = #tpu.core_type<tc>, window_params = [{transform_indices = @transform_0, window_bounds = array<i64: 2, 4, 2048>}, {pipeline_mode = #tpu.pipeline_mode<synchronous>, transform_indices = @transform_1, window_bounds = array<i64: 2048, 128>}, {pipeline_mode = #tpu.pipeline_mode<synchronous>, transform_indices = @transform_2, window_bounds = array<i64: 1, 128>}, {pipeline_mode = #tpu.pipeline_mode<synchronous>, transform_indices = @transform_3, window_bounds = array<i64: 2, 2048>}, {pipeline_mode = #tpu.pipeline_mode<synchronous>, transform_indices = @transform_4, window_bounds = array<i64: 2, 128>}]} {
    %c0 = arith.constant 0 : index
    %c0_0 = arith.constant 0 : index
    %c0_1 = arith.constant 0 : index
    %0 = vector.load %arg1[%c0, %c0_0, %c0_1] : memref<2x4x2048xbf16, #tpu.memory_space<vmem>>, vector<2x4x2048xbf16>
    %1 = arith.extf %0 : vector<2x4x2048xbf16> to vector<2x4x2048xf32>
    %cst = arith.constant dense<0.000000e+00> : vector<2x2048xf32>
    %2 = vector.multi_reduction <add>, %1, %cst [1] : vector<2x4x2048xf32> to vector<2x2048xf32>
    %c0_i32 = arith.constant 0 : i32
    %3 = arith.cmpi eq, %arg0, %c0_i32 : i32
    %4 = arith.extui %3 : i1 to i32
    %c0_i32_2 = arith.constant 0 : i32
    %5 = arith.cmpi ne, %4, %c0_i32_2 : i32
    scf.if %5 {
      %c0_7 = arith.constant 0 : index
      %c0_8 = arith.constant 0 : index
      %12 = vector.load %arg6[%c0_7, %c0_8] : memref<2x2048xf32, #tpu.memory_space<vmem>>, vector<2x2048xf32>
      tpu.vector_store %arg6[%c0_7, %c0_8], %2 {strides = array<i32>} : memref<2x2048xf32, #tpu.memory_space<vmem>>, vector<2x2048xf32>,
    } else {
    }
    %c0_i32_3 = arith.constant 0 : i32
    %6 = arith.cmpi sgt, %arg0, %c0_i32_3 : i32
    %7 = arith.extui %6 : i1 to i32
    %c0_i32_4 = arith.constant 0 : i32
    %8 = arith.cmpi ne, %7, %c0_i32_4 : i32
    scf.if %8 {
      %c0_7 = arith.constant 0 : index
      %c0_8 = arith.constant 0 : index
      %12 = vector.load %arg6[%c0_7, %c0_8] : memref<2x2048xf32, #tpu.memory_space<vmem>>, vector<2x2048xf32>
      %13 = arith.addf %12, %2 : vector<2x2048xf32>
      %c0_9 = arith.constant 0 : index
      %c0_10 = arith.constant 0 : index
      %14 = vector.load %arg6[%c0_9, %c0_10] : memref<2x2048xf32, #tpu.memory_space<vmem>>, vector<2x2048xf32>
      tpu.vector_store %arg6[%c0_9, %c0_10], %13 {strides = array<i32>} : memref<2x2048xf32, #tpu.memory_space<vmem>>, vector<2x2048xf32>,
    } else {
    }
    %c0_i32_5 = arith.constant 0 : i32
    %9 = arith.cmpi eq, %arg0, %c0_i32_5 : i32
    %10 = arith.extui %9 : i1 to i32
    %c0_i32_6 = arith.constant 0 : i32
    %11 = arith.cmpi ne, %10, %c0_i32_6 : i32
    scf.if %11 {
      %c0_7 = arith.constant 0 : index
      %c0_8 = arith.constant 0 : index
      %12 = vector.load %arg6[%c0_7, %c0_8] : memref<2x2048xf32, #tpu.memory_space<vmem>>, vector<2x2048xf32>
      %cst_9 = arith.constant 2.500000e-01 : f32
      %13 = vector.broadcast %cst_9 : f32 to vector<2x2048xf32>
      %14 = arith.mulf %12, %13 : vector<2x2048xf32>
      %c0_10 = arith.constant 0 : index
      %c0_11 = arith.constant 0 : index
      %15 = vector.load %arg4[%c0_10, %c0_11] : memref<2x2048xf32, #tpu.memory_space<vmem>>, vector<2x2048xf32>
      tpu.vector_store %arg4[%c0_10, %c0_11], %14 {strides = array<i32>} : memref<2x2048xf32, #tpu.memory_space<vmem>>, vector<2x2048xf32>,
      %16 = arith.truncf %14 : vector<2x2048xf32> to vector<2x2048xbf16>
      %c0_12 = arith.constant 0 : index
      %c0_13 = arith.constant 0 : index
      %17 = vector.load %arg2[%c0_12, %c0_13] : memref<2048x128xbf16, #tpu.memory_space<vmem>>, vector<2048x128xbf16>
      %cst_14 = arith.constant dense<0.000000e+00> : vector<2x128xf32>
      %18 = tpu.matmul %16, %17, %cst_14 {dimension_numbers = #tpu.dot_dimension_numbers<[1], [0], [0], [1], [0, 0, 1, 1], [], []>} : vector<2x2048xbf16>, vector<2048x128xbf16>, vector<2x128xf32> -> vector<2x128xf32>
      %c0_15 = arith.constant 0 : index
      %c0_16 = arith.constant 0 : index
      %19 = vector.load %arg3[%c0_15, %c0_16] : memref<1x128xf32, #tpu.memory_space<vmem>>, vector<1x128xf32>
      %20 = vector.broadcast %19 : vector<1x128xf32> to vector<2x128xf32>
      %21 = arith.addf %18, %20 : vector<2x128xf32>
      %c0_17 = arith.constant 0 : index
      %c0_18 = arith.constant 0 : index
      %22 = vector.load %arg5[%c0_17, %c0_18] : memref<2x128xf32, #tpu.memory_space<vmem>>, vector<2x128xf32>
      tpu.vector_store %arg5[%c0_17, %c0_18], %21 {strides = array<i32>} : memref<2x128xf32, #tpu.memory_space<vmem>>, vector<2x128xf32>,
    } else {
    }
    return
  }
  func.func @transform_0(%arg0: i32) -> (i32, i32, i32) {
    %c0_i32 = arith.constant 0 : i32
    %c0_i32_0 = arith.constant 0 : i32
    %c0_i32_1 = arith.constant 0 : i32
    return %c0_i32, %arg0, %c0_i32_0 : i32, i32, i32
  }
  func.func @transform_1(%arg0: i32) -> (i32, i32) {
    %c0_i32 = arith.constant 0 : i32
    %c0_i32_0 = arith.constant 0 : i32
    %c0_i32_1 = arith.constant 0 : i32
    return %c0_i32, %c0_i32_0 : i32, i32
  }
  func.func @transform_2(%arg0: i32) -> (i32, i32) {
    %c0_i32 = arith.constant 0 : i32
    %c0_i32_0 = arith.constant 0 : i32
    %c0_i32_1 = arith.constant 0 : i32
    return %c0_i32, %c0_i32_0 : i32, i32
  }
  func.func @transform_3(%arg0: i32) -> (i32, i32) {
    %c0_i32 = arith.constant 0 : i32
    %c0_i32_0 = arith.constant 0 : i32
    %c0_i32_1 = arith.constant 0 : i32
    return %c0_i32, %c0_i32_0 : i32, i32
  }
  func.func @transform_4(%arg0: i32) -> (i32, i32) {
    %c0_i32 = arith.constant 0 : i32
    %c0_i32_0 = arith.constant 0 : i32
    %c0_i32_1 = arith.constant 0 : i32
    return %c0_i32, %c0_i32_0 : i32, i32
  }
}

module attributes {stable_mosaic.version = 11 : i64} {
  func.func @_matmul_kernel_1k(%arg0: i32, %arg1: i32, %arg2: memref<32x512xbf16, #tpu.memory_space<vmem>>, %arg3: memref<512x512xbf16, #tpu.memory_space<vmem>>, %arg4: memref<1x512xf32, #tpu.memory_space<vmem>>, %arg5: memref<32x512xf32, #tpu.memory_space<vmem>>) attributes {dimension_semantics = [#tpu.dimension_semantics<parallel>, #tpu.dimension_semantics<parallel>], iteration_bounds = array<i64: 1, 1>, scalar_prefetch = 0 : i64, scratch_operands = 0 : i64, tpu.core_type = #tpu.core_type<tc>, window_params = [{transform_indices = @transform_0, window_bounds = array<i64: 32, 512>}, {transform_indices = @transform_1, window_bounds = array<i64: 512, 512>}, {transform_indices = @transform_2, window_bounds = array<i64: 1, 512>}, {transform_indices = @transform_3, window_bounds = array<i64: 32, 512>}]} {
    %c0 = arith.constant 0 : index
    %c0_0 = arith.constant 0 : index
    %0 = vector.load %arg2[%c0, %c0_0] : memref<32x512xbf16, #tpu.memory_space<vmem>>, vector<32x512xbf16>
    %c0_1 = arith.constant 0 : index
    %c0_2 = arith.constant 0 : index
    %1 = vector.load %arg3[%c0_1, %c0_2] : memref<512x512xbf16, #tpu.memory_space<vmem>>, vector<512x512xbf16>
    %cst = arith.constant dense<0.000000e+00> : vector<32x512xf32>
    %2 = tpu.matmul %0, %1, %cst {dimension_numbers = #tpu.dot_dimension_numbers<[1], [0], [0], [1], [0, 0, 1, 1], [], []>} : vector<32x512xbf16>, vector<512x512xbf16>, vector<32x512xf32> -> vector<32x512xf32>
    %c0_3 = arith.constant 0 : index
    %c0_4 = arith.constant 0 : index
    %3 = vector.load %arg4[%c0_3, %c0_4] : memref<1x512xf32, #tpu.memory_space<vmem>>, vector<1x512xf32>
    %4 = vector.broadcast %3 : vector<1x512xf32> to vector<32x512xf32>
    %5 = arith.addf %2, %4 : vector<32x512xf32>
    %c0_5 = arith.constant 0 : index
    %c0_6 = arith.constant 0 : index
    %6 = vector.load %arg5[%c0_5, %c0_6] : memref<32x512xf32, #tpu.memory_space<vmem>>, vector<32x512xf32>
    tpu.vector_store %arg5[%c0_5, %c0_6], %5 {strides = array<i32>} : memref<32x512xf32, #tpu.memory_space<vmem>>, vector<32x512xf32>,
    return
  }
  func.func @transform_0(%arg0: i32, %arg1: i32) -> (i32, i32) {
    %c0_i32 = arith.constant 0 : i32
    %c0_i32_0 = arith.constant 0 : i32
    return %arg1, %c0_i32 : i32, i32
  }
  func.func @transform_1(%arg0: i32, %arg1: i32) -> (i32, i32) {
    %c0_i32 = arith.constant 0 : i32
    %c0_i32_0 = arith.constant 0 : i32
    return %c0_i32, %arg0 : i32, i32
  }
  func.func @transform_2(%arg0: i32, %arg1: i32) -> (i32, i32) {
    %c0_i32 = arith.constant 0 : i32
    %c0_i32_0 = arith.constant 0 : i32
    return %c0_i32, %arg0 : i32, i32
  }
  func.func @transform_3(%arg0: i32, %arg1: i32) -> (i32, i32) {
    %c0_i32 = arith.constant 0 : i32
    return %arg1, %arg0 : i32, i32
  }
}

module attributes {stable_mosaic.version = 11 : i64} {
  func.func @_matmul_kernel_mk_f32(%arg0: i32, %arg1: i32, %arg2: i32, %arg3: memref<8x512xbf16, #tpu.memory_space<vmem>>, %arg4: memref<512x1280xbf16, #tpu.memory_space<vmem>>, %arg5: memref<1x1280xf32, #tpu.memory_space<vmem>>, %arg6: memref<8x1280xf32, #tpu.memory_space<vmem>>) attributes {dimension_semantics = [#tpu.dimension_semantics<parallel>, #tpu.dimension_semantics<parallel>, #tpu.dimension_semantics<arbitrary>], iteration_bounds = array<i64: 2, 1, 4>, scalar_prefetch = 0 : i64, scratch_operands = 0 : i64, tpu.core_type = #tpu.core_type<tc>, window_params = [{transform_indices = @transform_0, window_bounds = array<i64: 8, 512>}, {transform_indices = @transform_1, window_bounds = array<i64: 512, 1280>}, {transform_indices = @transform_2, window_bounds = array<i64: 1, 1280>}, {transform_indices = @transform_3, window_bounds = array<i64: 8, 1280>}]} {
    %c0 = arith.constant 0 : index
    %c0_0 = arith.constant 0 : index
    %0 = vector.load %arg3[%c0, %c0_0] : memref<8x512xbf16, #tpu.memory_space<vmem>>, vector<8x512xbf16>
    %c0_1 = arith.constant 0 : index
    %c0_2 = arith.constant 0 : index
    %1 = vector.load %arg4[%c0_1, %c0_2] : memref<512x1280xbf16, #tpu.memory_space<vmem>>, vector<512x1280xbf16>
    %cst = arith.constant dense<0.000000e+00> : vector<8x1280xf32>
    %2 = tpu.matmul %0, %1, %cst {dimension_numbers = #tpu.dot_dimension_numbers<[1], [0], [0], [1], [0, 0, 1, 1], [], []>} : vector<8x512xbf16>, vector<512x1280xbf16>, vector<8x1280xf32> -> vector<8x1280xf32>
    %c0_i32 = arith.constant 0 : i32
    %3 = arith.cmpi eq, %arg2, %c0_i32 : i32
    %4 = arith.extui %3 : i1 to i32
    %c0_i32_3 = arith.constant 0 : i32
    %5 = arith.cmpi ne, %4, %c0_i32_3 : i32
    scf.if %5 {
      %c0_7 = arith.constant 0 : index
      %c0_8 = arith.constant 0 : index
      %12 = vector.load %arg6[%c0_7, %c0_8] : memref<8x1280xf32, #tpu.memory_space<vmem>>, vector<8x1280xf32>
      tpu.vector_store %arg6[%c0_7, %c0_8], %2 {strides = array<i32>} : memref<8x1280xf32, #tpu.memory_space<vmem>>, vector<8x1280xf32>,
    } else {
    }
    %c0_i32_4 = arith.constant 0 : i32
    %6 = arith.cmpi sgt, %arg2, %c0_i32_4 : i32
    %7 = arith.extui %6 : i1 to i32
    %c0_i32_5 = arith.constant 0 : i32
    %8 = arith.cmpi ne, %7, %c0_i32_5 : i32
    scf.if %8 {
      %c0_7 = arith.constant 0 : index
      %c0_8 = arith.constant 0 : index
      %12 = vector.load %arg6[%c0_7, %c0_8] : memref<8x1280xf32, #tpu.memory_space<vmem>>, vector<8x1280xf32>
      %13 = arith.addf %12, %2 : vector<8x1280xf32>
      %c0_9 = arith.constant 0 : index
      %c0_10 = arith.constant 0 : index
      %14 = vector.load %arg6[%c0_9, %c0_10] : memref<8x1280xf32, #tpu.memory_space<vmem>>, vector<8x1280xf32>
      tpu.vector_store %arg6[%c0_9, %c0_10], %13 {strides = array<i32>} : memref<8x1280xf32, #tpu.memory_space<vmem>>, vector<8x1280xf32>,
    } else {
    }
    %c3_i32 = arith.constant 3 : i32
    %9 = arith.cmpi eq, %arg2, %c3_i32 : i32
    %10 = arith.extui %9 : i1 to i32
    %c0_i32_6 = arith.constant 0 : i32
    %11 = arith.cmpi ne, %10, %c0_i32_6 : i32
    scf.if %11 {
      %c0_7 = arith.constant 0 : index
      %c0_8 = arith.constant 0 : index
      %12 = vector.load %arg6[%c0_7, %c0_8] : memref<8x1280xf32, #tpu.memory_space<vmem>>, vector<8x1280xf32>
      %c0_9 = arith.constant 0 : index
      %c0_10 = arith.constant 0 : index
      %13 = vector.load %arg5[%c0_9, %c0_10] : memref<1x1280xf32, #tpu.memory_space<vmem>>, vector<1x1280xf32>
      %14 = vector.broadcast %13 : vector<1x1280xf32> to vector<8x1280xf32>
      %15 = arith.addf %12, %14 : vector<8x1280xf32>
      %c0_11 = arith.constant 0 : index
      %c0_12 = arith.constant 0 : index
      %16 = vector.load %arg6[%c0_11, %c0_12] : memref<8x1280xf32, #tpu.memory_space<vmem>>, vector<8x1280xf32>
      tpu.vector_store %arg6[%c0_11, %c0_12], %15 {strides = array<i32>} : memref<8x1280xf32, #tpu.memory_space<vmem>>, vector<8x1280xf32>,
    } else {
    }
    return
  }
  func.func @transform_0(%arg0: i32, %arg1: i32, %arg2: i32) -> (i32, i32) {
    %c0_i32 = arith.constant 0 : i32
    return %arg1, %arg2 : i32, i32
  }
  func.func @transform_1(%arg0: i32, %arg1: i32, %arg2: i32) -> (i32, i32) {
    %c0_i32 = arith.constant 0 : i32
    return %arg2, %arg0 : i32, i32
  }
  func.func @transform_2(%arg0: i32, %arg1: i32, %arg2: i32) -> (i32, i32) {
    %c0_i32 = arith.constant 0 : i32
    %c0_i32_0 = arith.constant 0 : i32
    return %c0_i32, %arg0 : i32, i32
  }
  func.func @transform_3(%arg0: i32, %arg1: i32, %arg2: i32) -> (i32, i32) {
    %c0_i32 = arith.constant 0 : i32
    return %arg1, %arg0 : i32, i32
  }
}

</mosaic_0001>

<bundles_post_ra>
// kernel: backbone_forward.10
= control target key start
LH: loop header
LB: loop body
LE: loop exit
PB: predicated region body
PF: predicated region fallthrough
CT: control target
= control target key end

     0   :  { %8 = vsyncpa [#allocation3], 0  ;;  %s2320_s0 = inlined_call_operand.vmem [shape: bf16[2048,3], index: 0, kind: input, shape index: {}]   ;;  %s2321_s1 = inlined_call_operand.hbm [shape: bf16[3,128], index: 1, kind: input, shape index: {}]   ;;  %s2322_s2 = inlined_call_operand.hbm [shape: f32[1,128], index: 2, kind: input, shape index: {}]   ;;  %s2323_s3 = inlined_call_operand.vmem [shape: bf16[2048,128], index: 3, kind: output, shape index: {}]  }
   0x1   :  { %9 = vsyncpa [#allocation5], 0  ;;  %s2034_s12 = smov 0   ;;  %s2036_s13 = smov 0  }
   0x2   :  { %s2038_s14 = smov 0  }
   0x3 LB: > { %s1345_s15 = sadd.s32 4294967295, %s2009_s14   ;;  %s24_s16 = sadd.s32 1, %s2005_s13  ;;  %s2009_s14 = sphi %s2038_s14, %s15_s14   ;;  %s2005_s13 = sphi %s2036_s13, %s2333_s13   ;;  %s2001_s12 = sphi %s2034_s12, %s2332_s12  }
   0x4   : > { %p25_p0 = scmp.ge.s32.totalorder %s24_s16, 4  ;;  %p1347_p1 = scmp.ge.s32.totalorder %s2009_s14, 1 }
   0x5   : > { %p138_p2 = scmp.lt.s32.totalorder %s2009_s14, 5  ;;  %p2059_p4 = scmp.eq.s32.totalorder %s1345_s15, 0 }
   0x6   : > { %s2335_s16 = smov (%p25_p0, %s24_s16), 0  ;;  %s2011_s19 = smov [#allocation2]  }
   0x7   : > { %p2055_p3 = pnand %p1347_p1, %p138_p2  ;;  %s153_s20 = sshll.u32 %s2011_s19, 4  ;;  %s154_s20 = int_to_ptr.vmem [resolvable:$true] %s153_s20 }
   0x8   : > { %s2328_s18 = scalar_select %p2059_p4, 1, 0 }
   0x9   : > { %s2327_s17 = scalar_select %p2055_p3, 1, 0 }
   0xa   : > { %p1853_p5 = pneg %p2055_p3  ;;  %s2012_s21 = smov [#allocation4]  }
   0xb   : > { %s166_s22 = sshll.u32 %s2012_s21, 4  ;;  %s1923_s26 = scalar_lea.hbm %s2321_s1, 32  ;;  %s2071_s22 = int_to_ptr.vmem [resolvable:$true] %s166_s22 }
   0xc   : > { %p2067_p6 = pnand %p2059_p4, %p1853_p5  ;;  %p1924_p7 = scmp.ne.s32.totalorder %s2321_s1, %s1923_s26 }
   0xd   : > { %p1930_p11 = scmp.lt.u32.totalorder %s1923_s26, %s2321_s1 }
   0xe   : > { %p1925_p8 = pneg %p2067_p6 }
  0x10   : > { %p1926_p9 = pnand %p1925_p8, %p1924_p7 }
  0x12   : > { %p1927_p10 = pneg %p1926_p9 }
  0x14   : > { %p1932_p12 = pnand %p1930_p11, %p1927_p10 }
  0x16   : > { %1935 = shalt.err (!%p1932_p12)
}
  0x17   : > { %s1936_s4 = scalar_lea.vmem %s154_s20, 32  ;;  %p1944_p2 = scmp.lt.s32.totalorder %s154_s20, %s154_s20 }
  0x18   : > { %p1937_p13 = scmp.ne.s32.totalorder %s154_s20, %s1936_s4  ;;  %p1945_p5 = scmp.lt.s32.totalorder %s1936_s4, %s1936_s4 }
  0x1a   : > { %p1939_p0 = pnand %p1937_p13, %p1925_p8  ;;  %p1946_p4 = por %p1945_p5, %p1944_p2 }
  0x1c   : > { %p1940_p1 = pneg %p1939_p0 }
  0x1e   : > { %p1947_p3 = pnand %p1946_p4, %p1940_p1 }
  0x20   : > { %1950 = shalt.err (!%p1947_p3)
}
  0x21   : > { %1856 = dma.hbm_to_vmem [thread:$0]  (!%p2067_p6), %s2321_s1, 32, %s154_s20, [#allocation3]  }
  0x22   : > { %s1951_s9 = scalar_lea.hbm %s2322_s2, 16 }
  0x23   : > { %p1952_p7 = scmp.ne.s32.totalorder %s2322_s2, %s1951_s9  ;;  %p1958_p3 = scmp.lt.u32.totalorder %s1951_s9, %s2322_s2 }
  0x25   : > { %p1954_p9 = pnand %p1952_p7, %p1925_p8 }
  0x27   : > { %p1955_p4 = pneg %p1954_p9 }
  0x29   : > { %p1960_p10 = pnand %p1958_p3, %p1955_p4 }
  0x2b   : > { %1963 = shalt.err (!%p1960_p10)
}
  0x2c   : > { %s1964_s20 = scalar_lea.vmem %s2071_s22, 16  ;;  %s1971_s21 = scalar_lea.vmem %s2071_s22, 32 }
  0x2d   : > { %p1965_p11 = scmp.ne.s32.totalorder %s2071_s22, %s1964_s20  ;;  %p1972_p0 = scmp.lt.s32.totalorder %s2071_s22, %s2071_s22 }
  0x2e   : > { %p1973_p1 = scmp.lt.s32.totalorder %s1971_s21, %s1964_s20 }
  0x2f   : > { %p1967_p12 = pnand %p1965_p11, %p1925_p8 }
  0x30   : > { %p1974_p2 = por %p1973_p1, %p1972_p0 }
  0x31   : > { %p1968_p13 = pneg %p1967_p12 }
  0x33   : > { %p1975_p5 = pnand %p1974_p2, %p1968_p13 }
  0x35   : > { %1978 = shalt.err (!%p1975_p5)
}
  0x36   : > { %1859 = dma.hbm_to_vmem [thread:$0]  (!%p2067_p6), %s2322_s2, 16, %s2071_s22, [#allocation5]  }
  0x37   : > { %p2330_p7 = scmp.ne.s32.totalorder %s2327_s17, 0 }
  0x38   : > { %p2331_p8 = scmp.ne.s32.totalorder (!%p2330_p7), %s2328_s18, 0 }
  0x39   : > { %188 = sbr.rel (%p2330_p7) target bundleno = 354 (0x162), region = 32 }
  0x40   : > { %1992 = dma.done.wait (%p2331_p8), [#allocation3], 32  }
  0x41   : > { %1994 = vsyncadd (%p2331_p8), [#allocation3], 4294967264 }
  0x42   : > { %1996 = dma.done.wait (%p2331_p8), [#allocation5], 16  }
  0x43   : > { %1998 = vsyncadd (%p2331_p8), [#allocation5], 4294967280  ;;  %vm564_vm0 = vcmask 1040384   ;;  %s1354_s23 = sshll.u32 %s2001_s12, 6  ;;  %vm565_vm1 = vcmask 1041408   ;;  %v2013_v0 = vmov 65535  }
  0x44   : > { %p220_p9 = scmp.lt.s32.totalorder %s1354_s23, 255  ;;  %v566_v1 = vsel %vm564_vm0, 4294967295, %v2013_v0  ;;  %v299_v3 = vld [vmem:[#allocation2] sm:$0x3]  ;;  %vm467_vm2 = vcmask 23552  }
  0x45   : > { %v567_v2 = vsel %vm565_vm1, %v566_v1, 0  ;;  %v2206_v37 = vld [vmem:[#allocation4] ss:$0 sm:$0xff] }
  0x46   : > { %s2337_s23 = smov (!%p220_p9, %s1354_s23), 255  ;;  %v569_v4 = vand.u32 %v567_v2, %v299_v3 }
  0x47   : > { %s1355_s17 = sshll.u32 %s2337_s23, 2 }
  0x48   : > { %s2140_s27 = scalar_lea.vmem %s2320_s0, %s1355_s17  ;;  %1777 = vmatprep.subr.bf16.mxu0 %v569_v4  ;;  %1843 = vmatprep.subr.bf16.mxu1 %v569_v4  ;;  %s2221_s28 = scalar_lea.vmem %s2323_s3, %s1355_s17 }
  0x49   : > { %v1891_v5 = vld [vmem:[%s2140_s27] sm:$0xff]   ;;  %v1893_v7 = vld [vmem:[%s2140_s27 + $0x8] sm:$0xff]   ;;  %1778 = vmatpush3.bf16.msra.mxu0 %v569_v4  ;;  %1844 = vmatpush3.bf16.msra.mxu1 %v569_v4  ;;  %v1895_v9 = vld [vmem:[%s2140_s27 + $0x10] sm:$0xff]  }
  0x4a   : > { %v1892_v6 = vld [vmem:[%s2140_s27 + $0x80] sm:$0xff]   ;;  %v1894_v8 = vld [vmem:[%s2140_s27 + $0x88] sm:$0xff]   ;;  %1779 = vmatprep.mubr.msk.bf16.mxu0 %vm467_vm2, %v1891_v5  ;;  %v1896_v10 = vld [vmem:[%s2140_s27 + $0x90] sm:$0xff]  }
  0x4b   : > { %1811 = vmatprep.mubr.msk.bf16.mxu1 %vm467_vm2, %v1892_v6  ;;  %v1897_v11 = vld [vmem:[%s2140_s27 + $0x18] sm:$0xff]   ;;  %v1899_v13 = vld [vmem:[%s2140_s27 + $0x20] sm:$0xff]   ;;  %v1901_v15 = vld [vmem:[%s2140_s27 + $0x28] sm:$0xff]  }
  0x4c   : > { %1780 = vmatmul.mubr.msk.bf16.vlgmr.msra.gmra.mrb[0].mxu0 %vm467_vm2, %v1893_v7  ;;  %1812 = vmatmul.mubr.msk.bf16.vlgmr.msra.gmra.mrb[0].mxu1 %vm467_vm2, %v1894_v8  ;;  %v1898_v12 = vld [vmem:[%s2140_s27 + $0x98] sm:$0xff]   ;;  %v1900_v14 = vld [vmem:[%s2140_s27 + $0xa0] sm:$0xff]   ;;  %v1902_v16 = vld [vmem:[%s2140_s27 + $0xa8] sm:$0xff]  }
  0x4d   : > { %1783 = vmatprep.mubr.msk.bf16.mxu0 %vm467_vm2, %v1895_v9  ;;  %1815 = vmatprep.mubr.msk.bf16.mxu1 %vm467_vm2, %v1896_v10  ;;  %v1903_v17 = vld [vmem:[%s2140_s27 + $0x30] sm:$0xff]   ;;  %v1905_v19 = vld [vmem:[%s2140_s27 + $0x38] sm:$0xff]   ;;  %v1907_v21 = vld [vmem:[%s2140_s27 + $0x40] sm:$0xff]  }
  0x4e   : > { %v1904_v18 = vld [vmem:[%s2140_s27 + $0xb0] sm:$0xff]   ;;  %v1906_v20 = vld [vmem:[%s2140_s27 + $0xb8] sm:$0xff]   ;;  %v1908_v22 = vld [vmem:[%s2140_s27 + $0xc0] sm:$0xff]  }
  0x4f   : > { %v1909_v23 = vld [vmem:[%s2140_s27 + $0x48] sm:$0xff]   ;;  %v1911_v25 = vld [vmem:[%s2140_s27 + $0x50] sm:$0xff]   ;;  %v1913_v27 = vld [vmem:[%s2140_s27 + $0x58] sm:$0xff]  }
  0x50   : > { %v1910_v24 = vld [vmem:[%s2140_s27 + $0xc8] sm:$0xff]   ;;  %v1912_v26 = vld [vmem:[%s2140_s27 + $0xd0] sm:$0xff]   ;;  %v1914_v28 = vld [vmem:[%s2140_s27 + $0xd8] sm:$0xff]  }
  0x51   : > { %v1915_v29 = vld [vmem:[%s2140_s27 + $0x60] sm:$0xff]   ;;  %v1917_v31 = vld [vmem:[%s2140_s27 + $0x68] sm:$0xff]   ;;  %v1919_v33 = vld [vmem:[%s2140_s27 + $0x70] sm:$0xff]  }
  0x52   : > { %v1916_v30 = vld [vmem:[%s2140_s27 + $0xe0] sm:$0xff]   ;;  %v1918_v32 = vld [vmem:[%s2140_s27 + $0xe8] sm:$0xff]   ;;  %v1920_v34 = vld [vmem:[%s2140_s27 + $0xf0] sm:$0xff]  }
  0x53   : > { %v1921_v35 = vld [vmem:[%s2140_s27 + $0x78] sm:$0xff]  }
  0x54   : > { %1784 = vmatmul.mubr.msk.bf16.gmra.mrb[4].mxu0 %vm467_vm2, %v1897_v11  ;;  %1816 = vmatmul.mubr.msk.bf16.gmra.mrb[4].mxu1 %vm467_vm2, %v1898_v12  ;;  %v1922_v36 = vld [vmem:[%s2140_s27 + $0xf8] sm:$0xff]  }
  0x55   : > { %1787 = vmatprep.mubr.msk.bf16.mxu0 %vm467_vm2, %v1899_v13  ;;  %1819 = vmatprep.mubr.msk.bf16.mxu1 %vm467_vm2, %v1900_v14 }
  0x5c   : > { %1788 = vmatmul.mubr.msk.bf16.gmra.mrb[8].mxu0 %vm467_vm2, %v1901_v15  ;;  %1820 = vmatmul.mubr.msk.bf16.gmra.mrb[8].mxu1 %vm467_vm2, %v1902_v16 }
  0x5d   : > { %1791 = vmatprep.mubr.msk.bf16.mxu0 %vm467_vm2, %v1903_v17  ;;  %1823 = vmatprep.mubr.msk.bf16.mxu1 %vm467_vm2, %v1904_v18 }
  0x64   : > { %1792 = vmatmul.mubr.msk.bf16.gmra.mrb[12].mxu0 %vm467_vm2, %v1905_v19  ;;  %1824 = vmatmul.mubr.msk.bf16.gmra.mrb[12].mxu1 %vm467_vm2, %v1906_v20 }
  0x65   : > { %1795 = vmatprep.mubr.msk.bf16.mxu0 %vm467_vm2, %v1907_v21  ;;  %1827 = vmatprep.mubr.msk.bf16.mxu1 %vm467_vm2, %v1908_v22 }
  0x6c   : > { %1796 = vmatmul.mubr.msk.bf16.gmra.mrb[16].mxu0 %vm467_vm2, %v1909_v23  ;;  %1828 = vmatmul.mubr.msk.bf16.gmra.mrb[16].mxu1 %vm467_vm2, %v1910_v24 }
  0x6d   : > { %1799 = vmatprep.mubr.msk.bf16.mxu0 %vm467_vm2, %v1911_v25  ;;  %1831 = vmatprep.mubr.msk.bf16.mxu1 %vm467_vm2, %v1912_v26 }
  0x74   : > { %1800 = vmatmul.mubr.msk.bf16.gmra.mrb[20].mxu0 %vm467_vm2, %v1913_v27  ;;  %1832 = vmatmul.mubr.msk.bf16.gmra.mrb[20].mxu1 %vm467_vm2, %v1914_v28 }
  0x75   : > { %1803 = vmatprep.mubr.msk.bf16.mxu0 %vm467_vm2, %v1915_v29  ;;  %1835 = vmatprep.mubr.msk.bf16.mxu1 %vm467_vm2, %v1916_v30 }
  0x7c   : > { %1804 = vmatmul.mubr.msk.bf16.gmra.mrb[24].mxu0 %vm467_vm2, %v1917_v31  ;;  %1836 = vmatmul.mubr.msk.bf16.gmra.mrb[24].mxu1 %vm467_vm2, %v1918_v32 }
  0x7d   : > { %1807 = vmatprep.mubr.msk.bf16.mxu0 %vm467_vm2, %v1919_v33  ;;  %1839 = vmatprep.mubr.msk.bf16.mxu1 %vm467_vm2, %v1920_v34 }
  0x84   : > { %1808 = vmatmul.mubr.msk.bf16.gmra.mrb[28].mxu0 %vm467_vm2, %v1921_v35  ;;  %1840 = vmatmul.mubr.msk.bf16.gmra.mrb[28].mxu1 %vm467_vm2, %v1922_v36 }
 0x11f   : > { %v1781_v38 = vpop.f32.mrb[0].mxu0  ;;  %v1813_v39 = vpop.f32.mrb[0].mxu1 }
 0x120   : > { %v614_v40 = vadd.f32 %v1781_v38, %v2206_v37  ;;  %v742_v41 = vadd.f32 %v1813_v39, %v2206_v37  ;;  %v605_v42 = vpop.f32.mrb[1].mxu0  ;;  %v733_v43 = vpop.f32.mrb[1].mxu1 }
 0x121   : > { %v606_v44 = vadd.f32 %v2206_v37, %v605_v42  ;;  %v734_v45 = vadd.f32 %v2206_v37, %v733_v43  ;;  %v1782_v46 = vpop.f32.mrb[2].mxu0  ;;  %v1814_v47 = vpop.f32.mrb[2].mxu1 }
 0x122   : > { %v617_v48 = vadd.f32 %v1782_v46, %v2206_v37  ;;  %v745_v49 = vadd.f32 %v1814_v47, %v2206_v37  ;;  %v608_v50 = vpop.f32.mrb[3].mxu0  ;;  %v736_v51 = vpop.f32.mrb[3].mxu1  ;;  %v862_v54 = vmax.f32 %v614_v40, 0.0  ;;  %v894_v55 = vmax.f32 %v742_v41, 0.0 }
 0x123   : > { %v609_v52 = vadd.f32 %v2206_v37, %v608_v50  ;;  %v737_v53 = vadd.f32 %v2206_v37, %v736_v51  ;;  %v860_v58 = vmax.f32 %v606_v44, 0.0  ;;  %v892_v59 = vmax.f32 %v734_v45, 0.0 }
 0x124   : > { %v863_v56 = vmax.f32 %v617_v48, 0.0  ;;  %v895_v57 = vmax.f32 %v745_v49, 0.0 }
 0x125   : > { %v861_v60 = vmax.f32 %v609_v52, 0.0  ;;  %v893_v61 = vmax.f32 %v737_v53, 0.0 }
 0x126   : > { %v1561_v62 = vpack.c.bf16 %v863_v56, %v862_v54  ;;  %v1641_v63 = vpack.c.bf16 %v895_v57, %v894_v55 }
 0x127   : > { %v1556_v0 = vpack.c.bf16 %v861_v60, %v860_v58  ;;  %v1636_v1 = vpack.c.bf16 %v893_v61, %v892_v59  ;;  %v1785_v2 = vpop.f32.mrb[4].mxu0  ;;  %v1817_v3 = vpop.f32.mrb[4].mxu1 }
 0x128   : > { %1713 = vst [vmem:[%s2221_s28 + $0x8] sm:$0xff] %v1561_v62   ;;  %1729 = vst [vmem:[%s2221_s28 + $0x88] sm:$0xff] %v1641_v63   ;;  %v630_v4 = vadd.f32 %v1785_v2, %v2206_v37  ;;  %v758_v5 = vadd.f32 %v1817_v3, %v2206_v37  ;;  %v621_v6 = vpop.f32.mrb[5].mxu0  ;;  %v749_v7 = vpop.f32.mrb[5].mxu1 }
 0x129   : > { %1557 = vst [vmem:[%s2221_s28] sm:$0xff] %v1556_v0   ;;  %1728 = vst [vmem:[%s2221_s28 + $0x80] sm:$0xff] %v1636_v1   ;;  %v622_v8 = vadd.f32 %v2206_v37, %v621_v6  ;;  %v750_v9 = vadd.f32 %v2206_v37, %v749_v7  ;;  %v1786_v10 = vpop.f32.mrb[6].mxu0  ;;  %v1818_v11 = vpop.f32.mrb[6].mxu1 }
 0x12a   : > { %v633_v12 = vadd.f32 %v1786_v10, %v2206_v37  ;;  %v761_v13 = vadd.f32 %v1818_v11, %v2206_v37  ;;  %v624_v14 = vpop.f32.mrb[7].mxu0  ;;  %v752_v15 = vpop.f32.mrb[7].mxu1  ;;  %v866_v18 = vmax.f32 %v630_v4, 0.0  ;;  %v898_v19 = vmax.f32 %v758_v5, 0.0 }
 0x12b   : > { %v625_v16 = vadd.f32 %v2206_v37, %v624_v14  ;;  %v753_v17 = vadd.f32 %v2206_v37, %v752_v15  ;;  %v864_v22 = vmax.f32 %v622_v8, 0.0  ;;  %v896_v23 = vmax.f32 %v750_v9, 0.0 }
 0x12c   : > { %v867_v20 = vmax.f32 %v633_v12, 0.0  ;;  %v899_v21 = vmax.f32 %v761_v13, 0.0 }
 0x12d   : > { %v865_v24 = vmax.f32 %v625_v16, 0.0  ;;  %v897_v25 = vmax.f32 %v753_v17, 0.0 }
 0x12e   : > { %v1571_v26 = vpack.c.bf16 %v867_v20, %v866_v18  ;;  %v1651_v27 = vpack.c.bf16 %v899_v21, %v898_v19 }
 0x12f   : > { %v1566_v28 = vpack.c.bf16 %v865_v24, %v864_v22  ;;  %v1646_v29 = vpack.c.bf16 %v897_v25, %v896_v23  ;;  %v1789_v30 = vpop.f32.mrb[8].mxu0  ;;  %v1821_v31 = vpop.f32.mrb[8].mxu1 }
 0x130   : > { %1715 = vst [vmem:[%s2221_s28 + $0x18] sm:$0xff] %v1571_v26   ;;  %1731 = vst [vmem:[%s2221_s28 + $0x98] sm:$0xff] %v1651_v27   ;;  %v646_v32 = vadd.f32 %v1789_v30, %v2206_v37  ;;  %v774_v33 = vadd.f32 %v1821_v31, %v2206_v37  ;;  %v637_v34 = vpop.f32.mrb[9].mxu0  ;;  %v765_v35 = vpop.f32.mrb[9].mxu1 }
 0x131   : > { %1714 = vst [vmem:[%s2221_s28 + $0x10] sm:$0xff] %v1566_v28   ;;  %1730 = vst [vmem:[%s2221_s28 + $0x90] sm:$0xff] %v1646_v29   ;;  %v638_v36 = vadd.f32 %v2206_v37, %v637_v34  ;;  %v766_v38 = vadd.f32 %v2206_v37, %v765_v35  ;;  %v1790_v39 = vpop.f32.mrb[10].mxu0  ;;  %v1822_v40 = vpop.f32.mrb[10].mxu1 }
 0x132   : > { %v649_v41 = vadd.f32 %v1790_v39, %v2206_v37  ;;  %v777_v42 = vadd.f32 %v1822_v40, %v2206_v37  ;;  %v640_v43 = vpop.f32.mrb[11].mxu0  ;;  %v768_v44 = vpop.f32.mrb[11].mxu1  ;;  %v870_v47 = vmax.f32 %v646_v32, 0.0  ;;  %v902_v48 = vmax.f32 %v774_v33, 0.0 }
 0x133   : > { %v641_v45 = vadd.f32 %v2206_v37, %v640_v43  ;;  %v769_v46 = vadd.f32 %v2206_v37, %v768_v44  ;;  %v868_v51 = vmax.f32 %v638_v36, 0.0  ;;  %v900_v52 = vmax.f32 %v766_v38, 0.0 }
 0x134   : > { %v871_v49 = vmax.f32 %v649_v41, 0.0  ;;  %v903_v50 = vmax.f32 %v777_v42, 0.0 }
 0x135   : > { %v869_v53 = vmax.f32 %v641_v45, 0.0  ;;  %v901_v54 = vmax.f32 %v769_v46, 0.0 }
 0x136   : > { %v1581_v55 = vpack.c.bf16 %v871_v49, %v870_v47  ;;  %v1661_v56 = vpack.c.bf16 %v903_v50, %v902_v48 }
 0x137   : > { %v1576_v57 = vpack.c.bf16 %v869_v53, %v868_v51  ;;  %v1656_v58 = vpack.c.bf16 %v901_v54, %v900_v52  ;;  %v1793_v59 = vpop.f32.mrb[12].mxu0  ;;  %v1825_v60 = vpop.f32.mrb[12].mxu1 }
 0x138   : > { %1717 = vst [vmem:[%s2221_s28 + $0x28] sm:$0xff] %v1581_v55   ;;  %1733 = vst [vmem:[%s2221_s28 + $0xa8] sm:$0xff] %v1661_v56   ;;  %v662_v61 = vadd.f32 %v1793_v59, %v2206_v37  ;;  %v790_v62 = vadd.f32 %v1825_v60, %v2206_v37  ;;  %v653_v63 = vpop.f32.mrb[13].mxu0  ;;  %v781_v0 = vpop.f32.mrb[13].mxu1 }
 0x139   : > { %1716 = vst [vmem:[%s2221_s28 + $0x20] sm:$0xff] %v1576_v57   ;;  %1732 = vst [vmem:[%s2221_s28 + $0xa0] sm:$0xff] %v1656_v58   ;;  %v654_v1 = vadd.f32 %v2206_v37, %v653_v63  ;;  %v782_v2 = vadd.f32 %v2206_v37, %v781_v0  ;;  %v1794_v3 = vpop.f32.mrb[14].mxu0  ;;  %v1826_v4 = vpop.f32.mrb[14].mxu1 }
 0x13a   : > { %v665_v5 = vadd.f32 %v1794_v3, %v2206_v37  ;;  %v793_v6 = vadd.f32 %v1826_v4, %v2206_v37  ;;  %v656_v7 = vpop.f32.mrb[15].mxu0  ;;  %v784_v8 = vpop.f32.mrb[15].mxu1  ;;  %v874_v11 = vmax.f32 %v662_v61, 0.0  ;;  %v906_v12 = vmax.f32 %v790_v62, 0.0 }
 0x13b   : > { %v657_v9 = vadd.f32 %v2206_v37, %v656_v7  ;;  %v785_v10 = vadd.f32 %v2206_v37, %v784_v8  ;;  %v872_v15 = vmax.f32 %v654_v1, 0.0  ;;  %v904_v16 = vmax.f32 %v782_v2, 0.0 }
 0x13c   : > { %v875_v13 = vmax.f32 %v665_v5, 0.0  ;;  %v907_v14 = vmax.f32 %v793_v6, 0.0 }
 0x13d   : > { %v873_v17 = vmax.f32 %v657_v9, 0.0  ;;  %v905_v18 = vmax.f32 %v785_v10, 0.0 }
 0x13e   : > { %v1591_v19 = vpack.c.bf16 %v875_v13, %v874_v11  ;;  %v1671_v20 = vpack.c.bf16 %v907_v14, %v906_v12 }
 0x13f   : > { %v1586_v21 = vpack.c.bf16 %v873_v17, %v872_v15  ;;  %v1666_v22 = vpack.c.bf16 %v905_v18, %v904_v16  ;;  %v1797_v23 = vpop.f32.mrb[16].mxu0  ;;  %v1829_v24 = vpop.f32.mrb[16].mxu1 }
 0x140   : > { %1719 = vst [vmem:[%s2221_s28 + $0x38] sm:$0xff] %v1591_v19   ;;  %1735 = vst [vmem:[%s2221_s28 + $0xb8] sm:$0xff] %v1671_v20   ;;  %v678_v25 = vadd.f32 %v1797_v23, %v2206_v37  ;;  %v806_v26 = vadd.f32 %v1829_v24, %v2206_v37  ;;  %v669_v27 = vpop.f32.mrb[17].mxu0  ;;  %v797_v28 = vpop.f32.mrb[17].mxu1 }
 0x141   : > { %1718 = vst [vmem:[%s2221_s28 + $0x30] sm:$0xff] %v1586_v21   ;;  %1734 = vst [vmem:[%s2221_s28 + $0xb0] sm:$0xff] %v1666_v22   ;;  %v670_v29 = vadd.f32 %v2206_v37, %v669_v27  ;;  %v798_v30 = vadd.f32 %v2206_v37, %v797_v28  ;;  %v1798_v31 = vpop.f32.mrb[18].mxu0  ;;  %v1830_v32 = vpop.f32.mrb[18].mxu1 }
 0x142   : > { %v681_v33 = vadd.f32 %v1798_v31, %v2206_v37  ;;  %v809_v34 = vadd.f32 %v1830_v32, %v2206_v37  ;;  %v672_v35 = vpop.f32.mrb[19].mxu0  ;;  %v800_v36 = vpop.f32.mrb[19].mxu1  ;;  %v878_v40 = vmax.f32 %v678_v25, 0.0  ;;  %v910_v41 = vmax.f32 %v806_v26, 0.0 }
 0x143   : > { %v673_v38 = vadd.f32 %v2206_v37, %v672_v35  ;;  %v801_v39 = vadd.f32 %v2206_v37, %v800_v36  ;;  %v876_v44 = vmax.f32 %v670_v29, 0.0  ;;  %v908_v45 = vmax.f32 %v798_v30, 0.0 }
 0x144   : > { %v879_v42 = vmax.f32 %v681_v33, 0.0  ;;  %v911_v43 = vmax.f32 %v809_v34, 0.0 }
 0x145   : > { %v877_v46 = vmax.f32 %v673_v38, 0.0  ;;  %v909_v47 = vmax.f32 %v801_v39, 0.0 }
 0x146   : > { %v1601_v48 = vpack.c.bf16 %v879_v42, %v878_v40  ;;  %v1681_v49 = vpack.c.bf16 %v911_v43, %v910_v41 }
 0x147   : > { %v1596_v50 = vpack.c.bf16 %v877_v46, %v876_v44  ;;  %v1676_v51 = vpack.c.bf16 %v909_v47, %v908_v45  ;;  %v1801_v52 = vpop.f32.mrb[20].mxu0  ;;  %v1833_v53 = vpop.f32.mrb[20].mxu1 }
 0x148   : > { %1721 = vst [vmem:[%s2221_s28 + $0x48] sm:$0xff] %v1601_v48   ;;  %1737 = vst [vmem:[%s2221_s28 + $0xc8] sm:$0xff] %v1681_v49   ;;  %v694_v54 = vadd.f32 %v1801_v52, %v2206_v37  ;;  %v822_v55 = vadd.f32 %v1833_v53, %v2206_v37  ;;  %v685_v56 = vpop.f32.mrb[21].mxu0  ;;  %v813_v57 = vpop.f32.mrb[21].mxu1 }
 0x149   : > { %1720 = vst [vmem:[%s2221_s28 + $0x40] sm:$0xff] %v1596_v50   ;;  %1736 = vst [vmem:[%s2221_s28 + $0xc0] sm:$0xff] %v1676_v51   ;;  %v686_v58 = vadd.f32 %v2206_v37, %v685_v56  ;;  %v814_v59 = vadd.f32 %v2206_v37, %v813_v57  ;;  %v1802_v60 = vpop.f32.mrb[22].mxu0  ;;  %v1834_v61 = vpop.f32.mrb[22].mxu1 }
 0x14a   : > { %v697_v62 = vadd.f32 %v1802_v60, %v2206_v37  ;;  %v825_v63 = vadd.f32 %v1834_v61, %v2206_v37  ;;  %v688_v0 = vpop.f32.mrb[23].mxu0  ;;  %v816_v1 = vpop.f32.mrb[23].mxu1  ;;  %v882_v4 = vmax.f32 %v694_v54, 0.0  ;;  %v914_v5 = vmax.f32 %v822_v55, 0.0 }
 0x14b   : > { %v689_v2 = vadd.f32 %v2206_v37, %v688_v0  ;;  %v817_v3 = vadd.f32 %v2206_v37, %v816_v1  ;;  %v880_v8 = vmax.f32 %v686_v58, 0.0  ;;  %v912_v9 = vmax.f32 %v814_v59, 0.0 }
 0x14c   : > { %v883_v6 = vmax.f32 %v697_v62, 0.0  ;;  %v915_v7 = vmax.f32 %v825_v63, 0.0 }
 0x14d   : > { %v881_v10 = vmax.f32 %v689_v2, 0.0  ;;  %v913_v11 = vmax.f32 %v817_v3, 0.0 }
 0x14e   : > { %v1611_v12 = vpack.c.bf16 %v883_v6, %v882_v4  ;;  %v1691_v13 = vpack.c.bf16 %v915_v7, %v914_v5 }
 0x14f   : > { %v1606_v14 = vpack.c.bf16 %v881_v10, %v880_v8  ;;  %v1686_v15 = vpack.c.bf16 %v913_v11, %v912_v9  ;;  %v1805_v16 = vpop.f32.mrb[24].mxu0  ;;  %v1837_v17 = vpop.f32.mrb[24].mxu1 }
 0x150   : > { %1723 = vst [vmem:[%s2221_s28 + $0x58] sm:$0xff] %v1611_v12   ;;  %1739 = vst [vmem:[%s2221_s28 + $0xd8] sm:$0xff] %v1691_v13   ;;  %v710_v18 = vadd.f32 %v1805_v16, %v2206_v37  ;;  %v838_v19 = vadd.f32 %v1837_v17, %v2206_v37  ;;  %v701_v20 = vpop.f32.mrb[25].mxu0  ;;  %v829_v21 = vpop.f32.mrb[25].mxu1 }
 0x151   : > { %1722 = vst [vmem:[%s2221_s28 + $0x50] sm:$0xff] %v1606_v14   ;;  %1738 = vst [vmem:[%s2221_s28 + $0xd0] sm:$0xff] %v1686_v15   ;;  %v702_v22 = vadd.f32 %v2206_v37, %v701_v20  ;;  %v830_v23 = vadd.f32 %v2206_v37, %v829_v21  ;;  %v1806_v24 = vpop.f32.mrb[26].mxu0  ;;  %v1838_v25 = vpop.f32.mrb[26].mxu1 }
 0x152   : > { %v713_v26 = vadd.f32 %v1806_v24, %v2206_v37  ;;  %v841_v27 = vadd.f32 %v1838_v25, %v2206_v37  ;;  %v704_v28 = vpop.f32.mrb[27].mxu0  ;;  %v832_v29 = vpop.f32.mrb[27].mxu1  ;;  %v886_v32 = vmax.f32 %v710_v18, 0.0  ;;  %v918_v33 = vmax.f32 %v838_v19, 0.0 }
 0x153   : > { %v705_v30 = vadd.f32 %v2206_v37, %v704_v28  ;;  %v833_v31 = vadd.f32 %v2206_v37, %v832_v29  ;;  %v884_v36 = vmax.f32 %v702_v22, 0.0  ;;  %v916_v38 = vmax.f32 %v830_v23, 0.0 }
 0x154   : > { %v887_v34 = vmax.f32 %v713_v26, 0.0  ;;  %v919_v35 = vmax.f32 %v841_v27, 0.0 }
 0x155   : > { %v885_v39 = vmax.f32 %v705_v30, 0.0  ;;  %v917_v40 = vmax.f32 %v833_v31, 0.0 }
 0x156   : > { %v1621_v41 = vpack.c.bf16 %v887_v34, %v886_v32  ;;  %v1701_v42 = vpack.c.bf16 %v919_v35, %v918_v33 }
 0x157   : > { %v1616_v43 = vpack.c.bf16 %v885_v39, %v884_v36  ;;  %v1696_v44 = vpack.c.bf16 %v917_v40, %v916_v38  ;;  %v1809_v45 = vpop.f32.mrb[28].mxu0  ;;  %v1841_v46 = vpop.f32.mrb[28].mxu1 }
 0x158   : > { %1725 = vst [vmem:[%s2221_s28 + $0x68] sm:$0xff] %v1621_v41   ;;  %1741 = vst [vmem:[%s2221_s28 + $0xe8] sm:$0xff] %v1701_v42   ;;  %v726_v47 = vadd.f32 %v1809_v45, %v2206_v37  ;;  %v854_v48 = vadd.f32 %v1841_v46, %v2206_v37  ;;  %v717_v49 = vpop.f32.mrb[29].mxu0  ;;  %v845_v50 = vpop.f32.mrb[29].mxu1 }
 0x159   : > { %1724 = vst [vmem:[%s2221_s28 + $0x60] sm:$0xff] %v1616_v43   ;;  %1740 = vst [vmem:[%s2221_s28 + $0xe0] sm:$0xff] %v1696_v44   ;;  %v718_v51 = vadd.f32 %v2206_v37, %v717_v49  ;;  %v846_v52 = vadd.f32 %v2206_v37, %v845_v50  ;;  %v1810_v53 = vpop.f32.mrb[30].mxu0  ;;  %v1842_v54 = vpop.f32.mrb[30].mxu1 }
 0x15a   : > { %v729_v55 = vadd.f32 %v1810_v53, %v2206_v37  ;;  %v857_v56 = vadd.f32 %v1842_v54, %v2206_v37  ;;  %v720_v57 = vpop.f32.mrb[31].mxu0  ;;  %v848_v58 = vpop.f32.mrb[31].mxu1  ;;  %v890_v61 = vmax.f32 %v726_v47, 0.0  ;;  %v922_v62 = vmax.f32 %v854_v48, 0.0 }
 0x15b   : > { %v721_v59 = vadd.f32 %v2206_v37, %v720_v57  ;;  %v849_v60 = vadd.f32 %v2206_v37, %v848_v58  ;;  %v888_v1 = vmax.f32 %v718_v51, 0.0  ;;  %v920_v2 = vmax.f32 %v846_v52, 0.0 }
 0x15c   : > { %v891_v63 = vmax.f32 %v729_v55, 0.0  ;;  %v923_v0 = vmax.f32 %v857_v56, 0.0 }
 0x15d   : > { %v889_v3 = vmax.f32 %v721_v59, 0.0  ;;  %v921_v4 = vmax.f32 %v849_v60, 0.0 }
 0x15e   : > { %v1631_v5 = vpack.c.bf16 %v891_v63, %v890_v61  ;;  %v1711_v6 = vpack.c.bf16 %v923_v0, %v922_v62 }
 0x15f   : > { %v1626_v7 = vpack.c.bf16 %v889_v3, %v888_v1  ;;  %v1706_v8 = vpack.c.bf16 %v921_v4, %v920_v2 }
 0x160   : > { %1727 = vst [vmem:[%s2221_s28 + $0x78] sm:$0xff] %v1631_v5   ;;  %1743 = vst [vmem:[%s2221_s28 + $0xf8] sm:$0xff] %v1711_v6  }
 0x161   : > { %1726 = vst [vmem:[%s2221_s28 + $0x70] sm:$0xff] %v1626_v7   ;;  %1742 = vst [vmem:[%s2221_s28 + $0xf0] sm:$0xff] %v1706_v8  }
 0x162 PF: > { %s15_s14 = sadd.s32 1, %s2009_s14   ;;  %s2332_s12 = smov %s2005_s13 }
 0x163   : > { %p12_p6 = scmp.ge.s32.totalorder %s15_s14, 6   ;;  %s2333_s13 = smov %s2335_s16 }
 0x165   :  { %14 = sbr.rel (!%p12_p6) target bundleno = 3 (0x3), region = 73 }
 0x16c   :  { %1272 = vsyncpa [#allocation3], 1 }
 0x16d   :  { %1274 = vsyncpa [#allocation3 + $0x1], 1 }
 0x16e   :  { %1275 = vsyncpa [#allocation5], 1 }

// kernel: backbone_forward.11
= control target key start
LH: loop header
LB: loop body
LE: loop exit
PB: predicated region body
PF: predicated region fallthrough
CT: control target
= control target key end

     0   :  { %s2320_s0 = inlined_call_operand.vmem [shape: bf16[16,4,8,512], index: 0, kind: input, shape index: {}]   ;;  %s2321_s1 = inlined_call_operand.vmem [shape: bf16[16,8,128], index: 1, kind: output, shape index: {}]  }
   0x1   :  { %v744_v0 = vld [vmem:[%s2320_s0] sm:$0xff]  ;;  %v749_v1 = vld [vmem:[%s2320_s0 + $0x8] sm:$0xff]  ;;  %v754_v2 = vld [vmem:[%s2320_s0 + $0x10] sm:$0xff] }
   0x2   :  { %v759_v3 = vld [vmem:[%s2320_s0 + $0x18] sm:$0xff]  ;;  %v764_v4 = vld [vmem:[%s2320_s0 + $0x20] sm:$0xff]  ;;  %v769_v5 = vld [vmem:[%s2320_s0 + $0x28] sm:$0xff] }
   0x3   :  { %v778_v10 = vld [vmem:[%s2320_s0 + $0x30] sm:$0xff]  ;;  %v783_v11 = vld [vmem:[%s2320_s0 + $0x38] sm:$0xff]  ;;  %v788_v12 = vld [vmem:[%s2320_s0 + $0x40] sm:$0xff] }
   0x4   :  { %v797_v17 = vld [vmem:[%s2320_s0 + $0x48] sm:$0xff]  ;;  %v802_v18 = vld [vmem:[%s2320_s0 + $0x50] sm:$0xff]  ;;  %v807_v19 = vld [vmem:[%s2320_s0 + $0x58] sm:$0xff] }
   0x5   :  { %v816_v24 = vld [vmem:[%s2320_s0 + $0x60] sm:$0xff]  ;;  %v821_v25 = vld [vmem:[%s2320_s0 + $0x68] sm:$0xff]  ;;  %v830_v30 = vld [vmem:[%s2320_s0 + $0x70] sm:$0xff] }
   0x6   :  { %v835_v31 = vld [vmem:[%s2320_s0 + $0x78] sm:$0xff]  ;;  %v844_v36 = vld [vmem:[%s2320_s0 + $0x80] sm:$0xff]  ;;  %v849_v37 = vld [vmem:[%s2320_s0 + $0x88] sm:$0xff] }
   0x7   :  { %v858_v42 = vld [vmem:[%s2320_s0 + $0x90] sm:$0xff]  ;;  %v863_v43 = vld [vmem:[%s2320_s0 + $0x98] sm:$0xff]  ;;  %v872_v48 = vld [vmem:[%s2320_s0 + $0xa0] sm:$0xff] }
   0x8   :  { %v877_v49 = vld [vmem:[%s2320_s0 + $0xa8] sm:$0xff]  ;;  %v886_v54 = vld [vmem:[%s2320_s0 + $0xb0] sm:$0xff]  ;;  %v891_v55 = vld [vmem:[%s2320_s0 + $0xb8] sm:$0xff] }
   0x9   :  { %v900_v60 = vld [vmem:[%s2320_s0 + $0xc0] sm:$0xff]  ;;  %v905_v61 = vld [vmem:[%s2320_s0 + $0xc8] sm:$0xff]  ;;  %v914_v59 = vld [vmem:[%s2320_s0 + $0xd0] sm:$0xff] }
   0xa   :  { %v919_v56 = vld [vmem:[%s2320_s0 + $0xd8] sm:$0xff]  ;;  %v928_v58 = vld [vmem:[%s2320_s0 + $0xe0] sm:$0xff]  ;;  %v933_v52 = vld [vmem:[%s2320_s0 + $0xe8] sm:$0xff] }
   0xb   :  { %v942_v57 = vld [vmem:[%s2320_s0 + $0xf0] sm:$0xff]  ;;  %v947_v50 = vld [vmem:[%s2320_s0 + $0xf8] sm:$0xff]  ;;  %v956_v63 = vld [vmem:[%s2320_s0 + $0x100] sm:$0xff] }
   0xc   :  { %v961_v28 = vld [vmem:[%s2320_s0 + $0x108] sm:$0xff]  ;;  %v970_v62 = vld [vmem:[%s2320_s0 + $0x110] sm:$0xff]  ;;  %v975_v26 = vld [vmem:[%s2320_s0 + $0x118] sm:$0xff] }
   0xd   :  { %v984_v53 = vld [vmem:[%s2320_s0 + $0x120] sm:$0xff]  ;;  %v989_v46 = vld [vmem:[%s2320_s0 + $0x128] sm:$0xff]  ;;  %v998_v51 = vld [vmem:[%s2320_s0 + $0x130] sm:$0xff] }
   0xe   :  { %v1003_v44 = vld [vmem:[%s2320_s0 + $0x138] sm:$0xff]  ;;  %v1012_v29 = vld [vmem:[%s2320_s0 + $0x140] sm:$0xff]  ;;  %v1017_v22 = vld [vmem:[%s2320_s0 + $0x148] sm:$0xff] }
   0xf   :  { %v1026_v27 = vld [vmem:[%s2320_s0 + $0x150] sm:$0xff]  ;;  %v1031_v20 = vld [vmem:[%s2320_s0 + $0x158] sm:$0xff]  ;;  %v1040_v47 = vld [vmem:[%s2320_s0 + $0x160] sm:$0xff] }
  0x10   :  { %v1045_v35 = vld [vmem:[%s2320_s0 + $0x168] sm:$0xff]  ;;  %v1054_v45 = vld [vmem:[%s2320_s0 + $0x170] sm:$0xff]  ;;  %v1059_v34 = vld [vmem:[%s2320_s0 + $0x178] sm:$0xff] }
  0x11   :  { %2480 = vst [vmem:[#allocation2_spill] sm:$0xff] %v1054_v45  ;;  %2481 = vst [vmem:[#allocation3_spill] sm:$0xff] %v1059_v34  ;;  %v1068_v23 = vld [vmem:[%s2320_s0 + $0x180] sm:$0xff]  ;;  %v1073_v33 = vld [vmem:[%s2320_s0 + $0x188] sm:$0xff]  ;;  %v2561_v34 = vunpack.c.h.bf16 %v744_v0  ;;  %v2562_v45 = vunpack.c.h.bf16 %v754_v2 }
  0x12   :  { %2482 = vst [vmem:[#allocation4_spill] sm:$0xff] %v1068_v23  ;;  %2483 = vst [vmem:[#allocation5_spill] sm:$0xff] %v1073_v33  ;;  %v1082_v21 = vld [vmem:[%s2320_s0 + $0x190] sm:$0xff]  ;;  %v1087_v32 = vld [vmem:[%s2320_s0 + $0x198] sm:$0xff]  ;;  %v2560_v23 = vunpack.c.l.bf16 %v754_v2  ;;  %v2570_v2 = vunpack.c.h.bf16 %v802_v18 }
  0x13   :  { %2484 = vst [vmem:[#allocation6_spill] sm:$0xff] %v1082_v21  ;;  %2485 = vst [vmem:[#allocation7_spill] sm:$0xff] %v1087_v32  ;;  %v1096_v41 = vld [vmem:[%s2320_s0 + $0x1a0] sm:$0xff]  ;;  %v1101_v9 = vld [vmem:[%s2320_s0 + $0x1a8] sm:$0xff] }
  0x14   :  { %2486 = vst [vmem:[#allocation8_spill] sm:$0xff] %v1096_v41  ;;  %2487 = vst [vmem:[#allocation9_spill] sm:$0xff] %v1101_v9  ;;  %v1110_v40 = vld [vmem:[%s2320_s0 + $0x1b0] sm:$0xff]  ;;  %v1115_v8 = vld [vmem:[%s2320_s0 + $0x1b8] sm:$0xff] }
  0x15   :  { %2488 = vst [vmem:[#allocation10_spill] sm:$0xff] %v1110_v40  ;;  %2489 = vst [vmem:[#allocation11_spill] sm:$0xff] %v1115_v8  ;;  %v1124_v39 = vld [vmem:[%s2320_s0 + $0x1c0] sm:$0xff]  ;;  %v1129_v7 = vld [vmem:[%s2320_s0 + $0x1c8] sm:$0xff] }
  0x16   :  { %2490 = vst [vmem:[#allocation12_spill] sm:$0xff] %v1124_v39  ;;  %2491 = vst [vmem:[#allocation13_spill] sm:$0xff] %v1129_v7  ;;  %v1138_v38 = vld [vmem:[%s2320_s0 + $0x1d0] sm:$0xff]  ;;  %v1143_v6 = vld [vmem:[%s2320_s0 + $0x1d8] sm:$0xff] }
  0x17   :  { %2492 = vst [vmem:[#allocation14_spill] sm:$0xff] %v1138_v38  ;;  %2493 = vst [vmem:[#allocation15_spill] sm:$0xff] %v1143_v6  ;;  %v1152_v16 = vld [vmem:[%s2320_s0 + $0x1e0] sm:$0xff]  ;;  %v1157_v32 = vld [vmem:[%s2320_s0 + $0x1e8] sm:$0xff] }
  0x18   :  { %2494 = vst [vmem:[#allocation16_spill] sm:$0xff] %v1152_v16  ;;  %2495 = vst [vmem:[#allocation17_spill] sm:$0xff] %v1157_v32  ;;  %v1166_v15 = vld [vmem:[%s2320_s0 + $0x1f0] sm:$0xff]  ;;  %v1171_v9 = vld [vmem:[%s2320_s0 + $0x1f8] sm:$0xff] }
  0x19   :  { %2496 = vst [vmem:[#allocation18_spill] sm:$0xff] %v1166_v15  ;;  %2497 = vst [vmem:[#allocation19_spill] sm:$0xff] %v1171_v9  ;;  %v1180_v14 = vld [vmem:[%s2320_s0 + $0x200] sm:$0xff]  ;;  %v1185_v8 = vld [vmem:[%s2320_s0 + $0x208] sm:$0xff] }
  0x1a   :  { %2498 = vst [vmem:[#allocation20_spill] sm:$0xff] %v1180_v14  ;;  %2499 = vst [vmem:[#allocation21_spill] sm:$0xff] %v1185_v8  ;;  %v1194_v13 = vld [vmem:[%s2320_s0 + $0x210] sm:$0xff]  ;;  %v1199_v7 = vld [vmem:[%s2320_s0 + $0x218] sm:$0xff] }
  0x1b   :  { %2500 = vst [vmem:[#allocation22_spill] sm:$0xff] %v1194_v13  ;;  %2501 = vst [vmem:[#allocation23_spill] sm:$0xff] %v1199_v7  ;;  %v1208_v33 = vld [vmem:[%s2320_s0 + $0x220] sm:$0xff]  ;;  %v1213_v6 = vld [vmem:[%s2320_s0 + $0x228] sm:$0xff] }
  0x1c   :  { %2502 = vst [vmem:[#allocation24_spill] sm:$0xff] %v1208_v33  ;;  %2503 = vst [vmem:[#allocation25_spill] sm:$0xff] %v1213_v6  ;;  %v1222_v21 = vld [vmem:[%s2320_s0 + $0x230] sm:$0xff]  ;;  %v1227_v32 = vld [vmem:[%s2320_s0 + $0x238] sm:$0xff] }
  0x1d   :  { %2504 = vst [vmem:[#allocation26_spill] sm:$0xff] %v1222_v21  ;;  %2505 = vst [vmem:[#allocation27_spill] sm:$0xff] %v1227_v32  ;;  %v1236_v41 = vld [vmem:[%s2320_s0 + $0x240] sm:$0xff]  ;;  %v1241_v9 = vld [vmem:[%s2320_s0 + $0x248] sm:$0xff] }
  0x1e   :  { %2506 = vst [vmem:[#allocation28_spill] sm:$0xff] %v1236_v41  ;;  %2507 = vst [vmem:[#allocation29_spill] sm:$0xff] %v1241_v9  ;;  %v1250_v40 = vld [vmem:[%s2320_s0 + $0x250] sm:$0xff]  ;;  %v1255_v8 = vld [vmem:[%s2320_s0 + $0x258] sm:$0xff] }
  0x1f   :  { %2508 = vst [vmem:[#allocation30_spill] sm:$0xff] %v1250_v40  ;;  %2509 = vst [vmem:[#allocation31_spill] sm:$0xff] %v1255_v8  ;;  %v1264_v39 = vld [vmem:[%s2320_s0 + $0x260] sm:$0xff]  ;;  %v1269_v7 = vld [vmem:[%s2320_s0 + $0x268] sm:$0xff] }
  0x20   :  { %2510 = vst [vmem:[#allocation32_spill] sm:$0xff] %v1264_v39  ;;  %2511 = vst [vmem:[#allocation33_spill] sm:$0xff] %v1269_v7  ;;  %v1278_v38 = vld [vmem:[%s2320_s0 + $0x270] sm:$0xff]  ;;  %v1283_v6 = vld [vmem:[%s2320_s0 + $0x278] sm:$0xff] }
  0x21   :  { %2512 = vst [vmem:[#allocation34_spill] sm:$0xff] %v1278_v38  ;;  %2513 = vst [vmem:[#allocation35_spill] sm:$0xff] %v1283_v6  ;;  %v1292_v16 = vld [vmem:[%s2320_s0 + $0x280] sm:$0xff]  ;;  %v1297_v32 = vld [vmem:[%s2320_s0 + $0x288] sm:$0xff] }
  0x22   :  { %2514 = vst [vmem:[#allocation36_spill] sm:$0xff] %v1292_v16  ;;  %2515 = vst [vmem:[#allocation37_spill] sm:$0xff] %v1297_v32  ;;  %v1306_v15 = vld [vmem:[%s2320_s0 + $0x290] sm:$0xff]  ;;  %v1311_v9 = vld [vmem:[%s2320_s0 + $0x298] sm:$0xff] }
  0x23   :  { %2516 = vst [vmem:[#allocation38_spill] sm:$0xff] %v1306_v15  ;;  %2517 = vst [vmem:[#allocation39_spill] sm:$0xff] %v1311_v9  ;;  %v1320_v14 = vld [vmem:[%s2320_s0 + $0x2a0] sm:$0xff]  ;;  %v1325_v8 = vld [vmem:[%s2320_s0 + $0x2a8] sm:$0xff] }
  0x24   :  { %2518 = vst [vmem:[#allocation40_spill] sm:$0xff] %v1320_v14  ;;  %2519 = vst [vmem:[#allocation41_spill] sm:$0xff] %v1325_v8  ;;  %v1334_v13 = vld [vmem:[%s2320_s0 + $0x2b0] sm:$0xff]  ;;  %v1339_v7 = vld [vmem:[%s2320_s0 + $0x2b8] sm:$0xff] }
  0x25   :  { %2520 = vst [vmem:[#allocation42_spill] sm:$0xff] %v1334_v13  ;;  %2521 = vst [vmem:[#allocation43_spill] sm:$0xff] %v1339_v7  ;;  %v1348_v33 = vld [vmem:[%s2320_s0 + $0x2c0] sm:$0xff]  ;;  %v1353_v6 = vld [vmem:[%s2320_s0 + $0x2c8] sm:$0xff] }
  0x26   :  { %2522 = vst [vmem:[#allocation44_spill] sm:$0xff] %v1348_v33  ;;  %2523 = vst [vmem:[#allocation45_spill] sm:$0xff] %v1353_v6  ;;  %v1362_v21 = vld [vmem:[%s2320_s0 + $0x2d0] sm:$0xff]  ;;  %v1367_v32 = vld [vmem:[%s2320_s0 + $0x2d8] sm:$0xff] }
  0x27   :  { %2524 = vst [vmem:[#allocation46_spill] sm:$0xff] %v1362_v21  ;;  %2525 = vst [vmem:[#allocation47_spill] sm:$0xff] %v1367_v32  ;;  %v1376_v41 = vld [vmem:[%s2320_s0 + $0x2e0] sm:$0xff]  ;;  %v1381_v9 = vld [vmem:[%s2320_s0 + $0x2e8] sm:$0xff] }
  0x28   :  { %2526 = vst [vmem:[#allocation48_spill] sm:$0xff] %v1376_v41  ;;  %2527 = vst [vmem:[#allocation49_spill] sm:$0xff] %v1381_v9  ;;  %v1390_v40 = vld [vmem:[%s2320_s0 + $0x2f0] sm:$0xff]  ;;  %v1395_v8 = vld [vmem:[%s2320_s0 + $0x2f8] sm:$0xff] }
  0x29   :  { %2528 = vst [vmem:[#allocation50_spill] sm:$0xff] %v1390_v40  ;;  %2529 = vst [vmem:[#allocation51_spill] sm:$0xff] %v1395_v8  ;;  %v1404_v39 = vld [vmem:[%s2320_s0 + $0x300] sm:$0xff]  ;;  %v1409_v7 = vld [vmem:[%s2320_s0 + $0x308] sm:$0xff] }
  0x2a   :  { %2530 = vst [vmem:[#allocation52_spill] sm:$0xff] %v1404_v39  ;;  %2531 = vst [vmem:[#allocation53_spill] sm:$0xff] %v1409_v7  ;;  %v1418_v38 = vld [vmem:[%s2320_s0 + $0x310] sm:$0xff]  ;;  %v1423_v6 = vld [vmem:[%s2320_s0 + $0x318] sm:$0xff] }
  0x2b   :  { %2532 = vst [vmem:[#allocation54_spill] sm:$0xff] %v1418_v38  ;;  %2533 = vst [vmem:[#allocation55_spill] sm:$0xff] %v1423_v6  ;;  %v1432_v16 = vld [vmem:[%s2320_s0 + $0x320] sm:$0xff]  ;;  %v1437_v32 = vld [vmem:[%s2320_s0 + $0x328] sm:$0xff] }
  0x2c   :  { %2534 = vst [vmem:[#allocation56_spill] sm:$0xff] %v1432_v16  ;;  %2535 = vst [vmem:[#allocation57_spill] sm:$0xff] %v1437_v32  ;;  %v1446_v15 = vld [vmem:[%s2320_s0 + $0x330] sm:$0xff]  ;;  %v1451_v9 = vld [vmem:[%s2320_s0 + $0x338] sm:$0xff] }
  0x2d   :  { %2536 = vst [vmem:[#allocation58_spill] sm:$0xff] %v1446_v15  ;;  %2537 = vst [vmem:[#allocation59_spill] sm:$0xff] %v1451_v9  ;;  %v1460_v14 = vld [vmem:[%s2320_s0 + $0x340] sm:$0xff]  ;;  %v1465_v8 = vld [vmem:[%s2320_s0 + $0x348] sm:$0xff] }
  0x2e   :  { %2538 = vst [vmem:[#allocation60_spill] sm:$0xff] %v1460_v14  ;;  %2539 = vst [vmem:[#allocation61_spill] sm:$0xff] %v1465_v8  ;;  %v1474_v13 = vld [vmem:[%s2320_s0 + $0x350] sm:$0xff]  ;;  %v1479_v7 = vld [vmem:[%s2320_s0 + $0x358] sm:$0xff] }
  0x2f   :  { %2540 = vst [vmem:[#allocation62_spill] sm:$0xff] %v1474_v13  ;;  %2541 = vst [vmem:[#allocation63_spill] sm:$0xff] %v1479_v7  ;;  %v1488_v33 = vld [vmem:[%s2320_s0 + $0x360] sm:$0xff]  ;;  %v1493_v6 = vld [vmem:[%s2320_s0 + $0x368] sm:$0xff] }
  0x30   :  { %2542 = vst [vmem:[#allocation64_spill] sm:$0xff] %v1488_v33  ;;  %2543 = vst [vmem:[#allocation65_spill] sm:$0xff] %v1493_v6  ;;  %v1502_v21 = vld [vmem:[%s2320_s0 + $0x370] sm:$0xff]  ;;  %v1507_v32 = vld [vmem:[%s2320_s0 + $0x378] sm:$0xff]  ;;  %v2566_v33 = vunpack.c.h.bf16 %v759_v3 }
  0x31   :  { %2544 = vst [vmem:[#allocation66_spill] sm:$0xff] %v1502_v21  ;;  %2545 = vst [vmem:[#allocation67_spill] sm:$0xff] %v1507_v32  ;;  %v1516_v41 = vld [vmem:[%s2320_s0 + $0x380] sm:$0xff]  ;;  %v1521_v9 = vld [vmem:[%s2320_s0 + $0x388] sm:$0xff]  ;;  %v2565_v21 = vunpack.c.h.bf16 %v749_v1 }
  0x32   :  { %2546 = vst [vmem:[#allocation68_spill] sm:$0xff] %v1516_v41  ;;  %2547 = vst [vmem:[#allocation69_spill] sm:$0xff] %v1521_v9  ;;  %v1530_v40 = vld [vmem:[%s2320_s0 + $0x390] sm:$0xff]  ;;  %v1535_v8 = vld [vmem:[%s2320_s0 + $0x398] sm:$0xff]  ;;  %v2564_v41 = vunpack.c.l.bf16 %v759_v3  ;;  %v2574_v3 = vunpack.c.h.bf16 %v807_v19 }
  0x33   :  { %2548 = vst [vmem:[#allocation70_spill] sm:$0xff] %v1530_v40  ;;  %2549 = vst [vmem:[#allocation71_spill] sm:$0xff] %v1535_v8  ;;  %v1544_v39 = vld [vmem:[%s2320_s0 + $0x3a0] sm:$0xff]  ;;  %v1549_v7 = vld [vmem:[%s2320_s0 + $0x3a8] sm:$0xff]  ;;  %v2563_v40 = vunpack.c.l.bf16 %v749_v1  ;;  %v2573_v1 = vunpack.c.h.bf16 %v797_v17 }
  0x34   :  { %2550 = vst [vmem:[#allocation72_spill] sm:$0xff] %v1544_v39  ;;  %2551 = vst [vmem:[#allocation73_spill] sm:$0xff] %v1549_v7  ;;  %v1558_v38 = vld [vmem:[%s2320_s0 + $0x3b0] sm:$0xff]  ;;  %v1563_v6 = vld [vmem:[%s2320_s0 + $0x3b8] sm:$0xff]  ;;  %v395_v39 = vadd.f32 %v2562_v45, %v2561_v34  ;;  %v2572_v45 = vunpack.c.l.bf16 %v807_v19  ;;  %v2581_v19 = vunpack.c.l.bf16 %v821_v25 }
  0x35   :  { %2552 = vst [vmem:[#allocation74_spill] sm:$0xff] %v1558_v38  ;;  %2553 = vst [vmem:[#allocation75_spill] sm:$0xff] %v1563_v6  ;;  %v1572_v16 = vld [vmem:[%s2320_s0 + $0x3c0] sm:$0xff]  ;;  %v1577_v32 = vld [vmem:[%s2320_s0 + $0x3c8] sm:$0xff]  ;;  %v2559_v38 = vunpack.c.l.bf16 %v744_v0  ;;  %v401_v6 = vadd.f32 %v2566_v33, %v2565_v21  ;;  %v2569_v0 = vunpack.c.h.bf16 %v788_v12  ;;  %v413_v21 = vadd.f32 %v2574_v3, %v2573_v1 }
  0x36   :  { %v1586_v15 = vld [vmem:[%s2320_s0 + $0x3d0] sm:$0xff]  ;;  %v1591_v9 = vld [vmem:[%s2320_s0 + $0x3d8] sm:$0xff]  ;;  %v1600_v14 = vld [vmem:[%s2320_s0 + $0x3e0] sm:$0xff]  ;;  %v2575_v33 = vunpack.c.l.bf16 %v764_v4 }
  0x37   :  { %2554 = vst [vmem:[#allocation76_spill] sm:$0xff] %v1591_v9  ;;  %2555 = vst [vmem:[#allocation77_spill] sm:$0xff] %v1600_v14  ;;  %v1605_v8 = vld [vmem:[%s2320_s0 + $0x3e8] sm:$0xff]  ;;  %v1614_v13 = vld [vmem:[%s2320_s0 + $0x3f0] sm:$0xff]  ;;  %v392_v9 = vadd.f32 %v2560_v23, %v2559_v38  ;;  %v407_v34 = vadd.f32 %v2570_v2, %v2569_v0  ;;  %v2571_v38 = vunpack.c.l.bf16 %v797_v17  ;;  %v2578_v0 = vunpack.c.h.bf16 %v769_v5 }
  0x38   :  { %2556 = vst [vmem:[#allocation78_spill] sm:$0xff] %v1605_v8  ;;  %2557 = vst [vmem:[#allocation79_spill] sm:$0xff] %v1614_v13  ;;  %v1619_v7 = vld [vmem:[%s2320_s0 + $0x3f8] sm:$0xff]  ;;  %v398_v8 = vadd.f32 %v2564_v41, %v2563_v40  ;;  %v2568_v13 = vunpack.c.l.bf16 %v802_v18  ;;  %v2579_v14 = vunpack.c.l.bf16 %v816_v24  ;;  %v2580_v17 = vunpack.c.h.bf16 %v816_v24 }
  0x39   :  { %2558 = vst [vmem:[#allocation80_spill] sm:$0xff] %v1619_v7  ;;  %v2567_v7 = vunpack.c.l.bf16 %v788_v12  ;;  %v410_v40 = vadd.f32 %v2572_v45, %v2571_v38  ;;  %v393_v41 = vadd.f32 %v392_v9, %v2575_v33  ;;  %v2577_v12 = vunpack.c.l.bf16 %v769_v5 }
  0x3a   :  { %v402_v2 = vadd.f32 %v401_v6, %v2578_v0  ;;  %v408_v45 = vadd.f32 %v407_v34, %v2580_v17  ;;  %v2582_v9 = vunpack.c.h.bf16 %v821_v25  ;;  %v2585_v6 = vunpack.c.l.bf16 %v783_v11 }
  0x3b   :  { %v404_v23 = vadd.f32 %v2568_v13, %v2567_v7  ;;  %v2576_v7 = vunpack.c.h.bf16 %v764_v4  ;;  %v399_v18 = vadd.f32 %v398_v8, %v2577_v12  ;;  %v411_v1 = vadd.f32 %v410_v40, %v2581_v19 }
  0x3c   :  { %v414_v3 = vadd.f32 %v413_v21, %v2582_v9  ;;  %v2583_v4 = vunpack.c.l.bf16 %v778_v10  ;;  %v2584_v8 = vunpack.c.h.bf16 %v778_v10  ;;  %v2586_v24 = vunpack.c.h.bf16 %v783_v11 }
  0x3d   :  { %v396_v13 = vadd.f32 %v395_v39, %v2576_v7  ;;  %v405_v38 = vadd.f32 %v404_v23, %v2579_v14  ;;  %v1695_v14 = vadd.f32 %v399_v18, %v2585_v6  ;;  %v2588_v34 = vunpack.c.l.bf16 %v830_v30 }
  0x3e   :  { %v1687_v39 = vadd.f32 %v393_v41, %v2583_v4  ;;  %v1699_v23 = vadd.f32 %v402_v2, %v2586_v24  ;;  %v2589_v40 = vunpack.c.h.bf16 %v830_v30  ;;  %v2590_v10 = vunpack.c.l.bf16 %v835_v31 }
  0x3f   :  { %v1691_v5 = vadd.f32 %v396_v13, %v2584_v8  ;;  %v1703_v25 = vadd.f32 %v405_v38, %v2588_v34  ;;  %v2591_v41 = vunpack.c.h.bf16 %v835_v31  ;;  %v2593_v11 = vunpack.c.l.bf16 %v844_v36 }
  0x40   :  { %2587 = vst [vmem:[#allocation81_spill] sm:$0xff] %v1699_v23  ;;  %v1707_v21 = vadd.f32 %v408_v45, %v2589_v40  ;;  %v1711_v33 = vadd.f32 %v411_v1, %v2590_v10  ;;  %v2594_v13 = vunpack.c.l.bf16 %v858_v42  ;;  %v2595_v18 = vunpack.c.h.bf16 %v844_v36  ;;  %v2847_v23 = vld [vmem:[#allocation64_spill] sm:$0xff] }
  0x41   :  { %v1715_v7 = vadd.f32 %v414_v3, %v2591_v41  ;;  %v2596_v0 = vunpack.c.h.bf16 %v858_v42  ;;  %v2597_v2 = vunpack.c.l.bf16 %v849_v37  ;;  %v2598_v38 = vunpack.c.l.bf16 %v863_v43 }
  0x42   :  { %v416_v12 = vadd.f32 %v2594_v13, %v2593_v11  ;;  %v2599_v45 = vunpack.c.h.bf16 %v849_v37  ;;  %v2600_v31 = vunpack.c.h.bf16 %v863_v43  ;;  %v2601_v1 = vunpack.c.l.bf16 %v900_v60 }
  0x43   :  { %2592 = vst [vmem:[#allocation82_spill] sm:$0xff] %v1715_v7  ;;  %v419_v30 = vadd.f32 %v2596_v0, %v2595_v18  ;;  %v422_v17 = vadd.f32 %v2598_v38, %v2597_v2  ;;  %v2602_v9 = vunpack.c.l.bf16 %v914_v59  ;;  %v2603_v36 = vunpack.c.h.bf16 %v900_v60 }
  0x44   :  { %v425_v19 = vadd.f32 %v2600_v31, %v2599_v45  ;;  %v2604_v42 = vunpack.c.h.bf16 %v914_v59  ;;  %v2605_v8 = vunpack.c.l.bf16 %v905_v61  ;;  %v2606_v6 = vunpack.c.l.bf16 %v919_v56 }
  0x45   :  { %v428_v3 = vadd.f32 %v2602_v9, %v2601_v1  ;;  %v2607_v37 = vunpack.c.h.bf16 %v905_v61  ;;  %v2608_v43 = vunpack.c.h.bf16 %v919_v56  ;;  %v2609_v40 = vunpack.c.l.bf16 %v872_v48 }
  0x46   :  { %v431_v4 = vadd.f32 %v2604_v42, %v2603_v36  ;;  %v434_v24 = vadd.f32 %v2606_v6, %v2605_v8  ;;  %v2610_v41 = vunpack.c.h.bf16 %v872_v48  ;;  %v2611_v60 = vunpack.c.l.bf16 %v877_v49 }
  0x47   :  { %v437_v34 = vadd.f32 %v2608_v43, %v2607_v37  ;;  %v417_v10 = vadd.f32 %v416_v12, %v2609_v40  ;;  %v2612_v13 = vunpack.c.h.bf16 %v877_v49  ;;  %v2613_v0 = vunpack.c.l.bf16 %v928_v58 }
  0x48   :  { %v420_v11 = vadd.f32 %v419_v30, %v2610_v41  ;;  %v423_v59 = vadd.f32 %v422_v17, %v2611_v60  ;;  %v2614_v61 = vunpack.c.h.bf16 %v928_v58  ;;  %v2615_v56 = vunpack.c.l.bf16 %v933_v52 }
  0x49   :  { %v426_v18 = vadd.f32 %v425_v19, %v2612_v13  ;;  %v429_v2 = vadd.f32 %v428_v3, %v2613_v0  ;;  %v2616_v12 = vunpack.c.h.bf16 %v933_v52  ;;  %v2617_v48 = vunpack.c.l.bf16 %v886_v54 }
  0x4a   :  { %v432_v38 = vadd.f32 %v431_v4, %v2614_v61  ;;  %v435_v45 = vadd.f32 %v434_v24, %v2615_v56  ;;  %v2618_v17 = vunpack.c.h.bf16 %v886_v54  ;;  %v2619_v19 = vunpack.c.l.bf16 %v891_v55 }
  0x4b   :  { %v438_v31 = vadd.f32 %v437_v34, %v2616_v12  ;;  %v1767_v30 = vadd.f32 %v417_v10, %v2617_v48  ;;  %v2620_v58 = vunpack.c.h.bf16 %v891_v55  ;;  %v2622_v3 = vunpack.c.l.bf16 %v942_v57 }
  0x4c   :  { %v1771_v49 = vadd.f32 %v420_v11, %v2618_v17  ;;  %v1775_v1 = vadd.f32 %v423_v59, %v2619_v19  ;;  %v2623_v36 = vunpack.c.h.bf16 %v942_v57  ;;  %v2624_v54 = vunpack.c.l.bf16 %v947_v50 }
  0x4d   :  { %v1779_v9 = vadd.f32 %v426_v18, %v2620_v58  ;;  %v1783_v52 = vadd.f32 %v429_v2, %v2622_v3  ;;  %v2625_v8 = vunpack.c.h.bf16 %v947_v50  ;;  %v2627_v55 = vunpack.c.l.bf16 %v956_v63 }
  0x4e   :  { %v1787_v42 = vadd.f32 %v432_v38, %v2623_v36  ;;  %v1791_v4 = vadd.f32 %v435_v45, %v2624_v54  ;;  %v2628_v24 = vunpack.c.l.bf16 %v970_v62  ;;  %v2629_v43 = vunpack.c.h.bf16 %v956_v63 }
  0x4f   :  { %2621 = vst [vmem:[#allocation83_spill] sm:$0xff] %v1779_v9  ;;  %v1795_v6 = vadd.f32 %v438_v31, %v2625_v8  ;;  %v2630_v34 = vunpack.c.h.bf16 %v970_v62  ;;  %v2631_v40 = vunpack.c.l.bf16 %v961_v28  ;;  %v2632_v10 = vunpack.c.l.bf16 %v975_v26 }
  0x50   :  { %v440_v37 = vadd.f32 %v2628_v24, %v2627_v55  ;;  %v2633_v11 = vunpack.c.h.bf16 %v961_v28  ;;  %v2634_v50 = vunpack.c.h.bf16 %v975_v26  ;;  %v2635_v59 = vunpack.c.l.bf16 %v1012_v29 }
  0x51   :  { %2626 = vst [vmem:[#allocation84_spill] sm:$0xff] %v1795_v6  ;;  %v443_v57 = vadd.f32 %v2630_v34, %v2629_v43  ;;  %v446_v41 = vadd.f32 %v2632_v10, %v2631_v40  ;;  %v2636_v13 = vunpack.c.l.bf16 %v1026_v27  ;;  %v2637_v63 = vunpack.c.h.bf16 %v1012_v29  ;;  %v2656_v40 = vld [vmem:[#allocation2_spill] sm:$0xff] }
  0x52   :  { %v449_v60 = vadd.f32 %v2634_v50, %v2633_v11  ;;  %v2638_v62 = vunpack.c.h.bf16 %v1026_v27  ;;  %v2639_v2 = vunpack.c.l.bf16 %v1017_v22  ;;  %v2640_v61 = vunpack.c.l.bf16 %v1031_v20  ;;  %v2659_v50 = vld [vmem:[#allocation3_spill] sm:$0xff] }
  0x53   :  { %v452_v18 = vadd.f32 %v2636_v13, %v2635_v59  ;;  %v2641_v28 = vunpack.c.h.bf16 %v1017_v22  ;;  %v2642_v26 = vunpack.c.h.bf16 %v1031_v20  ;;  %v2643_v45 = vunpack.c.l.bf16 %v984_v53 }
  0x54   :  { %v455_v0 = vadd.f32 %v2638_v62, %v2637_v63  ;;  %v458_v38 = vadd.f32 %v2640_v61, %v2639_v2  ;;  %v2644_v31 = vunpack.c.h.bf16 %v984_v53  ;;  %v2645_v29 = vunpack.c.l.bf16 %v989_v46  ;;  %v2665_v63 = vld [vmem:[#allocation6_spill] sm:$0xff] }
  0x55   :  { %v461_v56 = vadd.f32 %v2642_v26, %v2641_v28  ;;  %v441_v12 = vadd.f32 %v440_v37, %v2643_v45  ;;  %v2646_v17 = vunpack.c.h.bf16 %v989_v46  ;;  %v2647_v58 = vunpack.c.l.bf16 %v1040_v47  ;;  %v2669_v28 = vld [vmem:[#allocation5_spill] sm:$0xff] }
  0x56   :  { %v444_v48 = vadd.f32 %v443_v57, %v2644_v31  ;;  %v447_v27 = vadd.f32 %v446_v41, %v2645_v29  ;;  %v2648_v22 = vunpack.c.h.bf16 %v1040_v47  ;;  %v2649_v20 = vunpack.c.l.bf16 %v1045_v35 }
  0x57   :  { %v450_v19 = vadd.f32 %v449_v60, %v2646_v17  ;;  %v453_v3 = vadd.f32 %v452_v18, %v2647_v58  ;;  %v2650_v8 = vunpack.c.h.bf16 %v1045_v35  ;;  %v2651_v53 = vunpack.c.l.bf16 %v998_v51  ;;  %v2663_v18 = vld [vmem:[#allocation4_spill] sm:$0xff] }
  0x58   :  { %v456_v36 = vadd.f32 %v455_v0, %v2648_v22  ;;  %v459_v54 = vadd.f32 %v458_v38, %v2649_v20  ;;  %v2652_v37 = vunpack.c.h.bf16 %v998_v51  ;;  %v2653_v43 = vunpack.c.l.bf16 %v1003_v44 }
  0x59   :  { %v462_v55 = vadd.f32 %v461_v56, %v2650_v8  ;;  %v1847_v24 = vadd.f32 %v441_v12, %v2651_v53  ;;  %v2654_v47 = vunpack.c.h.bf16 %v1003_v44  ;;  %v2657_v10 = vunpack.c.l.bf16 %v2656_v40  ;;  %v2671_v56 = vld [vmem:[#allocation7_spill] sm:$0xff] }
  0x5a   :  { %v1851_v46 = vadd.f32 %v444_v48, %v2652_v37  ;;  %v1855_v34 = vadd.f32 %v447_v27, %v2653_v43  ;;  %v2658_v41 = vunpack.c.h.bf16 %v2656_v40  ;;  %v2660_v51 = vunpack.c.l.bf16 %v2659_v50  ;;  %v2675_v27 = vld [vmem:[#allocation12_spill] sm:$0xff] }
  0x5b   :  { %v1859_v57 = vadd.f32 %v450_v19, %v2654_v47  ;;  %v1863_v35 = vadd.f32 %v453_v3, %v2657_v10  ;;  %v2661_v59 = vunpack.c.h.bf16 %v2659_v50  ;;  %v2664_v44 = vunpack.c.l.bf16 %v2663_v18  ;;  %v2677_v19 = vld [vmem:[#allocation14_spill] sm:$0xff]  ;;  %v2687_v10 = vld [vmem:[#allocation8_spill] sm:$0xff] }
  0x5c   :  { %v1867_v11 = vadd.f32 %v456_v36, %v2658_v41  ;;  %v1871_v60 = vadd.f32 %v459_v54, %v2660_v51  ;;  %v2666_v62 = vunpack.c.l.bf16 %v2665_v63  ;;  %v2667_v2 = vunpack.c.h.bf16 %v2663_v18  ;;  %v2681_v54 = vld [vmem:[#allocation13_spill] sm:$0xff] }
  0x5d   :  { %2655 = vst [vmem:[#allocation85_spill] sm:$0xff] %v1859_v57  ;;  %v1875_v13 = vadd.f32 %v462_v55, %v2661_v59  ;;  %v2668_v61 = vunpack.c.h.bf16 %v2665_v63  ;;  %v2670_v26 = vunpack.c.l.bf16 %v2669_v28  ;;  %v2672_v45 = vunpack.c.l.bf16 %v2671_v56  ;;  %v2683_v55 = vld [vmem:[#allocation15_spill] sm:$0xff]  ;;  %v2690_v18 = vld [vmem:[#allocation9_spill] sm:$0xff] }
  0x5e   :  { %v464_v0 = vadd.f32 %v2666_v62, %v2664_v44  ;;  %v2673_v31 = vunpack.c.h.bf16 %v2669_v28  ;;  %v2674_v48 = vunpack.c.h.bf16 %v2671_v56  ;;  %v2676_v17 = vunpack.c.l.bf16 %v2675_v27  ;;  %v2837_v57 = vld [vmem:[#allocation63_spill] sm:$0xff] }
  0x5f   :  { %2662 = vst [vmem:[#allocation2_spill] sm:$0xff] %v1875_v13  ;;  %v467_v38 = vadd.f32 %v2668_v61, %v2667_v2  ;;  %v470_v12 = vadd.f32 %v2672_v45, %v2670_v26  ;;  %v2678_v58 = vunpack.c.l.bf16 %v2677_v19  ;;  %v2679_v22 = vunpack.c.h.bf16 %v2675_v27  ;;  %v2693_v61 = vld [vmem:[#allocation16_spill] sm:$0xff] }
  0x60   :  { %v473_v29 = vadd.f32 %v2674_v48, %v2673_v31  ;;  %v2680_v36 = vunpack.c.h.bf16 %v2677_v19  ;;  %v2682_v8 = vunpack.c.l.bf16 %v2681_v54  ;;  %v2684_v53 = vunpack.c.l.bf16 %v2683_v55  ;;  %v2696_v31 = vld [vmem:[#allocation17_spill] sm:$0xff]  ;;  %v2699_v19 = vld [vmem:[#allocation10_spill] sm:$0xff] }
  0x61   :  { %v476_v3 = vadd.f32 %v2678_v58, %v2676_v17  ;;  %v2685_v43 = vunpack.c.h.bf16 %v2681_v54  ;;  %v2686_v47 = vunpack.c.h.bf16 %v2683_v55  ;;  %v2688_v41 = vunpack.c.l.bf16 %v2687_v10 }
  0x62   :  { %v479_v20 = vadd.f32 %v2680_v36, %v2679_v22  ;;  %v482_v37 = vadd.f32 %v2684_v53, %v2682_v8  ;;  %v2689_v51 = vunpack.c.h.bf16 %v2687_v10  ;;  %v2691_v44 = vunpack.c.l.bf16 %v2690_v18  ;;  %v2706_v8 = vld [vmem:[#allocation18_spill] sm:$0xff] }
  0x63   :  { %v485_v40 = vadd.f32 %v2686_v47, %v2685_v43  ;;  %v465_v50 = vadd.f32 %v464_v0, %v2688_v41  ;;  %v2692_v62 = vunpack.c.h.bf16 %v2690_v18  ;;  %v2694_v28 = vunpack.c.l.bf16 %v2693_v61  ;;  %v2709_v47 = vld [vmem:[#allocation19_spill] sm:$0xff]  ;;  %v2715_v18 = vld [vmem:[#allocation22_spill] sm:$0xff] }
  0x64   :  { %v468_v59 = vadd.f32 %v467_v38, %v2689_v51  ;;  %v471_v63 = vadd.f32 %v470_v12, %v2691_v44  ;;  %v2695_v56 = vunpack.c.h.bf16 %v2693_v61  ;;  %v2697_v48 = vunpack.c.l.bf16 %v2696_v31  ;;  %v2713_v51 = vld [vmem:[#allocation20_spill] sm:$0xff] }
  0x65   :  { %v474_v2 = vadd.f32 %v473_v29, %v2692_v62  ;;  %v477_v26 = vadd.f32 %v476_v3, %v2694_v28  ;;  %v2698_v0 = vunpack.c.h.bf16 %v2696_v31  ;;  %v2700_v38 = vunpack.c.l.bf16 %v2699_v19  ;;  %v2702_v29 = vld [vmem:[#allocation11_spill] sm:$0xff]  ;;  %v2719_v28 = vld [vmem:[#allocation21_spill] sm:$0xff] }
  0x66   :  { %v480_v45 = vadd.f32 %v479_v20, %v2695_v56  ;;  %v483_v27 = vadd.f32 %v482_v37, %v2697_v48  ;;  %v2701_v12 = vunpack.c.h.bf16 %v2699_v19  ;;  %v2703_v36 = vunpack.c.l.bf16 %v2702_v29  ;;  %v2721_v56 = vld [vmem:[#allocation23_spill] sm:$0xff] }
  0x67   :  { %v486_v17 = vadd.f32 %v485_v40, %v2698_v0  ;;  %v1927_v58 = vadd.f32 %v465_v50, %v2700_v38  ;;  %v2704_v20 = vunpack.c.h.bf16 %v2702_v29  ;;  %v2707_v55 = vunpack.c.l.bf16 %v2706_v8  ;;  %v2727_v38 = vld [vmem:[#allocation30_spill] sm:$0xff] }
  0x68   :  { %v1931_v22 = vadd.f32 %v468_v59, %v2701_v12  ;;  %v1935_v3 = vadd.f32 %v471_v63, %v2703_v36  ;;  %v2708_v37 = vunpack.c.h.bf16 %v2706_v8  ;;  %v2710_v40 = vunpack.c.l.bf16 %v2709_v47 }
  0x69   :  { %v1939_v54 = vadd.f32 %v474_v2, %v2704_v20  ;;  %v1943_v53 = vadd.f32 %v477_v26, %v2707_v55  ;;  %v2711_v41 = vunpack.c.h.bf16 %v2709_v47  ;;  %v2714_v59 = vunpack.c.l.bf16 %v2713_v51  ;;  %v2731_v55 = vld [vmem:[#allocation29_spill] sm:$0xff]  ;;  %v2733_v47 = vld [vmem:[#allocation31_spill] sm:$0xff] }
  0x6a   :  { %v1947_v43 = vadd.f32 %v480_v45, %v2708_v37  ;;  %v1951_v10 = vadd.f32 %v483_v27, %v2710_v40  ;;  %v2716_v44 = vunpack.c.l.bf16 %v2715_v18  ;;  %v2717_v62 = vunpack.c.h.bf16 %v2713_v51 }
  0x6b   :  { %2705 = vst [vmem:[#allocation3_spill] sm:$0xff] %v1939_v54  ;;  %v1955_v50 = vadd.f32 %v486_v17, %v2711_v41  ;;  %v2718_v2 = vunpack.c.h.bf16 %v2715_v18  ;;  %v2720_v26 = vunpack.c.l.bf16 %v2719_v28  ;;  %v2722_v45 = vunpack.c.l.bf16 %v2721_v56  ;;  %v2725_v17 = vld [vmem:[#allocation28_spill] sm:$0xff] }
  0x6c   :  { %v488_v63 = vadd.f32 %v2716_v44, %v2714_v59  ;;  %v2723_v48 = vunpack.c.h.bf16 %v2719_v28  ;;  %v2724_v27 = vunpack.c.h.bf16 %v2721_v56  ;;  %v2726_v19 = vunpack.c.l.bf16 %v2725_v17  ;;  %v2737_v44 = vld [vmem:[#allocation24_spill] sm:$0xff]  ;;  %v2740_v56 = vld [vmem:[#allocation25_spill] sm:$0xff] }
  0x6d   :  { %2712 = vst [vmem:[#allocation4_spill] sm:$0xff] %v1955_v50  ;;  %v491_v61 = vadd.f32 %v2718_v2, %v2717_v62  ;;  %v494_v31 = vadd.f32 %v2722_v45, %v2720_v26  ;;  %v2728_v12 = vunpack.c.l.bf16 %v2727_v38  ;;  %v2729_v36 = vunpack.c.h.bf16 %v2725_v17  ;;  %v2795_v54 = vld [vmem:[#allocation48_spill] sm:$0xff] }
  0x6e   :  { %v497_v0 = vadd.f32 %v2724_v27, %v2723_v48  ;;  %v2730_v20 = vunpack.c.h.bf16 %v2727_v38  ;;  %v2732_v37 = vunpack.c.l.bf16 %v2731_v55  ;;  %v2734_v40 = vunpack.c.l.bf16 %v2733_v47 }
  0x6f   :  { %v500_v29 = vadd.f32 %v2728_v12, %v2726_v19  ;;  %v2735_v51 = vunpack.c.h.bf16 %v2731_v55  ;;  %v2736_v59 = vunpack.c.h.bf16 %v2733_v47  ;;  %v2738_v62 = vunpack.c.l.bf16 %v2737_v44  ;;  %v2743_v19 = vld [vmem:[#allocation32_spill] sm:$0xff]  ;;  %v2746_v55 = vld [vmem:[#allocation33_spill] sm:$0xff] }
  0x70   :  { %v503_v8 = vadd.f32 %v2730_v20, %v2729_v36  ;;  %v506_v41 = vadd.f32 %v2734_v40, %v2732_v37  ;;  %v2739_v28 = vunpack.c.h.bf16 %v2737_v44  ;;  %v2741_v45 = vunpack.c.l.bf16 %v2740_v56 }
  0x71   :  { %v509_v18 = vadd.f32 %v2736_v59, %v2735_v51  ;;  %v489_v2 = vadd.f32 %v488_v63, %v2738_v62  ;;  %v2742_v27 = vunpack.c.h.bf16 %v2740_v56  ;;  %v2744_v38 = vunpack.c.l.bf16 %v2743_v19  ;;  %v2749_v51 = vld [vmem:[#allocation26_spill] sm:$0xff] }
  0x72   :  { %v492_v26 = vadd.f32 %v491_v61, %v2739_v28  ;;  %v495_v48 = vadd.f32 %v494_v31, %v2741_v45  ;;  %v2745_v36 = vunpack.c.h.bf16 %v2743_v19  ;;  %v2747_v37 = vunpack.c.l.bf16 %v2746_v55 }
  0x73   :  { %v498_v17 = vadd.f32 %v497_v0, %v2742_v27  ;;  %v501_v12 = vadd.f32 %v500_v29, %v2744_v38  ;;  %v2748_v63 = vunpack.c.h.bf16 %v2746_v55  ;;  %v2750_v61 = vunpack.c.l.bf16 %v2749_v51  ;;  %v2752_v0 = vld [vmem:[#allocation27_spill] sm:$0xff] }
  0x74   :  { %v504_v20 = vadd.f32 %v503_v8, %v2745_v36  ;;  %v507_v47 = vadd.f32 %v506_v41, %v2747_v37  ;;  %v2751_v31 = vunpack.c.h.bf16 %v2749_v51  ;;  %v2753_v62 = vunpack.c.l.bf16 %v2752_v0  ;;  %v2757_v41 = vld [vmem:[#allocation34_spill] sm:$0xff]  ;;  %v2760_v27 = vld [vmem:[#allocation35_spill] sm:$0xff]  ;;  %v2765_v36 = vld [vmem:[#allocation36_spill] sm:$0xff] }
  0x75   :  { %v510_v40 = vadd.f32 %v509_v18, %v2748_v63  ;;  %v2007_v59 = vadd.f32 %v489_v2, %v2750_v61  ;;  %v2755_v8 = vunpack.c.h.bf16 %v2752_v0  ;;  %v2758_v56 = vunpack.c.l.bf16 %v2757_v41  ;;  %v2773_v0 = vld [vmem:[#allocation39_spill] sm:$0xff] }
  0x76   :  { %v2011_v44 = vadd.f32 %v492_v26, %v2751_v31  ;;  %v2015_v29 = vadd.f32 %v495_v48, %v2753_v62  ;;  %v2759_v18 = vunpack.c.h.bf16 %v2757_v41  ;;  %v2761_v19 = vunpack.c.l.bf16 %v2760_v27 }
  0x77   :  { %v2019_v28 = vadd.f32 %v498_v17, %v2755_v8  ;;  %v2023_v45 = vadd.f32 %v501_v12, %v2758_v56  ;;  %v2763_v38 = vunpack.c.h.bf16 %v2760_v27  ;;  %v2766_v55 = vunpack.c.l.bf16 %v2765_v36  ;;  %v2767_v17 = vld [vmem:[#allocation38_spill] sm:$0xff]  ;;  %v2777_v56 = vld [vmem:[#allocation44_spill] sm:$0xff] }
  0x78   :  { %2754 = vst [vmem:[#allocation6_spill] sm:$0xff] %v2015_v29  ;;  %v2027_v2 = vadd.f32 %v504_v20, %v2759_v18  ;;  %v2031_v26 = vadd.f32 %v507_v47, %v2761_v19  ;;  %v2768_v37 = vunpack.c.l.bf16 %v2767_v17  ;;  %v2769_v12 = vunpack.c.h.bf16 %v2765_v36  ;;  %v2771_v20 = vld [vmem:[#allocation37_spill] sm:$0xff]  ;;  %v2779_v27 = vld [vmem:[#allocation46_spill] sm:$0xff] }
  0x79   :  { %2756 = vst [vmem:[#allocation5_spill] sm:$0xff] %v2019_v28  ;;  %v2035_v48 = vadd.f32 %v510_v40, %v2763_v38  ;;  %v2770_v51 = vunpack.c.h.bf16 %v2767_v17  ;;  %v2772_v31 = vunpack.c.l.bf16 %v2771_v20  ;;  %v2774_v62 = vunpack.c.l.bf16 %v2773_v0 }
  0x7a   :  { %2762 = vst [vmem:[#allocation7_spill] sm:$0xff] %v2031_v26  ;;  %v512_v63 = vadd.f32 %v2768_v37, %v2766_v55  ;;  %v2775_v8 = vunpack.c.h.bf16 %v2771_v20  ;;  %v2776_v40 = vunpack.c.h.bf16 %v2773_v0  ;;  %v2778_v18 = vunpack.c.l.bf16 %v2777_v56  ;;  %v2783_v37 = vld [vmem:[#allocation45_spill] sm:$0xff] }
  0x7b   :  { %2764 = vst [vmem:[#allocation12_spill] sm:$0xff] %v2035_v48  ;;  %v515_v61 = vadd.f32 %v2770_v51, %v2769_v12  ;;  %v518_v47 = vadd.f32 %v2774_v62, %v2772_v31  ;;  %v2780_v19 = vunpack.c.l.bf16 %v2779_v27  ;;  %v2781_v36 = vunpack.c.h.bf16 %v2777_v56  ;;  %v2785_v51 = vld [vmem:[#allocation47_spill] sm:$0xff]  ;;  %v2792_v56 = vld [vmem:[#allocation41_spill] sm:$0xff] }
  0x7c   :  { %v521_v41 = vadd.f32 %v2776_v40, %v2775_v8  ;;  %v2782_v55 = vunpack.c.h.bf16 %v2779_v27  ;;  %v2784_v12 = vunpack.c.l.bf16 %v2783_v37  ;;  %v2786_v48 = vunpack.c.l.bf16 %v2785_v51  ;;  %v2789_v8 = vld [vmem:[#allocation40_spill] sm:$0xff]  ;;  %v2894_v26 = vld [vmem:[#allocation77_spill] sm:$0xff] }
  0x7d   :  { %v524_v38 = vadd.f32 %v2780_v19, %v2778_v18  ;;  %v2787_v20 = vunpack.c.h.bf16 %v2783_v37  ;;  %v2788_v0 = vunpack.c.h.bf16 %v2785_v51  ;;  %v2790_v40 = vunpack.c.l.bf16 %v2789_v8  ;;  %v2798_v51 = vld [vmem:[#allocation49_spill] sm:$0xff] }
  0x7e   :  { %v527_v17 = vadd.f32 %v2782_v55, %v2781_v36  ;;  %v530_v31 = vadd.f32 %v2786_v48, %v2784_v12  ;;  %v2791_v18 = vunpack.c.h.bf16 %v2789_v8  ;;  %v2793_v50 = vunpack.c.l.bf16 %v2792_v56  ;;  %v2801_v8 = vld [vmem:[#allocation42_spill] sm:$0xff] }
  0x7f   :  { %v533_v62 = vadd.f32 %v2788_v0, %v2787_v20  ;;  %v513_v28 = vadd.f32 %v512_v63, %v2790_v40  ;;  %v2794_v36 = vunpack.c.h.bf16 %v2792_v56  ;;  %v2796_v13 = vunpack.c.l.bf16 %v2795_v54 }
  0x80   :  { %v516_v19 = vadd.f32 %v515_v61, %v2791_v18  ;;  %v519_v27 = vadd.f32 %v518_v47, %v2793_v50  ;;  %v2797_v37 = vunpack.c.h.bf16 %v2795_v54  ;;  %v2799_v20 = vunpack.c.l.bf16 %v2798_v51 }
  0x81   :  { %v522_v55 = vadd.f32 %v521_v41, %v2794_v36  ;;  %v525_v48 = vadd.f32 %v524_v38, %v2796_v13  ;;  %v2800_v63 = vunpack.c.h.bf16 %v2798_v51  ;;  %v2802_v61 = vunpack.c.l.bf16 %v2801_v8  ;;  %v2804_v41 = vld [vmem:[#allocation43_spill] sm:$0xff] }
  0x82   :  { %v528_v12 = vadd.f32 %v527_v17, %v2797_v37  ;;  %v531_v0 = vadd.f32 %v530_v31, %v2799_v20  ;;  %v2803_v50 = vunpack.c.h.bf16 %v2801_v8  ;;  %v2805_v56 = vunpack.c.l.bf16 %v2804_v41  ;;  %v2809_v17 = vld [vmem:[#allocation50_spill] sm:$0xff]  ;;  %v2812_v37 = vld [vmem:[#allocation51_spill] sm:$0xff] }
  0x83   :  { %v534_v40 = vadd.f32 %v533_v62, %v2800_v63  ;;  %v2087_v18 = vadd.f32 %v513_v28, %v2802_v61  ;;  %v2807_v54 = vunpack.c.h.bf16 %v2804_v41  ;;  %v2810_v31 = vunpack.c.l.bf16 %v2809_v17  ;;  %v2819_v61 = vld [vmem:[#allocation54_spill] sm:$0xff] }
  0x84   :  { %v2091_v47 = vadd.f32 %v516_v19, %v2803_v50  ;;  %v2095_v13 = vadd.f32 %v519_v27, %v2805_v56  ;;  %v2811_v62 = vunpack.c.h.bf16 %v2809_v17  ;;  %v2813_v51 = vunpack.c.l.bf16 %v2812_v37  ;;  %v2817_v27 = vld [vmem:[#allocation52_spill] sm:$0xff]  ;;  %v2825_v17 = vld [vmem:[#allocation55_spill] sm:$0xff] }
  0x85   :  { %v2099_v38 = vadd.f32 %v522_v55, %v2807_v54  ;;  %v2103_v36 = vadd.f32 %v525_v48, %v2810_v31  ;;  %v2815_v19 = vunpack.c.h.bf16 %v2812_v37  ;;  %v2818_v8 = vunpack.c.l.bf16 %v2817_v27  ;;  %v2823_v54 = vld [vmem:[#allocation53_spill] sm:$0xff] }
  0x86   :  { %2806 = vst [vmem:[#allocation14_spill] sm:$0xff] %v2095_v13  ;;  %v529_v28 = vadd.f32 %v528_v12, %v2811_v62  ;;  %v2109_v20 = vadd.f32 %v531_v0, %v2813_v51  ;;  %v2820_v55 = vunpack.c.l.bf16 %v2819_v61  ;;  %v2821_v41 = vunpack.c.h.bf16 %v2817_v27  ;;  %v2829_v51 = vld [vmem:[#allocation60_spill] sm:$0xff] }
  0x87   :  { %2808 = vst [vmem:[#allocation13_spill] sm:$0xff] %v2099_v38  ;;  %v2113_v63 = vadd.f32 %v534_v40, %v2815_v19  ;;  %v2822_v48 = vunpack.c.h.bf16 %v2819_v61  ;;  %v2824_v12 = vunpack.c.l.bf16 %v2823_v54  ;;  %v2826_v31 = vunpack.c.l.bf16 %v2825_v17 }
  0x88   :  { %2814 = vst [vmem:[#allocation15_spill] sm:$0xff] %v2109_v20  ;;  %v536_v50 = vadd.f32 %v2820_v55, %v2818_v8  ;;  %v2827_v62 = vunpack.c.h.bf16 %v2823_v54  ;;  %v2828_v40 = vunpack.c.h.bf16 %v2825_v17  ;;  %v2830_v19 = vunpack.c.l.bf16 %v2829_v51 }
  0x89   :  { %2816 = vst [vmem:[#allocation8_spill] sm:$0xff] %v2113_v63  ;;  %v539_v56 = vadd.f32 %v2822_v48, %v2821_v41  ;;  %v542_v0 = vadd.f32 %v2826_v31, %v2824_v12  ;;  %v2831_v63 = vld [vmem:[#allocation62_spill] sm:$0xff]  ;;  %v2833_v27 = vunpack.c.h.bf16 %v2829_v51  ;;  %v2835_v41 = vld [vmem:[#allocation61_spill] sm:$0xff]  ;;  %v2838_v6 = vunpack.c.l.bf16 %v2837_v57 }
  0x8a   :  { %v545_v37 = vadd.f32 %v2828_v40, %v2827_v62  ;;  %v2832_v38 = vunpack.c.l.bf16 %v2831_v63  ;;  %v2834_v61 = vunpack.c.h.bf16 %v2831_v63  ;;  %v2836_v48 = vunpack.c.l.bf16 %v2835_v41  ;;  %v2841_v62 = vld [vmem:[#allocation56_spill] sm:$0xff]  ;;  %v2844_v51 = vld [vmem:[#allocation57_spill] sm:$0xff] }
  0x8b   :  { %v2839_v54 = vunpack.c.h.bf16 %v2835_v41  ;;  %v2840_v17 = vunpack.c.h.bf16 %v2837_v57  ;;  %v2842_v40 = vunpack.c.l.bf16 %v2841_v62  ;;  %v2845_v7 = vunpack.c.l.bf16 %v2844_v51  ;;  %v2850_v57 = vld [vmem:[#allocation65_spill] sm:$0xff] }
  0x8c   :  { %v548_v8 = vadd.f32 %v2832_v38, %v2830_v19  ;;  %v551_v55 = vadd.f32 %v2834_v61, %v2833_v27  ;;  %v554_v12 = vadd.f32 %v2838_v6, %v2836_v48  ;;  %v2843_v38 = vunpack.c.h.bf16 %v2841_v62  ;;  %v2853_v62 = vld [vmem:[#allocation58_spill] sm:$0xff] }
  0x8d   :  { %v557_v31 = vadd.f32 %v2840_v17, %v2839_v54  ;;  %v537_v9 = vadd.f32 %v536_v50, %v2842_v40  ;;  %v543_v63 = vadd.f32 %v542_v0, %v2845_v7  ;;  %v2846_v27 = vunpack.c.h.bf16 %v2844_v51  ;;  %v2856_v51 = vld [vmem:[#allocation59_spill] sm:$0xff] }
  0x8e   :  { %v540_v19 = vadd.f32 %v539_v56, %v2843_v38  ;;  %v2848_v20 = vunpack.c.l.bf16 %v2847_v23  ;;  %v2849_v41 = vunpack.c.h.bf16 %v2847_v23  ;;  %v2851_v54 = vunpack.c.l.bf16 %v2850_v57  ;;  %v2860_v23 = vld [vmem:[#allocation66_spill] sm:$0xff] }
  0x8f   :  { %v546_v61 = vadd.f32 %v545_v37, %v2846_v27  ;;  %v2852_v50 = vunpack.c.h.bf16 %v2850_v57  ;;  %v2854_v56 = vunpack.c.l.bf16 %v2853_v62  ;;  %v2855_v7 = vunpack.c.h.bf16 %v2853_v62 }
  0x90   :  { %v549_v6 = vadd.f32 %v548_v8, %v2848_v20  ;;  %v552_v48 = vadd.f32 %v551_v55, %v2849_v41  ;;  %v555_v17 = vadd.f32 %v554_v12, %v2851_v54  ;;  %v2857_v37 = vunpack.c.l.bf16 %v2856_v51 }
  0x91   :  { %v558_v40 = vadd.f32 %v557_v31, %v2852_v50  ;;  %v538_v38 = vadd.f32 %v537_v9, %v2854_v56  ;;  %v541_v0 = vadd.f32 %v540_v19, %v2855_v7  ;;  %v2858_v20 = vunpack.c.h.bf16 %v2856_v51  ;;  %v2863_v31 = vld [vmem:[#allocation67_spill] sm:$0xff]  ;;  %v2867_v19 = vld [vmem:[#allocation68_spill] sm:$0xff] }
  0x92   :  { %v544_v27 = vadd.f32 %v543_v63, %v2857_v37  ;;  %v2861_v55 = vunpack.c.l.bf16 %v2860_v23  ;;  %v2862_v12 = vunpack.c.h.bf16 %v2860_v23  ;;  %v2864_v54 = vunpack.c.l.bf16 %v2863_v31  ;;  %v2869_v63 = vld [vmem:[#allocation70_spill] sm:$0xff] }
  0x93   :  { %v2171_v8 = vadd.f32 %v546_v61, %v2858_v20  ;;  %v2865_v9 = vunpack.c.h.bf16 %v2863_v31  ;;  %v2868_v56 = vunpack.c.l.bf16 %v2867_v19  ;;  %v2870_v7 = vunpack.c.l.bf16 %v2869_v63  ;;  %v2873_v20 = vld [vmem:[#allocation69_spill] sm:$0xff] }
  0x94   :  { %v550_v41 = vadd.f32 %v549_v6, %v2861_v55  ;;  %v553_v57 = vadd.f32 %v552_v48, %v2862_v12  ;;  %v556_v50 = vadd.f32 %v555_v17, %v2864_v54  ;;  %v2871_v61 = vunpack.c.h.bf16 %v2867_v19  ;;  %v2875_v48 = vld [vmem:[#allocation71_spill] sm:$0xff] }
  0x95   :  { %2859 = vst [vmem:[#allocation9_spill] sm:$0xff] %v2171_v8  ;;  %v2181_v62 = vadd.f32 %v558_v40, %v2865_v9  ;;  %v560_v51 = vadd.f32 %v2870_v7, %v2868_v56  ;;  %v2872_v37 = vunpack.c.h.bf16 %v2869_v63  ;;  %v2874_v23 = vunpack.c.l.bf16 %v2873_v20 }
  0x96   :  { %v2876_v55 = vunpack.c.l.bf16 %v2875_v48  ;;  %v2877_v17 = vunpack.c.h.bf16 %v2873_v20  ;;  %v2878_v40 = vunpack.c.h.bf16 %v2875_v48  ;;  %v2879_v54 = vunpack.c.l.bf16 %v1572_v16 }
  0x97   :  { %2866 = vst [vmem:[#allocation16_spill] sm:$0xff] %v2181_v62  ;;  %v563_v6 = vadd.f32 %v2872_v37, %v2871_v61  ;;  %v2880_v9 = vunpack.c.l.bf16 %v1586_v15  ;;  %v2881_v19 = vunpack.c.h.bf16 %v1572_v16  ;;  %v2882_v63 = vunpack.c.h.bf16 %v1586_v15  ;;  %v2884_v37 = vld [vmem:[#allocation76_spill] sm:$0xff]  ;;  %v2891_v16 = vld [vmem:[#allocation73_spill] sm:$0xff] }
  0x98   :  { %v566_v12 = vadd.f32 %v2876_v55, %v2874_v23  ;;  %v569_v31 = vadd.f32 %v2878_v40, %v2877_v17  ;;  %v2883_v61 = vunpack.c.l.bf16 %v1577_v32  ;;  %v2885_v62 = vunpack.c.l.bf16 %v2884_v37  ;;  %v2888_v17 = vld [vmem:[#allocation72_spill] sm:$0xff] }
  0x99   :  { %v572_v56 = vadd.f32 %v2880_v9, %v2879_v54  ;;  %v575_v7 = vadd.f32 %v2882_v63, %v2881_v19  ;;  %v2886_v20 = vunpack.c.h.bf16 %v1577_v32  ;;  %v2887_v48 = vunpack.c.h.bf16 %v2884_v37  ;;  %v2897_v37 = vld [vmem:[#allocation78_spill] sm:$0xff] }
  0x9a   :  { %v578_v23 = vadd.f32 %v2885_v62, %v2883_v61  ;;  %v2889_v40 = vunpack.c.l.bf16 %v2888_v17  ;;  %v2890_v54 = vunpack.c.h.bf16 %v2888_v17  ;;  %v2892_v13 = vunpack.c.l.bf16 %v2891_v16  ;;  %v2900_v17 = vld [vmem:[#allocation74_spill] sm:$0xff] }
  0x9b   :  { %v581_v55 = vadd.f32 %v2887_v48, %v2886_v20  ;;  %v2893_v19 = vunpack.c.h.bf16 %v2891_v16  ;;  %v2895_v29 = vunpack.c.l.bf16 %v2894_v26  ;;  %v2896_v32 = vunpack.c.h.bf16 %v2894_v26  ;;  %v2903_v16 = vld [vmem:[#allocation75_spill] sm:$0xff] }
  0x9c   :  { %v561_v8 = vadd.f32 %v560_v51, %v2889_v40  ;;  %v564_v9 = vadd.f32 %v563_v6, %v2890_v54  ;;  %v567_v15 = vadd.f32 %v566_v12, %v2892_v13  ;;  %v2898_v20 = vunpack.c.l.bf16 %v2897_v37  ;;  %v2906_v26 = vld [vmem:[#allocation79_spill] sm:$0xff] }
  0x9d   :  { %v570_v63 = vadd.f32 %v569_v31, %v2893_v19  ;;  %v573_v62 = vadd.f32 %v572_v56, %v2895_v29  ;;  %v576_v61 = vadd.f32 %v575_v7, %v2896_v32  ;;  %v2899_v51 = vunpack.c.h.bf16 %v2897_v37  ;;  %v2909_v37 = vld [vmem:[#allocation80_spill] sm:$0xff] }
  0x9e   :  { %v579_v48 = vadd.f32 %v578_v23, %v2898_v20  ;;  %v2901_v6 = vunpack.c.l.bf16 %v2900_v17  ;;  %v2902_v13 = vunpack.c.h.bf16 %v2900_v17  ;;  %v2904_v31 = vunpack.c.l.bf16 %v2903_v16  ;;  %v2919_v17 = vld [vmem:[#allocation84_spill] sm:$0xff] }
  0x9f   :  { %v582_v40 = vadd.f32 %v581_v55, %v2899_v51  ;;  %v2905_v29 = vunpack.c.h.bf16 %v2903_v16  ;;  %v2907_v7 = vunpack.c.l.bf16 %v2906_v26  ;;  %v2908_v23 = vunpack.c.h.bf16 %v2906_v26  ;;  %v2923_v26 = vld [vmem:[#allocation4_spill] sm:$0xff] }
  0xa0   :  { %v562_v54 = vadd.f32 %v561_v8, %v2901_v6  ;;  %v565_v12 = vadd.f32 %v564_v9, %v2902_v13  ;;  %v568_v19 = vadd.f32 %v567_v15, %v2904_v31  ;;  %v2910_v55 = vunpack.c.l.bf16 %v2909_v37  ;;  %v2922_v31 = vld [vmem:[#allocation3_spill] sm:$0xff] }
  0xa1   :  { %v571_v56 = vadd.f32 %v570_v63, %v2905_v29  ;;  %v574_v32 = vadd.f32 %v573_v62, %v2907_v7  ;;  %v577_v20 = vadd.f32 %v576_v61, %v2908_v23  ;;  %v2911_v8 = vunpack.c.h.bf16 %v2909_v37  ;;  %v2926_v23 = vld [vmem:[#allocation13_spill] sm:$0xff]  ;;  %v2927_v37 = vld [vmem:[#allocation8_spill] sm:$0xff] }
  0xa2   :  { %v580_v51 = vadd.f32 %v579_v48, %v2910_v55  ;;  %v584_v9 = vadd.f32 %v1691_v5, %v1687_v39  ;;  %v585_v15 = vadd.f32 %v1707_v21, %v1703_v25  ;;  %v586_v63 = vadd.f32 %v1771_v49, %v1767_v30 }
  0xa3   :  { %v583_v6 = vadd.f32 %v582_v40, %v2911_v8  ;;  %v587_v62 = vadd.f32 %v1787_v42, %v1783_v52  ;;  %v588_v61 = vadd.f32 %v1851_v46, %v1847_v24  ;;  %v589_v48 = vadd.f32 %v1867_v11, %v1863_v35 }
  0xa4   :  { %v590_v40 = vadd.f32 %v1931_v22, %v1927_v58  ;;  %v591_v39 = vadd.f32 %v1947_v43, %v1943_v53  ;;  %v592_v5 = vadd.f32 %v2011_v44, %v2007_v59  ;;  %v593_v25 = vadd.f32 %v2027_v2, %v2023_v45  ;;  %v2912_v44 = vld [vmem:[#allocation6_spill] sm:$0xff]  ;;  %v2913_v2 = vld [vmem:[#allocation7_spill] sm:$0xff] }
  0xa5   :  { %v594_v21 = vadd.f32 %v2091_v47, %v2087_v18  ;;  %v595_v30 = vadd.f32 %v529_v28, %v2103_v36  ;;  %v596_v49 = vadd.f32 %v541_v0, %v538_v38  ;;  %v597_v52 = vadd.f32 %v553_v57, %v550_v41  ;;  %v2914_v47 = vld [vmem:[#allocation14_spill] sm:$0xff]  ;;  %v2915_v36 = vld [vmem:[#allocation15_spill] sm:$0xff]  ;;  %v2916_v0 = vld [vmem:[#allocation81_spill] sm:$0xff] }
  0xa6   :  { %v598_v42 = vadd.f32 %v565_v12, %v562_v54  ;;  %v599_v24 = vadd.f32 %v577_v20, %v574_v32  ;;  %v600_v46 = vadd.f32 %v584_v9, %v1695_v14  ;;  %v601_v35 = vadd.f32 %v585_v15, %v1711_v33  ;;  %v2917_v41 = vld [vmem:[#allocation82_spill] sm:$0xff]  ;;  %v2918_v57 = vld [vmem:[#allocation83_spill] sm:$0xff]  ;;  %v2920_v54 = vld [vmem:[#allocation85_spill] sm:$0xff] }
  0xa7   :  { %v602_v11 = vadd.f32 %v586_v63, %v1775_v1  ;;  %v603_v58 = vadd.f32 %v587_v62, %v1791_v4  ;;  %v604_v22 = vadd.f32 %v588_v61, %v1855_v34  ;;  %v605_v53 = vadd.f32 %v589_v48, %v1871_v60  ;;  %v2921_v12 = vld [vmem:[#allocation2_spill] sm:$0xff]  ;;  %v2929_v9 = vld [vmem:[#allocation16_spill] sm:$0xff] }
  0xa8   :  { %v606_v43 = vadd.f32 %v590_v40, %v1935_v3  ;;  %v607_v59 = vadd.f32 %v591_v39, %v1951_v10  ;;  %v608_v45 = vadd.f32 %v592_v5, %v2912_v44  ;;  %v609_v18 = vadd.f32 %v593_v25, %v2913_v2 }
  0xa9   :  { %v610_v14 = vadd.f32 %v594_v21, %v2914_v47  ;;  %v611_v33 = vadd.f32 %v595_v30, %v2915_v36  ;;  %v612_v28 = vadd.f32 %v596_v49, %v544_v27  ;;  %v613_v1 = vadd.f32 %v597_v52, %v556_v50  ;;  %v2924_v27 = vld [vmem:[#allocation5_spill] sm:$0xff] }
  0xaa   :  { %v614_v38 = vadd.f32 %v598_v42, %v568_v19  ;;  %v615_v4 = vadd.f32 %v599_v24, %v580_v51  ;;  %v616_v34 = vadd.f32 %v600_v46, %v2916_v0  ;;  %v617_v60 = vadd.f32 %v601_v35, %v2917_v41  ;;  %v2925_v19 = vld [vmem:[#allocation12_spill] sm:$0xff]  ;;  %v2928_v51 = vld [vmem:[#allocation9_spill] sm:$0xff] }
  0xab   :  { %v618_v3 = vadd.f32 %v602_v11, %v2918_v57  ;;  %v619_v10 = vadd.f32 %v603_v58, %v2919_v17  ;;  %v620_v13 = vadd.f32 %v604_v22, %v2920_v54  ;;  %v621_v16 = vadd.f32 %v605_v53, %v2921_v12 }
  0xac   :  { %v622_v29 = vadd.f32 %v606_v43, %v2922_v31  ;;  %v623_v7 = vadd.f32 %v607_v59, %v2923_v26  ;;  %v624_v50 = vadd.f32 %v608_v45, %v2924_v27  ;;  %v625_v32 = vadd.f32 %v609_v18, %v2925_v19 }
  0xad   :  { %v626_v20 = vadd.f32 %v610_v14, %v2926_v23  ;;  %v627_v55 = vadd.f32 %v611_v33, %v2927_v37  ;;  %v628_v8 = vadd.f32 %v612_v28, %v2928_v51  ;;  %v629_v15 = vadd.f32 %v613_v1, %v2929_v9 }
  0xae   :  { %v630_v63 = vadd.f32 %v614_v38, %v571_v56  ;;  %v631_v62 = vadd.f32 %v615_v4, %v583_v6  ;;  %v632_v61 = vmul.f32 0.0625, %v616_v34  ;;  %v633_v48 = vmul.f32 0.0625, %v617_v60 }
  0xaf   :  { %v634_v40 = vmul.f32 0.0625, %v618_v3  ;;  %v635_v39 = vmul.f32 0.0625, %v619_v10  ;;  %v636_v5 = vmul.f32 0.0625, %v620_v13  ;;  %v637_v25 = vmul.f32 0.0625, %v621_v16 }
  0xb0   :  { %v638_v21 = vmul.f32 0.0625, %v622_v29  ;;  %v639_v30 = vmul.f32 0.0625, %v623_v7  ;;  %v640_v49 = vmul.f32 0.0625, %v624_v50  ;;  %v641_v52 = vmul.f32 0.0625, %v625_v32 }
  0xb1   :  { %v642_v42 = vmul.f32 0.0625, %v626_v20  ;;  %v643_v24 = vmul.f32 0.0625, %v627_v55  ;;  %v644_v46 = vmul.f32 0.0625, %v628_v8  ;;  %v645_v35 = vmul.f32 0.0625, %v629_v15 }
  0xb2   :  { %v646_v11 = vmul.f32 0.0625, %v630_v63  ;;  %v647_v58 = vmul.f32 0.0625, %v631_v62  ;;  %v687_v22 = vpack.c.bf16 %v633_v48, %v632_v61  ;;  %v692_v53 = vpack.c.bf16 %v635_v39, %v634_v40 }
  0xb3   :  { %v697_v56 = vpack.c.bf16 %v637_v25, %v636_v5  ;;  %v702_v6 = vpack.c.bf16 %v639_v30, %v638_v21  ;;  %v707_v43 = vpack.c.bf16 %v641_v52, %v640_v49  ;;  %v712_v59 = vpack.c.bf16 %v643_v24, %v642_v42 }
  0xb4   :  { %v717_v44 = vpack.c.bf16 %v645_v35, %v644_v46  ;;  %v722_v45 = vpack.c.bf16 %v647_v58, %v646_v11  ;;  %688 = vst [vmem:[%s2321_s1] sm:$0xff] %v687_v22   ;;  %724 = vst [vmem:[%s2321_s1 + $0x8] sm:$0xff] %v692_v53  }
  0xb5   :  { %725 = vst [vmem:[%s2321_s1 + $0x10] sm:$0xff] %v697_v56   ;;  %726 = vst [vmem:[%s2321_s1 + $0x18] sm:$0xff] %v702_v6  }
  0xb6   :  { %727 = vst [vmem:[%s2321_s1 + $0x20] sm:$0xff] %v707_v43   ;;  %728 = vst [vmem:[%s2321_s1 + $0x28] sm:$0xff] %v712_v59  }
  0xb7   :  { %729 = vst [vmem:[%s2321_s1 + $0x30] sm:$0xff] %v717_v44   ;;  %730 = vst [vmem:[%s2321_s1 + $0x38] sm:$0xff] %v722_v45  }

// kernel: backbone_forward.12
= control target key start
LH: loop header
LB: loop body
LE: loop exit
PB: predicated region body
PF: predicated region fallthrough
CT: control target
= control target key end

     0   :  { %8 = vsyncpa [#allocation3], 0  ;;  %s798_s0 = inlined_call_operand.vmem [shape: bf16[128,128], index: 0, kind: input, shape index: {}]   ;;  %s799_s1 = inlined_call_operand.hbm [shape: bf16[128,256], index: 1, kind: input, shape index: {}]   ;;  %s800_s2 = inlined_call_operand.hbm [shape: f32[1,256], index: 2, kind: input, shape index: {}]   ;;  %s801_s3 = inlined_call_operand.vmem [shape: bf16[128,256], index: 3, kind: output, shape index: {}]  }
   0x1   :  { %9 = vsyncpa [#allocation5], 0  ;;  %s633_s12 = smov [#allocation2]   ;;  %s585_s16 = scalar_lea.hbm %s799_s1, 2048 }
   0x2   :  { %s17_s13 = sshll.u32 %s633_s12, 4  ;;  %p586_p0 = scmp.ne.s32.totalorder %s799_s1, %s585_s16  ;;  %s18_s13 = int_to_ptr.vmem [resolvable:$true] %s17_s13 }
   0x3   :  { %p589_p1 = scmp.lt.u32.totalorder %s585_s16, %s799_s1 }
   0x5   :  { %p591_p2 = pnand %p589_p1, %p586_p0 }
   0x7   :  { %594 = shalt.err (!%p591_p2)
}
   0x8   :  { %s595_s21 = scalar_lea.vmem %s18_s13, 2048  ;;  %p600_p4 = scmp.lt.s32.totalorder %s18_s13, %s18_s13 }
   0x9   :  { %p596_p3 = scmp.ne.s32.totalorder %s18_s13, %s595_s21  ;;  %p601_p5 = scmp.lt.s32.totalorder %s595_s21, %s595_s21 }
   0xb   :  { %p602_p6 = por %p601_p5, %p600_p4 }
   0xd   :  { %p603_p7 = pnand %p602_p6, %p596_p3 }
   0xf   :  { %606 = shalt.err (!%p603_p7)
}
  0x10   :  { %s634_s22 = smov 128   ;;  %s635_s23 = smov 8  }
  0x11   :  { %23 = dma.hbm_to_vmem [thread:$0]  %s799_s1, 2048, %s18_s13, [#allocation3], %s634_s22, %s634_s22, %s635_s23  }
  0x12   :  { %s636_s26 = smov [#allocation4]   ;;  %s607_s30 = scalar_lea.hbm %s800_s2, 32 }
  0x13   :  { %s30_s27 = sshll.u32 %s636_s26, 4  ;;  %p608_p8 = scmp.ne.s32.totalorder %s800_s2, %s607_s30  ;;  %s31_s27 = int_to_ptr.vmem [resolvable:$true] %s30_s27 }
  0x14   :  { %p611_p9 = scmp.lt.u32.totalorder %s607_s30, %s800_s2 }
  0x16   :  { %p613_p10 = pnand %p611_p9, %p608_p8 }
  0x18   :  { %616 = shalt.err (!%p613_p10)
}
  0x19   :  { %s617_s8 = scalar_lea.vmem %s31_s27, 32  ;;  %p622_p12 = scmp.lt.s32.totalorder %s31_s27, %s31_s27 }
  0x1a   :  { %p618_p11 = scmp.ne.s32.totalorder %s31_s27, %s617_s8  ;;  %p623_p13 = scmp.lt.s32.totalorder %s617_s8, %s617_s8 }
  0x1c   :  { %p624_p0 = por %p623_p13, %p622_p12 }
  0x1e   :  { %p625_p1 = pnand %p624_p0, %p618_p11 }
  0x20   :  { %628 = shalt.err (!%p625_p1)
}
  0x21   :  { %33 = dma.hbm_to_vmem [thread:$0]  %s800_s2, 32, %s31_s27, [#allocation5]  }
  0x22   :  { %629 = dma.done.wait [#allocation3], 2048  }
  0x23   :  { %630 = vsyncadd [#allocation3], 4294965248 }
  0x24   :  { %631 = dma.done.wait [#allocation5], 32  }
  0x25   :  { %632 = vsyncadd [#allocation5], 4294967264  ;;  %v637_v0 = vmov 0   ;;  %v553_v1 = vld [vmem:[#allocation2 + $0x4] ss:$8 sps:$4 sm:$0xff]   ;;  %v581_v21 = vld [vmem:[%s798_s0 + $0x10] sm:$0xff]   ;;  %v75_v25 = vlaneseq }
  0x26   :  { %245 = vmatprep.mubr.bf16.mxu0 %v637_v0  ;;  %285 = vmatprep.mubr.bf16.mxu1 %v637_v0  ;;  %v555_v2 = vld [vmem:[#allocation2] ss:$8 sps:$4 sm:$0xff]   ;;  %v556_v3 = vld [vmem:[#allocation2 + $0x14] ss:$8 sps:$4 sm:$0xff]   ;;  %v558_v4 = vld [vmem:[#allocation2 + $0x10] ss:$8 sps:$4 sm:$0xff]  }
  0x27   :  { %213 = vmatprep.subr.bf16.mxu0 %v553_v1  ;;  %532 = vmatprep.subr.bf16.mxu1 %v553_v1  ;;  %v559_v5 = vld [vmem:[#allocation2 + $0x24] ss:$8 sps:$4 sm:$0xff]   ;;  %v561_v6 = vld [vmem:[#allocation2 + $0x20] ss:$8 sps:$4 sm:$0xff]   ;;  %v562_v7 = vld [vmem:[#allocation2 + $0x34] ss:$8 sps:$4 sm:$0xff]  }
  0x28   :  { %214 = vmatpush1.bf16.msra.mxu0 %v555_v2  ;;  %540 = vmatpush1.bf16.msra.mxu1 %v555_v2  ;;  %v564_v8 = vld [vmem:[#allocation2 + $0x30] ss:$8 sps:$4 sm:$0xff]   ;;  %v565_v9 = vld [vmem:[#allocation2 + $0x44] ss:$8 sps:$4 sm:$0xff]   ;;  %v567_v10 = vld [vmem:[#allocation2 + $0x40] ss:$8 sps:$4 sm:$0xff]  }
  0x29   :  { %215 = vmatprep.subr.bf16.mxu0 %v556_v3  ;;  %533 = vmatprep.subr.bf16.mxu1 %v556_v3  ;;  %v568_v11 = vld [vmem:[#allocation2 + $0x54] ss:$8 sps:$4 sm:$0xff]   ;;  %v570_v12 = vld [vmem:[#allocation2 + $0x50] ss:$8 sps:$4 sm:$0xff]   ;;  %v571_v13 = vld [vmem:[#allocation2 + $0x64] ss:$8 sps:$4 sm:$0xff]  }
  0x2a   :  { %v573_v14 = vld [vmem:[#allocation2 + $0x60] ss:$8 sps:$4 sm:$0xff]   ;;  %v574_v15 = vld [vmem:[#allocation2 + $0x74] ss:$8 sps:$4 sm:$0xff]   ;;  %v576_v16 = vld [vmem:[#allocation2 + $0x70] ss:$8 sps:$4 sm:$0xff]  }
  0x2b   :  { %v577_v17 = vld [vmem:[%s798_s0] sm:$0xff]   ;;  %v579_v19 = vld [vmem:[%s798_s0 + $0x8] sm:$0xff]   ;;  %v582_v22 = vld [vmem:[%s798_s0 + $0x30] sm:$0xff]   ;;  %v76_v26 = vshrl.u32 %v75_v25, 7 }
  0x2c   :  { %216 = vmatpush1.bf16.msra.mxu0 %v558_v4  ;;  %541 = vmatpush1.bf16.msra.mxu1 %v558_v4  ;;  %v578_v18 = vld [vmem:[%s798_s0 + $0x20] sm:$0xff]   ;;  %v580_v20 = vld [vmem:[%s798_s0 + $0x28] sm:$0xff]   ;;  %v583_v23 = vld [vmem:[%s798_s0 + $0x18] sm:$0xff]  }
  0x2d   :  { %217 = vmatprep.subr.bf16.mxu0 %v559_v5  ;;  %534 = vmatprep.subr.bf16.mxu1 %v559_v5  ;;  %v584_v24 = vld [vmem:[%s798_s0 + $0x38] sm:$0xff]   ;;  %v77_v27 = vsub.s32 0, %v76_v26  ;;  %v73_v28 = vld [vmem:[#allocation4] sm:$0x3]  ;;  %v81_v29 = vsub.s32 1, %v76_v26 }
  0x2f   :  { %v714_v30 = vrot.slane %v73_v28, %v77_v27  ;;  %v716_v31 = vrot.slane %v73_v28, %v81_v29 }
  0x30   :  { %218 = vmatpush1.bf16.msra.mxu0 %v561_v6  ;;  %542 = vmatpush1.bf16.msra.mxu1 %v561_v6 }
  0x31   :  { %219 = vmatprep.subr.bf16.mxu0 %v562_v7  ;;  %535 = vmatprep.subr.bf16.mxu1 %v562_v7 }
  0x34   :  { %220 = vmatpush1.bf16.msra.mxu0 %v564_v8  ;;  %543 = vmatpush1.bf16.msra.mxu1 %v564_v8 }
  0x35   :  { %221 = vmatprep.subr.bf16.mxu0 %v565_v9  ;;  %536 = vmatprep.subr.bf16.mxu1 %v565_v9 }
  0x38   :  { %222 = vmatpush1.bf16.msra.mxu0 %v567_v10  ;;  %544 = vmatpush1.bf16.msra.mxu1 %v567_v10 }
  0x39   :  { %223 = vmatprep.subr.bf16.mxu0 %v568_v11  ;;  %537 = vmatprep.subr.bf16.mxu1 %v568_v11 }
  0x3c   :  { %224 = vmatpush1.bf16.msra.mxu0 %v570_v12  ;;  %545 = vmatpush1.bf16.msra.mxu1 %v570_v12 }
  0x3d   :  { %225 = vmatprep.subr.bf16.mxu0 %v571_v13  ;;  %538 = vmatprep.subr.bf16.mxu1 %v571_v13 }
  0x40   :  { %226 = vmatpush1.bf16.msra.mxu0 %v573_v14  ;;  %546 = vmatpush1.bf16.msra.mxu1 %v573_v14 }
  0x41   :  { %227 = vmatprep.subr.bf16.mxu0 %v574_v15  ;;  %539 = vmatprep.subr.bf16.mxu1 %v574_v15 }
  0x44   :  { %228 = vmatpush1.bf16.msra.mxu0 %v576_v16  ;;  %547 = vmatpush1.bf16.msra.mxu1 %v576_v16 }
  0x47   :  { %246 = vmatmul.mubr.bf16.vlgmr.msra.gmra.mrb[0].mxu0 %v577_v17  ;;  %286 = vmatmul.mubr.bf16.vlgmr.msra.gmra.mrb[0].mxu1 %v578_v18 }
  0x48   :  { %255 = vmatprep.mubr.bf16.mxu0 %v637_v0  ;;  %295 = vmatprep.mubr.bf16.mxu1 %v637_v0 }
  0x4f   :  { %256 = vmatmul.mubr.bf16.gmra.mrb[4].mxu0 %v579_v19  ;;  %296 = vmatmul.mubr.bf16.gmra.mrb[4].mxu1 %v580_v20 }
  0x50   :  { %265 = vmatprep.mubr.bf16.mxu0 %v637_v0  ;;  %305 = vmatprep.mubr.bf16.mxu1 %v637_v0 }
  0x57   :  { %266 = vmatmul.mubr.bf16.gmra.mrb[8].mxu0 %v581_v21  ;;  %306 = vmatmul.mubr.bf16.gmra.mrb[8].mxu1 %v582_v22 }
  0x58   :  { %275 = vmatprep.mubr.bf16.mxu0 %v637_v0  ;;  %315 = vmatprep.mubr.bf16.mxu1 %v637_v0 }
  0x5f   :  { %276 = vmatmul.mubr.bf16.gmra.mrb[12].mxu0 %v583_v23  ;;  %316 = vmatmul.mubr.bf16.gmra.mrb[12].mxu1 %v584_v24 }
 0x11a   :  { %v247_v32 = vpop.f32.mrb[0].mxu0  ;;  %v287_v33 = vpop.f32.mrb[0].mxu1 }
 0x11b   :  { %v248_v34 = vadd.f32 %v247_v32, %v714_v30  ;;  %v288_v35 = vadd.f32 %v287_v33, %v714_v30  ;;  %v249_v36 = vpop.f32.mrb[1].mxu0  ;;  %v289_v37 = vpop.f32.mrb[1].mxu1 }
 0x11c   :  { %v250_v38 = vadd.f32 %v249_v36, %v716_v31  ;;  %v290_v39 = vadd.f32 %v289_v37, %v716_v31  ;;  %v251_v40 = vpop.f32.mrb[2].mxu0  ;;  %v291_v41 = vpop.f32.mrb[2].mxu1 }
 0x11d   :  { %v326_v42 = vmax.f32 %v248_v34, 0.0  ;;  %v342_v43 = vmax.f32 %v288_v35, 0.0  ;;  %v252_v44 = vadd.f32 %v251_v40, %v714_v30  ;;  %v292_v45 = vadd.f32 %v291_v41, %v714_v30  ;;  %v253_v46 = vpop.f32.mrb[3].mxu0  ;;  %v293_v47 = vpop.f32.mrb[3].mxu1 }
 0x11e   :  { %v327_v48 = vmax.f32 %v250_v38, 0.0  ;;  %v343_v49 = vmax.f32 %v290_v39, 0.0  ;;  %v254_v50 = vadd.f32 %v253_v46, %v716_v31  ;;  %v294_v51 = vadd.f32 %v293_v47, %v716_v31 }
 0x11f   :  { %v328_v52 = vmax.f32 %v252_v44, 0.0  ;;  %v344_v53 = vmax.f32 %v292_v45, 0.0 }
 0x120   :  { %v516_v54 = vpack.c.bf16 %v327_v48, %v326_v42  ;;  %v524_v55 = vpack.c.bf16 %v343_v49, %v342_v43  ;;  %v329_v56 = vmax.f32 %v254_v50, 0.0  ;;  %v345_v57 = vmax.f32 %v294_v51, 0.0 }
 0x122   :  { %454 = vst [vmem:[%s801_s3] sm:$0xff] %v516_v54  ;;  %462 = vst [vmem:[%s801_s3 + $0x40] sm:$0xff] %v524_v55  ;;  %v517_v58 = vpack.c.bf16 %v329_v56, %v328_v52  ;;  %v525_v59 = vpack.c.bf16 %v345_v57, %v344_v53  ;;  %v257_v60 = vpop.f32.mrb[4].mxu0  ;;  %v297_v61 = vpop.f32.mrb[4].mxu1 }
 0x123   :  { %v258_v62 = vadd.f32 %v257_v60, %v714_v30  ;;  %v298_v63 = vadd.f32 %v297_v61, %v714_v30  ;;  %v259_v0 = vpop.f32.mrb[5].mxu0  ;;  %v299_v1 = vpop.f32.mrb[5].mxu1 }
 0x124   :  { %455 = vst [vmem:[%s801_s3 + $0x8] sm:$0xff] %v517_v58  ;;  %463 = vst [vmem:[%s801_s3 + $0x48] sm:$0xff] %v525_v59  ;;  %v260_v2 = vadd.f32 %v259_v0, %v716_v31  ;;  %v300_v3 = vadd.f32 %v299_v1, %v716_v31  ;;  %v261_v4 = vpop.f32.mrb[6].mxu0  ;;  %v301_v5 = vpop.f32.mrb[6].mxu1 }
 0x125   :  { %v330_v6 = vmax.f32 %v258_v62, 0.0  ;;  %v346_v7 = vmax.f32 %v298_v63, 0.0  ;;  %v262_v8 = vadd.f32 %v261_v4, %v714_v30  ;;  %v302_v9 = vadd.f32 %v301_v5, %v714_v30  ;;  %v263_v10 = vpop.f32.mrb[7].mxu0  ;;  %v303_v11 = vpop.f32.mrb[7].mxu1 }
 0x126   :  { %v331_v12 = vmax.f32 %v260_v2, 0.0  ;;  %v347_v13 = vmax.f32 %v300_v3, 0.0  ;;  %v264_v14 = vadd.f32 %v263_v10, %v716_v31  ;;  %v304_v15 = vadd.f32 %v303_v11, %v716_v31 }
 0x127   :  { %v332_v16 = vmax.f32 %v262_v8, 0.0  ;;  %v348_v17 = vmax.f32 %v302_v9, 0.0 }
 0x128   :  { %v518_v18 = vpack.c.bf16 %v331_v12, %v330_v6  ;;  %v526_v19 = vpack.c.bf16 %v347_v13, %v346_v7  ;;  %v333_v20 = vmax.f32 %v264_v14, 0.0  ;;  %v349_v21 = vmax.f32 %v304_v15, 0.0 }
 0x12a   :  { %456 = vst [vmem:[%s801_s3 + $0x10] sm:$0xff] %v518_v18  ;;  %464 = vst [vmem:[%s801_s3 + $0x50] sm:$0xff] %v526_v19  ;;  %v519_v22 = vpack.c.bf16 %v333_v20, %v332_v16  ;;  %v527_v23 = vpack.c.bf16 %v349_v21, %v348_v17  ;;  %v267_v24 = vpop.f32.mrb[8].mxu0  ;;  %v307_v25 = vpop.f32.mrb[8].mxu1 }
 0x12b   :  { %v268_v26 = vadd.f32 %v267_v24, %v714_v30  ;;  %v308_v27 = vadd.f32 %v307_v25, %v714_v30  ;;  %v269_v28 = vpop.f32.mrb[9].mxu0  ;;  %v309_v29 = vpop.f32.mrb[9].mxu1 }
 0x12c   :  { %457 = vst [vmem:[%s801_s3 + $0x18] sm:$0xff] %v519_v22  ;;  %465 = vst [vmem:[%s801_s3 + $0x58] sm:$0xff] %v527_v23  ;;  %v270_v32 = vadd.f32 %v269_v28, %v716_v31  ;;  %v310_v33 = vadd.f32 %v309_v29, %v716_v31  ;;  %v271_v34 = vpop.f32.mrb[10].mxu0  ;;  %v311_v35 = vpop.f32.mrb[10].mxu1 }
 0x12d   :  { %v334_v36 = vmax.f32 %v268_v26, 0.0  ;;  %v350_v37 = vmax.f32 %v308_v27, 0.0  ;;  %v272_v38 = vadd.f32 %v271_v34, %v714_v30  ;;  %v312_v39 = vadd.f32 %v311_v35, %v714_v30  ;;  %v273_v40 = vpop.f32.mrb[11].mxu0  ;;  %v313_v41 = vpop.f32.mrb[11].mxu1 }
 0x12e   :  { %v335_v42 = vmax.f32 %v270_v32, 0.0  ;;  %v351_v43 = vmax.f32 %v310_v33, 0.0  ;;  %v274_v44 = vadd.f32 %v273_v40, %v716_v31  ;;  %v314_v45 = vadd.f32 %v313_v41, %v716_v31 }
 0x12f   :  { %v336_v46 = vmax.f32 %v272_v38, 0.0  ;;  %v352_v47 = vmax.f32 %v312_v39, 0.0 }
 0x130   :  { %v520_v48 = vpack.c.bf16 %v335_v42, %v334_v36  ;;  %v528_v49 = vpack.c.bf16 %v351_v43, %v350_v37  ;;  %v337_v50 = vmax.f32 %v274_v44, 0.0  ;;  %v353_v51 = vmax.f32 %v314_v45, 0.0 }
 0x132   :  { %458 = vst [vmem:[%s801_s3 + $0x20] sm:$0xff] %v520_v48  ;;  %466 = vst [vmem:[%s801_s3 + $0x60] sm:$0xff] %v528_v49  ;;  %v521_v52 = vpack.c.bf16 %v337_v50, %v336_v46  ;;  %v529_v53 = vpack.c.bf16 %v353_v51, %v352_v47  ;;  %v277_v54 = vpop.f32.mrb[12].mxu0  ;;  %v317_v55 = vpop.f32.mrb[12].mxu1 }
 0x133   :  { %v278_v56 = vadd.f32 %v277_v54, %v714_v30  ;;  %v318_v57 = vadd.f32 %v317_v55, %v714_v30  ;;  %v279_v58 = vpop.f32.mrb[13].mxu0  ;;  %v319_v59 = vpop.f32.mrb[13].mxu1 }
 0x134   :  { %459 = vst [vmem:[%s801_s3 + $0x28] sm:$0xff] %v521_v52  ;;  %467 = vst [vmem:[%s801_s3 + $0x68] sm:$0xff] %v529_v53  ;;  %v280_v60 = vadd.f32 %v279_v58, %v716_v31  ;;  %v320_v61 = vadd.f32 %v319_v59, %v716_v31  ;;  %v281_v62 = vpop.f32.mrb[14].mxu0  ;;  %v321_v63 = vpop.f32.mrb[14].mxu1 }
 0x135   :  { %v338_v0 = vmax.f32 %v278_v56, 0.0  ;;  %v354_v1 = vmax.f32 %v318_v57, 0.0  ;;  %v282_v2 = vadd.f32 %v281_v62, %v714_v30  ;;  %v322_v3 = vadd.f32 %v321_v63, %v714_v30  ;;  %v283_v4 = vpop.f32.mrb[15].mxu0  ;;  %v323_v5 = vpop.f32.mrb[15].mxu1 }
 0x136   :  { %v339_v6 = vmax.f32 %v280_v60, 0.0  ;;  %v355_v7 = vmax.f32 %v320_v61, 0.0  ;;  %v284_v8 = vadd.f32 %v283_v4, %v716_v31  ;;  %v324_v9 = vadd.f32 %v323_v5, %v716_v31 }
 0x137   :  { %v340_v10 = vmax.f32 %v282_v2, 0.0  ;;  %v356_v11 = vmax.f32 %v322_v3, 0.0 }
 0x138   :  { %v522_v12 = vpack.c.bf16 %v339_v6, %v338_v0  ;;  %v530_v13 = vpack.c.bf16 %v355_v7, %v354_v1  ;;  %v341_v14 = vmax.f32 %v284_v8, 0.0  ;;  %v357_v15 = vmax.f32 %v324_v9, 0.0 }
 0x13a   :  { %460 = vst [vmem:[%s801_s3 + $0x30] sm:$0xff] %v522_v12  ;;  %468 = vst [vmem:[%s801_s3 + $0x70] sm:$0xff] %v530_v13  ;;  %v523_v30 = vpack.c.bf16 %v341_v14, %v340_v10  ;;  %v531_v16 = vpack.c.bf16 %v357_v15, %v356_v11 }
 0x13c   :  { %461 = vst [vmem:[%s801_s3 + $0x38] sm:$0xff] %v523_v30  ;;  %469 = vst [vmem:[%s801_s3 + $0x78] sm:$0xff] %v531_v16 }
 0x13d   :  { %474 = vsyncpa [#allocation3], 1 }
 0x13e   :  { %475 = vsyncpa [#allocation5], 1 }

// kernel: backbone_forward.13
= control target key start
LH: loop header
LB: loop body
LE: loop exit
PB: predicated region body
PF: predicated region fallthrough
CT: control target
= control target key end

     0   :  { %vm152_vm0 = vcmask 1043456   ;;  %s559_s0 = inlined_call_operand.vmem [shape: bf16[8,2,4,512], index: 0, kind: input, shape index: {}]   ;;  %s560_s1 = inlined_call_operand.vmem [shape: bf16[8,4,256], index: 1, kind: output, shape index: {}]  }
   0x1   :  { %v8_v0 = vld [vmem:[%s559_s0] sm:$0xff]  ;;  %v9_v1 = vld [vmem:[%s559_s0 + $0x8] sm:$0xff]  ;;  %v10_v2 = vld [vmem:[%s559_s0 + $0x10] sm:$0xff] }
   0x2   :  { %v24_v3 = vunpack.c.l.bf16 %v8_v0  ;;  %v25_v4 = vunpack.c.h.bf16 %v8_v0  ;;  %v26_v5 = vunpack.c.l.bf16 %v9_v1  ;;  %v27_v6 = vunpack.c.h.bf16 %v9_v1  ;;  %v11_v7 = vld [vmem:[%s559_s0 + $0x18] sm:$0xff]  ;;  %v12_v36 = vld [vmem:[%s559_s0 + $0x20] sm:$0xff]  ;;  %v13_v41 = vld [vmem:[%s559_s0 + $0x28] sm:$0xff] }
   0x3   :  { %v28_v8 = vunpack.c.l.bf16 %v10_v2  ;;  %v29_v9 = vunpack.c.h.bf16 %v10_v2  ;;  %v30_v10 = vunpack.c.l.bf16 %v11_v7  ;;  %v31_v11 = vunpack.c.h.bf16 %v11_v7  ;;  %v14_v2 = vld [vmem:[%s559_s0 + $0x30] sm:$0xff]  ;;  %v15_v7 = vld [vmem:[%s559_s0 + $0x38] sm:$0xff] }
   0x4   :  { %v88_v12 = vcombine.high %v24_v3, %v24_v3  ;;  %v89_v13 = vcombine.high %v25_v4, %v25_v4  ;;  %v90_v14 = vcombine.high %v26_v5, %v26_v5  ;;  %v91_v15 = vcombine.high %v27_v6, %v27_v6 }
   0x5   :  { %v153_v16 = vsel %vm152_vm0, %v24_v3, 0.0  ;;  %v154_v17 = vsel %vm152_vm0, %v26_v5, 0.0  ;;  %v159_v18 = vsel %vm152_vm0, %v25_v4, 0.0  ;;  %v160_v19 = vsel %vm152_vm0, %v27_v6, 0.0 }
   0x6   :  { %v155_v20 = vadd.f32 %v154_v17, %v153_v16  ;;  %v156_v21 = vsel %vm152_vm0, %v88_v12, 0.0  ;;  %v157_v22 = vsel %vm152_vm0, %v90_v14, 0.0  ;;  %v161_v23 = vadd.f32 %v160_v19, %v159_v18 }
   0x7   :  { %v158_v24 = vadd.f32 %v157_v22, %v156_v21  ;;  %v162_v25 = vsel %vm152_vm0, %v89_v13, 0.0  ;;  %v163_v26 = vsel %vm152_vm0, %v91_v15, 0.0  ;;  %v92_v27 = vcombine.high %v28_v8, %v28_v8 }
   0x8   :  { %v164_v28 = vadd.f32 %v163_v26, %v162_v25  ;;  %v249_v29 = vadd.f32 %v161_v23, %v155_v20  ;;  %v93_v30 = vcombine.high %v29_v9, %v29_v9  ;;  %v94_v31 = vcombine.high %v30_v10, %v30_v10 }
   0x9   :  { %v95_v32 = vcombine.high %v31_v11, %v31_v11  ;;  %v165_v33 = vsel %vm152_vm0, %v28_v8, 0.0  ;;  %v166_v34 = vsel %vm152_vm0, %v30_v10, 0.0  ;;  %v168_v35 = vsel %vm152_vm0, %v92_v27, 0.0  ;;  %v16_v8 = vld [vmem:[%s559_s0 + $0x40] sm:$0xff] }
   0xa   :  { %v250_v37 = vadd.f32 %v164_v28, %v158_v24  ;;  %v265_v38 = vmul.f32 0.25, %v249_v29  ;;  %v167_v39 = vadd.f32 %v166_v34, %v165_v33  ;;  %v169_v40 = vsel %vm152_vm0, %v94_v31, 0.0  ;;  %v17_v33 = vld [vmem:[%s559_s0 + $0x48] sm:$0xff] }
   0xb   :  { %v170_v42 = vadd.f32 %v169_v40, %v168_v35  ;;  %v171_v43 = vsel %vm152_vm0, %v29_v9, 0.0  ;;  %v172_v44 = vsel %vm152_vm0, %v31_v11, 0.0  ;;  %v174_v45 = vsel %vm152_vm0, %v93_v30, 0.0 }
   0xc   :  { %v266_v46 = vmul.f32 0.25, %v250_v37  ;;  %v173_v47 = vadd.f32 %v172_v44, %v171_v43  ;;  %v175_v48 = vsel %vm152_vm0, %v95_v32, 0.0  ;;  %v32_v49 = vunpack.c.l.bf16 %v12_v36 }
   0xd   :  { %v176_v50 = vadd.f32 %v175_v48, %v174_v45  ;;  %v33_v51 = vunpack.c.h.bf16 %v12_v36  ;;  %v34_v52 = vunpack.c.l.bf16 %v13_v41  ;;  %v35_v53 = vunpack.c.h.bf16 %v13_v41 }
   0xe   :  { %v397_v54 = vpack.c.bf16 %v266_v46, %v265_v38  ;;  %v251_v55 = vadd.f32 %v173_v47, %v167_v39  ;;  %v96_v56 = vcombine.high %v32_v49, %v32_v49  ;;  %v177_v57 = vsel %vm152_vm0, %v32_v49, 0.0  ;;  %v18_v38 = vld [vmem:[%s559_s0 + $0x50] sm:$0xff] }
   0xf   :  { %v252_v58 = vadd.f32 %v176_v50, %v170_v42  ;;  %v97_v59 = vcombine.high %v33_v51, %v33_v51  ;;  %v98_v60 = vcombine.high %v34_v52, %v34_v52  ;;  %v99_v61 = vcombine.high %v35_v53, %v35_v53 }
  0x10   :  { %405 = vst.sshfl [vmem:[%s560_s1] sm:$0x33 pattern:$0x76325410] %v397_v54  ;;  %v267_v62 = vmul.f32 0.25, %v251_v55  ;;  %v178_v63 = vsel %vm152_vm0, %v34_v52, 0.0  ;;  %v180_v0 = vsel %vm152_vm0, %v96_v56, 0.0  ;;  %v36_v15 = vunpack.c.l.bf16 %v14_v2 }
  0x11   :  { %v183_v1 = vsel %vm152_vm0, %v33_v51, 0.0  ;;  %v268_v3 = vmul.f32 0.25, %v252_v58  ;;  %v179_v4 = vadd.f32 %v178_v63, %v177_v57  ;;  %v181_v5 = vsel %vm152_vm0, %v98_v60, 0.0 }
  0x12   :  { %v184_v6 = vsel %vm152_vm0, %v35_v53, 0.0  ;;  %v182_v9 = vadd.f32 %v181_v5, %v180_v0  ;;  %v186_v11 = vsel %vm152_vm0, %v97_v59, 0.0  ;;  %v187_v12 = vsel %vm152_vm0, %v99_v61, 0.0  ;;  %v19_v59 = vld [vmem:[%s559_s0 + $0x58] sm:$0xff]  ;;  %v20_v0 = vld [vmem:[%s559_s0 + $0x60] sm:$0xff] }
  0x13   :  { %v185_v10 = vadd.f32 %v184_v6, %v183_v1  ;;  %v398_v13 = vpack.c.bf16 %v268_v3, %v267_v62  ;;  %v188_v14 = vadd.f32 %v187_v12, %v186_v11  ;;  %v37_v16 = vunpack.c.h.bf16 %v14_v2 }
  0x14   :  { %v38_v18 = vunpack.c.l.bf16 %v15_v7  ;;  %v39_v19 = vunpack.c.h.bf16 %v15_v7  ;;  %v40_v20 = vunpack.c.l.bf16 %v16_v8  ;;  %v100_v22 = vcombine.high %v36_v15, %v36_v15 }
  0x15   :  { %v253_v17 = vadd.f32 %v185_v10, %v179_v4  ;;  %406 = vst.sshfl [vmem:[%s560_s1 + $0x4] sm:$0x33 pattern:$0x76325410] %v398_v13  ;;  %v254_v21 = vadd.f32 %v188_v14, %v182_v9  ;;  %v101_v23 = vcombine.high %v37_v16, %v37_v16  ;;  %v189_v24 = vsel %vm152_vm0, %v36_v15, 0.0 }
  0x16   :  { %v102_v26 = vcombine.high %v38_v18, %v38_v18  ;;  %v103_v27 = vcombine.high %v39_v19, %v39_v19  ;;  %v190_v28 = vsel %vm152_vm0, %v38_v18, 0.0  ;;  %v192_v31 = vsel %vm152_vm0, %v100_v22, 0.0 }
  0x17   :  { %v269_v25 = vmul.f32 0.25, %v253_v17  ;;  %v270_v29 = vmul.f32 0.25, %v254_v21  ;;  %v191_v30 = vadd.f32 %v190_v28, %v189_v24  ;;  %v195_v32 = vsel %vm152_vm0, %v37_v16, 0.0  ;;  %v21_v21 = vld [vmem:[%s559_s0 + $0x68] sm:$0xff] }
  0x18   :  { %v193_v34 = vsel %vm152_vm0, %v102_v26, 0.0  ;;  %v196_v35 = vsel %vm152_vm0, %v39_v19, 0.0  ;;  %v198_v36 = vsel %vm152_vm0, %v101_v23, 0.0  ;;  %v199_v37 = vsel %vm152_vm0, %v103_v27, 0.0 }
  0x19   :  { %v399_v39 = vpack.c.bf16 %v270_v29, %v269_v25  ;;  %v194_v40 = vadd.f32 %v193_v34, %v192_v31  ;;  %v197_v41 = vadd.f32 %v196_v35, %v195_v32  ;;  %v200_v42 = vadd.f32 %v199_v37, %v198_v36 }
  0x1a   :  { %v41_v43 = vunpack.c.h.bf16 %v16_v8  ;;  %v42_v44 = vunpack.c.l.bf16 %v17_v33  ;;  %v43_v45 = vunpack.c.h.bf16 %v17_v33  ;;  %v104_v46 = vcombine.high %v40_v20, %v40_v20 }
  0x1b   :  { %407 = vst.sshfl [vmem:[%s560_s1 + $0x8] sm:$0x33 pattern:$0x76325410] %v399_v39  ;;  %v255_v47 = vadd.f32 %v197_v41, %v191_v30  ;;  %v256_v48 = vadd.f32 %v200_v42, %v194_v40  ;;  %v201_v49 = vsel %vm152_vm0, %v40_v20, 0.0  ;;  %v44_v50 = vunpack.c.l.bf16 %v18_v38 }
  0x1c   :  { %v105_v51 = vcombine.high %v41_v43, %v41_v43  ;;  %v106_v52 = vcombine.high %v42_v44, %v42_v44  ;;  %v107_v53 = vcombine.high %v43_v45, %v43_v45  ;;  %v202_v54 = vsel %vm152_vm0, %v42_v44, 0.0 }
  0x1d   :  { %v271_v55 = vmul.f32 0.25, %v255_v47  ;;  %v272_v56 = vmul.f32 0.25, %v256_v48  ;;  %v203_v57 = vadd.f32 %v202_v54, %v201_v49  ;;  %v204_v58 = vsel %vm152_vm0, %v104_v46, 0.0  ;;  %v22_v46 = vld [vmem:[%s559_s0 + $0x70] sm:$0xff] }
  0x1e   :  { %v205_v60 = vsel %vm152_vm0, %v106_v52, 0.0  ;;  %v207_v61 = vsel %vm152_vm0, %v41_v43, 0.0  ;;  %v208_v62 = vsel %vm152_vm0, %v43_v45, 0.0  ;;  %v210_v63 = vsel %vm152_vm0, %v105_v51, 0.0  ;;  %v23_v51 = vld [vmem:[%s559_s0 + $0x78] sm:$0xff] }
  0x1f   :  { %v400_v1 = vpack.c.bf16 %v272_v56, %v271_v55  ;;  %v206_v2 = vadd.f32 %v205_v60, %v204_v58  ;;  %v209_v3 = vadd.f32 %v208_v62, %v207_v61  ;;  %v211_v4 = vsel %vm152_vm0, %v107_v53, 0.0 }
  0x20   :  { %v212_v5 = vadd.f32 %v211_v4, %v210_v63  ;;  %v45_v6 = vunpack.c.h.bf16 %v18_v38  ;;  %v46_v7 = vunpack.c.l.bf16 %v19_v59  ;;  %v47_v8 = vunpack.c.h.bf16 %v19_v59 }
  0x21   :  { %408 = vst.sshfl [vmem:[%s560_s1 + $0xc] sm:$0x33 pattern:$0x76325410] %v400_v1  ;;  %v257_v9 = vadd.f32 %v209_v3, %v203_v57  ;;  %v108_v10 = vcombine.high %v44_v50, %v44_v50  ;;  %v213_v11 = vsel %vm152_vm0, %v44_v50, 0.0  ;;  %v48_v12 = vunpack.c.l.bf16 %v20_v0 }
  0x22   :  { %v258_v13 = vadd.f32 %v212_v5, %v206_v2  ;;  %v109_v14 = vcombine.high %v45_v6, %v45_v6  ;;  %v110_v15 = vcombine.high %v46_v7, %v46_v7  ;;  %v111_v16 = vcombine.high %v47_v8, %v47_v8 }
  0x23   :  { %v273_v17 = vmul.f32 0.25, %v257_v9  ;;  %v214_v18 = vsel %vm152_vm0, %v46_v7, 0.0  ;;  %v216_v19 = vsel %vm152_vm0, %v108_v10, 0.0  ;;  %v219_v20 = vsel %vm152_vm0, %v45_v6, 0.0 }
  0x24   :  { %v274_v22 = vmul.f32 0.25, %v258_v13  ;;  %v215_v23 = vadd.f32 %v214_v18, %v213_v11  ;;  %v217_v24 = vsel %vm152_vm0, %v110_v15, 0.0  ;;  %v220_v25 = vsel %vm152_vm0, %v47_v8, 0.0 }
  0x25   :  { %v218_v26 = vadd.f32 %v217_v24, %v216_v19  ;;  %v221_v27 = vadd.f32 %v220_v25, %v219_v20  ;;  %v222_v28 = vsel %vm152_vm0, %v109_v14, 0.0  ;;  %v223_v29 = vsel %vm152_vm0, %v111_v16, 0.0 }
  0x26   :  { %v401_v30 = vpack.c.bf16 %v274_v22, %v273_v17  ;;  %v224_v31 = vadd.f32 %v223_v29, %v222_v28  ;;  %v49_v32 = vunpack.c.h.bf16 %v20_v0  ;;  %v50_v33 = vunpack.c.l.bf16 %v21_v21 }
  0x27   :  { %v259_v34 = vadd.f32 %v221_v27, %v215_v23  ;;  %v51_v35 = vunpack.c.h.bf16 %v21_v21  ;;  %v112_v36 = vcombine.high %v48_v12, %v48_v12  ;;  %v225_v37 = vsel %vm152_vm0, %v48_v12, 0.0 }
  0x28   :  { %409 = vst.sshfl [vmem:[%s560_s1 + $0x10] sm:$0x33 pattern:$0x76325410] %v401_v30  ;;  %v260_v38 = vadd.f32 %v224_v31, %v218_v26  ;;  %v113_v39 = vcombine.high %v49_v32, %v49_v32  ;;  %v114_v40 = vcombine.high %v50_v33, %v50_v33  ;;  %v226_v41 = vsel %vm152_vm0, %v50_v33, 0.0 }
  0x29   :  { %v275_v42 = vmul.f32 0.25, %v259_v34  ;;  %v115_v43 = vcombine.high %v51_v35, %v51_v35  ;;  %v227_v44 = vadd.f32 %v226_v41, %v225_v37  ;;  %v228_v45 = vsel %vm152_vm0, %v112_v36, 0.0 }
  0x2a   :  { %v276_v47 = vmul.f32 0.25, %v260_v38  ;;  %v229_v48 = vsel %vm152_vm0, %v114_v40, 0.0  ;;  %v231_v49 = vsel %vm152_vm0, %v49_v32, 0.0  ;;  %v232_v50 = vsel %vm152_vm0, %v51_v35, 0.0 }
  0x2b   :  { %v230_v52 = vadd.f32 %v229_v48, %v228_v45  ;;  %v233_v53 = vadd.f32 %v232_v50, %v231_v49  ;;  %v234_v54 = vsel %vm152_vm0, %v113_v39, 0.0  ;;  %v235_v55 = vsel %vm152_vm0, %v115_v43, 0.0 }
  0x2c   :  { %v402_v56 = vpack.c.bf16 %v276_v47, %v275_v42  ;;  %v236_v57 = vadd.f32 %v235_v55, %v234_v54  ;;  %v52_v58 = vunpack.c.l.bf16 %v22_v46  ;;  %v53_v59 = vunpack.c.h.bf16 %v22_v46 }
  0x2d   :  { %v261_v60 = vadd.f32 %v233_v53, %v227_v44  ;;  %v54_v61 = vunpack.c.l.bf16 %v23_v51  ;;  %v55_v62 = vunpack.c.h.bf16 %v23_v51 }
  0x2e   :  { %410 = vst.sshfl [vmem:[%s560_s1 + $0x14] sm:$0x33 pattern:$0x76325410] %v402_v56  ;;  %v262_v63 = vadd.f32 %v236_v57, %v230_v52  ;;  %v116_v0 = vcombine.high %v52_v58, %v52_v58  ;;  %v117_v1 = vcombine.high %v53_v59, %v53_v59  ;;  %v237_v2 = vsel %vm152_vm0, %v52_v58, 0.0 }
  0x2f   :  { %v277_v3 = vmul.f32 0.25, %v261_v60  ;;  %v118_v4 = vcombine.high %v54_v61, %v54_v61  ;;  %v119_v5 = vcombine.high %v55_v62, %v55_v62  ;;  %v238_v6 = vsel %vm152_vm0, %v54_v61, 0.0 }
  0x30   :  { %v278_v7 = vmul.f32 0.25, %v262_v63  ;;  %v239_v8 = vadd.f32 %v238_v6, %v237_v2  ;;  %v240_v9 = vsel %vm152_vm0, %v116_v0, 0.0  ;;  %v243_v10 = vsel %vm152_vm0, %v53_v59, 0.0 }
  0x31   :  { %v241_v11 = vsel %vm152_vm0, %v118_v4, 0.0  ;;  %v244_v12 = vsel %vm152_vm0, %v55_v62, 0.0  ;;  %v246_v13 = vsel %vm152_vm0, %v117_v1, 0.0  ;;  %v247_v14 = vsel %vm152_vm0, %v119_v5, 0.0 }
  0x32   :  { %v403_v15 = vpack.c.bf16 %v278_v7, %v277_v3  ;;  %v242_v16 = vadd.f32 %v241_v11, %v240_v9  ;;  %v245_v17 = vadd.f32 %v244_v12, %v243_v10  ;;  %v248_v18 = vadd.f32 %v247_v14, %v246_v13 }
  0x34   :  { %411 = vst.sshfl [vmem:[%s560_s1 + $0x18] sm:$0x33 pattern:$0x76325410] %v403_v15  ;;  %v263_v19 = vadd.f32 %v245_v17, %v239_v8  ;;  %v264_v20 = vadd.f32 %v248_v18, %v242_v16 }
  0x36   :  { %v279_v21 = vmul.f32 0.25, %v263_v19  ;;  %v280_v22 = vmul.f32 0.25, %v264_v20 }
  0x38   :  { %v404_v23 = vpack.c.bf16 %v280_v22, %v279_v21 }
  0x3a   :  { %412 = vst.sshfl [vmem:[%s560_s1 + $0x1c] sm:$0x33 pattern:$0x76325410] %v404_v23 }

// kernel: backbone_forward.14
= control target key start
LH: loop header
LB: loop body
LE: loop exit
PB: predicated region body
PF: predicated region fallthrough
CT: control target
= control target key end

     0   :  { %8 = vsyncpa [#allocation3], 0  ;;  %s976_s0 = inlined_call_operand.vmem [shape: bf16[32,256], index: 0, kind: input, shape index: {}]   ;;  %s977_s1 = inlined_call_operand.hbm [shape: bf16[256,512], index: 1, kind: input, shape index: {}]   ;;  %s978_s2 = inlined_call_operand.hbm [shape: f32[1,512], index: 2, kind: input, shape index: {}]   ;;  %s979_s3 = inlined_call_operand.vmem [shape: bf16[32,512], index: 3, kind: output, shape index: {}]  }
   0x1   :  { %9 = vsyncpa [#allocation5], 0  ;;  %s892_s12 = smov [#allocation2]   ;;  %s844_s16 = scalar_lea.hbm %s977_s1, 8192 }
   0x2   :  { %s17_s13 = sshll.u32 %s892_s12, 4  ;;  %p845_p0 = scmp.ne.s32.totalorder %s977_s1, %s844_s16  ;;  %s18_s13 = int_to_ptr.vmem [resolvable:$true] %s17_s13 }
   0x3   :  { %p848_p1 = scmp.lt.u32.totalorder %s844_s16, %s977_s1 }
   0x5   :  { %p850_p2 = pnand %p848_p1, %p845_p0 }
   0x7   :  { %853 = shalt.err (!%p850_p2)
}
   0x8   :  { %s854_s21 = scalar_lea.vmem %s18_s13, 8192  ;;  %p859_p4 = scmp.lt.s32.totalorder %s18_s13, %s18_s13 }
   0x9   :  { %p855_p3 = scmp.ne.s32.totalorder %s18_s13, %s854_s21  ;;  %p860_p5 = scmp.lt.s32.totalorder %s854_s21, %s854_s21 }
   0xb   :  { %p861_p6 = por %p860_p5, %p859_p4 }
   0xd   :  { %p862_p7 = pnand %p861_p6, %p855_p3 }
   0xf   :  { %865 = shalt.err (!%p862_p7)
}
  0x10   :  { %s893_s22 = smov 256   ;;  %s894_s23 = smov 16  }
  0x11   :  { %23 = dma.hbm_to_vmem [thread:$0]  %s977_s1, 8192, %s18_s13, [#allocation3], %s893_s22, %s893_s22, %s894_s23  }
  0x12   :  { %s895_s26 = smov [#allocation4]   ;;  %s866_s30 = scalar_lea.hbm %s978_s2, 64 }
  0x13   :  { %s30_s27 = sshll.u32 %s895_s26, 4  ;;  %p867_p8 = scmp.ne.s32.totalorder %s978_s2, %s866_s30  ;;  %s31_s27 = int_to_ptr.vmem [resolvable:$true] %s30_s27 }
  0x14   :  { %p870_p9 = scmp.lt.u32.totalorder %s866_s30, %s978_s2 }
  0x16   :  { %p872_p10 = pnand %p870_p9, %p867_p8 }
  0x18   :  { %875 = shalt.err (!%p872_p10)
}
  0x19   :  { %s876_s8 = scalar_lea.vmem %s31_s27, 64  ;;  %p881_p12 = scmp.lt.s32.totalorder %s31_s27, %s31_s27 }
  0x1a   :  { %p877_p11 = scmp.ne.s32.totalorder %s31_s27, %s876_s8  ;;  %p882_p13 = scmp.lt.s32.totalorder %s876_s8, %s876_s8 }
  0x1c   :  { %p883_p0 = por %p882_p13, %p881_p12 }
  0x1e   :  { %p884_p1 = pnand %p883_p0, %p877_p11 }
  0x20   :  { %887 = shalt.err (!%p884_p1)
}
  0x21   :  { %33 = dma.hbm_to_vmem [thread:$0]  %s978_s2, 64, %s31_s27, [#allocation5]  }
  0x22   :  { %888 = dma.done.wait [#allocation3], 8192  }
  0x23   :  { %889 = vsyncadd [#allocation3], 4294959104 }
  0x24   :  { %890 = dma.done.wait [#allocation5], 64  }
  0x25   :  { %891 = vsyncadd [#allocation5], 4294967232  ;;  %v742_v0 = vld [vmem:[#allocation2 + $0x4] ss:$16 sps:$4 sm:$0xff]   ;;  %v744_v1 = vld [vmem:[#allocation2 + $0xc] ss:$16 sps:$4 sm:$0xff]  }
  0x26   :  { %470 = vmatprep.subr.bf16.mxu0 %v742_v0  ;;  %v746_v2 = vld [vmem:[#allocation2] ss:$16 sps:$4 sm:$0xff]   ;;  %v747_v3 = vld [vmem:[#allocation2 + $0x8] ss:$16 sps:$4 sm:$0xff]   ;;  %523 = vmatprep.subr.bf16.mxu1 %v744_v1  ;;  %v748_v4 = vld [vmem:[#allocation2 + $0x24] ss:$16 sps:$4 sm:$0xff]  }
  0x27   :  { %471 = vmatpush1.bf16.msra.mxu0 %v746_v2  ;;  %524 = vmatpush1.bf16.msra.mxu1 %v747_v3  ;;  %v750_v5 = vld [vmem:[#allocation2 + $0x2c] ss:$16 sps:$4 sm:$0xff]   ;;  %v752_v6 = vld [vmem:[#allocation2 + $0x20] ss:$16 sps:$4 sm:$0xff]   ;;  %v753_v7 = vld [vmem:[#allocation2 + $0x28] ss:$16 sps:$4 sm:$0xff]  }
  0x28   :  { %472 = vmatprep.subr.bf16.mxu0 %v748_v4  ;;  %525 = vmatprep.subr.bf16.mxu1 %v750_v5  ;;  %v754_v8 = vld [vmem:[#allocation2 + $0x44] ss:$16 sps:$4 sm:$0xff]   ;;  %v756_v9 = vld [vmem:[#allocation2 + $0x4c] ss:$16 sps:$4 sm:$0xff]   ;;  %v758_v10 = vld [vmem:[#allocation2 + $0x40] ss:$16 sps:$4 sm:$0xff]   ;;  %v110_v4 = vlaneseq }
  0x29   :  { %v759_v11 = vld [vmem:[#allocation2 + $0x48] ss:$16 sps:$4 sm:$0xff]   ;;  %v760_v12 = vld [vmem:[#allocation2 + $0x64] ss:$16 sps:$4 sm:$0xff]   ;;  %v762_v13 = vld [vmem:[#allocation2 + $0x6c] ss:$16 sps:$4 sm:$0xff]  }
  0x2a   :  { %v764_v14 = vld [vmem:[#allocation2 + $0x60] ss:$16 sps:$4 sm:$0xff]   ;;  %v765_v15 = vld [vmem:[#allocation2 + $0x68] ss:$16 sps:$4 sm:$0xff]   ;;  %v766_v16 = vld [vmem:[#allocation2 + $0x84] ss:$16 sps:$4 sm:$0xff]  }
  0x2b   :  { %473 = vmatpush1.bf16.msra.mxu0 %v752_v6  ;;  %526 = vmatpush1.bf16.msra.mxu1 %v753_v7  ;;  %v768_v17 = vld [vmem:[#allocation2 + $0x8c] ss:$16 sps:$4 sm:$0xff]   ;;  %v770_v18 = vld [vmem:[#allocation2 + $0x80] ss:$16 sps:$4 sm:$0xff]   ;;  %v771_v19 = vld [vmem:[#allocation2 + $0x88] ss:$16 sps:$4 sm:$0xff]  }
  0x2c   :  { %474 = vmatprep.subr.bf16.mxu0 %v754_v8  ;;  %527 = vmatprep.subr.bf16.mxu1 %v756_v9  ;;  %v772_v20 = vld [vmem:[#allocation2 + $0xa4] ss:$16 sps:$4 sm:$0xff]   ;;  %v774_v21 = vld [vmem:[#allocation2 + $0xac] ss:$16 sps:$4 sm:$0xff]   ;;  %v776_v22 = vld [vmem:[#allocation2 + $0xa0] ss:$16 sps:$4 sm:$0xff]  }
  0x2d   :  { %v777_v23 = vld [vmem:[#allocation2 + $0xa8] ss:$16 sps:$4 sm:$0xff]   ;;  %v778_v24 = vld [vmem:[#allocation2 + $0xc4] ss:$16 sps:$4 sm:$0xff]   ;;  %v780_v25 = vld [vmem:[#allocation2 + $0xcc] ss:$16 sps:$4 sm:$0xff]  }
  0x2e   :  { %v782_v26 = vld [vmem:[#allocation2 + $0xc0] ss:$16 sps:$4 sm:$0xff]   ;;  %v783_v27 = vld [vmem:[#allocation2 + $0xc8] ss:$16 sps:$4 sm:$0xff]   ;;  %v784_v28 = vld [vmem:[#allocation2 + $0xe4] ss:$16 sps:$4 sm:$0xff]  }
  0x2f   :  { %475 = vmatpush1.bf16.msra.mxu0 %v758_v10  ;;  %528 = vmatpush1.bf16.msra.mxu1 %v759_v11  ;;  %v786_v29 = vld [vmem:[#allocation2 + $0xec] ss:$16 sps:$4 sm:$0xff]   ;;  %v788_v30 = vld [vmem:[#allocation2 + $0xe0] ss:$16 sps:$4 sm:$0xff]   ;;  %v789_v31 = vld [vmem:[#allocation2 + $0xe8] ss:$16 sps:$4 sm:$0xff]  }
  0x30   :  { %476 = vmatprep.subr.bf16.mxu0 %v760_v12  ;;  %529 = vmatprep.subr.bf16.mxu1 %v762_v13  ;;  %v790_v32 = vld [vmem:[#allocation2 + $0x104] ss:$16 sps:$4 sm:$0xff]   ;;  %v792_v33 = vld [vmem:[#allocation2 + $0x10c] ss:$16 sps:$4 sm:$0xff]   ;;  %v794_v34 = vld [vmem:[#allocation2 + $0x100] ss:$16 sps:$4 sm:$0xff]  }
  0x31   :  { %v795_v35 = vld [vmem:[#allocation2 + $0x108] ss:$16 sps:$4 sm:$0xff]   ;;  %v796_v36 = vld [vmem:[#allocation2 + $0x124] ss:$16 sps:$4 sm:$0xff]   ;;  %v798_v37 = vld [vmem:[#allocation2 + $0x12c] ss:$16 sps:$4 sm:$0xff]  }
  0x32   :  { %v800_v38 = vld [vmem:[#allocation2 + $0x120] ss:$16 sps:$4 sm:$0xff]   ;;  %v801_v39 = vld [vmem:[#allocation2 + $0x128] ss:$16 sps:$4 sm:$0xff]   ;;  %v802_v40 = vld [vmem:[#allocation2 + $0x144] ss:$16 sps:$4 sm:$0xff]  }
  0x33   :  { %477 = vmatpush1.bf16.msra.mxu0 %v764_v14  ;;  %530 = vmatpush1.bf16.msra.mxu1 %v765_v15  ;;  %v804_v41 = vld [vmem:[#allocation2 + $0x14c] ss:$16 sps:$4 sm:$0xff]   ;;  %v806_v42 = vld [vmem:[#allocation2 + $0x140] ss:$16 sps:$4 sm:$0xff]   ;;  %v807_v43 = vld [vmem:[#allocation2 + $0x148] ss:$16 sps:$4 sm:$0xff]  }
  0x34   :  { %478 = vmatprep.subr.bf16.mxu0 %v766_v16  ;;  %531 = vmatprep.subr.bf16.mxu1 %v768_v17  ;;  %v808_v44 = vld [vmem:[#allocation2 + $0x164] ss:$16 sps:$4 sm:$0xff]   ;;  %v810_v45 = vld [vmem:[#allocation2 + $0x16c] ss:$16 sps:$4 sm:$0xff]   ;;  %v812_v46 = vld [vmem:[#allocation2 + $0x160] ss:$16 sps:$4 sm:$0xff]  }
  0x35   :  { %v840_v47 = vld [vmem:[%s976_s0 + $0x4] ss:$8 sps:$4 sm:$0xff]   ;;  %v813_v48 = vld [vmem:[#allocation2 + $0x168] ss:$16 sps:$4 sm:$0xff]   ;;  %v818_v51 = vld [vmem:[#allocation2 + $0x180] ss:$16 sps:$4 sm:$0xff]  }
  0x36   :  { %v814_v49 = vld [vmem:[#allocation2 + $0x184] ss:$16 sps:$4 sm:$0xff]   ;;  %v816_v50 = vld [vmem:[#allocation2 + $0x18c] ss:$16 sps:$4 sm:$0xff]   ;;  %502 = vmatprep.mubr.bf16.mxu0 %v840_v47  ;;  %555 = vmatprep.mubr.bf16.mxu1 %v840_v47  ;;  %v819_v52 = vld [vmem:[#allocation2 + $0x188] ss:$16 sps:$4 sm:$0xff]  }
  0x37   :  { %479 = vmatpush1.bf16.msra.mxu0 %v770_v18  ;;  %532 = vmatpush1.bf16.msra.mxu1 %v771_v19  ;;  %v820_v53 = vld [vmem:[#allocation2 + $0x1a4] ss:$16 sps:$4 sm:$0xff]   ;;  %v822_v54 = vld [vmem:[#allocation2 + $0x1ac] ss:$16 sps:$4 sm:$0xff]   ;;  %v824_v55 = vld [vmem:[#allocation2 + $0x1a0] ss:$16 sps:$4 sm:$0xff]  }
  0x38   :  { %480 = vmatprep.subr.bf16.mxu0 %v772_v20  ;;  %533 = vmatprep.subr.bf16.mxu1 %v774_v21  ;;  %v825_v56 = vld [vmem:[#allocation2 + $0x1a8] ss:$16 sps:$4 sm:$0xff]   ;;  %v826_v57 = vld [vmem:[#allocation2 + $0x1c4] ss:$16 sps:$4 sm:$0xff]   ;;  %v828_v58 = vld [vmem:[#allocation2 + $0x1cc] ss:$16 sps:$4 sm:$0xff]  }
  0x39   :  { %v830_v59 = vld [vmem:[#allocation2 + $0x1c0] ss:$16 sps:$4 sm:$0xff]   ;;  %v831_v60 = vld [vmem:[#allocation2 + $0x1c8] ss:$16 sps:$4 sm:$0xff]   ;;  %v832_v61 = vld [vmem:[#allocation2 + $0x1e4] ss:$16 sps:$4 sm:$0xff]  }
  0x3a   :  { %v834_v62 = vld [vmem:[#allocation2 + $0x1ec] ss:$16 sps:$4 sm:$0xff]   ;;  %v836_v63 = vld [vmem:[#allocation2 + $0x1e0] ss:$16 sps:$4 sm:$0xff]   ;;  %v837_v0 = vld [vmem:[#allocation2 + $0x1e8] ss:$16 sps:$4 sm:$0xff]  }
  0x3b   :  { %481 = vmatpush1.bf16.msra.mxu0 %v776_v22  ;;  %534 = vmatpush1.bf16.msra.mxu1 %v777_v23  ;;  %v838_v1 = vld [vmem:[%s976_s0] ss:$8 sps:$4 sm:$0xff]   ;;  %v841_v2 = vld [vmem:[%s976_s0 + $0x14] ss:$8 sps:$4 sm:$0xff]   ;;  %v843_v3 = vld [vmem:[%s976_s0 + $0x10] ss:$8 sps:$4 sm:$0xff]  }
  0x3c   :  { %482 = vmatprep.subr.bf16.mxu0 %v778_v24  ;;  %535 = vmatprep.subr.bf16.mxu1 %v780_v25  ;;  %v111_v5 = vshrl.u32 %v110_v4, 7  ;;  %v108_v8 = vld [vmem:[#allocation4] sm:$0xf] }
  0x3e   :  { %v112_v6 = vsub.s32 0, %v111_v5  ;;  %v120_v7 = vsub.s32 2, %v111_v5  ;;  %v116_v9 = vsub.s32 1, %v111_v5  ;;  %v124_v10 = vsub.s32 3, %v111_v5 }
  0x3f   :  { %483 = vmatpush1.bf16.msra.mxu0 %v782_v26  ;;  %536 = vmatpush1.bf16.msra.mxu1 %v783_v27 }
  0x40   :  { %484 = vmatprep.subr.bf16.mxu0 %v784_v28  ;;  %537 = vmatprep.subr.bf16.mxu1 %v786_v29  ;;  %v113_v11 = vrot.slane %v108_v8, %v112_v6  ;;  %v121_v12 = vrot.slane %v108_v8, %v120_v7  ;;  %v117_v13 = vrot.slane %v108_v8, %v116_v9 }
  0x41   :  { %v125_v14 = vrot.slane %v108_v8, %v124_v10 }
  0x43   :  { %485 = vmatpush1.bf16.msra.mxu0 %v788_v30  ;;  %538 = vmatpush1.bf16.msra.mxu1 %v789_v31 }
  0x44   :  { %486 = vmatprep.subr.bf16.mxu0 %v790_v32  ;;  %539 = vmatprep.subr.bf16.mxu1 %v792_v33 }
  0x47   :  { %487 = vmatpush1.bf16.msra.mxu0 %v794_v34  ;;  %540 = vmatpush1.bf16.msra.mxu1 %v795_v35 }
  0x48   :  { %488 = vmatprep.subr.bf16.mxu0 %v796_v36  ;;  %541 = vmatprep.subr.bf16.mxu1 %v798_v37 }
  0x4b   :  { %489 = vmatpush1.bf16.msra.mxu0 %v800_v38  ;;  %542 = vmatpush1.bf16.msra.mxu1 %v801_v39 }
  0x4c   :  { %490 = vmatprep.subr.bf16.mxu0 %v802_v40  ;;  %543 = vmatprep.subr.bf16.mxu1 %v804_v41 }
  0x4f   :  { %491 = vmatpush1.bf16.msra.mxu0 %v806_v42  ;;  %544 = vmatpush1.bf16.msra.mxu1 %v807_v43 }
  0x50   :  { %492 = vmatprep.subr.bf16.mxu0 %v808_v44  ;;  %545 = vmatprep.subr.bf16.mxu1 %v810_v45 }
  0x53   :  { %493 = vmatpush1.bf16.msra.mxu0 %v812_v46  ;;  %546 = vmatpush1.bf16.msra.mxu1 %v813_v48 }
  0x54   :  { %494 = vmatprep.subr.bf16.mxu0 %v814_v49  ;;  %547 = vmatprep.subr.bf16.mxu1 %v816_v50 }
  0x57   :  { %495 = vmatpush1.bf16.msra.mxu0 %v818_v51  ;;  %548 = vmatpush1.bf16.msra.mxu1 %v819_v52 }
  0x58   :  { %496 = vmatprep.subr.bf16.mxu0 %v820_v53  ;;  %549 = vmatprep.subr.bf16.mxu1 %v822_v54 }
  0x5b   :  { %497 = vmatpush1.bf16.msra.mxu0 %v824_v55  ;;  %550 = vmatpush1.bf16.msra.mxu1 %v825_v56 }
  0x5c   :  { %498 = vmatprep.subr.bf16.mxu0 %v826_v57  ;;  %551 = vmatprep.subr.bf16.mxu1 %v828_v58 }
  0x5f   :  { %499 = vmatpush1.bf16.msra.mxu0 %v830_v59  ;;  %552 = vmatpush1.bf16.msra.mxu1 %v831_v60 }
  0x60   :  { %500 = vmatprep.subr.bf16.mxu0 %v832_v61  ;;  %553 = vmatprep.subr.bf16.mxu1 %v834_v62 }
  0x63   :  { %501 = vmatpush1.bf16.msra.mxu0 %v836_v63  ;;  %554 = vmatpush1.bf16.msra.mxu1 %v837_v0 }
  0x66   :  { %503 = vmatmul.mubr.bf16.vlgmr.msra.gmra.mrb[0].mxu0 %v838_v1  ;;  %556 = vmatmul.mubr.bf16.vlgmr.msra.gmra.mrb[0].mxu1 %v838_v1 }
  0x67   :  { %512 = vmatprep.mubr.bf16.mxu0 %v841_v2  ;;  %565 = vmatprep.mubr.bf16.mxu1 %v841_v2 }
  0x6e   :  { %513 = vmatmul.mubr.bf16.gmra.mrb[4].mxu0 %v843_v3  ;;  %566 = vmatmul.mubr.bf16.gmra.mrb[4].mxu1 %v843_v3 }
 0x139   :  { %v504_v15 = vpop.f32.mrb[0].mxu0  ;;  %v557_v16 = vpop.f32.mrb[0].mxu1 }
 0x13a   :  { %v505_v17 = vadd.f32 %v504_v15, %v113_v11  ;;  %v558_v18 = vadd.f32 %v557_v16, %v121_v12  ;;  %v506_v19 = vpop.f32.mrb[1].mxu0  ;;  %v559_v20 = vpop.f32.mrb[1].mxu1 }
 0x13b   :  { %v507_v21 = vadd.f32 %v506_v19, %v117_v13  ;;  %v560_v22 = vadd.f32 %v559_v20, %v125_v14  ;;  %v508_v23 = vpop.f32.mrb[2].mxu0  ;;  %v561_v24 = vpop.f32.mrb[2].mxu1 }
 0x13c   :  { %v576_v25 = vmax.f32 %v505_v17, 0.0  ;;  %v578_v26 = vmax.f32 %v558_v18, 0.0  ;;  %v509_v27 = vadd.f32 %v508_v23, %v113_v11  ;;  %v562_v28 = vadd.f32 %v561_v24, %v121_v12  ;;  %v510_v29 = vpop.f32.mrb[3].mxu0  ;;  %v563_v30 = vpop.f32.mrb[3].mxu1 }
 0x13d   :  { %v577_v31 = vmax.f32 %v507_v21, 0.0  ;;  %v579_v32 = vmax.f32 %v560_v22, 0.0  ;;  %v511_v33 = vadd.f32 %v510_v29, %v117_v13  ;;  %v564_v34 = vadd.f32 %v563_v30, %v125_v14 }
 0x13e   :  { %v580_v35 = vmax.f32 %v509_v27, 0.0  ;;  %v582_v36 = vmax.f32 %v562_v28, 0.0 }
 0x13f   :  { %v730_v37 = vpack.c.bf16 %v577_v31, %v576_v25  ;;  %v731_v38 = vpack.c.bf16 %v579_v32, %v578_v26  ;;  %v581_v39 = vmax.f32 %v511_v33, 0.0  ;;  %v583_v40 = vmax.f32 %v564_v34, 0.0 }
 0x141   :  { %640 = vst [vmem:[%s979_s3] sm:$0xff] %v730_v37  ;;  %641 = vst [vmem:[%s979_s3 + $0x8] sm:$0xff] %v731_v38  ;;  %v732_v41 = vpack.c.bf16 %v581_v39, %v580_v35  ;;  %v733_v42 = vpack.c.bf16 %v583_v40, %v582_v36  ;;  %v514_v43 = vpop.f32.mrb[4].mxu0  ;;  %v567_v44 = vpop.f32.mrb[4].mxu1 }
 0x142   :  { %v515_v45 = vadd.f32 %v514_v43, %v113_v11  ;;  %v568_v46 = vadd.f32 %v567_v44, %v121_v12  ;;  %v516_v47 = vpop.f32.mrb[5].mxu0  ;;  %v569_v48 = vpop.f32.mrb[5].mxu1 }
 0x143   :  { %642 = vst [vmem:[%s979_s3 + $0x10] sm:$0xff] %v732_v41  ;;  %643 = vst [vmem:[%s979_s3 + $0x18] sm:$0xff] %v733_v42  ;;  %v517_v49 = vadd.f32 %v516_v47, %v117_v13  ;;  %v570_v50 = vadd.f32 %v569_v48, %v125_v14  ;;  %v518_v51 = vpop.f32.mrb[6].mxu0  ;;  %v571_v52 = vpop.f32.mrb[6].mxu1 }
 0x144   :  { %v584_v53 = vmax.f32 %v515_v45, 0.0  ;;  %v586_v54 = vmax.f32 %v568_v46, 0.0  ;;  %v519_v55 = vadd.f32 %v518_v51, %v113_v11  ;;  %v572_v56 = vadd.f32 %v571_v52, %v121_v12  ;;  %v520_v57 = vpop.f32.mrb[7].mxu0  ;;  %v573_v58 = vpop.f32.mrb[7].mxu1 }
 0x145   :  { %v585_v59 = vmax.f32 %v517_v49, 0.0  ;;  %v587_v60 = vmax.f32 %v570_v50, 0.0  ;;  %v521_v61 = vadd.f32 %v520_v57, %v117_v13  ;;  %v574_v62 = vadd.f32 %v573_v58, %v125_v14 }
 0x146   :  { %v588_v63 = vmax.f32 %v519_v55, 0.0  ;;  %v590_v0 = vmax.f32 %v572_v56, 0.0 }
 0x147   :  { %v734_v1 = vpack.c.bf16 %v585_v59, %v584_v53  ;;  %v735_v2 = vpack.c.bf16 %v587_v60, %v586_v54  ;;  %v589_v3 = vmax.f32 %v521_v61, 0.0  ;;  %v591_v4 = vmax.f32 %v574_v62, 0.0 }
 0x149   :  { %644 = vst [vmem:[%s979_s3 + $0x20] sm:$0xff] %v734_v1  ;;  %645 = vst [vmem:[%s979_s3 + $0x28] sm:$0xff] %v735_v2  ;;  %v736_v5 = vpack.c.bf16 %v589_v3, %v588_v63  ;;  %v737_v6 = vpack.c.bf16 %v591_v4, %v590_v0 }
 0x14b   :  { %646 = vst [vmem:[%s979_s3 + $0x30] sm:$0xff] %v736_v5  ;;  %647 = vst [vmem:[%s979_s3 + $0x38] sm:$0xff] %v737_v6 }
 0x14c   :  { %652 = vsyncpa [#allocation3], 1 }
 0x14d   :  { %653 = vsyncpa [#allocation5], 1 }

// kernel: backbone_forward.15
= control target key start
LH: loop header
LB: loop body
LE: loop exit
PB: predicated region body
PF: predicated region fallthrough
CT: control target
= control target key end

     0   :  { %v667_v3 = vmov 1983009808   ;;  %v52_v5 = vlaneseq  ;;  %v668_v6 = vmov 1966171168   ;;  %vm384_vm0 = vcmask 1041408   ;;  %s1126_s0 = inlined_call_operand.vmem [shape: bf16[4,2,2,1024], index: 0, kind: input, shape index: {}]   ;;  %s1127_s1 = inlined_call_operand.vmem [shape: bf16[4,2,512], index: 1, kind: output, shape index: {}]  }
   0x1   :  { %v8_v0 = vld [vmem:[%s1126_s0] sm:$0xff]  ;;  %v9_v1 = vld [vmem:[%s1126_s0 + $0x8] sm:$0xff]  ;;  %v10_v2 = vld [vmem:[%s1126_s0 + $0x10] sm:$0xff]  ;;  %v50_v4 = vunpack.c.l.s4 %v667_v3  ;;  %v688_v7 = vunpack.c.l.s4 %v668_v6 }
   0x2   :  { %v11_v8 = vld [vmem:[%s1126_s0 + $0x18] sm:$0xff]  ;;  %v12_v9 = vld [vmem:[%s1126_s0 + $0x20] sm:$0xff]  ;;  %v13_v10 = vld [vmem:[%s1126_s0 + $0x28] sm:$0xff]  ;;  %v16_v11 = vunpack.c.l.bf16 %v8_v0  ;;  %v17_v12 = vunpack.c.h.bf16 %v8_v0  ;;  %v18_v13 = vunpack.c.l.bf16 %v9_v1  ;;  %v19_v14 = vunpack.c.h.bf16 %v9_v1 }
   0x3   :  { %v14_v15 = vld [vmem:[%s1126_s0 + $0x30] sm:$0xff]  ;;  %v15_v16 = vld [vmem:[%s1126_s0 + $0x38] sm:$0xff]  ;;  %v20_v17 = vunpack.c.l.bf16 %v10_v2  ;;  %v21_v18 = vunpack.c.h.bf16 %v10_v2  ;;  %v22_v19 = vunpack.c.l.bf16 %v11_v8  ;;  %v23_v20 = vunpack.c.h.bf16 %v11_v8 }
   0x4   :  { %v24_v21 = vunpack.c.l.bf16 %v12_v9  ;;  %v25_v22 = vunpack.c.h.bf16 %v12_v9  ;;  %v26_v23 = vunpack.c.l.bf16 %v13_v10  ;;  %v27_v24 = vunpack.c.h.bf16 %v13_v10 }
   0x5   :  { %v705_v25 = vunpack.c.l.bf16 %v14_v15  ;;  %v707_v26 = vunpack.c.h.bf16 %v14_v15  ;;  %v709_v27 = vunpack.c.l.bf16 %v15_v16  ;;  %v711_v28 = vunpack.c.h.bf16 %v15_v16 }
   0x6   :  { %v48_v29 = vcombine.high %v16_v11, %v16_v11  ;;  %v51_v30 = vunpack.c.0.s8 %v50_v4  ;;  %v713_v31 = vshrl.u32 %v52_v5, 7  ;;  %v65_v32 = vcombine.high %v17_v12, %v17_v12 }
   0x7   :  { %v82_v33 = vcombine.high %v18_v13, %v18_v13  ;;  %v99_v34 = vcombine.high %v19_v14, %v19_v14  ;;  %v116_v35 = vcombine.high %v20_v17, %v20_v17  ;;  %v133_v36 = vcombine.high %v21_v18, %v21_v18 }
   0x8   :  { %v716_v37 = vsub.s32 %v51_v30, %v713_v31  ;;  %v150_v38 = vcombine.high %v22_v19, %v22_v19  ;;  %v167_v39 = vcombine.high %v23_v20, %v23_v20  ;;  %v184_v40 = vcombine.high %v24_v21, %v24_v21 }
   0x9   :  { %v201_v41 = vcombine.high %v25_v22, %v25_v22  ;;  %v218_v42 = vcombine.high %v26_v23, %v26_v23  ;;  %v235_v43 = vcombine.high %v27_v24, %v27_v24  ;;  %v252_v44 = vcombine.high %v705_v25, %v705_v25 }
   0xa   :  { %v721_v45 = vrot.slane %v16_v11, %v716_v37  ;;  %v724_v46 = vrot.slane %v48_v29, %v716_v37  ;;  %v727_v47 = vrot.slane %v17_v12, %v716_v37  ;;  %v730_v48 = vrot.slane %v65_v32, %v716_v37 }
   0xb   :  { %v733_v49 = vrot.slane %v18_v13, %v716_v37  ;;  %v736_v50 = vrot.slane %v82_v33, %v716_v37  ;;  %v739_v51 = vrot.slane %v19_v14, %v716_v37  ;;  %v742_v52 = vrot.slane %v99_v34, %v716_v37 }
   0xc   :  { %v63_v53 = vcombine.high %v721_v45, %v721_v45  ;;  %v64_v54 = vcombine.high %v724_v46, %v724_v46  ;;  %v80_v55 = vcombine.high %v727_v47, %v727_v47  ;;  %v81_v56 = vcombine.high %v730_v48, %v730_v48 }
   0xd   :  { %v97_v57 = vcombine.high %v733_v49, %v733_v49  ;;  %v98_v58 = vcombine.high %v736_v50, %v736_v50  ;;  %v114_v59 = vcombine.high %v739_v51, %v739_v51  ;;  %v115_v60 = vcombine.high %v742_v52, %v742_v52 }
   0xe   :  { %v761_v61 = vrot.slane %v20_v17, %v716_v37  ;;  %v764_v62 = vrot.slane %v116_v35, %v716_v37  ;;  %v767_v63 = vrot.slane %v21_v18, %v716_v37  ;;  %v770_v0 = vrot.slane %v133_v36, %v716_v37 }
   0xf   :  { %v773_v1 = vrot.slane %v22_v19, %v716_v37  ;;  %v776_v2 = vrot.slane %v150_v38, %v716_v37  ;;  %v779_v3 = vrot.slane %v23_v20, %v716_v37  ;;  %v782_v4 = vrot.slane %v167_v39, %v716_v37 }
  0x10   :  { %v131_v5 = vcombine.high %v761_v61, %v761_v61  ;;  %v132_v6 = vcombine.high %v764_v62, %v764_v62  ;;  %v148_v8 = vcombine.high %v767_v63, %v767_v63  ;;  %v149_v9 = vcombine.high %v770_v0, %v770_v0 }
  0x11   :  { %v165_v10 = vcombine.high %v773_v1, %v773_v1  ;;  %v166_v11 = vcombine.high %v776_v2, %v776_v2  ;;  %v182_v12 = vcombine.high %v779_v3, %v779_v3  ;;  %v183_v13 = vcombine.high %v782_v4, %v782_v4 }
  0x12   :  { %v801_v14 = vrot.slane %v24_v21, %v716_v37  ;;  %v804_v15 = vrot.slane %v184_v40, %v716_v37  ;;  %v807_v16 = vrot.slane %v25_v22, %v716_v37  ;;  %v810_v17 = vrot.slane %v201_v41, %v716_v37 }
  0x13   :  { %v813_v18 = vrot.slane %v26_v23, %v716_v37  ;;  %v816_v19 = vrot.slane %v218_v42, %v716_v37  ;;  %v819_v20 = vrot.slane %v27_v24, %v716_v37  ;;  %v822_v21 = vrot.slane %v235_v43, %v716_v37 }
  0x14   :  { %v199_v29 = vcombine.high %v801_v14, %v801_v14  ;;  %v200_v22 = vcombine.high %v804_v15, %v804_v15  ;;  %v216_v30 = vcombine.high %v807_v16, %v807_v16  ;;  %v842_v35 = vrot.slane %v705_v25, %v716_v37 }
  0x15   :  { %v233_v32 = vcombine.high %v813_v18, %v813_v18  ;;  %v234_v24 = vcombine.high %v816_v19, %v816_v19  ;;  %v845_v36 = vrot.slane %v252_v44, %v716_v37  ;;  %v269_v38 = vcombine.high %v707_v26, %v707_v26 }
  0x16   :  { %v851_v39 = vrot.slane %v707_v26, %v716_v37  ;;  %v286_v40 = vcombine.high %v709_v27, %v709_v27  ;;  %v857_v41 = vrot.slane %v709_v27, %v716_v37  ;;  %v303_v25 = vcombine.high %v711_v28, %v711_v28 }
  0x17   :  { %v863_v42 = vrot.slane %v711_v28, %v716_v37  ;;  %v870_v44 = vrot.slane %v269_v38, %v716_v37  ;;  %v385_v38 = vsel %vm384_vm0, %v721_v45, 0.0  ;;  %v386_v27 = vsel %vm384_vm0, %v733_v49, 0.0 }
  0x18   :  { %v875_v34 = vrot.slane %v286_v40, %v716_v37  ;;  %v880_v28 = vrot.slane %v303_v25, %v716_v37  ;;  %v388_v40 = vsel %vm384_vm0, %v63_v53, 0.0  ;;  %v895_v25 = vadd.f32 %v386_v27, %v385_v38 }
  0x19   :  { %v389_v43 = vsel %vm384_vm0, %v97_v57, 0.0  ;;  %v391_v45 = vsel %vm384_vm0, %v724_v46, 0.0  ;;  %v392_v49 = vsel %vm384_vm0, %v736_v50, 0.0  ;;  %v394_v53 = vsel %vm384_vm0, %v64_v54, 0.0 }
  0x1a   :  { %v302_v23 = vcombine.high %v875_v34, %v875_v34  ;;  %v319_v37 = vcombine.high %v880_v28, %v880_v28  ;;  %v898_v33 = vadd.f32 %v389_v43, %v388_v40  ;;  %v908_v26 = vadd.f32 %v392_v49, %v391_v45 }
  0x1b   :  { %v395_v57 = vsel %vm384_vm0, %v98_v58, 0.0  ;;  %v397_v43 = vsel %vm384_vm0, %v727_v47, 0.0  ;;  %v398_v27 = vsel %vm384_vm0, %v739_v51, 0.0  ;;  %v400_v46 = vsel %vm384_vm0, %v80_v55, 0.0 }
  0x1c   :  { %v918_v38 = vadd.f32 %v395_v57, %v394_v53  ;;  %v920_v40 = vadd.f32 %v398_v27, %v397_v43  ;;  %v401_v50 = vsel %vm384_vm0, %v114_v59, 0.0  ;;  %v403_v58 = vsel %vm384_vm0, %v730_v48, 0.0 }
  0x1d   :  { %v930_v54 = vadd.f32 %v401_v50, %v400_v46  ;;  %v404_v45 = vsel %vm384_vm0, %v742_v52, 0.0  ;;  %v406_v47 = vsel %vm384_vm0, %v81_v56, 0.0  ;;  %v407_v51 = vsel %vm384_vm0, %v115_v60, 0.0 }
  0x1e   :  { %v940_v49 = vadd.f32 %v404_v45, %v403_v58  ;;  %v409_v55 = vsel %vm384_vm0, %v761_v61, 0.0  ;;  %v410_v59 = vsel %vm384_vm0, %v773_v1, 0.0  ;;  %v950_v53 = vadd.f32 %v407_v51, %v406_v47 }
  0x1f   :  { %v952_v57 = vadd.f32 %v410_v59, %v409_v55  ;;  %v412_v48 = vsel %vm384_vm0, %v131_v5, 0.0  ;;  %v413_v52 = vsel %vm384_vm0, %v165_v10, 0.0  ;;  %v415_v60 = vsel %vm384_vm0, %v764_v62, 0.0 }
  0x20   :  { %v962_v56 = vadd.f32 %v413_v52, %v412_v48  ;;  %v416_v43 = vsel %vm384_vm0, %v776_v2, 0.0  ;;  %v418_v61 = vsel %vm384_vm0, %v132_v6, 0.0  ;;  %v419_v1 = vsel %vm384_vm0, %v166_v11, 0.0 }
  0x21   :  { %v972_v27 = vadd.f32 %v416_v43, %v415_v60  ;;  %v421_v5 = vsel %vm384_vm0, %v767_v63, 0.0  ;;  %v422_v10 = vsel %vm384_vm0, %v779_v3, 0.0  ;;  %v982_v46 = vadd.f32 %v419_v1, %v418_v61 }
  0x22   :  { %v423_v50 = vadd.f32 %v422_v10, %v421_v5  ;;  %v424_v62 = vsel %vm384_vm0, %v148_v8, 0.0  ;;  %v425_v2 = vsel %vm384_vm0, %v182_v12, 0.0  ;;  %v427_v11 = vsel %vm384_vm0, %v770_v0, 0.0 }
  0x23   :  { %v426_v6 = vadd.f32 %v425_v2, %v424_v62  ;;  %v428_v58 = vsel %vm384_vm0, %v782_v4, 0.0  ;;  %v430_v45 = vsel %vm384_vm0, %v149_v9, 0.0  ;;  %v431_v3 = vsel %vm384_vm0, %v183_v13, 0.0 }
  0x24   :  { %v429_v63 = vadd.f32 %v428_v58, %v427_v11  ;;  %v433_v8 = vsel %vm384_vm0, %v801_v14, 0.0  ;;  %v434_v12 = vsel %vm384_vm0, %v813_v18, 0.0  ;;  %v432_v47 = vadd.f32 %v431_v3, %v430_v45 }
  0x25   :  { %v435_v51 = vadd.f32 %v434_v12, %v433_v8  ;;  %v436_v0 = vsel %vm384_vm0, %v199_v29, 0.0  ;;  %v437_v4 = vsel %vm384_vm0, %v233_v32, 0.0  ;;  %v439_v13 = vsel %vm384_vm0, %v804_v15, 0.0 }
  0x26   :  { %v438_v9 = vadd.f32 %v437_v4, %v436_v0  ;;  %v440_v55 = vsel %vm384_vm0, %v816_v19, 0.0  ;;  %v442_v59 = vsel %vm384_vm0, %v200_v22, 0.0  ;;  %v443_v18 = vsel %vm384_vm0, %v234_v24, 0.0 }
  0x27   :  { %v441_v14 = vadd.f32 %v440_v55, %v439_v13  ;;  %v445_v29 = vsel %vm384_vm0, %v807_v16, 0.0  ;;  %v446_v32 = vsel %vm384_vm0, %v819_v20, 0.0  ;;  %v444_v48 = vadd.f32 %v443_v18, %v442_v59 }
  0x28   :  { %v447_v52 = vadd.f32 %v446_v32, %v445_v29  ;;  %v448_v15 = vsel %vm384_vm0, %v216_v30, 0.0  ;;  %v1128_v22 = vcombine.high %v819_v20, %v819_v20  ;;  %v451_v24 = vsel %vm384_vm0, %v810_v17, 0.0 }
  0x29   :  { %v452_v43 = vsel %vm384_vm0, %v822_v21, 0.0  ;;  %v1129_v61 = vcombine.high %v810_v17, %v810_v17  ;;  %v1130_v30 = vcombine.high %v822_v21, %v822_v21  ;;  %v457_v5 = vsel %vm384_vm0, %v842_v35, 0.0 }
  0x2a   :  { %v449_v19 = vsel %vm384_vm0, %v1128_v22, 0.0  ;;  %v453_v16 = vadd.f32 %v452_v43, %v451_v24  ;;  %v458_v10 = vsel %vm384_vm0, %v857_v41, 0.0  ;;  %v1131_v11 = vcombine.high %v842_v35, %v842_v35 }
  0x2b   :  { %v450_v60 = vadd.f32 %v449_v19, %v448_v15  ;;  %v454_v1 = vsel %vm384_vm0, %v1129_v61, 0.0  ;;  %v455_v20 = vsel %vm384_vm0, %v1130_v30, 0.0  ;;  %v459_v2 = vadd.f32 %v458_v10, %v457_v5 }
  0x2c   :  { %v456_v62 = vadd.f32 %v455_v20, %v454_v1  ;;  %v460_v17 = vsel %vm384_vm0, %v1131_v11, 0.0  ;;  %v1132_v58 = vcombine.high %v857_v41, %v857_v41  ;;  %v463_v3 = vsel %vm384_vm0, %v845_v36, 0.0 }
  0x2d   :  { %v464_v8 = vsel %vm384_vm0, %v875_v34, 0.0  ;;  %v1133_v12 = vcombine.high %v845_v36, %v845_v36  ;;  %v467_v41 = vsel %vm384_vm0, %v302_v23, 0.0  ;;  %v469_v4 = vsel %vm384_vm0, %v851_v39, 0.0 }
  0x2e   :  { %v461_v21 = vsel %vm384_vm0, %v1132_v58, 0.0  ;;  %v465_v35 = vadd.f32 %v464_v8, %v463_v3  ;;  %v470_v13 = vsel %vm384_vm0, %v863_v42, 0.0  ;;  %v1134_v18 = vcombine.high %v851_v39, %v851_v39 }
  0x2f   :  { %v462_v45 = vadd.f32 %v461_v21, %v460_v17  ;;  %v466_v0 = vsel %vm384_vm0, %v1133_v12, 0.0  ;;  %v471_v59 = vadd.f32 %v470_v13, %v469_v4  ;;  %v1135_v29 = vcombine.high %v863_v42, %v863_v42 }
  0x30   :  { %v468_v55 = vadd.f32 %v467_v41, %v466_v0  ;;  %v472_v36 = vsel %vm384_vm0, %v1134_v18, 0.0  ;;  %v475_v23 = vsel %vm384_vm0, %v870_v44, 0.0  ;;  %v476_v15 = vsel %vm384_vm0, %v880_v28, 0.0 }
  0x31   :  { %v473_v34 = vsel %vm384_vm0, %v1135_v29, 0.0  ;;  %v1136_v22 = vcombine.high %v870_v44, %v870_v44  ;;  %v477_v39 = vadd.f32 %v476_v15, %v475_v23  ;;  %v479_v42 = vsel %vm384_vm0, %v319_v37, 0.0 }
  0x32   :  { %v474_v32 = vadd.f32 %v473_v34, %v472_v36  ;;  %v481_v24 = vadd.f32 %v920_v40, %v895_v25  ;;  %v482_v43 = vadd.f32 %v930_v54, %v898_v33  ;;  %v483_v1 = vadd.f32 %v940_v49, %v908_v26 }
  0x33   :  { %v478_v19 = vsel %vm384_vm0, %v1136_v22, 0.0  ;;  %v484_v44 = vadd.f32 %v950_v53, %v918_v38  ;;  %v485_v30 = vadd.f32 %v423_v50, %v952_v57  ;;  %v486_v20 = vadd.f32 %v426_v6, %v962_v56 }
  0x34   :  { %v480_v61 = vadd.f32 %v479_v42, %v478_v19  ;;  %v487_v28 = vadd.f32 %v429_v63, %v972_v27  ;;  %v488_v37 = vadd.f32 %v432_v47, %v982_v46  ;;  %v489_v5 = vadd.f32 %v447_v52, %v435_v51 }
  0x35   :  { %v490_v25 = vadd.f32 %v450_v60, %v438_v9  ;;  %v491_v40 = vadd.f32 %v453_v16, %v441_v14  ;;  %v492_v10 = vadd.f32 %v456_v62, %v444_v48  ;;  %v493_v33 = vadd.f32 %v471_v59, %v459_v2 }
  0x36   :  { %v494_v54 = vadd.f32 %v474_v32, %v462_v45  ;;  %v495_v11 = vadd.f32 %v477_v39, %v465_v35  ;;  %v496_v17 = vadd.f32 %v480_v61, %v468_v55  ;;  %v497_v26 = vmul.f32 0.25, %v481_v24 }
  0x37   :  { %v498_v49 = vmul.f32 0.25, %v482_v43  ;;  %v499_v58 = vmul.f32 0.25, %v483_v1  ;;  %v500_v38 = vmul.f32 0.25, %v484_v44  ;;  %v501_v53 = vmul.f32 0.25, %v485_v30 }
  0x38   :  { %v502_v57 = vmul.f32 0.25, %v486_v20  ;;  %v503_v50 = vmul.f32 0.25, %v487_v28  ;;  %v504_v56 = vmul.f32 0.25, %v488_v37  ;;  %v505_v6 = vmul.f32 0.25, %v489_v5 }
  0x39   :  { %v506_v27 = vmul.f32 0.25, %v490_v25  ;;  %v507_v63 = vmul.f32 0.25, %v491_v40  ;;  %v508_v46 = vmul.f32 0.25, %v492_v10  ;;  %v509_v47 = vmul.f32 0.25, %v493_v33 }
  0x3a   :  { %v510_v51 = vmul.f32 0.25, %v494_v54  ;;  %v511_v9 = vmul.f32 0.25, %v495_v11  ;;  %v512_v14 = vmul.f32 0.25, %v496_v17  ;;  %v653_v48 = vpack.c.bf16 %v498_v49, %v497_v26 }
  0x3b   :  { %v654_v52 = vpack.c.bf16 %v500_v38, %v499_v58  ;;  %v549_v60 = vunpack.c.0.s8 %v688_v7  ;;  %v655_v16 = vpack.c.bf16 %v502_v57, %v501_v53  ;;  %v656_v62 = vpack.c.bf16 %v504_v56, %v503_v50 }
  0x3c   :  { %v657_v2 = vpack.c.bf16 %v506_v27, %v505_v6  ;;  %v658_v21 = vpack.c.bf16 %v508_v46, %v507_v63  ;;  %v659_v45 = vpack.c.bf16 %v510_v51, %v509_v47  ;;  %v660_v3 = vpack.c.bf16 %v512_v14, %v511_v9 }
  0x3d   :  { %v552_v8 = vsub.s32 %v549_v60, %v713_v31 }
  0x3f   :  { %v553_v12 = vrot.slane %v653_v48, %v552_v8  ;;  %v560_v0 = vrot.slane %v654_v52, %v552_v8  ;;  %v577_v35 = vrot.slane %v655_v16, %v552_v8  ;;  %v584_v41 = vrot.slane %v656_v62, %v552_v8 }
  0x40   :  { %v601_v4 = vrot.slane %v657_v2, %v552_v8  ;;  %v608_v13 = vrot.slane %v658_v21, %v552_v8  ;;  %v625_v55 = vrot.slane %v659_v45, %v552_v8  ;;  %v632_v59 = vrot.slane %v660_v3, %v552_v8 }
  0x41   :  { %v561_v18 = vcombine.low %v553_v12, %v560_v0  ;;  %v585_v36 = vcombine.low %v577_v35, %v584_v41 }
  0x42   :  { %v609_v29 = vcombine.low %v601_v4, %v608_v13  ;;  %v633_v7 = vcombine.low %v625_v55, %v632_v59 }
  0x43   :  { %661 = vst.sshfl [vmem:[%s1127_s1] sm:$0x55 pattern:$0x73625140] %v561_v18 }
  0x44   :  { %662 = vst.sshfl [vmem:[%s1127_s1 + $0x4] sm:$0x55 pattern:$0x73625140] %v585_v36 }
  0x45   :  { %663 = vst.sshfl [vmem:[%s1127_s1 + $0x8] sm:$0x55 pattern:$0x73625140] %v609_v29 }
  0x46   :  { %664 = vst.sshfl [vmem:[%s1127_s1 + $0xc] sm:$0x55 pattern:$0x73625140] %v633_v7 }

// kernel: backbone_forward.17
= control target key start
LH: loop header
LB: loop body
LE: loop exit
PB: predicated region body
PF: predicated region fallthrough
CT: control target
= control target key end

     0   :  { %8 = vsyncpa [#allocation3], 0  ;;  %s1656_s0 = inlined_call_operand.vmem [shape: bf16[32,512], index: 0, kind: input, shape index: {}]   ;;  %s1657_s1 = inlined_call_operand.hbm [shape: bf16[512,512], index: 1, kind: input, shape index: {}]   ;;  %s1658_s2 = inlined_call_operand.hbm [shape: f32[1,512], index: 2, kind: input, shape index: {}]   ;;  %s1659_s3 = inlined_call_operand.vmem [shape: f32[32,512], index: 3, kind: output, shape index: {}]  }
   0x1   :  { %9 = vsyncpa [#allocation5], 0  ;;  %s1536_s12 = smov [#allocation2]   ;;  %s1488_s16 = scalar_lea.hbm %s1657_s1, 16384 }
   0x2   :  { %s17_s13 = sshll.u32 %s1536_s12, 4  ;;  %p1489_p0 = scmp.ne.s32.totalorder %s1657_s1, %s1488_s16  ;;  %s18_s13 = int_to_ptr.vmem [resolvable:$true] %s17_s13 }
   0x3   :  { %p1492_p1 = scmp.lt.u32.totalorder %s1488_s16, %s1657_s1 }
   0x5   :  { %p1494_p2 = pnand %p1492_p1, %p1489_p0 }
   0x7   :  { %1497 = shalt.err (!%p1494_p2)
}
   0x8   :  { %s1498_s21 = scalar_lea.vmem %s18_s13, 16384  ;;  %p1503_p4 = scmp.lt.s32.totalorder %s18_s13, %s18_s13 }
   0x9   :  { %p1499_p3 = scmp.ne.s32.totalorder %s18_s13, %s1498_s21  ;;  %p1504_p5 = scmp.lt.s32.totalorder %s1498_s21, %s1498_s21 }
   0xb   :  { %p1505_p6 = por %p1504_p5, %p1503_p4 }
   0xd   :  { %p1506_p7 = pnand %p1505_p6, %p1499_p3 }
   0xf   :  { %1509 = shalt.err (!%p1506_p7)
}
  0x10   :  { %s1537_s22 = smov 256   ;;  %s1538_s23 = smov 16  }
  0x11   :  { %23 = dma.hbm_to_vmem [thread:$0]  %s1657_s1, 16384, %s18_s13, [#allocation3], %s1537_s22, %s1537_s22, %s1538_s23  }
  0x12   :  { %s1539_s26 = smov [#allocation4]   ;;  %s1510_s30 = scalar_lea.hbm %s1658_s2, 64 }
  0x13   :  { %s30_s27 = sshll.u32 %s1539_s26, 4  ;;  %p1511_p8 = scmp.ne.s32.totalorder %s1658_s2, %s1510_s30  ;;  %s31_s27 = int_to_ptr.vmem [resolvable:$true] %s30_s27 }
  0x14   :  { %p1514_p9 = scmp.lt.u32.totalorder %s1510_s30, %s1658_s2 }
  0x16   :  { %p1516_p10 = pnand %p1514_p9, %p1511_p8 }
  0x18   :  { %1519 = shalt.err (!%p1516_p10)
}
  0x19   :  { %s1520_s8 = scalar_lea.vmem %s31_s27, 64  ;;  %p1525_p12 = scmp.lt.s32.totalorder %s31_s27, %s31_s27 }
  0x1a   :  { %p1521_p11 = scmp.ne.s32.totalorder %s31_s27, %s1520_s8  ;;  %p1526_p13 = scmp.lt.s32.totalorder %s1520_s8, %s1520_s8 }
  0x1c   :  { %p1527_p0 = por %p1526_p13, %p1525_p12 }
  0x1e   :  { %p1528_p1 = pnand %p1527_p0, %p1521_p11 }
  0x20   :  { %1531 = shalt.err (!%p1528_p1)
}
  0x21   :  { %33 = dma.hbm_to_vmem [thread:$0]  %s1658_s2, 64, %s31_s27, [#allocation5]  }
  0x22   :  { %1532 = dma.done.wait [#allocation3], 16384  }
  0x23   :  { %1533 = vsyncadd [#allocation3], 4294950912 }
  0x24   :  { %1534 = dma.done.wait [#allocation5], 64  }
  0x25   :  { %1535 = vsyncadd [#allocation5], 4294967232  ;;  %v1284_v0 = vld [vmem:[#allocation2 + $0x4] ss:$16 sps:$4 sm:$0xff]   ;;  %v1286_v1 = vld [vmem:[#allocation2 + $0xc] ss:$16 sps:$4 sm:$0xff]  }
  0x26   :  { %878 = vmatprep.subr.bf16.mxu0 %v1284_v0  ;;  %v1288_v2 = vld [vmem:[#allocation2] ss:$16 sps:$4 sm:$0xff]   ;;  %v1289_v3 = vld [vmem:[#allocation2 + $0x8] ss:$16 sps:$4 sm:$0xff]   ;;  %984 = vmatprep.subr.bf16.mxu1 %v1286_v1  ;;  %v1290_v4 = vld [vmem:[#allocation2 + $0x24] ss:$16 sps:$4 sm:$0xff]  }
  0x27   :  { %879 = vmatpush1.bf16.msra.mxu0 %v1288_v2  ;;  %985 = vmatpush1.bf16.msra.mxu1 %v1289_v3  ;;  %v1292_v5 = vld [vmem:[#allocation2 + $0x2c] ss:$16 sps:$4 sm:$0xff]   ;;  %v1294_v6 = vld [vmem:[#allocation2 + $0x20] ss:$16 sps:$4 sm:$0xff]   ;;  %v1295_v7 = vld [vmem:[#allocation2 + $0x28] ss:$16 sps:$4 sm:$0xff]  }
  0x28   :  { %880 = vmatprep.subr.bf16.mxu0 %v1290_v4  ;;  %986 = vmatprep.subr.bf16.mxu1 %v1292_v5  ;;  %v1296_v8 = vld [vmem:[#allocation2 + $0x44] ss:$16 sps:$4 sm:$0xff]   ;;  %v1298_v9 = vld [vmem:[#allocation2 + $0x4c] ss:$16 sps:$4 sm:$0xff]   ;;  %v1300_v10 = vld [vmem:[#allocation2 + $0x40] ss:$16 sps:$4 sm:$0xff]  }
  0x29   :  { %v1301_v11 = vld [vmem:[#allocation2 + $0x48] ss:$16 sps:$4 sm:$0xff]   ;;  %v1302_v12 = vld [vmem:[#allocation2 + $0x64] ss:$16 sps:$4 sm:$0xff]   ;;  %v1304_v13 = vld [vmem:[#allocation2 + $0x6c] ss:$16 sps:$4 sm:$0xff]  }
  0x2a   :  { %v1306_v14 = vld [vmem:[#allocation2 + $0x60] ss:$16 sps:$4 sm:$0xff]   ;;  %v1307_v15 = vld [vmem:[#allocation2 + $0x68] ss:$16 sps:$4 sm:$0xff]   ;;  %v1308_v16 = vld [vmem:[#allocation2 + $0x84] ss:$16 sps:$4 sm:$0xff]  }
  0x2b   :  { %881 = vmatpush1.bf16.msra.mxu0 %v1294_v6  ;;  %987 = vmatpush1.bf16.msra.mxu1 %v1295_v7  ;;  %v1310_v17 = vld [vmem:[#allocation2 + $0x8c] ss:$16 sps:$4 sm:$0xff]   ;;  %v1312_v18 = vld [vmem:[#allocation2 + $0x80] ss:$16 sps:$4 sm:$0xff]   ;;  %v1313_v19 = vld [vmem:[#allocation2 + $0x88] ss:$16 sps:$4 sm:$0xff]  }
  0x2c   :  { %882 = vmatprep.subr.bf16.mxu0 %v1296_v8  ;;  %988 = vmatprep.subr.bf16.mxu1 %v1298_v9  ;;  %v1314_v20 = vld [vmem:[#allocation2 + $0xa4] ss:$16 sps:$4 sm:$0xff]   ;;  %v1316_v21 = vld [vmem:[#allocation2 + $0xac] ss:$16 sps:$4 sm:$0xff]   ;;  %v1318_v22 = vld [vmem:[#allocation2 + $0xa0] ss:$16 sps:$4 sm:$0xff]  }
  0x2d   :  { %v1319_v23 = vld [vmem:[#allocation2 + $0xa8] ss:$16 sps:$4 sm:$0xff]   ;;  %v1320_v24 = vld [vmem:[#allocation2 + $0xc4] ss:$16 sps:$4 sm:$0xff]   ;;  %v1322_v25 = vld [vmem:[#allocation2 + $0xcc] ss:$16 sps:$4 sm:$0xff]  }
  0x2e   :  { %v1324_v26 = vld [vmem:[#allocation2 + $0xc0] ss:$16 sps:$4 sm:$0xff]   ;;  %v1325_v27 = vld [vmem:[#allocation2 + $0xc8] ss:$16 sps:$4 sm:$0xff]   ;;  %v1326_v28 = vld [vmem:[#allocation2 + $0xe4] ss:$16 sps:$4 sm:$0xff]  }
  0x2f   :  { %883 = vmatpush1.bf16.msra.mxu0 %v1300_v10  ;;  %989 = vmatpush1.bf16.msra.mxu1 %v1301_v11  ;;  %v1328_v29 = vld [vmem:[#allocation2 + $0xec] ss:$16 sps:$4 sm:$0xff]   ;;  %v1330_v30 = vld [vmem:[#allocation2 + $0xe0] ss:$16 sps:$4 sm:$0xff]   ;;  %v1331_v31 = vld [vmem:[#allocation2 + $0xe8] ss:$16 sps:$4 sm:$0xff]  }
  0x30   :  { %884 = vmatprep.subr.bf16.mxu0 %v1302_v12  ;;  %990 = vmatprep.subr.bf16.mxu1 %v1304_v13  ;;  %v1332_v32 = vld [vmem:[#allocation2 + $0x104] ss:$16 sps:$4 sm:$0xff]   ;;  %v1334_v33 = vld [vmem:[#allocation2 + $0x10c] ss:$16 sps:$4 sm:$0xff]   ;;  %v1336_v34 = vld [vmem:[#allocation2 + $0x100] ss:$16 sps:$4 sm:$0xff]  }
  0x31   :  { %v1337_v35 = vld [vmem:[#allocation2 + $0x108] ss:$16 sps:$4 sm:$0xff]   ;;  %v1338_v36 = vld [vmem:[#allocation2 + $0x124] ss:$16 sps:$4 sm:$0xff]   ;;  %v1340_v37 = vld [vmem:[#allocation2 + $0x12c] ss:$16 sps:$4 sm:$0xff]  }
  0x32   :  { %v1342_v38 = vld [vmem:[#allocation2 + $0x120] ss:$16 sps:$4 sm:$0xff]   ;;  %v1343_v39 = vld [vmem:[#allocation2 + $0x128] ss:$16 sps:$4 sm:$0xff]   ;;  %v1344_v40 = vld [vmem:[#allocation2 + $0x144] ss:$16 sps:$4 sm:$0xff]  }
  0x33   :  { %885 = vmatpush1.bf16.msra.mxu0 %v1306_v14  ;;  %991 = vmatpush1.bf16.msra.mxu1 %v1307_v15  ;;  %v1346_v41 = vld [vmem:[#allocation2 + $0x14c] ss:$16 sps:$4 sm:$0xff]   ;;  %v1348_v42 = vld [vmem:[#allocation2 + $0x140] ss:$16 sps:$4 sm:$0xff]   ;;  %v1349_v43 = vld [vmem:[#allocation2 + $0x148] ss:$16 sps:$4 sm:$0xff]  }
  0x34   :  { %886 = vmatprep.subr.bf16.mxu0 %v1308_v16  ;;  %992 = vmatprep.subr.bf16.mxu1 %v1310_v17  ;;  %v1350_v44 = vld [vmem:[#allocation2 + $0x164] ss:$16 sps:$4 sm:$0xff]   ;;  %v1352_v45 = vld [vmem:[#allocation2 + $0x16c] ss:$16 sps:$4 sm:$0xff]   ;;  %v1354_v46 = vld [vmem:[#allocation2 + $0x160] ss:$16 sps:$4 sm:$0xff]  }
  0x35   :  { %v1355_v47 = vld [vmem:[#allocation2 + $0x168] ss:$16 sps:$4 sm:$0xff]   ;;  %v1382_v48 = vld [vmem:[%s1656_s0 + $0x4] ss:$16 sps:$4 sm:$0xff]   ;;  %v1358_v50 = vld [vmem:[#allocation2 + $0x18c] ss:$16 sps:$4 sm:$0xff]  }
  0x36   :  { %v1356_v49 = vld [vmem:[#allocation2 + $0x184] ss:$16 sps:$4 sm:$0xff]   ;;  %910 = vmatprep.mubr.bf16.mxu0 %v1382_v48  ;;  %1016 = vmatprep.mubr.bf16.mxu1 %v1382_v48  ;;  %v1360_v51 = vld [vmem:[#allocation2 + $0x180] ss:$16 sps:$4 sm:$0xff]   ;;  %v1361_v52 = vld [vmem:[#allocation2 + $0x188] ss:$16 sps:$4 sm:$0xff]  }
  0x37   :  { %887 = vmatpush1.bf16.msra.mxu0 %v1312_v18  ;;  %993 = vmatpush1.bf16.msra.mxu1 %v1313_v19  ;;  %v1362_v53 = vld [vmem:[#allocation2 + $0x1a4] ss:$16 sps:$4 sm:$0xff]   ;;  %v1364_v54 = vld [vmem:[#allocation2 + $0x1ac] ss:$16 sps:$4 sm:$0xff]   ;;  %v1366_v55 = vld [vmem:[#allocation2 + $0x1a0] ss:$16 sps:$4 sm:$0xff]  }
  0x38   :  { %888 = vmatprep.subr.bf16.mxu0 %v1314_v20  ;;  %994 = vmatprep.subr.bf16.mxu1 %v1316_v21  ;;  %v1367_v56 = vld [vmem:[#allocation2 + $0x1a8] ss:$16 sps:$4 sm:$0xff]   ;;  %v1368_v57 = vld [vmem:[#allocation2 + $0x1c4] ss:$16 sps:$4 sm:$0xff]   ;;  %v1370_v58 = vld [vmem:[#allocation2 + $0x1cc] ss:$16 sps:$4 sm:$0xff]  }
  0x39   :  { %v1372_v59 = vld [vmem:[#allocation2 + $0x1c0] ss:$16 sps:$4 sm:$0xff]   ;;  %v1373_v60 = vld [vmem:[#allocation2 + $0x1c8] ss:$16 sps:$4 sm:$0xff]   ;;  %v1374_v61 = vld [vmem:[#allocation2 + $0x1e4] ss:$16 sps:$4 sm:$0xff]  }
  0x3a   :  { %v1376_v62 = vld [vmem:[#allocation2 + $0x1ec] ss:$16 sps:$4 sm:$0xff]   ;;  %v1378_v63 = vld [vmem:[#allocation2 + $0x1e0] ss:$16 sps:$4 sm:$0xff]   ;;  %v1379_v0 = vld [vmem:[#allocation2 + $0x1e8] ss:$16 sps:$4 sm:$0xff]  }
  0x3b   :  { %889 = vmatpush1.bf16.msra.mxu0 %v1318_v22  ;;  %995 = vmatpush1.bf16.msra.mxu1 %v1319_v23  ;;  %v1385_v1 = vld [vmem:[#allocation2 + $0x204] ss:$16 sps:$4 sm:$0xff]   ;;  %v1388_v2 = vld [vmem:[#allocation2 + $0x20c] ss:$16 sps:$4 sm:$0xff]   ;;  %v1380_v3 = vld [vmem:[%s1656_s0] ss:$16 sps:$4 sm:$0xff]  }
  0x3c   :  { %890 = vmatprep.subr.bf16.mxu0 %v1320_v24  ;;  %996 = vmatprep.subr.bf16.mxu1 %v1322_v25  ;;  %v1383_v4 = vld [vmem:[#allocation2 + $0x200] ss:$16 sps:$4 sm:$0xff]   ;;  %v1386_v5 = vld [vmem:[#allocation2 + $0x208] ss:$16 sps:$4 sm:$0xff]   ;;  %v1391_v6 = vld [vmem:[#allocation2 + $0x224] ss:$16 sps:$4 sm:$0xff]  }
  0x3d   :  { %v1394_v7 = vld [vmem:[#allocation2 + $0x22c] ss:$16 sps:$4 sm:$0xff]   ;;  %v1389_v8 = vld [vmem:[#allocation2 + $0x220] ss:$16 sps:$4 sm:$0xff]   ;;  %v1392_v9 = vld [vmem:[#allocation2 + $0x228] ss:$16 sps:$4 sm:$0xff]  }
  0x3e   :  { %v1397_v10 = vld [vmem:[#allocation2 + $0x244] ss:$16 sps:$4 sm:$0xff]   ;;  %v1400_v11 = vld [vmem:[#allocation2 + $0x24c] ss:$16 sps:$4 sm:$0xff]   ;;  %v1395_v12 = vld [vmem:[#allocation2 + $0x240] ss:$16 sps:$4 sm:$0xff]  }
  0x3f   :  { %891 = vmatpush1.bf16.msra.mxu0 %v1324_v26  ;;  %997 = vmatpush1.bf16.msra.mxu1 %v1325_v27  ;;  %v1398_v13 = vld [vmem:[#allocation2 + $0x248] ss:$16 sps:$4 sm:$0xff]   ;;  %v1403_v14 = vld [vmem:[#allocation2 + $0x264] ss:$16 sps:$4 sm:$0xff]   ;;  %v1406_v15 = vld [vmem:[#allocation2 + $0x26c] ss:$16 sps:$4 sm:$0xff]  }
  0x40   :  { %892 = vmatprep.subr.bf16.mxu0 %v1326_v28  ;;  %998 = vmatprep.subr.bf16.mxu1 %v1328_v29  ;;  %v1401_v16 = vld [vmem:[#allocation2 + $0x260] ss:$16 sps:$4 sm:$0xff]   ;;  %v1404_v17 = vld [vmem:[#allocation2 + $0x268] ss:$16 sps:$4 sm:$0xff]   ;;  %v1409_v18 = vld [vmem:[#allocation2 + $0x284] ss:$16 sps:$4 sm:$0xff]  }
  0x41   :  { %v1412_v19 = vld [vmem:[#allocation2 + $0x28c] ss:$16 sps:$4 sm:$0xff]   ;;  %v1407_v20 = vld [vmem:[#allocation2 + $0x280] ss:$16 sps:$4 sm:$0xff]   ;;  %v1410_v21 = vld [vmem:[#allocation2 + $0x288] ss:$16 sps:$4 sm:$0xff]  }
  0x42   :  { %v1415_v22 = vld [vmem:[#allocation2 + $0x2a4] ss:$16 sps:$4 sm:$0xff]   ;;  %v1418_v23 = vld [vmem:[#allocation2 + $0x2ac] ss:$16 sps:$4 sm:$0xff]   ;;  %v1413_v24 = vld [vmem:[#allocation2 + $0x2a0] ss:$16 sps:$4 sm:$0xff]  }
  0x43   :  { %893 = vmatpush1.bf16.msra.mxu0 %v1330_v30  ;;  %999 = vmatpush1.bf16.msra.mxu1 %v1331_v31  ;;  %v1467_v25 = vld [vmem:[%s1656_s0 + $0x24] ss:$16 sps:$4 sm:$0xff]   ;;  %v1416_v26 = vld [vmem:[#allocation2 + $0x2a8] ss:$16 sps:$4 sm:$0xff]   ;;  %v1469_v27 = vld [vmem:[%s1656_s0 + $0x20] ss:$16 sps:$4 sm:$0xff]  }
  0x44   :  { %894 = vmatprep.subr.bf16.mxu0 %v1332_v32  ;;  %1000 = vmatprep.subr.bf16.mxu1 %v1334_v33  ;;  %v1421_v28 = vld [vmem:[#allocation2 + $0x2c4] ss:$16 sps:$4 sm:$0xff]   ;;  %v1424_v29 = vld [vmem:[#allocation2 + $0x2cc] ss:$16 sps:$4 sm:$0xff]   ;;  %v1419_v30 = vld [vmem:[#allocation2 + $0x2c0] ss:$16 sps:$4 sm:$0xff]  }
  0x45   :  { %v1422_v31 = vld [vmem:[#allocation2 + $0x2c8] ss:$16 sps:$4 sm:$0xff]   ;;  %v1427_v32 = vld [vmem:[#allocation2 + $0x2e4] ss:$16 sps:$4 sm:$0xff]   ;;  %v1430_v33 = vld [vmem:[#allocation2 + $0x2ec] ss:$16 sps:$4 sm:$0xff]  }
  0x46   :  { %v1446_v48 = vld [vmem:[#allocation2 + $0x348] ss:$16 sps:$4 sm:$0xff]  }
  0x47   :  { %895 = vmatpush1.bf16.msra.mxu0 %v1336_v34  ;;  %1001 = vmatpush1.bf16.msra.mxu1 %v1337_v35  ;;  %v1484_v34 = vld [vmem:[%s1656_s0 + $0xc] ss:$16 sps:$4 sm:$0xff]   ;;  %v1425_v35 = vld [vmem:[#allocation2 + $0x2e0] ss:$16 sps:$4 sm:$0xff]  }
  0x48   :  { %896 = vmatprep.subr.bf16.mxu0 %v1338_v36  ;;  %1002 = vmatprep.subr.bf16.mxu1 %v1340_v37  ;;  %v1428_v36 = vld [vmem:[#allocation2 + $0x2e8] ss:$16 sps:$4 sm:$0xff]   ;;  %v1433_v37 = vld [vmem:[#allocation2 + $0x304] ss:$16 sps:$4 sm:$0xff]  }
  0x4b   :  { %897 = vmatpush1.bf16.msra.mxu0 %v1342_v38  ;;  %1003 = vmatpush1.bf16.msra.mxu1 %v1343_v39  ;;  %v1436_v38 = vld [vmem:[#allocation2 + $0x30c] ss:$16 sps:$4 sm:$0xff]   ;;  %v1431_v39 = vld [vmem:[#allocation2 + $0x300] ss:$16 sps:$4 sm:$0xff]  }
  0x4c   :  { %898 = vmatprep.subr.bf16.mxu0 %v1344_v40  ;;  %1004 = vmatprep.subr.bf16.mxu1 %v1346_v41  ;;  %v1434_v40 = vld [vmem:[#allocation2 + $0x308] ss:$16 sps:$4 sm:$0xff]   ;;  %v1439_v41 = vld [vmem:[#allocation2 + $0x324] ss:$16 sps:$4 sm:$0xff]  }
  0x4f   :  { %899 = vmatpush1.bf16.msra.mxu0 %v1348_v42  ;;  %1005 = vmatpush1.bf16.msra.mxu1 %v1349_v43  ;;  %v1442_v42 = vld [vmem:[#allocation2 + $0x32c] ss:$16 sps:$4 sm:$0xff]   ;;  %v1437_v43 = vld [vmem:[#allocation2 + $0x320] ss:$16 sps:$4 sm:$0xff]  }
  0x50   :  { %900 = vmatprep.subr.bf16.mxu0 %v1350_v44  ;;  %1006 = vmatprep.subr.bf16.mxu1 %v1352_v45  ;;  %v1440_v44 = vld [vmem:[#allocation2 + $0x328] ss:$16 sps:$4 sm:$0xff]   ;;  %v1445_v45 = vld [vmem:[#allocation2 + $0x344] ss:$16 sps:$4 sm:$0xff]  }
  0x53   :  { %901 = vmatpush1.bf16.msra.mxu0 %v1354_v46  ;;  %1007 = vmatpush1.bf16.msra.mxu1 %v1355_v47  ;;  %v1448_v46 = vld [vmem:[#allocation2 + $0x34c] ss:$16 sps:$4 sm:$0xff]   ;;  %v1443_v47 = vld [vmem:[#allocation2 + $0x340] ss:$16 sps:$4 sm:$0xff]  }
  0x54   :  { %902 = vmatprep.subr.bf16.mxu0 %v1356_v49  ;;  %1008 = vmatprep.subr.bf16.mxu1 %v1358_v50  ;;  %v1451_v49 = vld [vmem:[#allocation2 + $0x364] ss:$16 sps:$4 sm:$0xff]   ;;  %v1454_v50 = vld [vmem:[#allocation2 + $0x36c] ss:$16 sps:$4 sm:$0xff]  }
  0x57   :  { %903 = vmatpush1.bf16.msra.mxu0 %v1360_v51  ;;  %1009 = vmatpush1.bf16.msra.mxu1 %v1361_v52  ;;  %v1449_v51 = vld [vmem:[#allocation2 + $0x360] ss:$16 sps:$4 sm:$0xff]   ;;  %v1452_v52 = vld [vmem:[#allocation2 + $0x368] ss:$16 sps:$4 sm:$0xff]  }
  0x58   :  { %904 = vmatprep.subr.bf16.mxu0 %v1362_v53  ;;  %1010 = vmatprep.subr.bf16.mxu1 %v1364_v54  ;;  %v1457_v53 = vld [vmem:[#allocation2 + $0x384] ss:$16 sps:$4 sm:$0xff]   ;;  %v1460_v54 = vld [vmem:[#allocation2 + $0x38c] ss:$16 sps:$4 sm:$0xff]  }
  0x5b   :  { %905 = vmatpush1.bf16.msra.mxu0 %v1366_v55  ;;  %1011 = vmatpush1.bf16.msra.mxu1 %v1367_v56  ;;  %v1455_v55 = vld [vmem:[#allocation2 + $0x380] ss:$16 sps:$4 sm:$0xff]   ;;  %v1458_v56 = vld [vmem:[#allocation2 + $0x388] ss:$16 sps:$4 sm:$0xff]  }
  0x5c   :  { %906 = vmatprep.subr.bf16.mxu0 %v1368_v57  ;;  %1012 = vmatprep.subr.bf16.mxu1 %v1370_v58  ;;  %v1463_v57 = vld [vmem:[#allocation2 + $0x3a4] ss:$16 sps:$4 sm:$0xff]   ;;  %v1466_v58 = vld [vmem:[#allocation2 + $0x3ac] ss:$16 sps:$4 sm:$0xff]  }
  0x5f   :  { %907 = vmatpush1.bf16.msra.mxu0 %v1372_v59  ;;  %1013 = vmatpush1.bf16.msra.mxu1 %v1373_v60  ;;  %v1461_v59 = vld [vmem:[#allocation2 + $0x3a0] ss:$16 sps:$4 sm:$0xff]   ;;  %v1464_v60 = vld [vmem:[#allocation2 + $0x3a8] ss:$16 sps:$4 sm:$0xff]  }
  0x60   :  { %908 = vmatprep.subr.bf16.mxu0 %v1374_v61  ;;  %1014 = vmatprep.subr.bf16.mxu1 %v1376_v62  ;;  %v1472_v61 = vld [vmem:[#allocation2 + $0x3c4] ss:$16 sps:$4 sm:$0xff]   ;;  %v1475_v62 = vld [vmem:[#allocation2 + $0x3cc] ss:$16 sps:$4 sm:$0xff]  }
  0x63   :  { %909 = vmatpush1.bf16.msra.mxu0 %v1378_v63  ;;  %1015 = vmatpush1.bf16.msra.mxu1 %v1379_v0  ;;  %v1470_v63 = vld [vmem:[#allocation2 + $0x3c0] ss:$16 sps:$4 sm:$0xff]   ;;  %v1473_v0 = vld [vmem:[#allocation2 + $0x3c8] ss:$16 sps:$4 sm:$0xff]  }
  0x64   :  { %931 = vmatprep.subr.bf16.mxu0 %v1385_v1  ;;  %1037 = vmatprep.subr.bf16.mxu1 %v1388_v2  ;;  %v1478_v1 = vld [vmem:[#allocation2 + $0x3e4] ss:$16 sps:$4 sm:$0xff]   ;;  %v1481_v2 = vld [vmem:[#allocation2 + $0x3ec] ss:$16 sps:$4 sm:$0xff]  }
  0x66   :  { %911 = vmatmul.mubr.bf16.vlgmr.msra.gmra.mrb[0].mxu0 %v1380_v3  ;;  %1017 = vmatmul.mubr.bf16.vlgmr.msra.gmra.mrb[0].mxu1 %v1380_v3  ;;  %v1476_v3 = vld [vmem:[#allocation2 + $0x3e0] ss:$16 sps:$4 sm:$0xff]  }
  0x67   :  { %932 = vmatpush1.bf16.msra.mxu0 %v1383_v4  ;;  %1038 = vmatpush1.bf16.msra.mxu1 %v1386_v5  ;;  %v1479_v4 = vld [vmem:[#allocation2 + $0x3e8] ss:$16 sps:$4 sm:$0xff]  }
  0x68   :  { %933 = vmatprep.subr.bf16.mxu0 %v1391_v6  ;;  %1039 = vmatprep.subr.bf16.mxu1 %v1394_v7  ;;  %v1482_v5 = vld [vmem:[%s1656_s0 + $0x8] ss:$16 sps:$4 sm:$0xff]   ;;  %v1485_v6 = vld [vmem:[%s1656_s0 + $0x2c] ss:$16 sps:$4 sm:$0xff]  }
  0x69   :  { %920 = vmatprep.mubr.bf16.mxu0 %v1467_v25  ;;  %1026 = vmatprep.mubr.bf16.mxu1 %v1467_v25  ;;  %v1487_v7 = vld [vmem:[%s1656_s0 + $0x28] ss:$16 sps:$4 sm:$0xff]  }
  0x6b   :  { %934 = vmatpush1.bf16.msra.mxu0 %v1389_v8  ;;  %1040 = vmatpush1.bf16.msra.mxu1 %v1392_v9  ;;  %v178_v8 = vlaneseq }
  0x6c   :  { %935 = vmatprep.subr.bf16.mxu0 %v1397_v10  ;;  %1041 = vmatprep.subr.bf16.mxu1 %v1400_v11 }
  0x6d   :  { %v179_v9 = vshrl.u32 %v178_v8, 7 }
  0x6e   :  { %921 = vmatmul.mubr.bf16.gmra.mrb[4].mxu0 %v1469_v27  ;;  %1027 = vmatmul.mubr.bf16.gmra.mrb[4].mxu1 %v1469_v27 }
  0x6f   :  { %936 = vmatpush1.bf16.msra.mxu0 %v1395_v12  ;;  %1042 = vmatpush1.bf16.msra.mxu1 %v1398_v13  ;;  %v180_v10 = vsub.s32 0, %v179_v9  ;;  %v188_v11 = vsub.s32 2, %v179_v9  ;;  %v176_v12 = vld [vmem:[#allocation4] sm:$0xf]  ;;  %v184_v13 = vsub.s32 1, %v179_v9 }
  0x70   :  { %937 = vmatprep.subr.bf16.mxu0 %v1403_v14  ;;  %1043 = vmatprep.subr.bf16.mxu1 %v1406_v15  ;;  %v192_v14 = vsub.s32 3, %v179_v9 }
  0x71   :  { %963 = vmatprep.mubr.bf16.mxu0 %v1484_v34  ;;  %1069 = vmatprep.mubr.bf16.mxu1 %v1484_v34  ;;  %v181_v15 = vrot.slane %v176_v12, %v180_v10 }
  0x73   :  { %938 = vmatpush1.bf16.msra.mxu0 %v1401_v16  ;;  %1044 = vmatpush1.bf16.msra.mxu1 %v1404_v17  ;;  %v189_v16 = vrot.slane %v176_v12, %v188_v11  ;;  %v185_v17 = vrot.slane %v176_v12, %v184_v13 }
  0x74   :  { %939 = vmatprep.subr.bf16.mxu0 %v1409_v18  ;;  %1045 = vmatprep.subr.bf16.mxu1 %v1412_v19  ;;  %v193_v18 = vrot.slane %v176_v12, %v192_v14 }
  0x77   :  { %940 = vmatpush1.bf16.msra.mxu0 %v1407_v20  ;;  %1046 = vmatpush1.bf16.msra.mxu1 %v1410_v21 }
  0x78   :  { %941 = vmatprep.subr.bf16.mxu0 %v1415_v22  ;;  %1047 = vmatprep.subr.bf16.mxu1 %v1418_v23 }
  0x7b   :  { %942 = vmatpush1.bf16.msra.mxu0 %v1413_v24  ;;  %1048 = vmatpush1.bf16.msra.mxu1 %v1416_v26 }
  0x7c   :  { %943 = vmatprep.subr.bf16.mxu0 %v1421_v28  ;;  %1049 = vmatprep.subr.bf16.mxu1 %v1424_v29 }
  0x7f   :  { %944 = vmatpush1.bf16.msra.mxu0 %v1419_v30  ;;  %1050 = vmatpush1.bf16.msra.mxu1 %v1422_v31 }
  0x80   :  { %945 = vmatprep.subr.bf16.mxu0 %v1427_v32  ;;  %1051 = vmatprep.subr.bf16.mxu1 %v1430_v33 }
  0x83   :  { %946 = vmatpush1.bf16.msra.mxu0 %v1425_v35  ;;  %1052 = vmatpush1.bf16.msra.mxu1 %v1428_v36 }
  0x84   :  { %947 = vmatprep.subr.bf16.mxu0 %v1433_v37  ;;  %1053 = vmatprep.subr.bf16.mxu1 %v1436_v38 }
  0x87   :  { %948 = vmatpush1.bf16.msra.mxu0 %v1431_v39  ;;  %1054 = vmatpush1.bf16.msra.mxu1 %v1434_v40 }
  0x88   :  { %949 = vmatprep.subr.bf16.mxu0 %v1439_v41  ;;  %1055 = vmatprep.subr.bf16.mxu1 %v1442_v42 }
  0x8b   :  { %950 = vmatpush1.bf16.msra.mxu0 %v1437_v43  ;;  %1056 = vmatpush1.bf16.msra.mxu1 %v1440_v44 }
  0x8c   :  { %951 = vmatprep.subr.bf16.mxu0 %v1445_v45  ;;  %1057 = vmatprep.subr.bf16.mxu1 %v1448_v46 }
  0x8f   :  { %952 = vmatpush1.bf16.msra.mxu0 %v1443_v47  ;;  %1058 = vmatpush1.bf16.msra.mxu1 %v1446_v48 }
  0x90   :  { %953 = vmatprep.subr.bf16.mxu0 %v1451_v49  ;;  %1059 = vmatprep.subr.bf16.mxu1 %v1454_v50 }
  0x93   :  { %954 = vmatpush1.bf16.msra.mxu0 %v1449_v51  ;;  %1060 = vmatpush1.bf16.msra.mxu1 %v1452_v52 }
  0x94   :  { %955 = vmatprep.subr.bf16.mxu0 %v1457_v53  ;;  %1061 = vmatprep.subr.bf16.mxu1 %v1460_v54 }
  0x97   :  { %956 = vmatpush1.bf16.msra.mxu0 %v1455_v55  ;;  %1062 = vmatpush1.bf16.msra.mxu1 %v1458_v56 }
  0x98   :  { %957 = vmatprep.subr.bf16.mxu0 %v1463_v57  ;;  %1063 = vmatprep.subr.bf16.mxu1 %v1466_v58 }
  0x9b   :  { %958 = vmatpush1.bf16.msra.mxu0 %v1461_v59  ;;  %1064 = vmatpush1.bf16.msra.mxu1 %v1464_v60 }
  0x9c   :  { %959 = vmatprep.subr.bf16.mxu0 %v1472_v61  ;;  %1065 = vmatprep.subr.bf16.mxu1 %v1475_v62 }
  0x9f   :  { %960 = vmatpush1.bf16.msra.mxu0 %v1470_v63  ;;  %1066 = vmatpush1.bf16.msra.mxu1 %v1473_v0 }
  0xa0   :  { %961 = vmatprep.subr.bf16.mxu0 %v1478_v1  ;;  %1067 = vmatprep.subr.bf16.mxu1 %v1481_v2 }
  0xa3   :  { %962 = vmatpush1.bf16.msra.mxu0 %v1476_v3  ;;  %1068 = vmatpush1.bf16.msra.mxu1 %v1479_v4 }
  0xa6   :  { %964 = vmatmul.mubr.bf16.vlgmr.msra.gmra.mrb[0].mxu0 %v1482_v5  ;;  %1070 = vmatmul.mubr.bf16.vlgmr.msra.gmra.mrb[0].mxu1 %v1482_v5 }
  0xa7   :  { %973 = vmatprep.mubr.bf16.mxu0 %v1485_v6  ;;  %1079 = vmatprep.mubr.bf16.mxu1 %v1485_v6 }
  0xae   :  { %974 = vmatmul.mubr.bf16.gmra.mrb[4].mxu0 %v1487_v7  ;;  %1080 = vmatmul.mubr.bf16.gmra.mrb[4].mxu1 %v1487_v7 }
 0x179   :  { %v965_v19 = vpop.f32.mrb[0].mxu0  ;;  %v1071_v20 = vpop.f32.mrb[0].mxu1 }
 0x17a   :  { %v1248_v21 = vadd.f32 %v965_v19, %v181_v15  ;;  %v1256_v22 = vadd.f32 %v1071_v20, %v189_v16  ;;  %v967_v23 = vpop.f32.mrb[1].mxu0  ;;  %v1073_v24 = vpop.f32.mrb[1].mxu1 }
 0x17b   :  { %v1249_v25 = vadd.f32 %v967_v23, %v185_v17  ;;  %v1257_v26 = vadd.f32 %v1073_v24, %v193_v18  ;;  %v969_v27 = vpop.f32.mrb[2].mxu0  ;;  %v1075_v28 = vpop.f32.mrb[2].mxu1 }
 0x17c   :  { %1090 = vst [vmem:[%s1659_s3] sm:$0xff] %v1248_v21  ;;  %1092 = vst [vmem:[%s1659_s3 + $0x10] sm:$0xff] %v1256_v22  ;;  %v1250_v29 = vadd.f32 %v969_v27, %v181_v15  ;;  %v1258_v30 = vadd.f32 %v1075_v28, %v189_v16  ;;  %v971_v31 = vpop.f32.mrb[3].mxu0  ;;  %v1077_v32 = vpop.f32.mrb[3].mxu1 }
 0x17d   :  { %1091 = vst [vmem:[%s1659_s3 + $0x8] sm:$0xff] %v1249_v25  ;;  %1093 = vst [vmem:[%s1659_s3 + $0x18] sm:$0xff] %v1257_v26  ;;  %v1251_v33 = vadd.f32 %v971_v31, %v185_v17  ;;  %v1259_v34 = vadd.f32 %v1077_v32, %v193_v18 }
 0x17e   :  { %1094 = vst [vmem:[%s1659_s3 + $0x20] sm:$0xff] %v1250_v29  ;;  %1096 = vst [vmem:[%s1659_s3 + $0x30] sm:$0xff] %v1258_v30 }
 0x17f   :  { %1095 = vst [vmem:[%s1659_s3 + $0x28] sm:$0xff] %v1251_v33  ;;  %1097 = vst [vmem:[%s1659_s3 + $0x38] sm:$0xff] %v1259_v34 }
 0x181   :  { %v975_v35 = vpop.f32.mrb[4].mxu0  ;;  %v1081_v36 = vpop.f32.mrb[4].mxu1 }
 0x182   :  { %v1252_v37 = vadd.f32 %v975_v35, %v181_v15  ;;  %v1260_v38 = vadd.f32 %v1081_v36, %v189_v16  ;;  %v977_v39 = vpop.f32.mrb[5].mxu0  ;;  %v1083_v40 = vpop.f32.mrb[5].mxu1 }
 0x183   :  { %v1253_v41 = vadd.f32 %v977_v39, %v185_v17  ;;  %v1261_v42 = vadd.f32 %v1083_v40, %v193_v18  ;;  %v979_v43 = vpop.f32.mrb[6].mxu0  ;;  %v1085_v44 = vpop.f32.mrb[6].mxu1 }
 0x184   :  { %1098 = vst [vmem:[%s1659_s3 + $0x40] sm:$0xff] %v1252_v37  ;;  %1100 = vst [vmem:[%s1659_s3 + $0x50] sm:$0xff] %v1260_v38  ;;  %v1254_v45 = vadd.f32 %v979_v43, %v181_v15  ;;  %v1262_v46 = vadd.f32 %v1085_v44, %v189_v16  ;;  %v981_v47 = vpop.f32.mrb[7].mxu0  ;;  %v1087_v48 = vpop.f32.mrb[7].mxu1 }
 0x185   :  { %1099 = vst [vmem:[%s1659_s3 + $0x48] sm:$0xff] %v1253_v41  ;;  %1101 = vst [vmem:[%s1659_s3 + $0x58] sm:$0xff] %v1261_v42  ;;  %v1255_v49 = vadd.f32 %v981_v47, %v185_v17  ;;  %v1263_v50 = vadd.f32 %v1087_v48, %v193_v18 }
 0x186   :  { %1102 = vst [vmem:[%s1659_s3 + $0x60] sm:$0xff] %v1254_v45  ;;  %1104 = vst [vmem:[%s1659_s3 + $0x70] sm:$0xff] %v1262_v46 }
 0x187   :  { %1103 = vst [vmem:[%s1659_s3 + $0x68] sm:$0xff] %v1255_v49  ;;  %1105 = vst [vmem:[%s1659_s3 + $0x78] sm:$0xff] %v1263_v50 }
 0x188   :  { %1110 = vsyncpa [#allocation3], 1 }
 0x189   :  { %1111 = vsyncpa [#allocation5], 1 }

// kernel: backbone_forward.16
= control target key start
LH: loop header
LB: loop body
LE: loop exit
PB: predicated region body
PF: predicated region fallthrough
CT: control target
= control target key end

     0   :  { %8 = vsyncpa [#allocation3], 0  ;;  %s3364_s0 = inlined_call_operand.vmem [shape: bf16[8,512], index: 0, kind: input, shape index: {}]   ;;  %s3365_s1 = inlined_call_operand.hbm [shape: bf16[512,2048], index: 1, kind: input, shape index: {}]   ;;  %s3366_s2 = inlined_call_operand.hbm [shape: f32[1,2048], index: 2, kind: input, shape index: {}]   ;;  %s3367_s3 = inlined_call_operand.vmem [shape: bf16[8,2048], index: 3, kind: output, shape index: {}]  }
   0x1   :  { %10 = vsyncpa [#allocation3 + $0x1], 0 }
   0x2   :  { %11 = vsyncpa [#allocation5], 0 }
   0x3   :  { %13 = vsyncpa [#allocation5 + $0x1], 0  ;;  %s2890_s12 = smov 0   ;;  %s2892_s13 = smov 0  }
   0x4   :  { %s2894_s14 = smov 0   ;;  %s2896_s15 = smov 0  }
   0x5   :  { %s2898_s16 = smov 0   ;;  %s2900_s17 = smov 0  }
   0x6 LB: > { %s2370_s18 = sadd.s32 4294967295, %s2863_s17   ;;  %s31_s19 = sadd.s32 1, %s2859_s16  ;;  %s2863_s17 = sphi %s2900_s17, %s19_s17   ;;  %s2859_s16 = sphi %s2898_s16, %s3380_s16   ;;  %s2855_s15 = sphi %s2896_s15, %s3379_s15   ;;  %s2851_s14 = sphi %s2894_s14, %s3378_s14   ;;  %s2847_s13 = sphi %s2892_s13, %s3377_s13   ;;  %s2843_s12 = sphi %s2890_s12, %s3376_s12  }
   0x7   : > { %p33_p0 = scmp.ge.s32.totalorder %s31_s19, 2  ;;  %s64_s20 = sadd.s32 1, %s2851_s14 }
   0x8   : > { %p71_p1 = scmp.ne.s32.totalorder %s2851_s14, %s2847_s13  ;;  %p72_p2 = scmp.eq.s32.totalorder %s2863_s17, 0 }
   0x9   : > { %s3382_s19 = smov (%p33_p0, %s31_s19), 0  ;;  %p77_p4 = scmp.ne.s32.totalorder %s2847_s13, %s2843_s12 }
   0xa   : > { %p2926_p3 = por %p72_p2, %p71_p1  ;;  %s61_s22 = ssub.s32 %s2859_s16, %s3382_s19 }
   0xb   : > { %p78_p5 = scmp.eq.s32.totalorder %s2370_s18, 0  ;;  %p62_p6 = scmp.eq.s32.totalorder %s61_s22, 0 }
   0xc   : > { %p2693_p8 = scmp.lt.s32.totalorder %s2863_s17, 2  ;;  %s2942_s25 = sand.u32 1, %s2851_s14  }
   0xd   : > { %p2933_p7 = por %p78_p5, %p77_p4  ;;  %s2652_s26 = sshll.u32 %s2859_s16, 9 }
   0xe   : > { %s2939_s24 = scalar_select %p62_p6, %s2851_s14, %s64_s20  }
   0xf   : > { %s3370_s23 = scalar_select %p2933_p7, 1, 0 }
  0x10   : > { %s2375_s27 = sshll.u32 %s2942_s25, 11  ;;  %s2949_s30 = scalar_lea.hbm %s3365_s1, %s2652_s26 }
  0x11   : > { %s167_s4 = scalar_lea.vmem [#allocation2], %s2375_s27  ;;  %p2953_p9 = pnand %p2693_p8, %p2926_p3 }
  0x12   : > { %s174_s5 = sshll.u32 %s167_s4, 4  ;;  %s164_s7 = scalar_lea.sflag [#allocation3], %s2942_s25  ;;  %s2957_s5 = int_to_ptr.vmem [resolvable:$true] %s174_s5 }
  0x13   : > { %s2749_s8 = scalar_lea.hbm %s2949_s30, 32768  ;;  %p2751_p12 = pneg %p2953_p9 }
  0x14   : > { %p2750_p11 = scmp.ne.s32.totalorder %s2949_s30, %s2749_s8  ;;  %s2754_s11 = scalar_lea.hbm %s3365_s1, 65536 }
  0x15   : > { %p2755_p1 = scmp.lt.u32.totalorder %s2949_s30, %s3365_s1  ;;  %p2756_p2 = scmp.lt.u32.totalorder %s2754_s11, %s2749_s8 }
  0x16   : > { %p2752_p13 = pnand %p2751_p12, %p2750_p11  ;;  %p2758_p4 = scmp.lt.u32.totalorder %s2749_s8, %s2949_s30 }
  0x17   : > { %p2757_p3 = por %p2756_p2, %p2755_p1 }
  0x18   : > { %p2753_p0 = pneg %p2752_p13 }
  0x19   : > { %p2759_p5 = por %p2758_p4, %p2757_p3 }
  0x1b   : > { %p2760_p6 = pnand %p2759_p5, %p2753_p0 }
  0x1d   : > { %2763 = shalt.err (!%p2760_p6)
}
  0x1e   : > { %s2764_s20 = scalar_lea.vmem %s2957_s5, 32768  ;;  %s2865_s21 = smov [#allocation2]  }
  0x1f   : > { %p2765_p8 = scmp.ne.s32.totalorder %s2957_s5, %s2764_s20  ;;  %s2769_s22 = sshll.u32 %s2865_s21, 4  ;;  %s2770_s22 = int_to_ptr.vmem [resolvable:$false] %s2769_s22 }
  0x20   : > { %s2771_s26 = scalar_lea.vmem %s2770_s22, 65536  ;;  %p2772_p10 = scmp.lt.s32.totalorder %s2957_s5, %s2770_s22 }
  0x21   : > { %p2767_p11 = pnand %p2765_p8, %p2751_p12  ;;  %p2773_p1 = scmp.lt.s32.totalorder %s2771_s26, %s2764_s20 }
  0x23   : > { %p2768_p13 = pneg %p2767_p11  ;;  %p2774_p2 = por %p2773_p1, %p2772_p10 }
  0x25   : > { %p2775_p3 = pnand %p2774_p2, %p2768_p13 }
  0x27   : > { %2778 = shalt.err (!%p2775_p3)
}
  0x28   : > { %s2866_s27 = smov 1024   ;;  %s2867_s28 = smov 512  }
  0x29   : > { %s2868_s29 = smov 32   ;;  %p201_p0 = scmp.lt.s32.totalorder %s2863_s17, 3 }
  0x2a   : > { %2689 = dma.hbm_to_vmem [thread:$0]  (!%p2953_p9), %s2949_s30, 32768, %s2957_s5, %s164_s7, %s2866_s27, %s2867_s28, %s2868_s29  }
  0x2b   : > { %s2378_s4 = sshll.u32 %s2942_s25, 3  ;;  %s2653_s8 = sshll.u32 %s2859_s16, 7 }
  0x2c   : > { %p3372_p10 = scmp.ge.s32.totalorder %s2863_s17, 1  ;;  %s3000_s12 = scalar_lea.hbm %s3366_s2, %s2653_s8 }
  0x2d   : > { %s188_s18 = scalar_lea.vmem [#allocation4], %s2378_s4  ;;  %s185_s30 = scalar_lea.sflag [#allocation5], %s2942_s25 }
  0x2e   : > { %p2993_p4 = pnand %p3372_p10, %p201_p0  ;;  %s196_s20 = sshll.u32 %s188_s18, 4  ;;  %s197_s20 = int_to_ptr.vmem [resolvable:$true] %s196_s20 }
  0x2f   : > { %s2779_s5 = scalar_lea.hbm %s3000_s12, 128  ;;  %s2784_s22 = scalar_lea.hbm %s3366_s2, 256 }
  0x30   : > { %s3373_s9 = scalar_select %p2993_p4, 1, 0 }
  0x31   : > { %p2780_p5 = scmp.ne.s32.totalorder %s3000_s12, %s2779_s5  ;;  %p2785_p11 = scmp.lt.u32.totalorder %s3000_s12, %s3366_s2 }
  0x32   : > { %p2786_p13 = scmp.lt.u32.totalorder %s2784_s22, %s2779_s5  ;;  %p2788_p2 = scmp.lt.u32.totalorder %s2779_s5, %s3000_s12 }
  0x33   : > { %p2782_p6 = pnand %p2780_p5, %p2751_p12 }
  0x34   : > { %p2787_p1 = por %p2786_p13, %p2785_p11 }
  0x35   : > { %p2783_p8 = pneg %p2782_p6 }
  0x36   : > { %p2789_p3 = por %p2788_p2, %p2787_p1 }
  0x38   : > { %p2790_p0 = pnand %p2789_p3, %p2783_p8 }
  0x3a   : > { %2793 = shalt.err (!%p2790_p0)
}
  0x3b   : > { %s2794_s25 = scalar_lea.vmem %s197_s20, 128  ;;  %s2869_s28 = smov [#allocation4]  }
  0x3c   : > { %p2795_p10 = scmp.ne.s32.totalorder %s197_s20, %s2794_s25  ;;  %s2799_s29 = sshll.u32 %s2869_s28, 4  ;;  %s2800_s29 = int_to_ptr.vmem [resolvable:$false] %s2799_s29 }
  0x3d   : > { %s2801_s4 = scalar_lea.vmem %s2800_s29, 256  ;;  %p2802_p7 = scmp.lt.s32.totalorder %s197_s20, %s2800_s29 }
  0x3e   : > { %p2797_p5 = pnand %p2795_p10, %p2751_p12  ;;  %p2803_p4 = scmp.lt.s32.totalorder %s2801_s4, %s2794_s25 }
  0x40   : > { %p2798_p6 = pneg %p2797_p5  ;;  %p2804_p11 = por %p2803_p4, %p2802_p7 }
  0x42   : > { %p2805_p13 = pnand %p2804_p11, %p2798_p6 }
  0x44   : > { %2808 = shalt.err (!%p2805_p13)
}
  0x45   : > { %2692 = dma.hbm_to_vmem [thread:$0]  (!%p2953_p9), %s3000_s12, 128, %s197_s20, %s185_s30  }
  0x46   : > { %p3374_p8 = scmp.ne.s32.totalorder %s3373_s9, 0 }
  0x47   : > { %s207_s8 = sand.u32 (!%p3374_p8), 1, %s2847_s13   ;;  %p3375_p12 = scmp.ne.s32.totalorder (!%p3374_p8), %s3370_s23, 0 }
  0x48   : > { %205 = sbr.rel (%p3374_p8) target bundleno = 563 (0x233), region = 32  ;;  %s2382_s10 = sshll.u32 (!%p3374_p8), %s207_s8, 11 }
  0x49   : > { %s208_s11 = scalar_lea.sflag (!%p3374_p8), [#allocation3], %s207_s8  ;;  %s3025_s18 = scalar_lea.vmem (!%p3374_p8), [#allocation2], %s2382_s10 }
  0x4f   : > { %2834 = dma.done.wait (%p3375_p12), %s208_s11, 32768  }
  0x50   : > { %2836 = vsyncadd (%p3375_p12), %s208_s11, 4294934528  ;;  %s2383_s5 = sshll.u32 %s207_s8, 3  ;;  %s217_s6 = scalar_lea.sflag [#allocation5], %s207_s8 }
  0x51   : > { %s3031_s7 = scalar_lea.vmem [#allocation4], %s2383_s5 }
  0x52   : > { %2838 = dma.done.wait (%p3375_p12), %s217_s6, 128  }
  0x53   : > { %2840 = vsyncadd (%p3375_p12), %s217_s6, 4294967168  ;;  %v276_v0 = vld [vmem:[%s3025_s18] sm:$0xff]  ;;  %v277_v2 = vld [vmem:[%s3025_s18 + $0x8] sm:$0xff]  ;;  %s2384_s30 = sshll.u32 %s2855_s15, 3 }
  0x54   : > { %v280_v1 = vld [vmem:[%s3025_s18 + $0x20] sm:$0xff]  ;;  %v281_v4 = vld [vmem:[%s3025_s18 + $0x28] sm:$0xff]  ;;  %p267_p7 = scmp.lt.s32.totalorder %s2384_s30, 15 }
  0x55   : > { %v2391_v3 = vcombine.high %v276_v0, %v280_v1  ;;  %v2390_v5 = vcombine.low %v276_v0, %v280_v1  ;;  %v284_v6 = vld [vmem:[%s3025_s18 + $0x40] sm:$0xff]  ;;  %v2393_v8 = vcombine.high %v277_v2, %v281_v4  ;;  %v2392_v9 = vcombine.low %v277_v2, %v281_v4  ;;  %v285_v11 = vld [vmem:[%s3025_s18 + $0x48] sm:$0xff] }
  0x56   : > { %v288_v7 = vld [vmem:[%s3025_s18 + $0x60] sm:$0xff]  ;;  %v289_v12 = vld [vmem:[%s3025_s18 + $0x68] sm:$0xff]  ;;  %s3384_s30 = smov (!%p267_p7, %s2384_s30), 15 }
  0x57   : > { %v2399_v10 = vcombine.high %v284_v6, %v288_v7  ;;  %v292_v13 = vld [vmem:[%s3025_s18 + $0x80] sm:$0xff]  ;;  %1868 = vmatprep.subr.bf16.mxu0 %v2391_v3  ;;  %v2401_v14 = vcombine.high %v285_v11, %v289_v12  ;;  %v293_v16 = vld [vmem:[%s3025_s18 + $0x88] sm:$0xff]  ;;  %1950 = vmatprep.subr.bf16.mxu1 %v2393_v8  ;;  %v2398_v18 = vcombine.low %v284_v6, %v288_v7  ;;  %s2385_s21 = sshll.u32 %s3384_s30, 2 }
  0x58   : > { %v296_v15 = vld [vmem:[%s3025_s18 + $0xa0] sm:$0xff]  ;;  %v297_v17 = vld [vmem:[%s3025_s18 + $0xa8] sm:$0xff]  ;;  %1869 = vmatpush1.bf16.msra.mxu0 %v2390_v5  ;;  %1951 = vmatpush1.bf16.msra.mxu1 %v2392_v9  ;;  %v2400_v19 = vcombine.low %v285_v11, %v289_v12  ;;  %s3340_s26 = scalar_lea.vmem %s3367_s3, %s2385_s21 }
  0x59   : > { %1870 = vmatprep.subr.bf16.mxu0 %v2399_v10  ;;  %v2407_v20 = vcombine.high %v292_v13, %v296_v15  ;;  %1952 = vmatprep.subr.bf16.mxu1 %v2401_v14  ;;  %v2409_v21 = vcombine.high %v293_v16, %v297_v17  ;;  %v300_v22 = vld [vmem:[%s3025_s18 + $0xc0] sm:$0xff]  ;;  %v301_v24 = vld [vmem:[%s3025_s18 + $0xc8] sm:$0xff]  ;;  %v2406_v26 = vcombine.low %v292_v13, %v296_v15 }
  0x5a   : > { %v304_v23 = vld [vmem:[%s3025_s18 + $0xe0] sm:$0xff]  ;;  %v305_v25 = vld [vmem:[%s3025_s18 + $0xe8] sm:$0xff]  ;;  %v2408_v27 = vcombine.low %v293_v16, %v297_v17 }
  0x5b   : > { %v2415_v28 = vcombine.high %v300_v22, %v304_v23  ;;  %v2417_v29 = vcombine.high %v301_v24, %v305_v25  ;;  %v308_v30 = vld [vmem:[%s3025_s18 + $0x100] sm:$0xff]  ;;  %v309_v32 = vld [vmem:[%s3025_s18 + $0x108] sm:$0xff]  ;;  %v2414_v34 = vcombine.low %v300_v22, %v304_v23  ;;  %v2416_v35 = vcombine.low %v301_v24, %v305_v25 }
  0x5c   : > { %1871 = vmatpush1.bf16.msra.mxu0 %v2398_v18  ;;  %1953 = vmatpush1.bf16.msra.mxu1 %v2400_v19  ;;  %v312_v31 = vld [vmem:[%s3025_s18 + $0x120] sm:$0xff]  ;;  %v313_v33 = vld [vmem:[%s3025_s18 + $0x128] sm:$0xff] }
  0x5d   : > { %1872 = vmatprep.subr.bf16.mxu0 %v2407_v20  ;;  %1954 = vmatprep.subr.bf16.mxu1 %v2409_v21  ;;  %v2423_v36 = vcombine.high %v308_v30, %v312_v31  ;;  %v2425_v37 = vcombine.high %v309_v32, %v313_v33  ;;  %v316_v38 = vld [vmem:[%s3025_s18 + $0x140] sm:$0xff]  ;;  %v317_v40 = vld [vmem:[%s3025_s18 + $0x148] sm:$0xff]  ;;  %v2422_v42 = vcombine.low %v308_v30, %v312_v31 }
  0x5e   : > { %v320_v39 = vld [vmem:[%s3025_s18 + $0x160] sm:$0xff]  ;;  %v321_v41 = vld [vmem:[%s3025_s18 + $0x168] sm:$0xff]  ;;  %v2424_v43 = vcombine.low %v309_v32, %v313_v33 }
  0x5f   : > { %v2431_v44 = vcombine.high %v316_v38, %v320_v39  ;;  %v2433_v45 = vcombine.high %v317_v40, %v321_v41  ;;  %v324_v46 = vld [vmem:[%s3025_s18 + $0x180] sm:$0xff]  ;;  %v325_v48 = vld [vmem:[%s3025_s18 + $0x188] sm:$0xff]  ;;  %v2430_v50 = vcombine.low %v316_v38, %v320_v39  ;;  %v2432_v51 = vcombine.low %v317_v40, %v321_v41 }
  0x60   : > { %1873 = vmatpush1.bf16.msra.mxu0 %v2406_v26  ;;  %1955 = vmatpush1.bf16.msra.mxu1 %v2408_v27  ;;  %v328_v47 = vld [vmem:[%s3025_s18 + $0x1a0] sm:$0xff]  ;;  %v329_v49 = vld [vmem:[%s3025_s18 + $0x1a8] sm:$0xff] }
  0x61   : > { %1874 = vmatprep.subr.bf16.mxu0 %v2415_v28  ;;  %1956 = vmatprep.subr.bf16.mxu1 %v2417_v29  ;;  %v2439_v52 = vcombine.high %v324_v46, %v328_v47  ;;  %v3068_v53 = vld [vmem:[%s3364_s0] sm:$0xff]  ;;  %v2441_v54 = vcombine.high %v325_v48, %v329_v49  ;;  %v333_v58 = vld [vmem:[%s3025_s18 + $0x1c8] sm:$0xff]  ;;  %v2438_v60 = vcombine.low %v324_v46, %v328_v47 }
  0x62   : > { %v332_v55 = vld [vmem:[%s3025_s18 + $0x1c0] sm:$0xff]  ;;  %v3074_v57 = vcombine.high %v3068_v53, %v3068_v53  ;;  %v337_v59 = vld [vmem:[%s3025_s18 + $0x1e8] sm:$0xff]  ;;  %v2440_v61 = vcombine.low %v325_v48, %v329_v49 }
  0x63   : > { %v336_v56 = vld [vmem:[%s3025_s18 + $0x1e0] sm:$0xff]  ;;  %v2449_v63 = vcombine.high %v333_v58, %v337_v59  ;;  %v341_v2 = vld [vmem:[%s3025_s18 + $0x208] sm:$0xff]  ;;  %v2448_v5 = vcombine.low %v333_v58, %v337_v59 }
  0x64   : > { %1875 = vmatpush1.bf16.msra.mxu0 %v2414_v34  ;;  %1957 = vmatpush1.bf16.msra.mxu1 %v2416_v35  ;;  %v2447_v62 = vcombine.high %v332_v55, %v336_v56  ;;  %v340_v0 = vld [vmem:[%s3025_s18 + $0x200] sm:$0xff]  ;;  %v345_v3 = vld [vmem:[%s3025_s18 + $0x228] sm:$0xff]  ;;  %v2446_v4 = vcombine.low %v332_v55, %v336_v56 }
  0x65   : > { %1876 = vmatprep.subr.bf16.mxu0 %v2423_v36  ;;  %1958 = vmatprep.subr.bf16.mxu1 %v2425_v37  ;;  %v344_v1 = vld [vmem:[%s3025_s18 + $0x220] sm:$0xff]  ;;  %v2457_v7 = vcombine.high %v341_v2, %v345_v3  ;;  %v349_v10 = vld [vmem:[%s3025_s18 + $0x248] sm:$0xff]  ;;  %v2456_v13 = vcombine.low %v341_v2, %v345_v3 }
  0x66   : > { %1900 = vmatprep.mubr.bf16.mxu0 %v3074_v57  ;;  %1982 = vmatprep.mubr.bf16.mxu1 %v3074_v57  ;;  %v2455_v6 = vcombine.high %v340_v0, %v344_v1  ;;  %v348_v8 = vld [vmem:[%s3025_s18 + $0x240] sm:$0xff]  ;;  %v353_v11 = vld [vmem:[%s3025_s18 + $0x268] sm:$0xff]  ;;  %v2454_v12 = vcombine.low %v340_v0, %v344_v1 }
  0x67   : > { %v352_v9 = vld [vmem:[%s3025_s18 + $0x260] sm:$0xff]  ;;  %v2465_v15 = vcombine.high %v349_v10, %v353_v11  ;;  %v357_v18 = vld [vmem:[%s3025_s18 + $0x288] sm:$0xff]  ;;  %v2464_v21 = vcombine.low %v349_v10, %v353_v11 }
  0x68   : > { %1877 = vmatpush1.bf16.msra.mxu0 %v2422_v42  ;;  %1959 = vmatpush1.bf16.msra.mxu1 %v2424_v43  ;;  %v2463_v14 = vcombine.high %v348_v8, %v352_v9  ;;  %v356_v16 = vld [vmem:[%s3025_s18 + $0x280] sm:$0xff]  ;;  %v361_v19 = vld [vmem:[%s3025_s18 + $0x2a8] sm:$0xff]  ;;  %v2462_v20 = vcombine.low %v348_v8, %v352_v9 }
  0x69   : > { %1878 = vmatprep.subr.bf16.mxu0 %v2431_v44  ;;  %1960 = vmatprep.subr.bf16.mxu1 %v2433_v45  ;;  %v360_v17 = vld [vmem:[%s3025_s18 + $0x2a0] sm:$0xff]  ;;  %v2473_v23 = vcombine.high %v357_v18, %v361_v19  ;;  %v365_v26 = vld [vmem:[%s3025_s18 + $0x2c8] sm:$0xff]  ;;  %v2472_v29 = vcombine.low %v357_v18, %v361_v19 }
  0x6a   : > { %v2471_v22 = vcombine.high %v356_v16, %v360_v17  ;;  %v364_v24 = vld [vmem:[%s3025_s18 + $0x2c0] sm:$0xff]  ;;  %v369_v27 = vld [vmem:[%s3025_s18 + $0x2e8] sm:$0xff]  ;;  %v2470_v28 = vcombine.low %v356_v16, %v360_v17 }
  0x6b   : > { %v368_v25 = vld [vmem:[%s3025_s18 + $0x2e0] sm:$0xff]  ;;  %v2481_v31 = vcombine.high %v365_v26, %v369_v27  ;;  %v373_v34 = vld [vmem:[%s3025_s18 + $0x308] sm:$0xff]  ;;  %v2480_v37 = vcombine.low %v365_v26, %v369_v27 }
  0x6c   : > { %1879 = vmatpush1.bf16.msra.mxu0 %v2430_v50  ;;  %1961 = vmatpush1.bf16.msra.mxu1 %v2432_v51  ;;  %v2479_v30 = vcombine.high %v364_v24, %v368_v25  ;;  %v372_v32 = vld [vmem:[%s3025_s18 + $0x300] sm:$0xff]  ;;  %v377_v35 = vld [vmem:[%s3025_s18 + $0x328] sm:$0xff]  ;;  %v2478_v36 = vcombine.low %v364_v24, %v368_v25 }
  0x6d   : > { %1880 = vmatprep.subr.bf16.mxu0 %v2439_v52  ;;  %1962 = vmatprep.subr.bf16.mxu1 %v2441_v54  ;;  %v376_v33 = vld [vmem:[%s3025_s18 + $0x320] sm:$0xff]  ;;  %v2489_v39 = vcombine.high %v373_v34, %v377_v35  ;;  %v381_v42 = vld [vmem:[%s3025_s18 + $0x348] sm:$0xff]  ;;  %v2488_v45 = vcombine.low %v373_v34, %v377_v35 }
  0x6e   : > { %v2487_v38 = vcombine.high %v372_v32, %v376_v33  ;;  %v380_v40 = vld [vmem:[%s3025_s18 + $0x340] sm:$0xff]  ;;  %v385_v43 = vld [vmem:[%s3025_s18 + $0x368] sm:$0xff]  ;;  %v2486_v44 = vcombine.low %v372_v32, %v376_v33 }
  0x6f   : > { %v384_v41 = vld [vmem:[%s3025_s18 + $0x360] sm:$0xff]  ;;  %v2497_v47 = vcombine.high %v381_v42, %v385_v43  ;;  %v389_v50 = vld [vmem:[%s3025_s18 + $0x388] sm:$0xff]  ;;  %v2496_v54 = vcombine.low %v381_v42, %v385_v43 }
  0x70   : > { %1881 = vmatpush1.bf16.msra.mxu0 %v2438_v60  ;;  %1963 = vmatpush1.bf16.msra.mxu1 %v2440_v61  ;;  %v2495_v46 = vcombine.high %v380_v40, %v384_v41  ;;  %v388_v48 = vld [vmem:[%s3025_s18 + $0x380] sm:$0xff]  ;;  %v393_v51 = vld [vmem:[%s3025_s18 + $0x3a8] sm:$0xff]  ;;  %v2494_v52 = vcombine.low %v380_v40, %v384_v41 }
  0x71   : > { %1882 = vmatprep.subr.bf16.mxu0 %v2447_v62  ;;  %1964 = vmatprep.subr.bf16.mxu1 %v2449_v63  ;;  %v392_v49 = vld [vmem:[%s3025_s18 + $0x3a0] sm:$0xff]  ;;  %v2505_v56 = vcombine.high %v389_v50, %v393_v51  ;;  %v397_v60 = vld [vmem:[%s3025_s18 + $0x3c8] sm:$0xff]  ;;  %v2504_v63 = vcombine.low %v389_v50, %v393_v51 }
  0x72   : > { %v2503_v55 = vcombine.high %v388_v48, %v392_v49  ;;  %v396_v58 = vld [vmem:[%s3025_s18 + $0x3c0] sm:$0xff]  ;;  %v401_v61 = vld [vmem:[%s3025_s18 + $0x3e8] sm:$0xff]  ;;  %v2502_v62 = vcombine.low %v388_v48, %v392_v49 }
  0x73   : > { %v400_v59 = vld [vmem:[%s3025_s18 + $0x3e0] sm:$0xff]  ;;  %v2513_v1 = vcombine.high %v397_v60, %v401_v61 }
  0x74   : > { %1883 = vmatpush1.bf16.msra.mxu0 %v2446_v4  ;;  %1965 = vmatpush1.bf16.msra.mxu1 %v2448_v5  ;;  %v2511_v0 = vcombine.high %v396_v58, %v400_v59  ;;  %v404_v2 = vld [vmem:[%s3025_s18 + $0x400] sm:$0xff]  ;;  %v405_v4 = vld [vmem:[%s3025_s18 + $0x408] sm:$0xff] }
  0x75   : > { %1884 = vmatprep.subr.bf16.mxu0 %v2455_v6  ;;  %1966 = vmatprep.subr.bf16.mxu1 %v2457_v7  ;;  %v408_v3 = vld [vmem:[%s3025_s18 + $0x420] sm:$0xff]  ;;  %v409_v5 = vld [vmem:[%s3025_s18 + $0x428] sm:$0xff]  ;;  %v2510_v6 = vcombine.low %v396_v58, %v400_v59  ;;  %v2512_v7 = vcombine.low %v397_v60, %v401_v61 }
  0x76   : > { %v2519_v8 = vcombine.high %v404_v2, %v408_v3  ;;  %v2521_v9 = vcombine.high %v405_v4, %v409_v5  ;;  %v412_v10 = vld [vmem:[%s3025_s18 + $0x440] sm:$0xff]  ;;  %v2518_v16 = vcombine.low %v404_v2, %v408_v3  ;;  %v2520_v17 = vcombine.low %v405_v4, %v409_v5 }
  0x77   : > { %v416_v11 = vld [vmem:[%s3025_s18 + $0x460] sm:$0xff] }
  0x78   : > { %1885 = vmatpush1.bf16.msra.mxu0 %v2454_v12  ;;  %1967 = vmatpush1.bf16.msra.mxu1 %v2456_v13  ;;  %v3120_v12 = vcombine.low %v3068_v53, %v3068_v53  ;;  %v413_v13 = vld [vmem:[%s3025_s18 + $0x448] sm:$0xff]  ;;  %v2527_v18 = vcombine.high %v412_v10, %v416_v11  ;;  %v420_v53 = vld [vmem:[%s3025_s18 + $0x480] sm:$0xff]  ;;  %v2526_v24 = vcombine.low %v412_v10, %v416_v11 }
  0x79   : > { %1886 = vmatprep.subr.bf16.mxu0 %v2463_v14  ;;  %1968 = vmatprep.subr.bf16.mxu1 %v2465_v15  ;;  %v417_v14 = vld [vmem:[%s3025_s18 + $0x468] sm:$0xff] }
  0x7a   : > { %v3127_v15 = vld [vmem:[%s3364_s0 + $0x8] sm:$0xff]  ;;  %v2529_v19 = vcombine.high %v413_v13, %v417_v14  ;;  %v2528_v25 = vcombine.low %v413_v13, %v417_v14 }
  0x7c   : > { %1887 = vmatpush1.bf16.msra.mxu0 %v2462_v20  ;;  %1969 = vmatpush1.bf16.msra.mxu1 %v2464_v21  ;;  %v424_v20 = vld [vmem:[%s3025_s18 + $0x4a0] sm:$0xff]  ;;  %v3133_v21 = vcombine.high %v3127_v15, %v3127_v15 }
  0x7d   : > { %1888 = vmatprep.subr.bf16.mxu0 %v2471_v22  ;;  %1970 = vmatprep.subr.bf16.mxu1 %v2473_v23  ;;  %v421_v22 = vld [vmem:[%s3025_s18 + $0x488] sm:$0xff]  ;;  %v2535_v26 = vcombine.high %v420_v53, %v424_v20  ;;  %v2534_v32 = vcombine.low %v420_v53, %v424_v20 }
  0x7e   : > { %v425_v23 = vld [vmem:[%s3025_s18 + $0x4a8] sm:$0xff] }
  0x7f   : > { %v2537_v27 = vcombine.high %v421_v22, %v425_v23  ;;  %v2536_v33 = vcombine.low %v421_v22, %v425_v23 }
  0x80   : > { %1889 = vmatpush1.bf16.msra.mxu0 %v2470_v28  ;;  %1971 = vmatpush1.bf16.msra.mxu1 %v2472_v29  ;;  %v428_v28 = vld [vmem:[%s3025_s18 + $0x4c0] sm:$0xff] }
  0x81   : > { %1890 = vmatprep.subr.bf16.mxu0 %v2479_v30  ;;  %1972 = vmatprep.subr.bf16.mxu1 %v2481_v31  ;;  %v432_v29 = vld [vmem:[%s3025_s18 + $0x4e0] sm:$0xff]  ;;  %v429_v30 = vld [vmem:[%s3025_s18 + $0x4c8] sm:$0xff] }
  0x82   : > { %v433_v31 = vld [vmem:[%s3025_s18 + $0x4e8] sm:$0xff]  ;;  %v2543_v34 = vcombine.high %v428_v28, %v432_v29  ;;  %v2542_v40 = vcombine.low %v428_v28, %v432_v29 }
  0x83   : > { %v2545_v35 = vcombine.high %v429_v30, %v433_v31  ;;  %v2544_v41 = vcombine.low %v429_v30, %v433_v31 }
  0x84   : > { %1891 = vmatpush1.bf16.msra.mxu0 %v2478_v36  ;;  %1973 = vmatpush1.bf16.msra.mxu1 %v2480_v37  ;;  %v436_v36 = vld [vmem:[%s3025_s18 + $0x500] sm:$0xff] }
  0x85   : > { %1892 = vmatprep.subr.bf16.mxu0 %v2487_v38  ;;  %1974 = vmatprep.subr.bf16.mxu1 %v2489_v39  ;;  %v440_v37 = vld [vmem:[%s3025_s18 + $0x520] sm:$0xff]  ;;  %v437_v38 = vld [vmem:[%s3025_s18 + $0x508] sm:$0xff] }
  0x86   : > { %v441_v39 = vld [vmem:[%s3025_s18 + $0x528] sm:$0xff]  ;;  %v2551_v42 = vcombine.high %v436_v36, %v440_v37  ;;  %v2550_v48 = vcombine.low %v436_v36, %v440_v37 }
  0x87   : > { %v2553_v43 = vcombine.high %v437_v38, %v441_v39  ;;  %v2552_v49 = vcombine.low %v437_v38, %v441_v39 }
  0x88   : > { %1893 = vmatpush1.bf16.msra.mxu0 %v2486_v44  ;;  %1975 = vmatpush1.bf16.msra.mxu1 %v2488_v45  ;;  %v444_v44 = vld [vmem:[%s3025_s18 + $0x540] sm:$0xff] }
  0x89   : > { %1894 = vmatprep.subr.bf16.mxu0 %v2495_v46  ;;  %1976 = vmatprep.subr.bf16.mxu1 %v2497_v47  ;;  %v448_v45 = vld [vmem:[%s3025_s18 + $0x560] sm:$0xff]  ;;  %v445_v46 = vld [vmem:[%s3025_s18 + $0x548] sm:$0xff] }
  0x8a   : > { %v449_v47 = vld [vmem:[%s3025_s18 + $0x568] sm:$0xff]  ;;  %v2559_v50 = vcombine.high %v444_v44, %v448_v45  ;;  %v2558_v58 = vcombine.low %v444_v44, %v448_v45 }
  0x8b   : > { %v2561_v51 = vcombine.high %v445_v46, %v449_v47  ;;  %v2560_v59 = vcombine.low %v445_v46, %v449_v47 }
  0x8c   : > { %1895 = vmatpush1.bf16.msra.mxu0 %v2494_v52  ;;  %1977 = vmatpush1.bf16.msra.mxu1 %v2496_v54  ;;  %v452_v52 = vld [vmem:[%s3025_s18 + $0x580] sm:$0xff] }
  0x8d   : > { %1896 = vmatprep.subr.bf16.mxu0 %v2503_v55  ;;  %1978 = vmatprep.subr.bf16.mxu1 %v2505_v56  ;;  %v456_v54 = vld [vmem:[%s3025_s18 + $0x5a0] sm:$0xff]  ;;  %v453_v55 = vld [vmem:[%s3025_s18 + $0x588] sm:$0xff] }
  0x8e   : > { %v457_v56 = vld [vmem:[%s3025_s18 + $0x5a8] sm:$0xff]  ;;  %v2567_v60 = vcombine.high %v452_v52, %v456_v54  ;;  %v2566_v2 = vcombine.low %v452_v52, %v456_v54 }
  0x8f   : > { %v2569_v61 = vcombine.high %v453_v55, %v457_v56  ;;  %v2568_v3 = vcombine.low %v453_v55, %v457_v56 }
  0x90   : > { %1897 = vmatpush1.bf16.msra.mxu0 %v2502_v62  ;;  %1979 = vmatpush1.bf16.msra.mxu1 %v2504_v63  ;;  %v460_v62 = vld [vmem:[%s3025_s18 + $0x5c0] sm:$0xff] }
  0x91   : > { %1898 = vmatprep.subr.bf16.mxu0 %v2511_v0  ;;  %1980 = vmatprep.subr.bf16.mxu1 %v2513_v1  ;;  %v464_v63 = vld [vmem:[%s3025_s18 + $0x5e0] sm:$0xff]  ;;  %v461_v0 = vld [vmem:[%s3025_s18 + $0x5c8] sm:$0xff] }
  0x92   : > { %v465_v1 = vld [vmem:[%s3025_s18 + $0x5e8] sm:$0xff]  ;;  %v2575_v4 = vcombine.high %v460_v62, %v464_v63  ;;  %v2574_v10 = vcombine.low %v460_v62, %v464_v63 }
  0x93   : > { %v2577_v5 = vcombine.high %v461_v0, %v465_v1  ;;  %v2576_v11 = vcombine.low %v461_v0, %v465_v1 }
  0x94   : > { %1899 = vmatpush1.bf16.msra.mxu0 %v2510_v6  ;;  %1981 = vmatpush1.bf16.msra.mxu1 %v2512_v7  ;;  %v468_v6 = vld [vmem:[%s3025_s18 + $0x600] sm:$0xff] }
  0x95   : > { %1909 = vmatprep.subr.bf16.mxu0 %v2519_v8  ;;  %1991 = vmatprep.subr.bf16.mxu1 %v2521_v9  ;;  %v472_v7 = vld [vmem:[%s3025_s18 + $0x620] sm:$0xff]  ;;  %v469_v8 = vld [vmem:[%s3025_s18 + $0x608] sm:$0xff] }
  0x96   : > { %v473_v9 = vld [vmem:[%s3025_s18 + $0x628] sm:$0xff]  ;;  %v2583_v13 = vcombine.high %v468_v6, %v472_v7  ;;  %v2582_v53 = vcombine.low %v468_v6, %v472_v7 }
  0x97   : > { %1901 = vmatmul.mubr.bf16.vlgmr.msra.gmra.mrb[0].mxu0 %v3120_v12  ;;  %1983 = vmatmul.mubr.bf16.vlgmr.msra.gmra.mrb[0].mxu1 %v3120_v12  ;;  %v2585_v14 = vcombine.high %v469_v8, %v473_v9  ;;  %v2584_v20 = vcombine.low %v469_v8, %v473_v9 }
  0x98   : > { %1910 = vmatpush1.bf16.msra.mxu0 %v2518_v16  ;;  %1992 = vmatpush1.bf16.msra.mxu1 %v2520_v17  ;;  %v476_v16 = vld [vmem:[%s3025_s18 + $0x640] sm:$0xff] }
  0x99   : > { %1911 = vmatprep.subr.bf16.mxu0 %v2527_v18  ;;  %1993 = vmatprep.subr.bf16.mxu1 %v2529_v19  ;;  %v480_v17 = vld [vmem:[%s3025_s18 + $0x660] sm:$0xff]  ;;  %v477_v18 = vld [vmem:[%s3025_s18 + $0x648] sm:$0xff] }
  0x9a   : > { %1941 = vmatprep.mubr.bf16.mxu0 %v3133_v21  ;;  %2023 = vmatprep.mubr.bf16.mxu1 %v3133_v21  ;;  %v481_v19 = vld [vmem:[%s3025_s18 + $0x668] sm:$0xff]  ;;  %v2591_v22 = vcombine.high %v476_v16, %v480_v17  ;;  %v2590_v28 = vcombine.low %v476_v16, %v480_v17 }
  0x9b   : > { %v2593_v23 = vcombine.high %v477_v18, %v481_v19  ;;  %v2592_v29 = vcombine.low %v477_v18, %v481_v19 }
  0x9c   : > { %1912 = vmatpush1.bf16.msra.mxu0 %v2526_v24  ;;  %1994 = vmatpush1.bf16.msra.mxu1 %v2528_v25  ;;  %v484_v24 = vld [vmem:[%s3025_s18 + $0x680] sm:$0xff] }
  0x9d   : > { %1913 = vmatprep.subr.bf16.mxu0 %v2535_v26  ;;  %1995 = vmatprep.subr.bf16.mxu1 %v2537_v27  ;;  %v488_v25 = vld [vmem:[%s3025_s18 + $0x6a0] sm:$0xff]  ;;  %v485_v26 = vld [vmem:[%s3025_s18 + $0x688] sm:$0xff] }
  0x9e   : > { %v489_v27 = vld [vmem:[%s3025_s18 + $0x6a8] sm:$0xff]  ;;  %v2599_v30 = vcombine.high %v484_v24, %v488_v25  ;;  %v2598_v36 = vcombine.low %v484_v24, %v488_v25  ;;  %v291_v24 = vld [vmem:[%s3025_s18 + $0x78] sm:$0xff] }
  0x9f   : > { %v2601_v31 = vcombine.high %v485_v26, %v489_v27  ;;  %v2600_v37 = vcombine.low %v485_v26, %v489_v27 }
  0xa0   : > { %1914 = vmatpush1.bf16.msra.mxu0 %v2534_v32  ;;  %1996 = vmatpush1.bf16.msra.mxu1 %v2536_v33  ;;  %v492_v32 = vld [vmem:[%s3025_s18 + $0x6c0] sm:$0xff] }
  0xa1   : > { %1915 = vmatprep.subr.bf16.mxu0 %v2543_v34  ;;  %1997 = vmatprep.subr.bf16.mxu1 %v2545_v35  ;;  %v496_v33 = vld [vmem:[%s3025_s18 + $0x6e0] sm:$0xff]  ;;  %v493_v34 = vld [vmem:[%s3025_s18 + $0x6c8] sm:$0xff] }
  0xa2   : > { %v497_v35 = vld [vmem:[%s3025_s18 + $0x6e8] sm:$0xff]  ;;  %v2607_v38 = vcombine.high %v492_v32, %v496_v33  ;;  %v2606_v44 = vcombine.low %v492_v32, %v496_v33 }
  0xa3   : > { %v2609_v39 = vcombine.high %v493_v34, %v497_v35  ;;  %v2608_v45 = vcombine.low %v493_v34, %v497_v35 }
  0xa4   : > { %1916 = vmatpush1.bf16.msra.mxu0 %v2542_v40  ;;  %1998 = vmatpush1.bf16.msra.mxu1 %v2544_v41  ;;  %v500_v40 = vld [vmem:[%s3025_s18 + $0x700] sm:$0xff] }
  0xa5   : > { %1917 = vmatprep.subr.bf16.mxu0 %v2551_v42  ;;  %1999 = vmatprep.subr.bf16.mxu1 %v2553_v43  ;;  %v504_v41 = vld [vmem:[%s3025_s18 + $0x720] sm:$0xff]  ;;  %v501_v42 = vld [vmem:[%s3025_s18 + $0x708] sm:$0xff] }
  0xa6   : > { %v505_v43 = vld [vmem:[%s3025_s18 + $0x728] sm:$0xff]  ;;  %v2615_v46 = vcombine.high %v500_v40, %v504_v41  ;;  %v2614_v52 = vcombine.low %v500_v40, %v504_v41 }
  0xa7   : > { %v2617_v47 = vcombine.high %v501_v42, %v505_v43  ;;  %v2616_v54 = vcombine.low %v501_v42, %v505_v43 }
  0xa8   : > { %1918 = vmatpush1.bf16.msra.mxu0 %v2550_v48  ;;  %2000 = vmatpush1.bf16.msra.mxu1 %v2552_v49  ;;  %v508_v48 = vld [vmem:[%s3025_s18 + $0x740] sm:$0xff] }
  0xa9   : > { %1919 = vmatprep.subr.bf16.mxu0 %v2559_v50  ;;  %2001 = vmatprep.subr.bf16.mxu1 %v2561_v51  ;;  %v512_v49 = vld [vmem:[%s3025_s18 + $0x760] sm:$0xff]  ;;  %v509_v50 = vld [vmem:[%s3025_s18 + $0x748] sm:$0xff] }
  0xaa   : > { %v513_v51 = vld [vmem:[%s3025_s18 + $0x768] sm:$0xff]  ;;  %v2623_v55 = vcombine.high %v508_v48, %v512_v49  ;;  %v2622_v62 = vcombine.low %v508_v48, %v512_v49 }
  0xab   : > { %v2625_v56 = vcombine.high %v509_v50, %v513_v51  ;;  %v2624_v63 = vcombine.low %v509_v50, %v513_v51  ;;  %v318_v51 = vld [vmem:[%s3025_s18 + $0x150] sm:$0xff] }
  0xac   : > { %1920 = vmatpush1.bf16.msra.mxu0 %v2558_v58  ;;  %2002 = vmatpush1.bf16.msra.mxu1 %v2560_v59  ;;  %v516_v58 = vld [vmem:[%s3025_s18 + $0x780] sm:$0xff] }
  0xad   : > { %1921 = vmatprep.subr.bf16.mxu0 %v2567_v60  ;;  %2003 = vmatprep.subr.bf16.mxu1 %v2569_v61  ;;  %v520_v59 = vld [vmem:[%s3025_s18 + $0x7a0] sm:$0xff]  ;;  %v517_v60 = vld [vmem:[%s3025_s18 + $0x788] sm:$0xff] }
  0xae   : > { %v521_v61 = vld [vmem:[%s3025_s18 + $0x7a8] sm:$0xff]  ;;  %v2631_v0 = vcombine.high %v516_v58, %v520_v59  ;;  %v2630_v6 = vcombine.low %v516_v58, %v520_v59 }
  0xaf   : > { %v2633_v1 = vcombine.high %v517_v60, %v521_v61  ;;  %v2632_v7 = vcombine.low %v517_v60, %v521_v61  ;;  %v326_v61 = vld [vmem:[%s3025_s18 + $0x190] sm:$0xff] }
  0xb0   : > { %1922 = vmatpush1.bf16.msra.mxu0 %v2566_v2  ;;  %2004 = vmatpush1.bf16.msra.mxu1 %v2568_v3  ;;  %v524_v2 = vld [vmem:[%s3025_s18 + $0x7c0] sm:$0xff] }
  0xb1   : > { %1923 = vmatprep.subr.bf16.mxu0 %v2575_v4  ;;  %2005 = vmatprep.subr.bf16.mxu1 %v2577_v5  ;;  %v528_v3 = vld [vmem:[%s3025_s18 + $0x7e0] sm:$0xff]  ;;  %v525_v4 = vld [vmem:[%s3025_s18 + $0x7c8] sm:$0xff] }
  0xb2   : > { %v529_v5 = vld [vmem:[%s3025_s18 + $0x7e8] sm:$0xff]  ;;  %v2639_v8 = vcombine.high %v524_v2, %v528_v3  ;;  %v2638_v16 = vcombine.low %v524_v2, %v528_v3 }
  0xb3   : > { %v2641_v9 = vcombine.high %v525_v4, %v529_v5  ;;  %v2640_v17 = vcombine.low %v525_v4, %v529_v5  ;;  %v334_v5 = vld [vmem:[%s3025_s18 + $0x1d0] sm:$0xff] }
  0xb4   : > { %1924 = vmatpush1.bf16.msra.mxu0 %v2574_v10  ;;  %2006 = vmatpush1.bf16.msra.mxu1 %v2576_v11  ;;  %v278_v10 = vld [vmem:[%s3025_s18 + $0x10] sm:$0xff] }
  0xb5   : > { %1925 = vmatprep.subr.bf16.mxu0 %v2583_v13  ;;  %2007 = vmatprep.subr.bf16.mxu1 %v2585_v14  ;;  %v282_v11 = vld [vmem:[%s3025_s18 + $0x30] sm:$0xff]  ;;  %v279_v13 = vld [vmem:[%s3025_s18 + $0x18] sm:$0xff] }
  0xb6   : > { %v283_v14 = vld [vmem:[%s3025_s18 + $0x38] sm:$0xff]  ;;  %v2395_v18 = vcombine.high %v278_v10, %v282_v11  ;;  %v2394_v25 = vcombine.low %v278_v10, %v282_v11 }
  0xb7   : > { %v2397_v19 = vcombine.high %v279_v13, %v283_v14  ;;  %v2396_v26 = vcombine.low %v279_v13, %v283_v14  ;;  %v342_v14 = vld [vmem:[%s3025_s18 + $0x210] sm:$0xff] }
  0xb8   : > { %1926 = vmatpush1.bf16.msra.mxu0 %v2582_v53  ;;  %2008 = vmatpush1.bf16.msra.mxu1 %v2584_v20  ;;  %v286_v53 = vld [vmem:[%s3025_s18 + $0x50] sm:$0xff] }
  0xb9   : > { %1927 = vmatprep.subr.bf16.mxu0 %v2591_v22  ;;  %2009 = vmatprep.subr.bf16.mxu1 %v2593_v23  ;;  %v290_v20 = vld [vmem:[%s3025_s18 + $0x70] sm:$0xff]  ;;  %v3201_v22 = vcombine.low %v3127_v15, %v3127_v15  ;;  %v287_v23 = vld [vmem:[%s3025_s18 + $0x58] sm:$0xff] }
  0xba   : > { %v2403_v27 = vcombine.high %v286_v53, %v290_v20  ;;  %v295_v15 = vld [vmem:[%s3025_s18 + $0x98] sm:$0xff]  ;;  %v2402_v32 = vcombine.low %v286_v53, %v290_v20  ;;  %v2404_v33 = vcombine.low %v287_v23, %v291_v24 }
  0xbc   : > { %1928 = vmatpush1.bf16.msra.mxu0 %v2590_v28  ;;  %2010 = vmatpush1.bf16.msra.mxu1 %v2592_v29  ;;  %v2405_v28 = vcombine.high %v287_v23, %v291_v24  ;;  %v294_v29 = vld [vmem:[%s3025_s18 + $0x90] sm:$0xff] }
  0xbd   : > { %1929 = vmatprep.subr.bf16.mxu0 %v2599_v30  ;;  %2011 = vmatprep.subr.bf16.mxu1 %v2601_v31  ;;  %v298_v30 = vld [vmem:[%s3025_s18 + $0xb0] sm:$0xff]  ;;  %v299_v31 = vld [vmem:[%s3025_s18 + $0xb8] sm:$0xff] }
  0xbe   : > { %v2411_v34 = vcombine.high %v294_v29, %v298_v30  ;;  %v2413_v35 = vcombine.high %v295_v15, %v299_v31  ;;  %v2410_v40 = vcombine.low %v294_v29, %v298_v30  ;;  %v2412_v41 = vcombine.low %v295_v15, %v299_v31  ;;  %v350_v24 = vld [vmem:[%s3025_s18 + $0x250] sm:$0xff] }
  0xbf   : > { %v358_v31 = vld [vmem:[%s3025_s18 + $0x290] sm:$0xff] }
  0xc0   : > { %1930 = vmatpush1.bf16.msra.mxu0 %v2598_v36  ;;  %2012 = vmatpush1.bf16.msra.mxu1 %v2600_v37  ;;  %v302_v36 = vld [vmem:[%s3025_s18 + $0xd0] sm:$0xff] }
  0xc1   : > { %1931 = vmatprep.subr.bf16.mxu0 %v2607_v38  ;;  %2013 = vmatprep.subr.bf16.mxu1 %v2609_v39  ;;  %v306_v37 = vld [vmem:[%s3025_s18 + $0xf0] sm:$0xff]  ;;  %v303_v38 = vld [vmem:[%s3025_s18 + $0xd8] sm:$0xff] }
  0xc2   : > { %v307_v39 = vld [vmem:[%s3025_s18 + $0xf8] sm:$0xff]  ;;  %v2419_v42 = vcombine.high %v302_v36, %v306_v37  ;;  %v2418_v48 = vcombine.low %v302_v36, %v306_v37 }
  0xc3   : > { %v2421_v43 = vcombine.high %v303_v38, %v307_v39 }
  0xc4   : > { %1932 = vmatpush1.bf16.msra.mxu0 %v2606_v44  ;;  %2014 = vmatpush1.bf16.msra.mxu1 %v2608_v45  ;;  %v310_v44 = vld [vmem:[%s3025_s18 + $0x110] sm:$0xff] }
  0xc5   : > { %1933 = vmatprep.subr.bf16.mxu0 %v2615_v46  ;;  %2015 = vmatprep.subr.bf16.mxu1 %v2617_v47  ;;  %v314_v45 = vld [vmem:[%s3025_s18 + $0x130] sm:$0xff]  ;;  %v311_v46 = vld [vmem:[%s3025_s18 + $0x118] sm:$0xff] }
  0xc6   : > { %v315_v47 = vld [vmem:[%s3025_s18 + $0x138] sm:$0xff]  ;;  %v2427_v49 = vcombine.high %v310_v44, %v314_v45 }
  0xc7   : > { %v2429_v50 = vcombine.high %v311_v46, %v315_v47  ;;  %v2428_v58 = vcombine.low %v311_v46, %v315_v47  ;;  %v374_v47 = vld [vmem:[%s3025_s18 + $0x310] sm:$0xff] }
  0xc8   : > { %1934 = vmatpush1.bf16.msra.mxu0 %v2614_v52  ;;  %2016 = vmatpush1.bf16.msra.mxu1 %v2616_v54  ;;  %v322_v52 = vld [vmem:[%s3025_s18 + $0x170] sm:$0xff]  ;;  %v319_v54 = vld [vmem:[%s3025_s18 + $0x158] sm:$0xff] }
  0xc9   : > { %1935 = vmatprep.subr.bf16.mxu0 %v2623_v55  ;;  %2017 = vmatprep.subr.bf16.mxu1 %v2625_v56  ;;  %v323_v55 = vld [vmem:[%s3025_s18 + $0x178] sm:$0xff]  ;;  %v2426_v56 = vcombine.low %v310_v44, %v314_v45  ;;  %v2435_v59 = vcombine.high %v318_v51, %v322_v52 }
  0xca   : > { %v2437_v60 = vcombine.high %v319_v54, %v323_v55  ;;  %v2436_v2 = vcombine.low %v319_v54, %v323_v55  ;;  %v382_v55 = vld [vmem:[%s3025_s18 + $0x350] sm:$0xff] }
  0xcc   : > { %1936 = vmatpush1.bf16.msra.mxu0 %v2622_v62  ;;  %2018 = vmatpush1.bf16.msra.mxu1 %v2624_v63  ;;  %v330_v62 = vld [vmem:[%s3025_s18 + $0x1b0] sm:$0xff]  ;;  %v327_v63 = vld [vmem:[%s3025_s18 + $0x198] sm:$0xff] }
  0xcd   : > { %1937 = vmatprep.subr.bf16.mxu0 %v2631_v0  ;;  %2019 = vmatprep.subr.bf16.mxu1 %v2633_v1  ;;  %v331_v0 = vld [vmem:[%s3025_s18 + $0x1b8] sm:$0xff]  ;;  %v2434_v1 = vcombine.low %v318_v51, %v322_v52  ;;  %v2443_v3 = vcombine.high %v326_v61, %v330_v62 }
  0xce   : > { %v2445_v4 = vcombine.high %v327_v63, %v331_v0  ;;  %v2444_v10 = vcombine.low %v327_v63, %v331_v0  ;;  %v390_v0 = vld [vmem:[%s3025_s18 + $0x390] sm:$0xff] }
  0xd0   : > { %1938 = vmatpush1.bf16.msra.mxu0 %v2630_v6  ;;  %2020 = vmatpush1.bf16.msra.mxu1 %v2632_v7  ;;  %v338_v6 = vld [vmem:[%s3025_s18 + $0x1f0] sm:$0xff]  ;;  %v335_v7 = vld [vmem:[%s3025_s18 + $0x1d8] sm:$0xff] }
  0xd1   : > { %1939 = vmatprep.subr.bf16.mxu0 %v2639_v8  ;;  %2021 = vmatprep.subr.bf16.mxu1 %v2641_v9  ;;  %v339_v8 = vld [vmem:[%s3025_s18 + $0x1f8] sm:$0xff]  ;;  %v2442_v9 = vcombine.low %v326_v61, %v330_v62  ;;  %v2451_v11 = vcombine.high %v334_v5, %v338_v6 }
  0xd2   : > { %v2453_v13 = vcombine.high %v335_v7, %v339_v8  ;;  %v2452_v53 = vcombine.low %v335_v7, %v339_v8  ;;  %v398_v8 = vld [vmem:[%s3025_s18 + $0x3d0] sm:$0xff] }
  0xd4   : > { %1940 = vmatpush1.bf16.msra.mxu0 %v2638_v16  ;;  %2022 = vmatpush1.bf16.msra.mxu1 %v2640_v17  ;;  %v346_v16 = vld [vmem:[%s3025_s18 + $0x230] sm:$0xff]  ;;  %v343_v17 = vld [vmem:[%s3025_s18 + $0x218] sm:$0xff] }
  0xd5   : > { %2032 = vmatprep.subr.bf16.mxu0 %v2395_v18  ;;  %2114 = vmatprep.subr.bf16.mxu1 %v2397_v19  ;;  %v347_v18 = vld [vmem:[%s3025_s18 + $0x238] sm:$0xff]  ;;  %v2450_v19 = vcombine.low %v334_v5, %v338_v6  ;;  %v2459_v20 = vcombine.high %v342_v14, %v346_v16 }
  0xd6   : > { %v2461_v23 = vcombine.high %v343_v17, %v347_v18  ;;  %v2460_v29 = vcombine.low %v343_v17, %v347_v18  ;;  %v406_v18 = vld [vmem:[%s3025_s18 + $0x410] sm:$0xff] }
  0xd7   : > { %1942 = vmatmul.mubr.bf16.vlgmr.msra.gmra.mrb[0].mxu0 %v3201_v22  ;;  %2024 = vmatmul.mubr.bf16.vlgmr.msra.gmra.mrb[0].mxu1 %v3201_v22 }
  0xd8   : > { %2033 = vmatpush1.bf16.msra.mxu0 %v2394_v25  ;;  %2115 = vmatpush1.bf16.msra.mxu1 %v2396_v26  ;;  %v354_v25 = vld [vmem:[%s3025_s18 + $0x270] sm:$0xff]  ;;  %v351_v26 = vld [vmem:[%s3025_s18 + $0x258] sm:$0xff] }
  0xd9   : > { %2034 = vmatprep.subr.bf16.mxu0 %v2403_v27  ;;  %2116 = vmatprep.subr.bf16.mxu1 %v2405_v28  ;;  %v355_v27 = vld [vmem:[%s3025_s18 + $0x278] sm:$0xff]  ;;  %v2458_v28 = vcombine.low %v342_v14, %v346_v16  ;;  %v2467_v30 = vcombine.high %v350_v24, %v354_v25 }
  0xda   : > { %2064 = vmatprep.mubr.bf16.mxu0 %v3074_v57  ;;  %2146 = vmatprep.mubr.bf16.mxu1 %v3074_v57  ;;  %v2420_v57 = vcombine.low %v303_v38, %v307_v39  ;;  %v2469_v15 = vcombine.high %v351_v26, %v355_v27  ;;  %v2468_v36 = vcombine.low %v351_v26, %v355_v27  ;;  %v366_v39 = vld [vmem:[%s3025_s18 + $0x2d0] sm:$0xff] }
  0xdb   : > { %v414_v27 = vld [vmem:[%s3025_s18 + $0x450] sm:$0xff] }
  0xdc   : > { %2035 = vmatpush1.bf16.msra.mxu0 %v2402_v32  ;;  %2117 = vmatpush1.bf16.msra.mxu1 %v2404_v33  ;;  %v362_v32 = vld [vmem:[%s3025_s18 + $0x2b0] sm:$0xff]  ;;  %v359_v33 = vld [vmem:[%s3025_s18 + $0x298] sm:$0xff] }
  0xdd   : > { %2036 = vmatprep.subr.bf16.mxu0 %v2411_v34  ;;  %2118 = vmatprep.subr.bf16.mxu1 %v2413_v35  ;;  %v363_v34 = vld [vmem:[%s3025_s18 + $0x2b8] sm:$0xff]  ;;  %v2466_v35 = vcombine.low %v350_v24, %v354_v25  ;;  %v2475_v37 = vcombine.high %v358_v31, %v362_v32 }
  0xde   : > { %v2477_v38 = vcombine.high %v359_v33, %v363_v34  ;;  %v2476_v44 = vcombine.low %v359_v33, %v363_v34  ;;  %v422_v34 = vld [vmem:[%s3025_s18 + $0x490] sm:$0xff] }
  0xe0   : > { %2037 = vmatpush1.bf16.msra.mxu0 %v2410_v40  ;;  %2119 = vmatpush1.bf16.msra.mxu1 %v2412_v41  ;;  %v370_v40 = vld [vmem:[%s3025_s18 + $0x2f0] sm:$0xff]  ;;  %v367_v41 = vld [vmem:[%s3025_s18 + $0x2d8] sm:$0xff] }
  0xe1   : > { %2038 = vmatprep.subr.bf16.mxu0 %v2419_v42  ;;  %2120 = vmatprep.subr.bf16.mxu1 %v2421_v43  ;;  %v371_v42 = vld [vmem:[%s3025_s18 + $0x2f8] sm:$0xff]  ;;  %v2474_v43 = vcombine.low %v358_v31, %v362_v32  ;;  %v2483_v45 = vcombine.high %v366_v39, %v370_v40 }
  0xe2   : > { %v2485_v46 = vcombine.high %v367_v41, %v371_v42  ;;  %v2484_v51 = vcombine.low %v367_v41, %v371_v42  ;;  %v430_v42 = vld [vmem:[%s3025_s18 + $0x4d0] sm:$0xff] }
  0xe4   : > { %2039 = vmatpush1.bf16.msra.mxu0 %v2418_v48  ;;  %2121 = vmatpush1.bf16.msra.mxu1 %v2420_v57  ;;  %v378_v48 = vld [vmem:[%s3025_s18 + $0x330] sm:$0xff]  ;;  %v375_v57 = vld [vmem:[%s3025_s18 + $0x318] sm:$0xff] }
  0xe5   : > { %2040 = vmatprep.subr.bf16.mxu0 %v2427_v49  ;;  %2122 = vmatprep.subr.bf16.mxu1 %v2429_v50  ;;  %v379_v49 = vld [vmem:[%s3025_s18 + $0x338] sm:$0xff]  ;;  %v2482_v50 = vcombine.low %v366_v39, %v370_v40  ;;  %v2491_v52 = vcombine.high %v374_v47, %v378_v48 }
  0xe6   : > { %v2493_v54 = vcombine.high %v375_v57, %v379_v49  ;;  %v2492_v61 = vcombine.low %v375_v57, %v379_v49  ;;  %v438_v57 = vld [vmem:[%s3025_s18 + $0x510] sm:$0xff] }
  0xe7   : > { %v442_v49 = vld [vmem:[%s3025_s18 + $0x530] sm:$0xff] }
  0xe8   : > { %2041 = vmatpush1.bf16.msra.mxu0 %v2426_v56  ;;  %2123 = vmatpush1.bf16.msra.mxu1 %v2428_v58  ;;  %v386_v56 = vld [vmem:[%s3025_s18 + $0x370] sm:$0xff]  ;;  %v383_v58 = vld [vmem:[%s3025_s18 + $0x358] sm:$0xff] }
  0xe9   : > { %2042 = vmatprep.subr.bf16.mxu0 %v2435_v59  ;;  %2124 = vmatprep.subr.bf16.mxu1 %v2437_v60  ;;  %v387_v59 = vld [vmem:[%s3025_s18 + $0x378] sm:$0xff]  ;;  %v2490_v60 = vcombine.low %v374_v47, %v378_v48  ;;  %v2499_v62 = vcombine.high %v382_v55, %v386_v56 }
  0xea   : > { %v2501_v63 = vcombine.high %v383_v58, %v387_v59  ;;  %v2500_v5 = vcombine.low %v383_v58, %v387_v59  ;;  %v450_v58 = vld [vmem:[%s3025_s18 + $0x570] sm:$0xff]  ;;  %v447_v59 = vld [vmem:[%s3025_s18 + $0x558] sm:$0xff] }
  0xec   : > { %2043 = vmatpush1.bf16.msra.mxu0 %v2434_v1  ;;  %2125 = vmatpush1.bf16.msra.mxu1 %v2436_v2  ;;  %v394_v1 = vld [vmem:[%s3025_s18 + $0x3b0] sm:$0xff]  ;;  %v391_v2 = vld [vmem:[%s3025_s18 + $0x398] sm:$0xff] }
  0xed   : > { %2044 = vmatprep.subr.bf16.mxu0 %v2443_v3  ;;  %2126 = vmatprep.subr.bf16.mxu1 %v2445_v4  ;;  %v395_v3 = vld [vmem:[%s3025_s18 + $0x3b8] sm:$0xff]  ;;  %v2498_v4 = vcombine.low %v382_v55, %v386_v56  ;;  %v2507_v6 = vcombine.high %v390_v0, %v394_v1  ;;  %v446_v56 = vld [vmem:[%s3025_s18 + $0x550] sm:$0xff] }
  0xee   : > { %v2509_v7 = vcombine.high %v391_v2, %v395_v3  ;;  %v2508_v14 = vcombine.low %v391_v2, %v395_v3  ;;  %v458_v2 = vld [vmem:[%s3025_s18 + $0x5b0] sm:$0xff]  ;;  %v455_v3 = vld [vmem:[%s3025_s18 + $0x598] sm:$0xff] }
  0xf0   : > { %2045 = vmatpush1.bf16.msra.mxu0 %v2442_v9  ;;  %2127 = vmatpush1.bf16.msra.mxu1 %v2444_v10  ;;  %v402_v9 = vld [vmem:[%s3025_s18 + $0x3f0] sm:$0xff]  ;;  %v399_v10 = vld [vmem:[%s3025_s18 + $0x3d8] sm:$0xff] }
  0xf1   : > { %2046 = vmatprep.subr.bf16.mxu0 %v2451_v11  ;;  %2128 = vmatprep.subr.bf16.mxu1 %v2453_v13  ;;  %v403_v11 = vld [vmem:[%s3025_s18 + $0x3f8] sm:$0xff]  ;;  %v2506_v13 = vcombine.low %v390_v0, %v394_v1  ;;  %v2515_v16 = vcombine.high %v398_v8, %v402_v9  ;;  %v454_v1 = vld [vmem:[%s3025_s18 + $0x590] sm:$0xff] }
  0xf2   : > { %v2517_v17 = vcombine.high %v399_v10, %v403_v11  ;;  %v2516_v24 = vcombine.low %v399_v10, %v403_v11  ;;  %v466_v10 = vld [vmem:[%s3025_s18 + $0x5f0] sm:$0xff]  ;;  %v463_v11 = vld [vmem:[%s3025_s18 + $0x5d8] sm:$0xff] }
  0xf4   : > { %2047 = vmatpush1.bf16.msra.mxu0 %v2450_v19  ;;  %2129 = vmatpush1.bf16.msra.mxu1 %v2452_v53  ;;  %v410_v19 = vld [vmem:[%s3025_s18 + $0x430] sm:$0xff]  ;;  %v407_v53 = vld [vmem:[%s3025_s18 + $0x418] sm:$0xff] }
  0xf5   : > { %2048 = vmatprep.subr.bf16.mxu0 %v2459_v20  ;;  %2130 = vmatprep.subr.bf16.mxu1 %v2461_v23  ;;  %v411_v20 = vld [vmem:[%s3025_s18 + $0x438] sm:$0xff]  ;;  %v2514_v23 = vcombine.low %v398_v8, %v402_v9  ;;  %v2523_v25 = vcombine.high %v406_v18, %v410_v19  ;;  %v462_v9 = vld [vmem:[%s3025_s18 + $0x5d0] sm:$0xff] }
  0xf6   : > { %v2525_v26 = vcombine.high %v407_v53, %v411_v20  ;;  %v2524_v31 = vcombine.low %v407_v53, %v411_v20  ;;  %v474_v53 = vld [vmem:[%s3025_s18 + $0x630] sm:$0xff]  ;;  %v471_v20 = vld [vmem:[%s3025_s18 + $0x618] sm:$0xff] }
  0xf8   : > { %2049 = vmatpush1.bf16.msra.mxu0 %v2458_v28  ;;  %2131 = vmatpush1.bf16.msra.mxu1 %v2460_v29  ;;  %v418_v28 = vld [vmem:[%s3025_s18 + $0x470] sm:$0xff]  ;;  %v415_v29 = vld [vmem:[%s3025_s18 + $0x458] sm:$0xff] }
  0xf9   : > { %2050 = vmatprep.subr.bf16.mxu0 %v2467_v30  ;;  %2132 = vmatprep.subr.bf16.mxu1 %v2469_v15  ;;  %v419_v30 = vld [vmem:[%s3025_s18 + $0x478] sm:$0xff]  ;;  %v2522_v15 = vcombine.low %v406_v18, %v410_v19  ;;  %v2531_v32 = vcombine.high %v414_v27, %v418_v28  ;;  %v470_v19 = vld [vmem:[%s3025_s18 + $0x610] sm:$0xff] }
  0xfa   : > { %v2533_v33 = vcombine.high %v415_v29, %v419_v30  ;;  %v2532_v39 = vcombine.low %v415_v29, %v419_v30  ;;  %v482_v29 = vld [vmem:[%s3025_s18 + $0x670] sm:$0xff]  ;;  %v479_v30 = vld [vmem:[%s3025_s18 + $0x658] sm:$0xff] }
  0xfc   : > { %2051 = vmatpush1.bf16.msra.mxu0 %v2466_v35  ;;  %2133 = vmatpush1.bf16.msra.mxu1 %v2468_v36  ;;  %v426_v35 = vld [vmem:[%s3025_s18 + $0x4b0] sm:$0xff]  ;;  %v423_v36 = vld [vmem:[%s3025_s18 + $0x498] sm:$0xff] }
  0xfd   : > { %2052 = vmatprep.subr.bf16.mxu0 %v2475_v37  ;;  %2134 = vmatprep.subr.bf16.mxu1 %v2477_v38  ;;  %v427_v37 = vld [vmem:[%s3025_s18 + $0x4b8] sm:$0xff]  ;;  %v2530_v38 = vcombine.low %v414_v27, %v418_v28  ;;  %v2539_v40 = vcombine.high %v422_v34, %v426_v35  ;;  %v478_v28 = vld [vmem:[%s3025_s18 + $0x650] sm:$0xff] }
  0xfe   : > { %v2541_v41 = vcombine.high %v423_v36, %v427_v37 }
 0x100   : > { %2053 = vmatpush1.bf16.msra.mxu0 %v2474_v43  ;;  %2135 = vmatpush1.bf16.msra.mxu1 %v2476_v44  ;;  %v434_v43 = vld [vmem:[%s3025_s18 + $0x4f0] sm:$0xff]  ;;  %v431_v44 = vld [vmem:[%s3025_s18 + $0x4d8] sm:$0xff] }
 0x101   : > { %2054 = vmatprep.subr.bf16.mxu0 %v2483_v45  ;;  %2136 = vmatprep.subr.bf16.mxu1 %v2485_v46  ;;  %v435_v45 = vld [vmem:[%s3025_s18 + $0x4f8] sm:$0xff]  ;;  %v2540_v46 = vcombine.low %v423_v36, %v427_v37  ;;  %v2547_v47 = vcombine.high %v430_v42, %v434_v43  ;;  %v490_v36 = vld [vmem:[%s3025_s18 + $0x6b0] sm:$0xff] }
 0x102   : > { %v2549_v48 = vcombine.high %v431_v44, %v435_v45  ;;  %v487_v37 = vld [vmem:[%s3025_s18 + $0x698] sm:$0xff] }
 0x104   : > { %2055 = vmatpush1.bf16.msra.mxu0 %v2482_v50  ;;  %2137 = vmatpush1.bf16.msra.mxu1 %v2484_v51  ;;  %v439_v50 = vld [vmem:[%s3025_s18 + $0x518] sm:$0xff] }
 0x105   : > { %2056 = vmatprep.subr.bf16.mxu0 %v2491_v52  ;;  %2138 = vmatprep.subr.bf16.mxu1 %v2493_v54  ;;  %v443_v51 = vld [vmem:[%s3025_s18 + $0x538] sm:$0xff]  ;;  %v2546_v52 = vcombine.low %v430_v42, %v434_v43  ;;  %v2555_v54 = vcombine.high %v438_v57, %v442_v49  ;;  %v494_v43 = vld [vmem:[%s3025_s18 + $0x6d0] sm:$0xff] }
 0x106   : > { %v2557_v55 = vcombine.high %v439_v50, %v443_v51 }
 0x108   : > { %2057 = vmatpush1.bf16.msra.mxu0 %v2490_v60  ;;  %2139 = vmatpush1.bf16.msra.mxu1 %v2492_v61  ;;  %v451_v60 = vld [vmem:[%s3025_s18 + $0x578] sm:$0xff]  ;;  %v2554_v61 = vcombine.low %v438_v57, %v442_v49  ;;  %v502_v49 = vld [vmem:[%s3025_s18 + $0x710] sm:$0xff] }
 0x109   : > { %2058 = vmatprep.subr.bf16.mxu0 %v2499_v62  ;;  %2140 = vmatprep.subr.bf16.mxu1 %v2501_v63  ;;  %v2556_v62 = vcombine.low %v439_v50, %v443_v51  ;;  %v2563_v63 = vcombine.high %v446_v56, %v450_v58  ;;  %v2565_v0 = vcombine.high %v447_v59, %v451_v60  ;;  %v506_v50 = vld [vmem:[%s3025_s18 + $0x730] sm:$0xff]  ;;  %v503_v51 = vld [vmem:[%s3025_s18 + $0x718] sm:$0xff] }
 0x10c   : > { %2059 = vmatpush1.bf16.msra.mxu0 %v2498_v4  ;;  %2141 = vmatpush1.bf16.msra.mxu1 %v2500_v5  ;;  %v459_v4 = vld [vmem:[%s3025_s18 + $0x5b8] sm:$0xff]  ;;  %v2562_v5 = vcombine.low %v446_v56, %v450_v58  ;;  %v510_v58 = vld [vmem:[%s3025_s18 + $0x750] sm:$0xff] }
 0x10d   : > { %2060 = vmatprep.subr.bf16.mxu0 %v2507_v6  ;;  %2142 = vmatprep.subr.bf16.mxu1 %v2509_v7  ;;  %v2564_v6 = vcombine.low %v447_v59, %v451_v60  ;;  %v2571_v7 = vcombine.high %v454_v1, %v458_v2  ;;  %v2573_v8 = vcombine.high %v455_v3, %v459_v4  ;;  %v514_v59 = vld [vmem:[%s3025_s18 + $0x770] sm:$0xff]  ;;  %v511_v60 = vld [vmem:[%s3025_s18 + $0x758] sm:$0xff] }
 0x110   : > { %2061 = vmatpush1.bf16.msra.mxu0 %v2506_v13  ;;  %2143 = vmatpush1.bf16.msra.mxu1 %v2508_v14  ;;  %v467_v13 = vld [vmem:[%s3025_s18 + $0x5f8] sm:$0xff]  ;;  %v2570_v14 = vcombine.low %v454_v1, %v458_v2  ;;  %v518_v2 = vld [vmem:[%s3025_s18 + $0x790] sm:$0xff] }
 0x111   : > { %2062 = vmatprep.subr.bf16.mxu0 %v2515_v16  ;;  %2144 = vmatprep.subr.bf16.mxu1 %v2517_v17  ;;  %v2572_v16 = vcombine.low %v455_v3, %v459_v4  ;;  %v2579_v17 = vcombine.high %v462_v9, %v466_v10  ;;  %v2581_v18 = vcombine.high %v463_v11, %v467_v13  ;;  %v522_v3 = vld [vmem:[%s3025_s18 + $0x7b0] sm:$0xff]  ;;  %v519_v4 = vld [vmem:[%s3025_s18 + $0x798] sm:$0xff] }
 0x114   : > { %2063 = vmatpush1.bf16.msra.mxu0 %v2514_v23  ;;  %2145 = vmatpush1.bf16.msra.mxu1 %v2516_v24  ;;  %v475_v23 = vld [vmem:[%s3025_s18 + $0x638] sm:$0xff]  ;;  %v2578_v24 = vcombine.low %v462_v9, %v466_v10  ;;  %v526_v10 = vld [vmem:[%s3025_s18 + $0x7d0] sm:$0xff] }
 0x115   : > { %2073 = vmatprep.subr.bf16.mxu0 %v2523_v25  ;;  %2155 = vmatprep.subr.bf16.mxu1 %v2525_v26  ;;  %v2580_v25 = vcombine.low %v463_v11, %v467_v13  ;;  %v2587_v26 = vcombine.high %v470_v19, %v474_v53  ;;  %v2589_v27 = vcombine.high %v471_v20, %v475_v23  ;;  %v530_v11 = vld [vmem:[%s3025_s18 + $0x7f0] sm:$0xff]  ;;  %v527_v13 = vld [vmem:[%s3025_s18 + $0x7d8] sm:$0xff] }
 0x117   : > { %2065 = vmatmul.mubr.bf16.vlgmr.msra.gmra.mrb[4].mxu0 %v3120_v12  ;;  %2147 = vmatmul.mubr.bf16.vlgmr.msra.gmra.mrb[4].mxu1 %v3120_v12  ;;  %v2538_v12 = vcombine.low %v422_v34, %v426_v35  ;;  %v486_v35 = vld [vmem:[%s3025_s18 + $0x690] sm:$0xff] }
 0x118   : > { %2074 = vmatpush1.bf16.msra.mxu0 %v2522_v15  ;;  %2156 = vmatpush1.bf16.msra.mxu1 %v2524_v31  ;;  %v483_v15 = vld [vmem:[%s3025_s18 + $0x678] sm:$0xff]  ;;  %v2586_v31 = vcombine.low %v470_v19, %v474_v53  ;;  %v2642_v53 = vcombine.low %v526_v10, %v530_v11 }
 0x119   : > { %2075 = vmatprep.subr.bf16.mxu0 %v2531_v32  ;;  %2157 = vmatprep.subr.bf16.mxu1 %v2533_v33  ;;  %v2588_v32 = vcombine.low %v471_v20, %v475_v23  ;;  %v2595_v33 = vcombine.high %v478_v28, %v482_v29  ;;  %v2597_v34 = vcombine.high %v479_v30, %v483_v15  ;;  %v534_v23 = vlaneseq }
 0x11a   : > { %2105 = vmatprep.mubr.bf16.mxu0 %v3133_v21  ;;  %2187 = vmatprep.mubr.bf16.mxu1 %v3133_v21  ;;  %v2548_v21 = vcombine.low %v431_v44, %v435_v45  ;;  %v498_v44 = vld [vmem:[%s3025_s18 + $0x6f0] sm:$0xff]  ;;  %v495_v45 = vld [vmem:[%s3025_s18 + $0x6d8] sm:$0xff] }
 0x11c   : > { %2076 = vmatpush1.bf16.msra.mxu0 %v2530_v38  ;;  %2158 = vmatpush1.bf16.msra.mxu1 %v2532_v39  ;;  %v491_v38 = vld [vmem:[%s3025_s18 + $0x6b8] sm:$0xff]  ;;  %v2594_v39 = vcombine.low %v478_v28, %v482_v29 }
 0x11d   : > { %2077 = vmatprep.subr.bf16.mxu0 %v2539_v40  ;;  %2159 = vmatprep.subr.bf16.mxu1 %v2541_v41  ;;  %v2596_v40 = vcombine.low %v479_v30, %v483_v15  ;;  %v2603_v41 = vcombine.high %v486_v35, %v490_v36  ;;  %v2605_v42 = vcombine.high %v487_v37, %v491_v38 }
 0x120   : > { %2078 = vmatpush1.bf16.msra.mxu0 %v2538_v12  ;;  %2160 = vmatpush1.bf16.msra.mxu1 %v2540_v46  ;;  %v499_v12 = vld [vmem:[%s3025_s18 + $0x6f8] sm:$0xff]  ;;  %v2602_v46 = vcombine.low %v486_v35, %v490_v36 }
 0x121   : > { %2079 = vmatprep.subr.bf16.mxu0 %v2547_v47  ;;  %2161 = vmatprep.subr.bf16.mxu1 %v2549_v48  ;;  %v2604_v47 = vcombine.low %v487_v37, %v491_v38  ;;  %v2611_v48 = vcombine.high %v494_v43, %v498_v44  ;;  %v2613_v57 = vcombine.high %v495_v45, %v499_v12 }
 0x124   : > { %2080 = vmatpush1.bf16.msra.mxu0 %v2546_v52  ;;  %2162 = vmatpush1.bf16.msra.mxu1 %v2548_v21  ;;  %v507_v52 = vld [vmem:[%s3025_s18 + $0x738] sm:$0xff]  ;;  %v2610_v21 = vcombine.low %v494_v43, %v498_v44 }
 0x125   : > { %2081 = vmatprep.subr.bf16.mxu0 %v2555_v54  ;;  %2163 = vmatprep.subr.bf16.mxu1 %v2557_v55  ;;  %v2612_v54 = vcombine.low %v495_v45, %v499_v12  ;;  %v2619_v55 = vcombine.high %v502_v49, %v506_v50  ;;  %v2621_v56 = vcombine.high %v503_v51, %v507_v52 }
 0x128   : > { %2082 = vmatpush1.bf16.msra.mxu0 %v2554_v61  ;;  %2164 = vmatpush1.bf16.msra.mxu1 %v2556_v62  ;;  %v515_v61 = vld [vmem:[%s3025_s18 + $0x778] sm:$0xff]  ;;  %v2618_v62 = vcombine.low %v502_v49, %v506_v50 }
 0x129   : > { %2083 = vmatprep.subr.bf16.mxu0 %v2563_v63  ;;  %2165 = vmatprep.subr.bf16.mxu1 %v2565_v0  ;;  %v2620_v63 = vcombine.low %v503_v51, %v507_v52  ;;  %v2627_v0 = vcombine.high %v510_v58, %v514_v59  ;;  %v2629_v1 = vcombine.high %v511_v60, %v515_v61 }
 0x12c   : > { %2084 = vmatpush1.bf16.msra.mxu0 %v2562_v5  ;;  %2166 = vmatpush1.bf16.msra.mxu1 %v2564_v6  ;;  %v523_v5 = vld [vmem:[%s3025_s18 + $0x7b8] sm:$0xff]  ;;  %v2626_v6 = vcombine.low %v510_v58, %v514_v59 }
 0x12d   : > { %2085 = vmatprep.subr.bf16.mxu0 %v2571_v7  ;;  %2167 = vmatprep.subr.bf16.mxu1 %v2573_v8  ;;  %v2628_v7 = vcombine.low %v511_v60, %v515_v61  ;;  %v2635_v8 = vcombine.high %v518_v2, %v522_v3  ;;  %v2637_v9 = vcombine.high %v519_v4, %v523_v5 }
 0x130   : > { %2086 = vmatpush1.bf16.msra.mxu0 %v2570_v14  ;;  %2168 = vmatpush1.bf16.msra.mxu1 %v2572_v16  ;;  %v531_v14 = vld [vmem:[%s3025_s18 + $0x7f8] sm:$0xff]  ;;  %v2634_v16 = vcombine.low %v518_v2, %v522_v3 }
 0x131   : > { %2087 = vmatprep.subr.bf16.mxu0 %v2579_v17  ;;  %2169 = vmatprep.subr.bf16.mxu1 %v2581_v18  ;;  %v2636_v17 = vcombine.low %v519_v4, %v523_v5  ;;  %v2643_v18 = vcombine.high %v526_v10, %v530_v11  ;;  %v2645_v19 = vcombine.high %v527_v13, %v531_v14 }
 0x132   : > { %v2644_v20 = vcombine.low %v527_v13, %v531_v14 }
 0x134   : > { %2088 = vmatpush1.bf16.msra.mxu0 %v2578_v24  ;;  %2170 = vmatpush1.bf16.msra.mxu1 %v2580_v25  ;;  %v535_v24 = vshrl.u32 %v534_v23, 7 }
 0x135   : > { %2089 = vmatprep.subr.bf16.mxu0 %v2587_v26  ;;  %2171 = vmatprep.subr.bf16.mxu1 %v2589_v27  ;;  %v532_v26 = vld [vmem:[%s3031_s7] sm:$0xff] }
 0x136   : > { %v536_v25 = vsub.s32 0, %v535_v24  ;;  %v544_v27 = vsub.s32 2, %v535_v24  ;;  %v540_v28 = vsub.s32 1, %v535_v24  ;;  %v548_v29 = vsub.s32 3, %v535_v24 }
 0x137   : > { %v560_v49 = vsub.s32 6, %v535_v24  ;;  %v556_v50 = vsub.s32 5, %v535_v24  ;;  %v564_v51 = vsub.s32 7, %v535_v24 }
 0x138   : > { %2090 = vmatpush1.bf16.msra.mxu0 %v2586_v31  ;;  %2172 = vmatpush1.bf16.msra.mxu1 %v2588_v32  ;;  %v537_v30 = vrot.slane %v532_v26, %v536_v25  ;;  %v545_v15 = vrot.slane %v532_v26, %v544_v27  ;;  %v541_v31 = vrot.slane %v532_v26, %v540_v28 }
 0x139   : > { %2091 = vmatprep.subr.bf16.mxu0 %v2595_v33  ;;  %2173 = vmatprep.subr.bf16.mxu1 %v2597_v34  ;;  %v549_v32 = vrot.slane %v532_v26, %v548_v29 }
 0x13c   : > { %2092 = vmatpush1.bf16.msra.mxu0 %v2594_v39  ;;  %2174 = vmatpush1.bf16.msra.mxu1 %v2596_v40 }
 0x13d   : > { %2093 = vmatprep.subr.bf16.mxu0 %v2603_v41  ;;  %2175 = vmatprep.subr.bf16.mxu1 %v2605_v42 }
 0x140   : > { %2094 = vmatpush1.bf16.msra.mxu0 %v2602_v46  ;;  %2176 = vmatpush1.bf16.msra.mxu1 %v2604_v47 }
 0x141   : > { %2095 = vmatprep.subr.bf16.mxu0 %v2611_v48  ;;  %2177 = vmatprep.subr.bf16.mxu1 %v2613_v57  ;;  %v552_v57 = vsub.s32 4, %v535_v24 }
 0x143   : > { %v553_v52 = vrot.slane %v532_v26, %v552_v57 }
 0x144   : > { %2096 = vmatpush1.bf16.msra.mxu0 %v2610_v21  ;;  %2178 = vmatpush1.bf16.msra.mxu1 %v2612_v54  ;;  %v561_v21 = vrot.slane %v532_v26, %v560_v49  ;;  %v557_v54 = vrot.slane %v532_v26, %v556_v50 }
 0x145   : > { %2097 = vmatprep.subr.bf16.mxu0 %v2619_v55  ;;  %2179 = vmatprep.subr.bf16.mxu1 %v2621_v56  ;;  %v565_v55 = vrot.slane %v532_v26, %v564_v51 }
 0x148   : > { %2098 = vmatpush1.bf16.msra.mxu0 %v2618_v62  ;;  %2180 = vmatpush1.bf16.msra.mxu1 %v2620_v63 }
 0x149   : > { %2099 = vmatprep.subr.bf16.mxu0 %v2627_v0  ;;  %2181 = vmatprep.subr.bf16.mxu1 %v2629_v1 }
 0x14c   : > { %2100 = vmatpush1.bf16.msra.mxu0 %v2626_v6  ;;  %2182 = vmatpush1.bf16.msra.mxu1 %v2628_v7 }
 0x14d   : > { %2101 = vmatprep.subr.bf16.mxu0 %v2635_v8  ;;  %2183 = vmatprep.subr.bf16.mxu1 %v2637_v9 }
 0x150   : > { %2102 = vmatpush1.bf16.msra.mxu0 %v2634_v16  ;;  %2184 = vmatpush1.bf16.msra.mxu1 %v2636_v17 }
 0x151   : > { %2103 = vmatprep.subr.bf16.mxu0 %v2643_v18  ;;  %2185 = vmatprep.subr.bf16.mxu1 %v2645_v19 }
 0x154   : > { %2104 = vmatpush1.bf16.msra.mxu0 %v2642_v53  ;;  %2186 = vmatpush1.bf16.msra.mxu1 %v2644_v20 }
 0x157   : > { %2106 = vmatmul.mubr.bf16.vlgmr.msra.gmra.mrb[4].mxu0 %v3201_v22  ;;  %2188 = vmatmul.mubr.bf16.vlgmr.msra.gmra.mrb[4].mxu1 %v3201_v22 }
 0x1aa   : > { %v1943_v33 = vpop.f32.mrb[0].mxu0  ;;  %v2025_v35 = vpop.f32.mrb[0].mxu1 }
 0x1ab   : > { %v2658_v34 = vadd.f32 %v1943_v33, %v537_v30  ;;  %v1945_v36 = vpop.f32.mrb[1].mxu0  ;;  %v2660_v37 = vadd.f32 %v2025_v35, %v545_v15  ;;  %v2027_v38 = vpop.f32.mrb[1].mxu1 }
 0x1ac   : > { %v2659_v22 = vadd.f32 %v1945_v36, %v541_v31  ;;  %v1947_v39 = vpop.f32.mrb[2].mxu0  ;;  %v2661_v41 = vadd.f32 %v2027_v38, %v549_v32  ;;  %v2029_v42 = vpop.f32.mrb[2].mxu1 }
 0x1ad   : > { %v2196_v40 = vmax.f32 %v2658_v34, 0.0  ;;  %v1948_v43 = vpop.f32.mrb[3].mxu0  ;;  %v2198_v44 = vmax.f32 %v2660_v37, 0.0  ;;  %v2030_v12 = vpop.f32.mrb[3].mxu1 }
 0x1ae   : > { %v2197_v45 = vmax.f32 %v2659_v22, 0.0  ;;  %v2199_v46 = vmax.f32 %v2661_v41, 0.0 }
 0x1b0   : > { %v2654_v47 = vpack.c.bf16 %v2197_v45, %v2196_v40  ;;  %v2655_v48 = vpack.c.bf16 %v2199_v46, %v2198_v44 }
 0x1b2   : > { %2236 = vst [vmem:[%s3340_s26] sm:$0xff] %v2654_v47  ;;  %2237 = vst [vmem:[%s3340_s26 + $0x8] sm:$0xff] %v2655_v48 }
 0x22a   : > { %v2107_v56 = vpop.f32.mrb[4].mxu0  ;;  %v2189_v59 = vpop.f32.mrb[4].mxu1 }
 0x22b   : > { %v2662_v58 = vadd.f32 %v2107_v56, %v553_v52  ;;  %v2109_v60 = vpop.f32.mrb[5].mxu0  ;;  %v2664_v61 = vadd.f32 %v2189_v59, %v561_v21  ;;  %v2191_v63 = vpop.f32.mrb[5].mxu1 }
 0x22c   : > { %v2663_v62 = vadd.f32 %v2109_v60, %v557_v54  ;;  %v2111_v0 = vpop.f32.mrb[6].mxu0  ;;  %v2665_v2 = vadd.f32 %v2191_v63, %v565_v55  ;;  %v2193_v3 = vpop.f32.mrb[6].mxu1 }
 0x22d   : > { %v2200_v1 = vmax.f32 %v2662_v58, 0.0  ;;  %v2112_v4 = vpop.f32.mrb[7].mxu0  ;;  %v2202_v5 = vmax.f32 %v2664_v61, 0.0  ;;  %v2194_v7 = vpop.f32.mrb[7].mxu1 }
 0x22e   : > { %v2201_v6 = vmax.f32 %v2663_v62, 0.0  ;;  %v2203_v8 = vmax.f32 %v2665_v2, 0.0 }
 0x230   : > { %v2656_v9 = vpack.c.bf16 %v2201_v6, %v2200_v1  ;;  %v2657_v10 = vpack.c.bf16 %v2203_v8, %v2202_v5 }
 0x232   : > { %2238 = vst [vmem:[%s3340_s26 + $0x10] sm:$0xff] %v2656_v9  ;;  %2239 = vst [vmem:[%s3340_s26 + $0x18] sm:$0xff] %v2657_v10 }
 0x233 PF: > { %s19_s17 = sadd.s32 1, %s2863_s17   ;;  %s3376_s12 = smov %s2847_s13 }
 0x234   : > { %p16_p9 = scmp.ge.s32.totalorder %s19_s17, 4   ;;  %s3377_s13 = smov %s2851_s14 }
 0x235   : > { %s3378_s14 = smov %s2939_s24  ;;  %s3379_s15 = smov %s2859_s16 }
 0x236   : > { %s3380_s16 = smov %s3382_s19  ;;  %18 = sbr.rel (!%p16_p9) target bundleno = 6 (0x6), region = 88 }
 0x23d   :  { %2270 = vsyncpa [#allocation3], 1 }
 0x23e   :  { %2272 = vsyncpa [#allocation3 + $0x1], 1 }
 0x23f   :  { %2273 = vsyncpa [#allocation5], 1 }
 0x240   :  { %2275 = vsyncpa [#allocation5 + $0x1], 1 }

// kernel: backbone_forward.19
= control target key start
LH: loop header
LB: loop body
LE: loop exit
PB: predicated region body
PF: predicated region fallthrough
CT: control target
= control target key end

     0   :  { %10 = vsyncpa [#allocation4], 0  ;;  %s2996_s0 = inlined_call_operand.vmem [shape: bf16[2,4,2048], index: 0, kind: input, shape index: {}]   ;;  %s2997_s1 = inlined_call_operand.hbm [shape: bf16[2048,128], index: 1, kind: input, shape index: {}]   ;;  %s2998_s2 = inlined_call_operand.hbm [shape: f32[1,128], index: 2, kind: input, shape index: {}]   ;;  %s2999_s3 = inlined_call_operand.hbm [shape: f32[2,2048], index: 3, kind: output, shape index: {0}]   ;;  %s3000_s4 = inlined_call_operand.hbm [shape: f32[2,128], index: 4, kind: output, shape index: {1}]  }
   0x1   :  { %11 = vsyncpa [#allocation7], 0 }
   0x2   :  { %12 = vsyncpa [#allocation5], 0 }
   0x3   :  { %13 = vsyncpa [#allocation10], 0  ;;  %s2815_s15 = smov [#allocation3]   ;;  %s2719_s19 = scalar_lea.hbm %s2997_s1, 16384 }
   0x4   :  { %s21_s16 = sshll.u32 %s2815_s15, 4  ;;  %p2720_p0 = scmp.ne.s32.totalorder %s2997_s1, %s2719_s19  ;;  %s22_s16 = int_to_ptr.vmem [resolvable:$true] %s21_s16 }
   0x5   :  { %p2723_p1 = scmp.lt.u32.totalorder %s2719_s19, %s2997_s1 }
   0x7   :  { %p2725_p2 = pnand %p2723_p1, %p2720_p0 }
   0x9   :  { %2728 = shalt.err (!%p2725_p2)
}
   0xa   :  { %s2729_s24 = scalar_lea.vmem %s22_s16, 16384  ;;  %p2734_p4 = scmp.lt.s32.totalorder %s22_s16, %s22_s16 }
   0xb   :  { %p2730_p3 = scmp.ne.s32.totalorder %s22_s16, %s2729_s24  ;;  %p2735_p5 = scmp.lt.s32.totalorder %s2729_s24, %s2729_s24 }
   0xd   :  { %p2736_p6 = por %p2735_p5, %p2734_p4 }
   0xf   :  { %p2737_p7 = pnand %p2736_p6, %p2730_p3 }
  0x11   :  { %2740 = shalt.err (!%p2737_p7)
}
  0x12   :  { %s2816_s25 = smov 64   ;;  %s2817_s26 = smov 4  }
  0x13   :  { %27 = dma.hbm_to_vmem [thread:$0]  %s2997_s1, 16384, %s22_s16, [#allocation4], %s2816_s25, %s2816_s25, %s2817_s26  }
  0x14   :  { %s2818_s29 = smov [#allocation6]   ;;  %s2741_s7 = scalar_lea.hbm %s2998_s2, 16 }
  0x15   :  { %s34_s30 = sshll.u32 %s2818_s29, 4  ;;  %p2742_p8 = scmp.ne.s32.totalorder %s2998_s2, %s2741_s7  ;;  %s35_s30 = int_to_ptr.vmem [resolvable:$true] %s34_s30 }
  0x16   :  { %p2745_p9 = scmp.lt.u32.totalorder %s2741_s7, %s2998_s2 }
  0x18   :  { %p2747_p10 = pnand %p2745_p9, %p2742_p8 }
  0x1a   :  { %2750 = shalt.err (!%p2747_p10)
}
  0x1b   :  { %s2751_s12 = scalar_lea.vmem %s35_s30, 16  ;;  %s2755_s1 = scalar_lea.vmem %s35_s30, 32 }
  0x1c   :  { %p2752_p11 = scmp.ne.s32.totalorder %s35_s30, %s2751_s12  ;;  %p2756_p12 = scmp.lt.s32.totalorder %s35_s30, %s35_s30 }
  0x1d   :  { %p2757_p13 = scmp.lt.s32.totalorder %s2755_s1, %s2751_s12 }
  0x1f   :  { %p2758_p0 = por %p2757_p13, %p2756_p12 }
  0x21   :  { %p2759_p1 = pnand %p2758_p0, %p2752_p11 }
  0x23   :  { %2762 = shalt.err (!%p2759_p1)
}
  0x24   :  { %37 = dma.hbm_to_vmem [thread:$0]  %s2998_s2, 16, %s35_s30, [#allocation7]  }
  0x25   :  { %2807 = dma.done.wait [#allocation4], 16384  }
  0x26   :  { %2808 = vsyncadd [#allocation4], 4294950912 }
  0x27   :  { %2809 = dma.done.wait [#allocation7], 16  }
  0x28   :  { %2810 = vsyncadd [#allocation7], 4294967280  ;;  %v2591_v0 = vld [vmem:[#allocation3 + $0x40] sm:$0xff]   ;;  %v2595_v4 = vld [vmem:[#allocation3 + $0x48] sm:$0xff]   ;;  %v2819_v31 = vmov 1983009808   ;;  %v383_v33 = vlaneseq }
  0x29   :  { %v2592_v1 = vld [vmem:[#allocation3] sm:$0xff]   ;;  %2408 = vmatprep.subr.bf16.mxu0 %v2591_v0  ;;  %v2596_v5 = vld [vmem:[#allocation3 + $0x8] sm:$0xff]   ;;  %v2599_v8 = vld [vmem:[#allocation3 + $0x50] sm:$0xff]   ;;  %v2871_v32 = vunpack.c.l.s4 %v2819_v31  ;;  %vm117_vm0 = vcmask 1043456   ;;  %vm519_vm1 = vcmask 1041409   ;;  %vm521_vm2 = vcmask 1043459  }
  0x2a   :  { %v2593_v2 = vld [vmem:[#allocation3 + $0xc0] sm:$0xff]   ;;  %2409 = vmatpush3.bf16.msra.mxu0 %v2592_v1  ;;  %v2597_v6 = vld [vmem:[#allocation3 + $0xc8] sm:$0xff]   ;;  %v2600_v9 = vld [vmem:[#allocation3 + $0x10] sm:$0xff]   ;;  %v384_v43 = vshrl.u32 %v383_v33, 7  ;;  %vm523_vm3 = vcmask 1045509   ;;  %vm525_vm4 = vcmask 1047559  }
  0x2b   :  { %v2594_v3 = vld [vmem:[#allocation3 + $0x80] sm:$0xff]   ;;  %2430 = vmatprep.subr.bf16.mxu1 %v2593_v2  ;;  %2410 = vmatprep.subr.bf16.mxu0 %v2595_v4  ;;  %v2598_v7 = vld [vmem:[#allocation3 + $0x88] sm:$0xff]   ;;  %v2601_v10 = vld [vmem:[#allocation3 + $0xd0] sm:$0xff]   ;;  %v382_v42 = vunpack.c.0.s8 %v2871_v32 }
  0x2c   :  { %2431 = vmatpush3.bf16.msra.mxu1 %v2594_v3  ;;  %v2602_v11 = vld [vmem:[#allocation3 + $0x90] sm:$0xff]   ;;  %v2603_v12 = vld [vmem:[#allocation3 + $0x58] sm:$0xff]   ;;  %v2607_v16 = vld [vmem:[#allocation3 + $0x60] sm:$0xff]  }
  0x2d   :  { %2432 = vmatprep.subr.bf16.mxu1 %v2597_v6  ;;  %v2604_v13 = vld [vmem:[#allocation3 + $0x18] sm:$0xff]   ;;  %v2608_v17 = vld [vmem:[#allocation3 + $0x20] sm:$0xff]   ;;  %v2611_v20 = vld [vmem:[#allocation3 + $0x68] sm:$0xff]  }
  0x2e   :  { %2411 = vmatpush3.bf16.msra.mxu0 %v2596_v5  ;;  %v2605_v14 = vld [vmem:[#allocation3 + $0xd8] sm:$0xff]   ;;  %v2609_v18 = vld [vmem:[#allocation3 + $0xe0] sm:$0xff]   ;;  %v2612_v21 = vld [vmem:[#allocation3 + $0x28] sm:$0xff]  }
  0x2f   :  { %2412 = vmatprep.subr.bf16.mxu0 %v2599_v8  ;;  %v2606_v15 = vld [vmem:[#allocation3 + $0x98] sm:$0xff]   ;;  %v2610_v19 = vld [vmem:[#allocation3 + $0xa0] sm:$0xff]   ;;  %v2613_v22 = vld [vmem:[#allocation3 + $0xe8] sm:$0xff]  }
  0x30   :  { %2433 = vmatpush3.bf16.msra.mxu1 %v2598_v7  ;;  %v2614_v23 = vld [vmem:[#allocation3 + $0xa8] sm:$0xff]   ;;  %v2615_v24 = vld [vmem:[#allocation3 + $0x70] sm:$0xff]   ;;  %v2619_v28 = vld [vmem:[#allocation3 + $0x78] sm:$0xff]  }
  0x31   :  { %2434 = vmatprep.subr.bf16.mxu1 %v2601_v10  ;;  %v2616_v25 = vld [vmem:[#allocation3 + $0x30] sm:$0xff]   ;;  %v2620_v29 = vld [vmem:[#allocation3 + $0x38] sm:$0xff]   ;;  %v45_v35 = vld [vmem:[%s2996_s0] sm:$0xff] }
  0x32   :  { %2413 = vmatpush3.bf16.msra.mxu0 %v2600_v9  ;;  %v2617_v26 = vld [vmem:[#allocation3 + $0xf0] sm:$0xff]   ;;  %v2621_v30 = vld [vmem:[#allocation3 + $0xf8] sm:$0xff]   ;;  %v49_v36 = vld [vmem:[%s2996_s0 + $0x20] sm:$0xff]  ;;  %v53_v37 = vunpack.c.l.bf16 %v45_v35  ;;  %v54_v38 = vunpack.c.h.bf16 %v45_v35 }
  0x33   :  { %2414 = vmatprep.subr.bf16.mxu0 %v2603_v12  ;;  %v2618_v27 = vld [vmem:[#allocation3 + $0xb0] sm:$0xff]   ;;  %v2622_v34 = vld [vmem:[#allocation3 + $0xb8] sm:$0xff]   ;;  %v61_v39 = vunpack.c.l.bf16 %v49_v36  ;;  %v62_v40 = vunpack.c.h.bf16 %v49_v36  ;;  %v2623_v41 = vld [vmem:[#allocation3 + $0x140] sm:$0xff]  }
  0x34   :  { %2435 = vmatpush3.bf16.msra.mxu1 %v2602_v11  ;;  %v85_v44 = vcombine.high %v53_v37, %v53_v37  ;;  %v86_v45 = vcombine.high %v54_v38, %v54_v38  ;;  %v2625_v48 = vld [vmem:[#allocation3 + $0x1c0] sm:$0xff]   ;;  %v118_v49 = vsel %vm117_vm0, %v53_v37, 0.0  ;;  %v132_v50 = vsel %vm117_vm0, %v54_v38, 0.0 }
  0x35   :  { %2436 = vmatprep.subr.bf16.mxu1 %v2605_v14  ;;  %v93_v46 = vcombine.high %v61_v39, %v61_v39  ;;  %v94_v47 = vcombine.high %v62_v40, %v62_v40  ;;  %v230_v51 = vsel %vm117_vm0, %v61_v39, 0.0  ;;  %v244_v52 = vsel %vm117_vm0, %v62_v40, 0.0 }
  0x36   :  { %2415 = vmatpush3.bf16.msra.mxu0 %v2604_v13  ;;  %v119_v53 = vrot.slane %v118_v49, 4  ;;  %v125_v54 = vsel %vm117_vm0, %v85_v44, 0.0  ;;  %v133_v55 = vrot.slane %v132_v50, 4  ;;  %v139_v56 = vsel %vm117_vm0, %v86_v45, 0.0 }
  0x37   :  { %2416 = vmatprep.subr.bf16.mxu0 %v2607_v16  ;;  %v126_v57 = vrot.slane %v125_v54, 4  ;;  %v140_v58 = vrot.slane %v139_v56, 4  ;;  %v231_v59 = vrot.slane %v230_v51, 4  ;;  %v237_v60 = vsel %vm117_vm0, %v93_v46, 0.0 }
  0x38   :  { %2437 = vmatpush3.bf16.msra.mxu1 %v2606_v15  ;;  %v120_v61 = vadd.f32 %v119_v53, %v118_v49  ;;  %v134_v62 = vadd.f32 %v133_v55, %v132_v50  ;;  %v238_v63 = vrot.slane %v237_v60, 4  ;;  %v245_v0 = vrot.slane %v244_v52, 4 }
  0x39   :  { %2438 = vmatprep.subr.bf16.mxu1 %v2609_v18  ;;  %v127_v1 = vadd.f32 %v126_v57, %v125_v54  ;;  %v141_v2 = vadd.f32 %v140_v58, %v139_v56  ;;  %v232_v3 = vadd.f32 %v231_v59, %v230_v51  ;;  %v251_v4 = vsel %vm117_vm0, %v94_v47, 0.0  ;;  %v46_v58 = vld [vmem:[%s2996_s0 + $0x8] sm:$0xff] }
  0x3a   :  { %2417 = vmatpush3.bf16.msra.mxu0 %v2608_v17  ;;  %v121_v5 = vrot.slane %v120_v61, 2  ;;  %v135_v6 = vrot.slane %v134_v62, 2  ;;  %v239_v7 = vadd.f32 %v238_v63, %v237_v60  ;;  %v246_v8 = vadd.f32 %v245_v0, %v244_v52 }
  0x3b   :  { %2418 = vmatprep.subr.bf16.mxu0 %v2611_v20  ;;  %v128_v9 = vrot.slane %v127_v1, 2  ;;  %v142_v10 = vrot.slane %v141_v2, 2  ;;  %v233_v11 = vrot.slane %v232_v3, 2  ;;  %v252_v12 = vrot.slane %v251_v4, 4 }
  0x3c   :  { %2439 = vmatpush3.bf16.msra.mxu1 %v2610_v19  ;;  %v122_v13 = vadd.f32 %v121_v5, %v120_v61  ;;  %v136_v14 = vadd.f32 %v135_v6, %v134_v62  ;;  %v240_v15 = vrot.slane %v239_v7, 2  ;;  %v247_v16 = vrot.slane %v246_v8, 2  ;;  %v50_v61 = vld [vmem:[%s2996_s0 + $0x28] sm:$0xff]  ;;  %v2624_v6 = vld [vmem:[#allocation3 + $0x100] sm:$0xff]  }
  0x3d   :  { %2440 = vmatprep.subr.bf16.mxu1 %v2613_v22  ;;  %v129_v17 = vadd.f32 %v128_v9, %v127_v1  ;;  %v143_v18 = vadd.f32 %v142_v10, %v141_v2  ;;  %v234_v19 = vadd.f32 %v233_v11, %v232_v3  ;;  %v253_v20 = vadd.f32 %v252_v12, %v251_v4 }
  0x3e   :  { %2419 = vmatpush3.bf16.msra.mxu0 %v2612_v21  ;;  %v123_v21 = vrot.slane %v122_v13, 1  ;;  %v137_v22 = vrot.slane %v136_v14, 1  ;;  %v2888_v38 = vsub.s32 %v382_v42, %v384_v43  ;;  %v55_v62 = vunpack.c.l.bf16 %v46_v58 }
  0x3f   :  { %2420 = vmatprep.subr.bf16.mxu0 %v2615_v24  ;;  %v248_v24 = vadd.f32 %v247_v16, %v246_v8  ;;  %v56_v63 = vunpack.c.h.bf16 %v46_v58  ;;  %v63_v0 = vunpack.c.l.bf16 %v50_v61  ;;  %v64_v1 = vunpack.c.h.bf16 %v50_v61  ;;  %v2627_v16 = vld [vmem:[#allocation3 + $0x148] sm:$0xff]  }
  0x40   :  { %2441 = vmatpush3.bf16.msra.mxu1 %v2614_v23  ;;  %v241_v23 = vadd.f32 %v240_v15, %v239_v7  ;;  %v87_v5 = vcombine.high %v55_v62, %v55_v62  ;;  %v146_v10 = vsel %vm117_vm0, %v55_v62, 0.0  ;;  %v2636_v62 = vld [vmem:[#allocation3 + $0x118] sm:$0xff]  }
  0x41   :  { %2442 = vmatprep.subr.bf16.mxu1 %v2617_v26  ;;  %v144_v26 = vrot.slane %v143_v18, 1  ;;  %v249_v32 = vrot.slane %v248_v24, 1  ;;  %v88_v7 = vcombine.high %v56_v63, %v56_v63  ;;  %v95_v8 = vcombine.high %v63_v0, %v63_v0 }
  0x42   :  { %2421 = vmatpush3.bf16.msra.mxu0 %v2616_v25  ;;  %v130_v25 = vrot.slane %v129_v17, 1  ;;  %v242_v31 = vrot.slane %v241_v23, 1  ;;  %v96_v9 = vcombine.high %v64_v1, %v64_v1  ;;  %v147_v15 = vrot.slane %v146_v10, 4 }
  0x43   :  { %2422 = vmatprep.subr.bf16.mxu0 %v2619_v28  ;;  %v254_v28 = vrot.slane %v253_v20, 2  ;;  %v250_v39 = vadd.f32 %v249_v32, %v248_v24  ;;  %v2631_v32 = vld [vmem:[#allocation3 + $0x150] sm:$0xff]  }
  0x44   :  { %2443 = vmatpush3.bf16.msra.mxu1 %v2618_v27  ;;  %v235_v27 = vrot.slane %v234_v19, 1  ;;  %v131_v33 = vadd.f32 %v130_v25, %v129_v17  ;;  %v243_v37 = vadd.f32 %v242_v31, %v241_v23  ;;  %v2629_v17 = vld [vmem:[#allocation3 + $0x1c8] sm:$0xff]   ;;  %v148_v24 = vadd.f32 %v147_v15, %v146_v10 }
  0x45   :  { %2444 = vmatprep.subr.bf16.mxu1 %v2621_v30  ;;  %v138_v30 = vadd.f32 %v137_v22, %v136_v14  ;;  %v255_v36 = vadd.f32 %v254_v28, %v253_v20  ;;  %v2626_v14 = vld [vmem:[#allocation3 + $0x180] sm:$0xff]   ;;  %v167_v20 = vsel %vm117_vm0, %v88_v7, 0.0  ;;  %v2628_v23 = vld [vmem:[#allocation3 + $0x108] sm:$0xff]  }
  0x46   :  { %2423 = vmatpush3.bf16.msra.mxu0 %v2620_v29  ;;  %v124_v29 = vadd.f32 %v123_v21, %v122_v13  ;;  %v236_v35 = vadd.f32 %v235_v27, %v234_v19  ;;  %v160_v19 = vsel %vm117_vm0, %v56_v63, 0.0  ;;  %v258_v21 = vsel %vm117_vm0, %v63_v0, 0.0  ;;  %v2630_v31 = vld [vmem:[#allocation3 + $0x188] sm:$0xff]  }
  0x47   :  { %2452 = vmatprep.subr.bf16.mxu0 %v2623_v41  ;;  %v256_v40 = vrot.slane %v255_v36, 1  ;;  %v168_v27 = vrot.slane %v167_v20, 4  ;;  %v259_v28 = vrot.slane %v258_v21, 4 }
  0x48   :  { %2445 = vmatpush3.bf16.msra.mxu1 %v2622_v34  ;;  %v145_v34 = vadd.f32 %v144_v26, %v143_v18  ;;  %v378_v41 = vcombine.low %v124_v29, %v131_v33  ;;  %v446_v45 = vcombine.low %v236_v35, %v243_v37  ;;  %v153_v18 = vsel %vm117_vm0, %v87_v5, 0.0 }
  0x49   :  { %2474 = vmatprep.subr.bf16.mxu1 %v2625_v48  ;;  %v257_v46 = vadd.f32 %v256_v40, %v255_v36  ;;  %v154_v25 = vrot.slane %v153_v18, 4  ;;  %v161_v26 = vrot.slane %v160_v19, 4  ;;  %v265_v29 = vsel %vm117_vm0, %v95_v8, 0.0  ;;  %v2638_v8 = vld [vmem:[#allocation3 + $0x198] sm:$0xff]  }
  0x4a   :  { %v379_v44 = vcombine.low %v138_v30, %v145_v34  ;;  %v386_v47 = vrot.slane %v378_v41, %v2888_v38  ;;  %v454_v50 = vrot.slane %v446_v45, %v2888_v38  ;;  %v272_v30 = vsel %vm117_vm0, %v64_v1, 0.0 }
  0x4b   :  { %v447_v49 = vcombine.low %v250_v39, %v257_v46  ;;  %v149_v33 = vrot.slane %v148_v24, 2  ;;  %v155_v34 = vadd.f32 %v154_v25, %v153_v18  ;;  %v162_v35 = vadd.f32 %v161_v26, %v160_v19  ;;  %v2641_v18 = vld [vmem:[#allocation3 + $0x1e0] sm:$0xff]   ;;  %v2643_v25 = vld [vmem:[#allocation3 + $0x168] sm:$0xff]  }
  0x4c   :  { %v393_v48 = vrot.slane %v379_v44, %v2888_v38  ;;  %v266_v36 = vrot.slane %v265_v29, 4  ;;  %v169_v37 = vadd.f32 %v168_v27, %v167_v20  ;;  %v260_v39 = vadd.f32 %v259_v28, %v258_v21  ;;  %v2642_v27 = vld [vmem:[#allocation3 + $0x1a0] sm:$0xff]   ;;  %v2645_v28 = vld [vmem:[#allocation3 + $0x1e8] sm:$0xff]  }
  0x4d   :  { %v461_v51 = vrot.slane %v447_v49, %v2888_v38  ;;  %v273_v40 = vrot.slane %v272_v30, 4  ;;  %v279_v41 = vsel %vm117_vm0, %v96_v9, 0.0  ;;  %v150_v44 = vadd.f32 %v149_v33, %v148_v24  ;;  %v2644_v33 = vld [vmem:[#allocation3 + $0x128] sm:$0xff]  }
  0x4e   :  { %v394_v52 = vcombine.low %v386_v47, %v393_v48  ;;  %v156_v45 = vrot.slane %v155_v34, 2  ;;  %v163_v46 = vrot.slane %v162_v35, 2  ;;  %v267_v47 = vadd.f32 %v266_v36, %v265_v29  ;;  %v2633_v48 = vld [vmem:[#allocation3 + $0x1d0] sm:$0xff]   ;;  %v2646_v36 = vld [vmem:[#allocation3 + $0x1a8] sm:$0xff]  }
  0x4f   :  { %v462_v53 = vcombine.low %v454_v50, %v461_v51  ;;  %v170_v49 = vrot.slane %v169_v37, 2  ;;  %v261_v50 = vrot.slane %v260_v39, 2  ;;  %v274_v51 = vadd.f32 %v273_v40, %v272_v30 }
  0x51   :  { %v518_v42 = vrot.slane %v462_v53, 7  ;;  %v2632_v53 = vld [vmem:[#allocation3 + $0x110] sm:$0xff]   ;;  %v171_v58 = vadd.f32 %v170_v49, %v169_v37  ;;  %v2652_v49 = vld [vmem:[#allocation3 + $0x138] sm:$0xff]  }
  0x52   :  { %v2649_v37 = vld [vmem:[#allocation3 + $0x1f0] sm:$0xff]  }
  0x53   :  { %v520_v43 = vsel %vm519_vm1, %v518_v42, %v394_v52  ;;  %v280_v52 = vrot.slane %v279_v41, 4 }
  0x54   :  { %v522_v54 = vsel %vm521_vm2, %v518_v42, %v520_v43  ;;  %v151_v43 = vrot.slane %v150_v44, 1 }
  0x55   :  { %v524_v55 = vsel %vm523_vm3, %v518_v42, %v522_v54  ;;  %v157_v54 = vadd.f32 %v156_v45, %v155_v34  ;;  %v281_v61 = vadd.f32 %v280_v52, %v279_v41  ;;  %v2647_v34 = vld [vmem:[#allocation3 + $0x170] sm:$0xff]   ;;  %v2655_v52 = vld [vmem:[#allocation3 + $0x240] sm:$0xff]  }
  0x56   :  { %v526_v56 = vsel %vm525_vm4, %v518_v42, %v524_v55  ;;  %v2634_v42 = vld [vmem:[#allocation3 + $0x190] sm:$0xff]   ;;  %v164_v55 = vadd.f32 %v163_v46, %v162_v35  ;;  %v152_v63 = vadd.f32 %v151_v43, %v150_v44  ;;  %v2651_v44 = vld [vmem:[#allocation3 + $0x178] sm:$0xff]  }
  0x57   :  { %v785_v57 = vmul.f32 0.25, %v526_v56  ;;  %v268_v56 = vrot.slane %v267_v47, 2  ;;  %v158_v0 = vrot.slane %v157_v54, 1  ;;  %v282_v7 = vrot.slane %v281_v61, 2  ;;  %v2648_v41 = vld [vmem:[#allocation3 + $0x130] sm:$0xff]  }
  0x58   :  { %v165_v1 = vrot.slane %v164_v55, 1  ;;  %v2650_v46 = vld [vmem:[#allocation3 + $0x1b0] sm:$0xff]  }
  0x59   :  { %v804_v59 = vrot.slane %v785_v57, %v2888_v38  ;;  %789 = vst [vmem:[#allocation8] sm:$0xff] %v785_v57  ;;  %v797_v60 = vcombine.high %v785_v57, %v785_v57  ;;  %v2635_v57 = vld [vmem:[#allocation3 + $0x158] sm:$0xff]   ;;  %v159_v9 = vadd.f32 %v158_v0, %v157_v54  ;;  %v2657_v54 = vld [vmem:[#allocation3 + $0x2c0] sm:$0xff]  }
  0x5a   :  { %v166_v10 = vadd.f32 %v165_v1, %v164_v55  ;;  %v47_v55 = vld [vmem:[%s2996_s0 + $0x10] sm:$0xff] }
  0x5b   :  { %v812_v2 = vcombine.high %v804_v59, %v804_v59  ;;  %v881_v3 = vpack.c.bf16 %v804_v59, %v804_v59  ;;  %v811_v4 = vrot.slane %v797_v60, %v2888_v38  ;;  %v262_v59 = vadd.f32 %v261_v50, %v260_v39 }
  0x5c   :  { %v275_v60 = vrot.slane %v274_v51, 2  ;;  %v395_v21 = vcombine.low %v152_v63, %v159_v9 }
  0x5d   :  { %v882_v11 = vpack.c.bf16 %v812_v2, %v812_v2  ;;  %v813_v12 = vcombine.high %v811_v4, %v811_v4  ;;  %v883_v13 = vpack.c.bf16 %v811_v4, %v811_v4  ;;  %v269_v2 = vadd.f32 %v268_v56, %v267_v47  ;;  %v2653_v47 = vld [vmem:[#allocation3 + $0x1f8] sm:$0xff]   ;;  %v51_v56 = vld [vmem:[%s2996_s0 + $0x30] sm:$0xff] }
  0x5e   :  { %v172_v4 = vrot.slane %v171_v58, 1  ;;  %v263_v5 = vrot.slane %v262_v59, 1  ;;  %v403_v29 = vrot.slane %v395_v21, %v2888_v38 }
  0x5f   :  { %1960 = vmatprep.mubr.bf16.mxu0 %v882_v11  ;;  %v884_v22 = vpack.c.bf16 %v813_v12, %v813_v12  ;;  %v270_v11 = vrot.slane %v269_v2, 1  ;;  %v2639_v12 = vld [vmem:[#allocation3 + $0x160] sm:$0xff]  }
  0x60   :  { %1961 = vmatmul.mubr.bf16.vlgmr.msra.gmra.mrb[0].mxu0 %v881_v3  ;;  %v2637_v3 = vld [vmem:[#allocation3 + $0x1d8] sm:$0xff]  }
  0x61   :  { %2453 = vmatpush3.bf16.msra.mxu0 %v2624_v6  ;;  %2000 = vmatprep.mubr.bf16.mxu1 %v884_v22  ;;  %v276_v6 = vadd.f32 %v275_v60, %v274_v51  ;;  %v66_v60 = vunpack.c.h.bf16 %v51_v56 }
  0x62   :  { %2001 = vmatmul.mubr.bf16.vlgmr.msra.gmra.mrb[0].mxu1 %v883_v13  ;;  %2454 = vmatprep.subr.bf16.mxu0 %v2627_v16  ;;  %v173_v13 = vadd.f32 %v172_v4, %v171_v58  ;;  %v283_v16 = vadd.f32 %v282_v7, %v281_v61  ;;  %v58_v58 = vunpack.c.h.bf16 %v47_v55 }
  0x63   :  { %2475 = vmatpush3.bf16.msra.mxu1 %v2626_v14  ;;  %v264_v14 = vadd.f32 %v263_v5, %v262_v59  ;;  %v277_v15 = vrot.slane %v276_v6, 1  ;;  %v65_v59 = vunpack.c.l.bf16 %v51_v56 }
  0x64   :  { %2476 = vmatprep.subr.bf16.mxu1 %v2629_v17  ;;  %v271_v17 = vadd.f32 %v270_v11, %v269_v2  ;;  %v284_v20 = vrot.slane %v283_v16, 1  ;;  %v396_v22 = vcombine.low %v166_v10, %v173_v13  ;;  %v90_v0 = vcombine.high %v58_v58, %v58_v58 }
  0x65   :  { %2455 = vmatpush3.bf16.msra.mxu0 %v2628_v23  ;;  %v278_v19 = vadd.f32 %v277_v15, %v276_v6  ;;  %v2640_v23 = vld [vmem:[#allocation3 + $0x120] sm:$0xff]   ;;  %v97_v1 = vcombine.high %v65_v59, %v65_v59  ;;  %v98_v2 = vcombine.high %v66_v60, %v66_v60  ;;  %v188_v10 = vsel %vm117_vm0, %v58_v58, 0.0  ;;  %v2667_v58 = vld [vmem:[#allocation3 + $0x258] sm:$0xff]  }
  0x66   :  { %2456 = vmatprep.subr.bf16.mxu0 %v2631_v32  ;;  %v463_v24 = vcombine.low %v264_v14, %v271_v17  ;;  %v285_v26 = vadd.f32 %v284_v20, %v283_v16  ;;  %v410_v30 = vrot.slane %v396_v22, %v2888_v38  ;;  %v2656_v6 = vld [vmem:[#allocation3 + $0x200] sm:$0xff]   ;;  %v195_v11 = vsel %vm117_vm0, %v90_v0, 0.0  ;;  %v2659_v17 = vld [vmem:[#allocation3 + $0x248] sm:$0xff]  }
  0x67   :  { %2477 = vmatpush3.bf16.msra.mxu1 %v2630_v31  ;;  %v2658_v15 = vld [vmem:[#allocation3 + $0x280] sm:$0xff]   ;;  %v196_v20 = vrot.slane %v195_v11, 4  ;;  %v286_v21 = vsel %vm117_vm0, %v65_v59, 0.0 }
  0x68   :  { %2478 = vmatprep.subr.bf16.mxu1 %v2633_v48  ;;  %v464_v31 = vcombine.low %v278_v19, %v285_v26  ;;  %v471_v32 = vrot.slane %v463_v24, %v2888_v38  ;;  %v411_v39 = vcombine.low %v403_v29, %v410_v30  ;;  %v189_v19 = vrot.slane %v188_v10, 4  ;;  %v2660_v26 = vld [vmem:[#allocation3 + $0x208] sm:$0xff]  }
  0x69   :  { %2457 = vmatpush3.bf16.msra.mxu0 %v2632_v53  ;;  %v287_v24 = vrot.slane %v286_v21, 4  ;;  %v197_v30 = vadd.f32 %v196_v20, %v195_v11  ;;  %v2672_v20 = vld [vmem:[#allocation3 + $0x220] sm:$0xff]  }
  0x6a   :  { %2458 = vmatprep.subr.bf16.mxu0 %v2635_v57  ;;  %v478_v35 = vrot.slane %v464_v31, %v2888_v38  ;;  %v57_v57 = vunpack.c.l.bf16 %v47_v55  ;;  %v190_v29 = vadd.f32 %v189_v19, %v188_v10 }
  0x6b   :  { %2479 = vmatpush3.bf16.msra.mxu1 %v2634_v42  ;;  %v2654_v42 = vld [vmem:[#allocation3 + $0x1b8] sm:$0xff]  }
  0x6c   :  { %2480 = vmatprep.subr.bf16.mxu1 %v2637_v3  ;;  %v479_v40 = vcombine.low %v471_v32, %v478_v35  ;;  %v89_v63 = vcombine.high %v57_v57, %v57_v57  ;;  %v174_v7 = vsel %vm117_vm0, %v57_v57, 0.0  ;;  %v2662_v32 = vld [vmem:[#allocation3 + $0x288] sm:$0xff]   ;;  %v288_v35 = vadd.f32 %v287_v24, %v286_v21  ;;  %v2666_v57 = vld [vmem:[#allocation3 + $0x290] sm:$0xff]   ;;  %v2674_v24 = vld [vmem:[#allocation3 + $0x2a0] sm:$0xff]  }
  0x6d   :  { %2459 = vmatpush3.bf16.msra.mxu0 %v2636_v62 }
  0x6e   :  { %2460 = vmatprep.subr.bf16.mxu0 %v2639_v12  ;;  %v529_v45 = vrot.slane %v479_v40, 7  ;;  %v181_v9 = vsel %vm117_vm0, %v89_v63, 0.0  ;;  %v191_v40 = vrot.slane %v190_v29, 2  ;;  %v2668_v63 = vld [vmem:[#allocation3 + $0x218] sm:$0xff]  }
  0x6f   :  { %2481 = vmatpush3.bf16.msra.mxu1 %v2638_v8  ;;  %v175_v8 = vrot.slane %v174_v7, 4  ;;  %v182_v16 = vrot.slane %v181_v9, 4 }
  0x70   :  { %2482 = vmatprep.subr.bf16.mxu1 %v2641_v18  ;;  %v530_v48 = vsel %vm519_vm1, %v529_v45, %v411_v39 }
  0x71   :  { %2461 = vmatpush3.bf16.msra.mxu0 %v2640_v23  ;;  %v531_v50 = vsel %vm521_vm2, %v529_v45, %v530_v48  ;;  %v176_v18 = vadd.f32 %v175_v8, %v174_v7  ;;  %v183_v23 = vadd.f32 %v182_v16, %v181_v9  ;;  %v2670_v8 = vld [vmem:[#allocation3 + $0x298] sm:$0xff]  }
  0x72   :  { %2462 = vmatprep.subr.bf16.mxu0 %v2643_v25  ;;  %v532_v51 = vsel %vm523_vm3, %v529_v45, %v531_v50  ;;  %v293_v25 = vsel %vm117_vm0, %v97_v1, 0.0 }
  0x73   :  { %2483 = vmatpush3.bf16.msra.mxu1 %v2642_v27  ;;  %v533_v53 = vsel %vm525_vm4, %v529_v45, %v532_v51  ;;  %v2661_v27 = vld [vmem:[#allocation3 + $0x2c8] sm:$0xff]   ;;  %v294_v31 = vrot.slane %v293_v25, 4  ;;  %v2665_v45 = vld [vmem:[#allocation3 + $0x2d0] sm:$0xff]   ;;  %v192_v51 = vadd.f32 %v191_v40, %v190_v29  ;;  %v2683_v40 = vld [vmem:[#allocation3 + $0x278] sm:$0xff]  }
  0x74   :  { %2484 = vmatprep.subr.bf16.mxu1 %v2645_v28  ;;  %v786_v43 = vmul.f32 0.25, %v533_v53  ;;  %v177_v28 = vrot.slane %v176_v18, 2  ;;  %v2677_v29 = vld [vmem:[#allocation3 + $0x2e8] sm:$0xff]  }
  0x75   :  { %2463 = vmatpush3.bf16.msra.mxu0 %v2644_v33  ;;  %v2663_v33 = vld [vmem:[#allocation3 + $0x250] sm:$0xff]  }
  0x76   :  { %2464 = vmatprep.subr.bf16.mxu0 %v2647_v34  ;;  %v821_v61 = vrot.slane %v786_v43, %v2888_v38  ;;  %790 = vst [vmem:[#allocation8 + $0x8] sm:$0xff] %v786_v43  ;;  %v814_v62 = vcombine.high %v786_v43, %v786_v43  ;;  %v184_v34 = vrot.slane %v183_v23, 2  ;;  %v178_v39 = vadd.f32 %v177_v28, %v176_v18  ;;  %v2673_v18 = vld [vmem:[#allocation3 + $0x2e0] sm:$0xff]  }
  0x77   :  { %2485 = vmatpush3.bf16.msra.mxu1 %v2646_v36  ;;  %v300_v36 = vsel %vm117_vm0, %v66_v60, 0.0  ;;  %v193_v60 = vrot.slane %v192_v51, 1 }
  0x78   :  { %2486 = vmatprep.subr.bf16.mxu1 %v2649_v37  ;;  %v829_v3 = vcombine.high %v821_v61, %v821_v61  ;;  %v885_v4 = vpack.c.bf16 %v821_v61, %v821_v61  ;;  %v828_v5 = vrot.slane %v814_v62, %v2888_v38  ;;  %v307_v37 = vsel %vm117_vm0, %v98_v2, 0.0 }
  0x79   :  { %2465 = vmatpush3.bf16.msra.mxu0 %v2648_v41  ;;  %v198_v41 = vrot.slane %v197_v30, 2  ;;  %v301_v48 = vrot.slane %v300_v36, 4  ;;  %v179_v50 = vrot.slane %v178_v39, 1 }
  0x7a   :  { %2466 = vmatprep.subr.bf16.mxu0 %v2651_v44  ;;  %v886_v12 = vpack.c.bf16 %v829_v3, %v829_v3  ;;  %v830_v13 = vcombine.high %v828_v5, %v828_v5  ;;  %v887_v14 = vpack.c.bf16 %v828_v5, %v828_v5  ;;  %v295_v44 = vadd.f32 %v294_v31, %v293_v25 }
  0x7b   :  { %2487 = vmatpush3.bf16.msra.mxu1 %v2650_v46  ;;  %v185_v46 = vadd.f32 %v184_v34, %v183_v23  ;;  %v302_v55 = vadd.f32 %v301_v48, %v300_v36  ;;  %v180_v59 = vadd.f32 %v179_v50, %v178_v39  ;;  %v194_v5 = vadd.f32 %v193_v60, %v192_v51  ;;  %v2675_v23 = vld [vmem:[#allocation3 + $0x268] sm:$0xff]   ;;  %v2681_v36 = vld [vmem:[#allocation3 + $0x2f0] sm:$0xff]   ;;  %v2687_v50 = vld [vmem:[#allocation3 + $0x340] sm:$0xff]  }
  0x7c   :  { %2488 = vmatprep.subr.bf16.mxu1 %v2653_v47  ;;  %2040 = vmatprep.mubr.bf16.mxu0 %v886_v12  ;;  %v888_v22 = vpack.c.bf16 %v830_v13, %v830_v13  ;;  %v289_v47 = vrot.slane %v288_v35, 2  ;;  %v296_v53 = vrot.slane %v295_v44, 2  ;;  %v2671_v12 = vld [vmem:[#allocation3 + $0x260] sm:$0xff]  }
  0x7d   :  { %2467 = vmatpush3.bf16.msra.mxu0 %v2652_v49  ;;  %v308_v49 = vrot.slane %v307_v37, 4  ;;  %v186_v43 = vrot.slane %v185_v46, 1  ;;  %v303_v2 = vrot.slane %v302_v55, 2 }
  0x7e   :  { %2496 = vmatprep.subr.bf16.mxu0 %v2655_v52  ;;  %2080 = vmatprep.mubr.bf16.mxu1 %v888_v22  ;;  %v199_v52 = vadd.f32 %v198_v41, %v197_v30  ;;  %v297_v62 = vadd.f32 %v296_v53, %v295_v44  ;;  %v2676_v30 = vld [vmem:[#allocation3 + $0x228] sm:$0xff]   ;;  %v2682_v41 = vld [vmem:[#allocation3 + $0x2b0] sm:$0xff]   ;;  %v48_v53 = vld [vmem:[%s2996_s0 + $0x18] sm:$0xff] }
  0x7f   :  { %2489 = vmatpush3.bf16.msra.mxu1 %v2654_v42  ;;  %v2664_v42 = vld [vmem:[#allocation3 + $0x210] sm:$0xff]   ;;  %v309_v56 = vadd.f32 %v308_v49, %v307_v37  ;;  %v187_v0 = vadd.f32 %v186_v43, %v185_v46  ;;  %v304_v10 = vadd.f32 %v303_v2, %v302_v55  ;;  %v2689_v43 = vld [vmem:[#allocation3 + $0x3c0] sm:$0xff]   ;;  %v60_v55 = vunpack.c.h.bf16 %v48_v53 }
  0x80   :  { %2518 = vmatprep.subr.bf16.mxu1 %v2657_v54  ;;  %2041 = vmatmul.mubr.bf16.vlgmr.msra.gmra.mrb[4].mxu0 %v885_v4  ;;  %v290_v54 = vadd.f32 %v289_v47, %v288_v35  ;;  %v200_v61 = vrot.slane %v199_v52, 1  ;;  %v2669_v4 = vld [vmem:[#allocation3 + $0x2d8] sm:$0xff]   ;;  %v298_v7 = vrot.slane %v297_v62, 1  ;;  %v2680_v37 = vld [vmem:[#allocation3 + $0x230] sm:$0xff]  }
  0x81   :  { %2497 = vmatpush3.bf16.msra.mxu0 %v2656_v6  ;;  %v310_v3 = vrot.slane %v309_v56, 2  ;;  %v412_v16 = vcombine.low %v180_v59, %v187_v0  ;;  %v2684_v47 = vld [vmem:[#allocation3 + $0x238] sm:$0xff]  }
  0x82   :  { %2081 = vmatmul.mubr.bf16.vlgmr.msra.gmra.mrb[4].mxu1 %v887_v14  ;;  %2498 = vmatprep.subr.bf16.mxu0 %v2659_v17  ;;  %v291_v1 = vrot.slane %v290_v54, 1  ;;  %v201_v6 = vadd.f32 %v200_v61, %v199_v52  ;;  %v299_v13 = vadd.f32 %v298_v7, %v297_v62  ;;  %v305_v14 = vrot.slane %v304_v10, 1  ;;  %v2686_v52 = vld [vmem:[#allocation3 + $0x2b8] sm:$0xff]  }
  0x83   :  { %2519 = vmatpush3.bf16.msra.mxu1 %v2658_v15  ;;  %v311_v11 = vadd.f32 %v310_v3, %v309_v56  ;;  %v420_v25 = vrot.slane %v412_v16, %v2888_v38  ;;  %v92_v61 = vcombine.high %v60_v55, %v60_v55 }
  0x84   :  { %2520 = vmatprep.subr.bf16.mxu1 %v2661_v27  ;;  %v292_v9 = vadd.f32 %v291_v1, %v290_v54  ;;  %v413_v17 = vcombine.low %v194_v5, %v201_v6  ;;  %v306_v21 = vadd.f32 %v305_v14, %v304_v10  ;;  %v59_v54 = vunpack.c.l.bf16 %v48_v53  ;;  %v2688_v10 = vld [vmem:[#allocation3 + $0x300] sm:$0xff]  }
  0x85   :  { %2499 = vmatpush3.bf16.msra.mxu0 %v2660_v26  ;;  %v312_v15 = vrot.slane %v311_v11, 1  ;;  %v216_v6 = vsel %vm117_vm0, %v60_v55, 0.0  ;;  %v223_v7 = vsel %vm117_vm0, %v92_v61, 0.0 }
  0x86   :  { %2500 = vmatprep.subr.bf16.mxu0 %v2663_v33  ;;  %v480_v19 = vcombine.low %v292_v9, %v299_v13  ;;  %v427_v26 = vrot.slane %v413_v17, %v2888_v38  ;;  %v2678_v33 = vld [vmem:[#allocation3 + $0x2a8] sm:$0xff]   ;;  %v91_v60 = vcombine.high %v59_v54, %v59_v54  ;;  %v202_v3 = vsel %vm117_vm0, %v59_v54, 0.0  ;;  %v2699_v54 = vld [vmem:[#allocation3 + $0x358] sm:$0xff]  }
  0x87   :  { %2521 = vmatpush3.bf16.msra.mxu1 %v2662_v32  ;;  %v313_v22 = vadd.f32 %v312_v15, %v311_v11  ;;  %v2679_v32 = vld [vmem:[#allocation3 + $0x270] sm:$0xff]   ;;  %v2691_v13 = vld [vmem:[#allocation3 + $0x348] sm:$0xff]   ;;  %v217_v15 = vrot.slane %v216_v6, 4  ;;  %v224_v16 = vrot.slane %v223_v7, 4 }
  0x88   :  { %2522 = vmatprep.subr.bf16.mxu1 %v2665_v45  ;;  %v488_v28 = vrot.slane %v480_v19, %v2888_v38  ;;  %v428_v34 = vcombine.low %v420_v25, %v427_v26  ;;  %v2685_v45 = vld [vmem:[#allocation3 + $0x2f8] sm:$0xff]   ;;  %v209_v5 = vsel %vm117_vm0, %v91_v60, 0.0  ;;  %v2690_v19 = vld [vmem:[#allocation3 + $0x380] sm:$0xff]  }
  0x89   :  { %2501 = vmatpush3.bf16.msra.mxu0 %v2664_v42  ;;  %v481_v27 = vcombine.low %v306_v21, %v313_v22  ;;  %v52_v42 = vld [vmem:[%s2996_s0 + $0x38] sm:$0xff]  ;;  %v218_v25 = vadd.f32 %v217_v15, %v216_v6  ;;  %v225_v26 = vadd.f32 %v224_v16, %v223_v7  ;;  %v2705_v15 = vld [vmem:[#allocation3 + $0x3e0] sm:$0xff]   ;;  %s2820_s0 = smov [#allocation8]  }
  0x8a   :  { %2502 = vmatprep.subr.bf16.mxu0 %v2667_v58  ;;  %v67_v56 = vunpack.c.l.bf16 %v52_v42  ;;  %s2255_s30 = sshll.u32 %s2820_s0, 4  ;;  %s2256_s30 = int_to_ptr.vmem [resolvable:$true] %s2255_s30 }
  0x8b   :  { %2523 = vmatpush3.bf16.msra.mxu1 %v2666_v57  ;;  %v495_v31 = vrot.slane %v481_v27, %v2888_v38  ;;  %v68_v57 = vunpack.c.h.bf16 %v52_v42  ;;  %s2763_s5 = scalar_lea.vmem %s2256_s30, 512  ;;  %p2768_p3 = scmp.lt.s32.totalorder %s2256_s30, %s2256_s30 }
  0x8c   :  { %2524 = vmatprep.subr.bf16.mxu1 %v2669_v4  ;;  %v99_v62 = vcombine.high %v67_v56, %v67_v56  ;;  %v203_v4 = vrot.slane %v202_v3, 4  ;;  %v314_v17 = vsel %vm117_vm0, %v67_v56, 0.0  ;;  %p2764_p2 = scmp.ne.s32.totalorder %s2256_s30, %s2763_s5  ;;  %p2769_p4 = scmp.lt.s32.totalorder %s2763_s5, %s2763_s5 }
  0x8d   :  { %2503 = vmatpush3.bf16.msra.mxu0 %v2668_v63  ;;  %v496_v35 = vcombine.low %v488_v28, %v495_v31  ;;  %v100_v63 = vcombine.high %v68_v57, %v68_v57  ;;  %v315_v21 = vrot.slane %v314_v17, 4  ;;  %v2692_v28 = vld [vmem:[#allocation3 + $0x308] sm:$0xff]   ;;  %v328_v31 = vsel %vm117_vm0, %v68_v57, 0.0 }
  0x8e   :  { %2504 = vmatprep.subr.bf16.mxu0 %v2671_v12  ;;  %v210_v12 = vrot.slane %v209_v5, 4  ;;  %v204_v14 = vadd.f32 %v203_v4, %v202_v3  ;;  %v321_v22 = vsel %vm117_vm0, %v99_v62, 0.0  ;;  %v2700_v4 = vld [vmem:[#allocation3 + $0x318] sm:$0xff]   ;;  %p2770_p5 = por %p2769_p4, %p2768_p3 }
  0x8f   :  { %2525 = vmatpush3.bf16.msra.mxu1 %v2670_v8  ;;  %v536_v39 = vrot.slane %v496_v35, 7  ;;  %v322_v27 = vrot.slane %v321_v22, 4  ;;  %v219_v35 = vrot.slane %v218_v25, 2 }
  0x90   :  { %2526 = vmatprep.subr.bf16.mxu1 %v2673_v18  ;;  %p2771_p6 = pnand %p2770_p5, %p2764_p2 }
  0x91   :  { %2505 = vmatpush3.bf16.msra.mxu0 %v2672_v20  ;;  %v537_v44 = vsel %vm519_vm1, %v536_v39, %v428_v34  ;;  %v211_v20 = vadd.f32 %v210_v12, %v209_v5 }
  0x92   :  { %2506 = vmatprep.subr.bf16.mxu0 %v2675_v23  ;;  %v538_v46 = vsel %vm521_vm2, %v536_v39, %v537_v44  ;;  %v2693_v23 = vld [vmem:[#allocation3 + $0x3c8] sm:$0xff]   ;;  %v329_v44 = vrot.slane %v328_v31, 4 }
  0x93   :  { %2527 = vmatpush3.bf16.msra.mxu1 %v2674_v24  ;;  %v539_v48 = vsel %vm523_vm3, %v536_v39, %v538_v46  ;;  %v205_v24 = vrot.slane %v204_v14, 2  ;;  %v2697_v46 = vld [vmem:[#allocation3 + $0x3d0] sm:$0xff]  }
  0x94   :  { %2528 = vmatprep.subr.bf16.mxu1 %v2677_v29  ;;  %v540_v49 = vsel %vm525_vm4, %v536_v39, %v539_v48  ;;  %v212_v29 = vrot.slane %v211_v20, 2  ;;  %v2694_v39 = vld [vmem:[#allocation3 + $0x388] sm:$0xff]   ;;  %v220_v48 = vadd.f32 %v219_v35, %v218_v25  ;;  %v330_v42 = vadd.f32 %v329_v44, %v328_v31  ;;  %v2716_v44 = vld [vmem:[#allocation3 + $0x338] sm:$0xff]  }
  0x95   :  { %2507 = vmatpush3.bf16.msra.mxu0 %v2676_v30  ;;  %v787_v51 = vmul.f32 0.25, %v540_v49  ;;  %v316_v30 = vadd.f32 %v315_v21, %v314_v17  ;;  %v206_v34 = vadd.f32 %v205_v24, %v204_v14  ;;  %v2704_v17 = vld [vmem:[#allocation3 + $0x320] sm:$0xff]  }
  0x96   :  { %2508 = vmatprep.subr.bf16.mxu0 %v2679_v32  ;;  %v335_v32 = vsel %vm117_vm0, %v100_v63, 0.0  ;;  %v221_v56 = vrot.slane %v220_v48, 1  ;;  %v331_v62 = vrot.slane %v330_v42, 2  ;;  %v2706_v21 = vld [vmem:[#allocation3 + $0x3a0] sm:$0xff]  }
  0x97   :  { %2529 = vmatpush3.bf16.msra.mxu1 %v2678_v33  ;;  %v838_v58 = vrot.slane %v787_v51, %v2888_v38  ;;  %791 = vst [vmem:[#allocation8 + $0x10] sm:$0xff] %v787_v51  ;;  %v831_v59 = vcombine.high %v787_v51, %v787_v51  ;;  %v2695_v33 = vld [vmem:[#allocation3 + $0x350] sm:$0xff]  }
  0x98   :  { %2530 = vmatprep.subr.bf16.mxu1 %v2681_v36  ;;  %v226_v36 = vrot.slane %v225_v26, 2  ;;  %v2696_v51 = vld [vmem:[#allocation3 + $0x310] sm:$0xff]   ;;  %v332_v6 = vadd.f32 %v331_v62, %v330_v42 }
  0x99   :  { %2509 = vmatpush3.bf16.msra.mxu0 %v2680_v37  ;;  %v846_v0 = vcombine.high %v838_v58, %v838_v58  ;;  %v889_v1 = vpack.c.bf16 %v838_v58, %v838_v58  ;;  %v845_v2 = vrot.slane %v831_v59, %v2888_v38  ;;  %v323_v37 = vadd.f32 %v322_v27, %v321_v22  ;;  %v2698_v59 = vld [vmem:[#allocation3 + $0x390] sm:$0xff]   ;;  %v2708_v27 = vld [vmem:[#allocation3 + $0x328] sm:$0xff]  }
  0x9a   :  { %2510 = vmatprep.subr.bf16.mxu0 %v2683_v40  ;;  %v213_v40 = vadd.f32 %v212_v29, %v211_v20  ;;  %v227_v49 = vadd.f32 %v226_v36, %v225_v26  ;;  %v2707_v20 = vld [vmem:[#allocation3 + $0x368] sm:$0xff]   ;;  %v2711_v29 = vld [vmem:[#allocation3 + $0x370] sm:$0xff]   ;;  %v2715_v36 = vld [vmem:[#allocation3 + $0x378] sm:$0xff]  }
  0x9b   :  { %2531 = vmatpush3.bf16.msra.mxu1 %v2682_v41  ;;  %v890_v8 = vpack.c.bf16 %v846_v0, %v846_v0  ;;  %v847_v9 = vcombine.high %v845_v2, %v845_v2  ;;  %v891_v11 = vpack.c.bf16 %v845_v2, %v845_v2  ;;  %v317_v41 = vrot.slane %v316_v30, 2  ;;  %v2701_v0 = vld [vmem:[#allocation3 + $0x3d8] sm:$0xff]   ;;  %v2709_v26 = vld [vmem:[#allocation3 + $0x3e8] sm:$0xff]  }
  0x9c   :  { %2532 = vmatprep.subr.bf16.mxu1 %v2685_v45  ;;  %v336_v45 = vrot.slane %v335_v32, 4  ;;  %v228_v57 = vrot.slane %v227_v49, 1 }
  0x9d   :  { %2511 = vmatpush3.bf16.msra.mxu0 %v2684_v47  ;;  %2120 = vmatprep.mubr.bf16.mxu0 %v890_v8  ;;  %v892_v18 = vpack.c.bf16 %v847_v9, %v847_v9  ;;  %v207_v47 = vrot.slane %v206_v34, 1  ;;  %v318_v53 = vadd.f32 %v317_v41, %v316_v30  ;;  %v2703_v8 = vld [vmem:[#allocation3 + $0x360] sm:$0xff]   ;;  %v2710_v30 = vld [vmem:[#allocation3 + $0x3a8] sm:$0xff]  }
  0x9e   :  { %2540 = vmatprep.subr.bf16.mxu0 %v2687_v50  ;;  %v324_v50 = vrot.slane %v323_v37, 2  ;;  %v229_v2 = vadd.f32 %v228_v57, %v227_v49 }
  0x9f   :  { %2533 = vmatpush3.bf16.msra.mxu1 %v2686_v52  ;;  %2160 = vmatprep.mubr.bf16.mxu1 %v892_v18  ;;  %v214_v52 = vrot.slane %v213_v40, 1  ;;  %v208_v55 = vadd.f32 %v207_v47, %v206_v34  ;;  %v319_v61 = vrot.slane %v318_v53, 1  ;;  %v2712_v34 = vld [vmem:[#allocation3 + $0x330] sm:$0xff]  }
  0xa0   :  { %2562 = vmatprep.subr.bf16.mxu1 %v2689_v43  ;;  %2121 = vmatmul.mubr.bf16.vlgmr.msra.gmra.mrb[8].mxu0 %v889_v1  ;;  %v337_v43 = vadd.f32 %v336_v45, %v335_v32  ;;  %v325_v58 = vadd.f32 %v324_v50, %v323_v37  ;;  %v222_v1 = vadd.f32 %v221_v56, %v220_v48  ;;  %v2714_v37 = vld [vmem:[#allocation3 + $0x3b0] sm:$0xff]   ;;  %v2718_v48 = vld [vmem:[#allocation3 + $0x3b8] sm:$0xff]  }
  0xa1   :  { %2541 = vmatpush3.bf16.msra.mxu0 %v2688_v10  ;;  %v215_v60 = vadd.f32 %v214_v52, %v213_v40  ;;  %v320_v5 = vadd.f32 %v319_v61, %v318_v53  ;;  %v2702_v10 = vld [vmem:[#allocation3 + $0x398] sm:$0xff]  }
  0xa2   :  { %2161 = vmatmul.mubr.bf16.vlgmr.msra.gmra.mrb[8].mxu1 %v891_v11  ;;  %2542 = vmatprep.subr.bf16.mxu0 %v2691_v13  ;;  %v338_v63 = vrot.slane %v337_v43, 2  ;;  %v326_v3 = vrot.slane %v325_v58, 1  ;;  %v333_v11 = vrot.slane %v332_v6, 1  ;;  %v430_v14 = vcombine.low %v222_v1, %v229_v2  ;;  %v2717_v40 = vld [vmem:[#allocation3 + $0x3f8] sm:$0xff]  }
  0xa3   :  { %2563 = vmatpush3.bf16.msra.mxu1 %v2690_v19  ;;  %v429_v13 = vcombine.low %v208_v55, %v215_v60 }
  0xa4   :  { %2564 = vmatprep.subr.bf16.mxu1 %v2693_v23  ;;  %v339_v7 = vadd.f32 %v338_v63, %v337_v43  ;;  %v327_v9 = vadd.f32 %v326_v3, %v325_v58  ;;  %v334_v18 = vadd.f32 %v333_v11, %v332_v6  ;;  %v444_v23 = vrot.slane %v430_v14, %v2888_v38 }
  0xa5   :  { %2543 = vmatpush3.bf16.msra.mxu0 %v2692_v28  ;;  %v437_v22 = vrot.slane %v429_v13, %v2888_v38 }
  0xa6   :  { %2544 = vmatprep.subr.bf16.mxu0 %v2695_v33  ;;  %v340_v12 = vrot.slane %v339_v7, 1  ;;  %v497_v16 = vcombine.low %v320_v5, %v327_v9  ;;  %v2713_v33 = vld [vmem:[#allocation3 + $0x3f0] sm:$0xff]  }
  0xa7   :  { %2565 = vmatpush3.bf16.msra.mxu1 %v2694_v39  ;;  %v445_v31 = vcombine.low %v437_v22, %v444_v23 }
  0xa8   :  { %2566 = vmatprep.subr.bf16.mxu1 %v2697_v46  ;;  %v341_v19 = vadd.f32 %v340_v12, %v339_v7  ;;  %v505_v25 = vrot.slane %v497_v16, %v2888_v38 }
  0xa9   :  { %2545 = vmatpush3.bf16.msra.mxu0 %v2696_v51 }
  0xaa   :  { %2546 = vmatprep.subr.bf16.mxu0 %v2699_v54  ;;  %v498_v24 = vcombine.low %v334_v18, %v341_v19 }
  0xab   :  { %2567 = vmatpush3.bf16.msra.mxu1 %v2698_v59 }
  0xac   :  { %2568 = vmatprep.subr.bf16.mxu1 %v2701_v0  ;;  %v512_v28 = vrot.slane %v498_v24, %v2888_v38 }
  0xad   :  { %2547 = vmatpush3.bf16.msra.mxu0 %v2700_v4 }
  0xae   :  { %2548 = vmatprep.subr.bf16.mxu0 %v2703_v8  ;;  %v513_v32 = vcombine.low %v505_v25, %v512_v28 }
  0xaf   :  { %2569 = vmatpush3.bf16.msra.mxu1 %v2702_v10 }
  0xb0   :  { %2570 = vmatprep.subr.bf16.mxu1 %v2705_v15  ;;  %v543_v35 = vrot.slane %v513_v32, 7 }
  0xb1   :  { %2549 = vmatpush3.bf16.msra.mxu0 %v2704_v17 }
  0xb2   :  { %2550 = vmatprep.subr.bf16.mxu0 %v2707_v20  ;;  %v544_v39 = vsel %vm519_vm1, %v543_v35, %v445_v31 }
  0xb3   :  { %2571 = vmatpush3.bf16.msra.mxu1 %v2706_v21  ;;  %v545_v41 = vsel %vm521_vm2, %v543_v35, %v544_v39 }
  0xb4   :  { %2572 = vmatprep.subr.bf16.mxu1 %v2709_v26  ;;  %v546_v45 = vsel %vm523_vm3, %v543_v35, %v545_v41 }
  0xb5   :  { %2551 = vmatpush3.bf16.msra.mxu0 %v2708_v27  ;;  %v547_v46 = vsel %vm525_vm4, %v543_v35, %v546_v45 }
  0xb6   :  { %2552 = vmatprep.subr.bf16.mxu0 %v2711_v29  ;;  %v788_v47 = vmul.f32 0.25, %v547_v46 }
  0xb7   :  { %2573 = vmatpush3.bf16.msra.mxu1 %v2710_v30 }
  0xb8   :  { %2574 = vmatprep.subr.bf16.mxu1 %v2713_v33  ;;  %v855_v49 = vrot.slane %v788_v47, %v2888_v38  ;;  %792 = vst [vmem:[#allocation8 + $0x18] sm:$0xff] %v788_v47  ;;  %v848_v50 = vcombine.high %v788_v47, %v788_v47 }
  0xb9   :  { %2553 = vmatpush3.bf16.msra.mxu0 %v2712_v34 }
  0xba   :  { %2554 = vmatprep.subr.bf16.mxu0 %v2715_v36  ;;  %v863_v51 = vcombine.high %v855_v49, %v855_v49  ;;  %v862_v52 = vrot.slane %v848_v50, %v2888_v38  ;;  %v893_v53 = vpack.c.bf16 %v855_v49, %v855_v49 }
  0xbb   :  { %2575 = vmatpush3.bf16.msra.mxu1 %v2714_v37 }
  0xbc   :  { %2576 = vmatprep.subr.bf16.mxu1 %v2717_v40  ;;  %v894_v42 = vpack.c.bf16 %v863_v51, %v863_v51  ;;  %v864_v43 = vcombine.high %v862_v52, %v862_v52  ;;  %v895_v54 = vpack.c.bf16 %v862_v52, %v862_v52 }
  0xbd   :  { %2555 = vmatpush3.bf16.msra.mxu0 %v2716_v44 }
  0xbe   :  { %2200 = vmatprep.mubr.bf16.mxu0 %v894_v42  ;;  %v896_v55 = vpack.c.bf16 %v864_v43, %v864_v43 }
  0xbf   :  { %2577 = vmatpush3.bf16.msra.mxu1 %v2718_v48 }
  0xc0   :  { %2201 = vmatmul.mubr.bf16.vlgmr.msra.gmra.mrb[12].mxu0 %v893_v53  ;;  %2240 = vmatprep.mubr.bf16.mxu1 %v896_v55 }
  0xc2   :  { %2241 = vmatmul.mubr.bf16.vlgmr.msra.gmra.mrb[12].mxu1 %v895_v54 }
  0xc3   :  { %2774 = shalt.err (!%p2771_p6)
}
  0xc4   :  { %s2775_s8 = scalar_lea.hbm %s2999_s3, 512 }
  0xc5   :  { %p2776_p7 = scmp.ne.s32.totalorder %s2999_s3, %s2775_s8  ;;  %p2779_p8 = scmp.lt.u32.totalorder %s2775_s8, %s2999_s3 }
  0xc7   :  { %p2781_p9 = pnand %p2779_p8, %p2776_p7 }
  0xc9   :  { %2784 = shalt.err (!%p2781_p9)
}
  0xca   :  { %2258 = dma.vmem_to_hbm [thread:$0]  %s2256_s30, 512, %s2999_s3, [#allocation5]   ;;  %v2279_v56 = vld [vmem:[#allocation6] ss:$0 sm:$0xff] }
  0xcb   :  { %s2821_s3 = smov [#allocation9]  }
  0xcc   :  { %s2265_s14 = sshll.u32 %s2821_s3, 4  ;;  %s2266_s14 = int_to_ptr.vmem [resolvable:$true] %s2265_s14 }
  0xcd   :  { %s2785_s2 = scalar_lea.vmem %s2266_s14, 32  ;;  %p2790_p11 = scmp.lt.s32.totalorder %s2266_s14, %s2266_s14 }
  0xce   :  { %p2786_p10 = scmp.ne.s32.totalorder %s2266_s14, %s2785_s2  ;;  %p2791_p12 = scmp.lt.s32.totalorder %s2785_s2, %s2785_s2 }
  0xd0   :  { %p2792_p13 = por %p2791_p12, %p2790_p11 }
  0xd2   :  { %p2793_p0 = pnand %p2792_p13, %p2786_p10 }
 0x133   :  { %v2424_v38 = vpop.f32.mrb[0].mxu0 }
 0x134   :  { %v2425_v57 = vpop.f32.mrb[1].mxu0 }
 0x135   :  { %v2426_v58 = vadd.f32 %v2425_v57, %v2424_v38  ;;  %v2427_v59 = vpop.f32.mrb[2].mxu0  ;;  %v2446_v60 = vpop.f32.mrb[0].mxu1 }
 0x136   :  { %v2428_v61 = vpop.f32.mrb[3].mxu0  ;;  %v2447_v62 = vpop.f32.mrb[1].mxu1 }
 0x137   :  { %v1963_v63 = vadd.f32 %v2426_v58, %v2279_v56  ;;  %v2448_v0 = vadd.f32 %v2447_v62, %v2446_v60  ;;  %v2449_v1 = vpop.f32.mrb[2].mxu1 }
 0x138   :  { %v2450_v2 = vpop.f32.mrb[3].mxu1 }
 0x139   :  { %v2003_v3 = vadd.f32 %v2448_v0, %v1963_v63 }
 0x153   :  { %v2468_v4 = vpop.f32.mrb[4].mxu0 }
 0x154   :  { %v2469_v5 = vpop.f32.mrb[5].mxu0 }
 0x155   :  { %v2470_v6 = vadd.f32 %v2469_v5, %v2468_v4  ;;  %v2471_v7 = vpop.f32.mrb[6].mxu0  ;;  %v2490_v8 = vpop.f32.mrb[4].mxu1 }
 0x156   :  { %v2472_v9 = vpop.f32.mrb[7].mxu0  ;;  %v2491_v10 = vpop.f32.mrb[5].mxu1 }
 0x157   :  { %v2043_v11 = vadd.f32 %v2470_v6, %v2003_v3  ;;  %v2492_v12 = vadd.f32 %v2491_v10, %v2490_v8  ;;  %v2493_v13 = vpop.f32.mrb[6].mxu1 }
 0x158   :  { %v2494_v14 = vpop.f32.mrb[7].mxu1 }
 0x159   :  { %v2083_v15 = vadd.f32 %v2492_v12, %v2043_v11 }
 0x173   :  { %v2512_v16 = vpop.f32.mrb[8].mxu0 }
 0x174   :  { %v2513_v17 = vpop.f32.mrb[9].mxu0 }
 0x175   :  { %v2514_v18 = vadd.f32 %v2513_v17, %v2512_v16  ;;  %v2515_v19 = vpop.f32.mrb[10].mxu0  ;;  %v2534_v20 = vpop.f32.mrb[8].mxu1 }
 0x176   :  { %v2516_v21 = vpop.f32.mrb[11].mxu0  ;;  %v2535_v22 = vpop.f32.mrb[9].mxu1 }
 0x177   :  { %v2123_v23 = vadd.f32 %v2514_v18, %v2083_v15  ;;  %v2536_v24 = vadd.f32 %v2535_v22, %v2534_v20  ;;  %v2537_v25 = vpop.f32.mrb[10].mxu1 }
 0x178   :  { %v2538_v26 = vpop.f32.mrb[11].mxu1 }
 0x179   :  { %v2163_v27 = vadd.f32 %v2536_v24, %v2123_v23 }
 0x193   :  { %v2556_v28 = vpop.f32.mrb[12].mxu0 }
 0x194   :  { %v2557_v29 = vpop.f32.mrb[13].mxu0 }
 0x195   :  { %v2558_v30 = vadd.f32 %v2557_v29, %v2556_v28  ;;  %v2559_v31 = vpop.f32.mrb[14].mxu0  ;;  %v2578_v32 = vpop.f32.mrb[12].mxu1 }
 0x196   :  { %v2560_v33 = vpop.f32.mrb[15].mxu0  ;;  %v2579_v34 = vpop.f32.mrb[13].mxu1 }
 0x197   :  { %v2203_v35 = vadd.f32 %v2558_v30, %v2163_v27  ;;  %v2580_v36 = vadd.f32 %v2579_v34, %v2578_v32  ;;  %v2581_v37 = vpop.f32.mrb[14].mxu1 }
 0x198   :  { %v2582_v39 = vpop.f32.mrb[15].mxu1 }
 0x199   :  { %v2243_v40 = vadd.f32 %v2580_v36, %v2203_v35 }
 0x19b   :  { %2248 = vst [vmem:[#allocation9] sm:$0x3] %v2243_v40 }
 0x19c   :  { %2796 = shalt.err (!%p2793_p0)
}
 0x19d   :  { %s2797_s17 = scalar_lea.hbm %s3000_s4, 32 }
 0x19e   :  { %p2798_p1 = scmp.ne.s32.totalorder %s3000_s4, %s2797_s17  ;;  %p2801_p2 = scmp.lt.u32.totalorder %s2797_s17, %s3000_s4 }
 0x1a0   :  { %p2803_p3 = pnand %p2801_p2, %p2798_p1 }
 0x1a2   :  { %2806 = shalt.err (!%p2803_p3)
}
 0x1a3   :  { %2268 = dma.vmem_to_hbm [thread:$0]  %s2266_s14, 32, %s3000_s4, [#allocation10]  }
 0x1a4   :  { %2811 = dma.done.wait [#allocation5], 512  }
 0x1a5   :  { %2812 = vsyncadd [#allocation5], 4294966784 }
 0x1a6   :  { %2813 = dma.done.wait [#allocation10], 32  }
 0x1a7   :  { %2814 = vsyncadd [#allocation10], 4294967264 }
 0x1a8   :  { %2275 = vsyncpa [#allocation4], 1 }
 0x1a9   :  { %2276 = vsyncpa [#allocation7], 1 }
 0x1aa   :  { %2277 = vsyncpa [#allocation5], 1 }
 0x1ab   :  { %2278 = vsyncpa [#allocation10], 1 }

// kernel: backbone_forward.18
= control target key start
LH: loop header
LB: loop body
LE: loop exit
PB: predicated region body
PF: predicated region fallthrough
CT: control target
= control target key end

     0   :  { %s4743_s0 = inlined_call_operand.vmem [shape: bf16[8,2048], index: 0, kind: input, shape index: {}]   ;;  %s4744_s1 = inlined_call_operand.hbm [shape: bf16[2048,2560], index: 1, kind: input, shape index: {}]   ;;  %s4745_s2 = inlined_call_operand.hbm [shape: f32[1,2560], index: 2, kind: input, shape index: {}]   ;;  %s4746_s3 = inlined_call_operand.vmem [shape: f32[8,2560], index: 3, kind: output, shape index: {}]  }
   0x1   :  { %4752 = sst [smem:[#allocation9_spill]] %s4744_s1 }
   0x2   :  { %8 = vsyncpa [#allocation3], 0 }
   0x3   :  { %10 = vsyncpa [#allocation3 + $0x1], 0 }
   0x4   :  { %11 = vsyncpa [#allocation5], 0 }
   0x5   :  { %13 = vsyncpa [#allocation5 + $0x1], 0  ;;  %s4060_s12 = smov 0   ;;  %s4062_s13 = smov 0  }
   0x6   :  { %s4064_s14 = smov 0   ;;  %s4066_s15 = smov 0  }
   0x7   :  { %s4068_s16 = smov 0   ;;  %s4070_s17 = smov 0  }
   0x8   :  { %s4072_s18 = smov 0   ;;  %s4074_s19 = smov 0  }
   0x9   :  { %s4076_s20 = smov 0   ;;  %s4078_s21 = smov 0  }
   0xa   :  { %s4080_s22 = smov 0  }
   0xb LB: > { %s31_s23 = sadd.s32 1, %s4025_s20  ;;  %p82_p1 = scmp.ne.s32.totalorder %s4013_s17, %s4009_s16  ;;  %s4033_s22 = sphi %s4080_s22, %s19_s22   ;;  %s4029_s21 = sphi %s4078_s21, %s4779_s21   ;;  %s4025_s20 = sphi %s4076_s20, %s4778_s20   ;;  %s4021_s19 = sphi %s4074_s19, %s4777_s19   ;;  %s4017_s18 = sphi %s4072_s18, %s4776_s18   ;;  %s4013_s17 = sphi %s4070_s17, %s4775_s17   ;;  %s4009_s16 = sphi %s4068_s16, %s4774_s16   ;;  %s4005_s15 = sphi %s4066_s15, %s4773_s15   ;;  %s4001_s14 = sphi %s4064_s14, %s4772_s14   ;;  %s3997_s13 = sphi %s4062_s13, %s4771_s13   ;;  %s3993_s12 = sphi %s4060_s12, %s4770_s12  }
   0xc   : > { %p4117_p0 = scmp.ge.s32.totalorder %s31_s23, 4  ;;  %p4748_p2 = scmp.eq.s32.totalorder %s4033_s22, 0 }
   0xd   : > { %p4747_p4 = scmp.lt.s32.totalorder %s4033_s22, 8  ;;  %s179_s27 = sand.u32 1, %s4013_s17  }
   0xe   : > { %s4781_s23 = smov (%p4117_p0, %s31_s23), 0  ;;  %p84_p3 = por %p4748_p2, %p82_p1 }
   0xf   : > { %s3287_s28 = smul.u32 2560, %s179_s27  ;;  %s4755_s1 = sld [smem:[#allocation9_spill]] }
  0x10   : > { %s185_s29 = smul.u32 10, %s4029_s21  ;;  %p4137_p5 = pnand %p4747_p4, %p84_p3 }
  0x11   : > { %s3288_s4 = smul.u32 1280, %s4025_s20  ;;  %s183_s5 = scalar_lea.vmem [#allocation2], %s3287_s28 }
  0x12   : > { %s193_s6 = sshll.u32 %s183_s5, 4  ;;  %s4150_s24 = scalar_lea.sflag [#allocation3], %s179_s27  ;;  %s4142_s6 = int_to_ptr.vmem [resolvable:$true] %s193_s6 }
  0x13   : > { %s190_s7 = sadd.s32 %s3288_s4, %s185_s29  ;;  %p3881_p8 = pneg %p4137_p5 }
  0x14   : > { %s2933_s8 = sshll.u32 %s190_s7, 6 }
  0x15   : > { %s4147_s11 = scalar_lea.hbm %s4755_s1, %s2933_s8  ;;  %s3884_s4 = scalar_lea.hbm %s4755_s1, 327680 }
  0x16   : > { %s3879_s26 = scalar_lea.hbm %s4147_s11, 40960  ;;  %p3885_p11 = scmp.lt.u32.totalorder %s4147_s11, %s4755_s1 }
  0x17   : > { %p3880_p7 = scmp.ne.s32.totalorder %s4147_s11, %s3879_s26  ;;  %p3886_p12 = scmp.lt.u32.totalorder %s3884_s4, %s3879_s26 }
  0x18   : > { %p3888_p1 = scmp.lt.u32.totalorder %s3879_s26, %s4147_s11 }
  0x19   : > { %p3882_p9 = pnand %p3881_p8, %p3880_p7  ;;  %p3887_p13 = por %p3886_p12, %p3885_p11 }
  0x1b   : > { %p3883_p10 = pneg %p3882_p9  ;;  %p3889_p3 = por %p3888_p1, %p3887_p13 }
  0x1d   : > { %p3890_p4 = pnand %p3889_p3, %p3883_p10 }
  0x1f   : > { %3893 = shalt.err (!%p3890_p4)
}
  0x20   : > { %s3894_s27 = scalar_lea.vmem %s4142_s6, 40960  ;;  %s4035_s8 = smov [#allocation2]  }
  0x21   : > { %p3895_p7 = scmp.ne.s32.totalorder %s4142_s6, %s3894_s27  ;;  %s3899_s9 = sshll.u32 %s4035_s8, 4  ;;  %s3900_s9 = int_to_ptr.vmem [resolvable:$false] %s3899_s9 }
  0x22   : > { %s3901_s10 = scalar_lea.vmem %s3900_s9, 81920  ;;  %p3902_p6 = scmp.lt.s32.totalorder %s4142_s6, %s3900_s9 }
  0x23   : > { %p3897_p9 = pnand %p3895_p7, %p3881_p8  ;;  %p3903_p11 = scmp.lt.s32.totalorder %s3901_s10, %s3894_s27 }
  0x25   : > { %p3898_p2 = pneg %p3897_p9  ;;  %p3904_p12 = por %p3903_p11, %p3902_p6 }
  0x27   : > { %p3905_p13 = pnand %p3904_p12, %p3898_p2 }
  0x29   : > { %3908 = shalt.err (!%p3905_p13)
}
  0x2a   : > { %s4036_s26 = smov 1280   ;;  %s4037_s28 = smov 640  }
  0x2b   : > { %s4038_s29 = smov 40   ;;  %p220_p2 = scmp.lt.s32.totalorder %s4033_s22, 9 }
  0x2c   : > { %3299 = dma.hbm_to_vmem [thread:$0]  (!%p4137_p5), %s4147_s11, 40960, %s4142_s6, %s4150_s24, %s4036_s26, %s4037_s28, %s4038_s29  }
  0x2d   : > { %p4756_p4 = scmp.ge.s32.totalorder %s4033_s22, 1  ;;  %s2927_s5 = sadd.s32 4294967295, %s4033_s22  }
  0x2e   : > { %s38_s7 = sadd.s32 1, %s4029_s21  ;;  %p88_p8 = scmp.ne.s32.totalorder %s4009_s16, %s4005_s15 }
  0x2f   : > { %p4181_p6 = pnand %p4756_p4, %p220_p2  ;;  %s4783_s7 = smov (!%p4117_p0, %s38_s7), %s4029_s21 }
  0x30   : > { %p4192_p10 = scmp.eq.s32.totalorder %s2927_s5, 0  ;;  %p40_p5 = scmp.ge.s32.totalorder %s4783_s7, 2 }
  0x31   : > { %s101_s24 = sadd.s32 1, %s4001_s14  ;;  %p108_p0 = scmp.ne.s32.totalorder %s4001_s14, %s3997_s13 }
  0x32   : > { %p4199_p1 = por %p4192_p10, %p88_p8  ;;  %s4785_s7 = smov (%p40_p5, %s4783_s7), 0 }
  0x33   : > { %4760 = sst [smem:[#allocation8_spill]] %s4785_s7  ;;  %p4761_p3 = scmp.eq.s32.totalorder %s4033_s22, 0 }
  0x34   : > { %s4759_s6 = scalar_select %p4199_p1, 1, 0 }
  0x35   : > { %p110_p7 = por %p108_p0, %p4761_p3  ;;  %p114_p9 = scmp.ne.s32.totalorder %s3997_s13, %s3993_s12 }
  0x36   : > { %s71_s15 = ssub.s32 %s4029_s21, %s4785_s7  ;;  %s203_s25 = sand.u32 1, %s4001_s14  }
  0x37   : > { %s4762_s11 = ssub.s32 %s4025_s20, %s4781_s23  ;;  %p99_p11 = scmp.eq.s32.totalorder %s71_s15, 0 }
  0x38   : > { %s72_s27 = sor.u32 %s71_s15, %s4762_s11  ;;  %p4219_p13 = por %p114_p9, %p4192_p10 }
  0x39   : > { %p73_p12 = scmp.eq.s32.totalorder %s72_s27, 0  ;;  %s4764_s10 = sadd.s32 1, %s4013_s17 }
  0x3a   : > { %s4763_s8 = scalar_select %p4219_p13, 1, 0 }
  0x3b   : > { %s4224_s9 = scalar_select %p99_p11, %s4001_s14, %s101_s24  }
  0x3c   : > { %s4229_s26 = scalar_select %p73_p12, %s4013_s17, %s4764_s10  }
  0x3d   : > { %s3289_s28 = smul.u32 10, %s203_s25  ;;  %p4765_p2 = scmp.lt.s32.totalorder %s4033_s22, 8 }
  0x3e   : > { %s3268_s29 = smul.u32 160, %s4029_s21  ;;  %s204_s27 = scalar_lea.sflag [#allocation5], %s203_s25 }
  0x3f   : > { %p4234_p4 = pnand %p4765_p2, %p110_p7  ;;  %s207_s24 = scalar_lea.vmem [#allocation4], %s3289_s28 }
  0x40   : > { %s4241_s30 = scalar_lea.hbm %s4745_s2, %s3268_s29  ;;  %s215_s11 = sshll.u32 %s207_s24, 4  ;;  %s4243_s11 = int_to_ptr.vmem [resolvable:$true] %s215_s11 }
  0x41   : > { %s3909_s10 = scalar_lea.hbm %s4241_s30, 160  ;;  %p3911_p10 = pneg %p4234_p4 }
  0x42   : > { %p3910_p8 = scmp.ne.s32.totalorder %s4241_s30, %s3909_s10  ;;  %s3914_s15 = scalar_lea.hbm %s4745_s2, 320 }
  0x43   : > { %p3915_p3 = scmp.lt.u32.totalorder %s4241_s30, %s4745_s2  ;;  %p3916_p7 = scmp.lt.u32.totalorder %s3914_s15, %s3909_s10 }
  0x44   : > { %p3912_p5 = pnand %p3911_p10, %p3910_p8  ;;  %p3918_p11 = scmp.lt.u32.totalorder %s3909_s10, %s4241_s30 }
  0x45   : > { %p3917_p9 = por %p3916_p7, %p3915_p3 }
  0x46   : > { %p3913_p0 = pneg %p3912_p5 }
  0x47   : > { %p3919_p12 = por %p3918_p11, %p3917_p9 }
  0x49   : > { %p3920_p2 = pnand %p3919_p12, %p3913_p0 }
  0x4b   : > { %3923 = shalt.err (!%p3920_p2)
}
  0x4c   : > { %s3924_s25 = scalar_lea.vmem %s4243_s11, 160  ;;  %s4039_s28 = smov [#allocation4]  }
  0x4d   : > { %p3925_p8 = scmp.ne.s32.totalorder %s4243_s11, %s3924_s25  ;;  %s3929_s24 = sshll.u32 %s4039_s28, 4  ;;  %s3930_s24 = int_to_ptr.vmem [resolvable:$false] %s3929_s24 }
  0x4e   : > { %s3931_s1 = scalar_lea.vmem %s3930_s24, 320  ;;  %p3932_p1 = scmp.lt.s32.totalorder %s4243_s11, %s3930_s24 }
  0x4f   : > { %p3927_p5 = pnand %p3925_p8, %p3911_p10  ;;  %p3933_p3 = scmp.lt.s32.totalorder %s3931_s1, %s3924_s25 }
  0x51   : > { %p3928_p13 = pneg %p3927_p5  ;;  %p3934_p7 = por %p3933_p3, %p3932_p1 }
  0x53   : > { %p3935_p9 = pnand %p3934_p7, %p3928_p13 }
  0x55   : > { %3938 = shalt.err (!%p3935_p9)
}
  0x56   : > { %3302 = dma.hbm_to_vmem [thread:$0]  (!%p4234_p4), %s4241_s30, 160, %s4243_s11, %s204_s27  }
  0x57   : > { %224 = sbr.rel (%p4181_p6) target bundleno = 662 (0x296), region = 32  ;;  %s226_s7 = sand.u32 (!%p4181_p6), 1, %s4009_s16  }
  0x58   : > { %s3290_s10 = smul.u32 (!%p4181_p6), 2560, %s226_s7  ;;  %s227_s5 = scalar_lea.sflag (!%p4181_p6), [#allocation3], %s226_s7 }
  0x59   : > { %p4767_p10 = scmp.ne.s32.totalorder (!%p4181_p6), %s4759_s6, 0 }
  0x5a   : > { %s4273_s29 = scalar_lea.vmem (!%p4181_p6), [#allocation2], %s3290_s10 }
  0x5e   : > { %3984 = dma.done.wait (%p4767_p10), %s227_s5, 40960  }
  0x5f   : > { %3986 = vsyncadd (%p4767_p10), %s227_s5, 4294926336  ;;  %s235_s12 = sand.u32 1, %s3997_s13   ;;  %p4768_p6 = scmp.ne.s32.totalorder %s4763_s8, 0 }
  0x60   : > { %s4280_s15 = smul.u32 10, %s235_s12  ;;  %s236_s4 = scalar_lea.sflag [#allocation5], %s235_s12 }
  0x62   : > { %s239_s30 = scalar_lea.vmem [#allocation4], %s4280_s15 }
  0x63   : > { %3988 = dma.done.wait (%p4768_p6), %s236_s4, 160  }
  0x64   : > { %3990 = vsyncadd (%p4768_p6), %s236_s4, 4294967136  ;;  %s293_s6 = smul.u32 10, %s4021_s19  ;;  %v3395_v0 = vld [vmem:[%s4273_s29 + $0x4] ss:$40 sps:$4 sm:$0xff]   ;;  %v3399_v2 = vld [vmem:[%s4273_s29] ss:$40 sps:$4 sm:$0xff]  }
  0x65   : > { %v3397_v1 = vld [vmem:[%s4273_s29 + $0x504] ss:$40 sps:$4 sm:$0xff]   ;;  %2239 = vmatprep.subr.bf16.mxu1 %v3395_v0  ;;  %v3400_v3 = vld [vmem:[%s4273_s29 + $0x500] ss:$40 sps:$4 sm:$0xff]   ;;  %v3401_v4 = vld [vmem:[%s4273_s29 + $0x54] ss:$40 sps:$4 sm:$0xff]  }
  0x66   : > { %p296_p1 = scmp.lt.s32.totalorder %s293_s6, 19  ;;  %2280 = vmatprep.subr.bf16.mxu0 %v3397_v1  ;;  %2240 = vmatpush1.bf16.msra.mxu1 %v3399_v2  ;;  %v3403_v5 = vld [vmem:[%s4273_s29 + $0x554] ss:$40 sps:$4 sm:$0xff]   ;;  %v3405_v6 = vld [vmem:[%s4273_s29 + $0x50] ss:$40 sps:$4 sm:$0xff]   ;;  %s2936_s19 = sshll.u32 %s4017_s18, 2 }
  0x67   : > { %2281 = vmatpush1.bf16.msra.mxu0 %v3400_v3  ;;  %2241 = vmatprep.subr.bf16.mxu1 %v3401_v4  ;;  %v3406_v7 = vld [vmem:[%s4273_s29 + $0x550] ss:$40 sps:$4 sm:$0xff]   ;;  %v3407_v8 = vld [vmem:[%s4273_s29 + $0xa4] ss:$40 sps:$4 sm:$0xff]   ;;  %v3411_v10 = vld [vmem:[%s4273_s29 + $0xa0] ss:$40 sps:$4 sm:$0xff]  }
  0x68   : > { %s4787_s6 = smov (!%p296_p1, %s293_s6), 19  ;;  %2282 = vmatprep.subr.bf16.mxu0 %v3403_v5  ;;  %v3409_v9 = vld [vmem:[%s4273_s29 + $0x5a4] ss:$40 sps:$4 sm:$0xff]   ;;  %v3412_v11 = vld [vmem:[%s4273_s29 + $0x5a0] ss:$40 sps:$4 sm:$0xff]   ;;  %p283_p13 = scmp.lt.s32.totalorder %s2936_s19, 15 }
  0x69   : > { %s2938_s11 = sshll.u32 %s4787_s6, 3  ;;  %v3413_v12 = vld [vmem:[%s4273_s29 + $0xf4] ss:$40 sps:$4 sm:$0xff]   ;;  %v3417_v14 = vld [vmem:[%s4273_s29 + $0xf0] ss:$40 sps:$4 sm:$0xff]   ;;  %p3263_p4 = scmp.ne.s32.totalorder %s4017_s18, 0 }
  0x6a   : > { %s4291_s28 = scalar_lea.vmem %s4746_s3, %s2938_s11  ;;  %2242 = vmatpush1.bf16.msra.mxu1 %v3405_v6  ;;  %v3415_v13 = vld [vmem:[%s4273_s29 + $0x5f4] ss:$40 sps:$4 sm:$0xff]   ;;  %v3418_v15 = vld [vmem:[%s4273_s29 + $0x5f0] ss:$40 sps:$4 sm:$0xff]   ;;  %v3419_v16 = vld [vmem:[%s4273_s29 + $0x144] ss:$40 sps:$4 sm:$0xff]  }
  0x6b   : > { %2283 = vmatpush1.bf16.msra.mxu0 %v3406_v7  ;;  %2243 = vmatprep.subr.bf16.mxu1 %v3407_v8  ;;  %v3421_v17 = vld [vmem:[%s4273_s29 + $0x644] ss:$40 sps:$4 sm:$0xff]   ;;  %v3423_v18 = vld [vmem:[%s4273_s29 + $0x140] ss:$40 sps:$4 sm:$0xff]   ;;  %v3425_v20 = vld [vmem:[%s4273_s29 + $0x194] ss:$40 sps:$4 sm:$0xff]  }
  0x6c   : > { %2284 = vmatprep.subr.bf16.mxu0 %v3409_v9  ;;  %v3424_v19 = vld [vmem:[%s4273_s29 + $0x640] ss:$40 sps:$4 sm:$0xff]   ;;  %v3427_v21 = vld [vmem:[%s4273_s29 + $0x694] ss:$40 sps:$4 sm:$0xff]   ;;  %v3429_v22 = vld [vmem:[%s4273_s29 + $0x190] ss:$40 sps:$4 sm:$0xff]  }
  0x6d   : > { %v3430_v23 = vld [vmem:[%s4273_s29 + $0x690] ss:$40 sps:$4 sm:$0xff]   ;;  %v3431_v24 = vld [vmem:[%s4273_s29 + $0x1e4] ss:$40 sps:$4 sm:$0xff]   ;;  %v3435_v26 = vld [vmem:[%s4273_s29 + $0x1e0] ss:$40 sps:$4 sm:$0xff]  }
  0x6e   : > { %2244 = vmatpush1.bf16.msra.mxu1 %v3411_v10  ;;  %v3433_v25 = vld [vmem:[%s4273_s29 + $0x6e4] ss:$40 sps:$4 sm:$0xff]   ;;  %v3436_v27 = vld [vmem:[%s4273_s29 + $0x6e0] ss:$40 sps:$4 sm:$0xff]   ;;  %v3437_v28 = vld [vmem:[%s4273_s29 + $0x234] ss:$40 sps:$4 sm:$0xff]  }
  0x6f   : > { %2285 = vmatpush1.bf16.msra.mxu0 %v3412_v11  ;;  %2245 = vmatprep.subr.bf16.mxu1 %v3413_v12  ;;  %v3439_v29 = vld [vmem:[%s4273_s29 + $0x734] ss:$40 sps:$4 sm:$0xff]   ;;  %v3441_v30 = vld [vmem:[%s4273_s29 + $0x230] ss:$40 sps:$4 sm:$0xff]   ;;  %v3443_v32 = vld [vmem:[%s4273_s29 + $0x284] ss:$40 sps:$4 sm:$0xff]  }
  0x70   : > { %2286 = vmatprep.subr.bf16.mxu0 %v3415_v13  ;;  %v3442_v31 = vld [vmem:[%s4273_s29 + $0x730] ss:$40 sps:$4 sm:$0xff]   ;;  %v3445_v33 = vld [vmem:[%s4273_s29 + $0x784] ss:$40 sps:$4 sm:$0xff]   ;;  %v3447_v34 = vld [vmem:[%s4273_s29 + $0x280] ss:$40 sps:$4 sm:$0xff]  }
  0x71   : > { %v3448_v35 = vld [vmem:[%s4273_s29 + $0x780] ss:$40 sps:$4 sm:$0xff]   ;;  %v3449_v36 = vld [vmem:[%s4273_s29 + $0x2d4] ss:$40 sps:$4 sm:$0xff]   ;;  %s4789_s19 = smov (!%p283_p13, %s2936_s19), 15 }
  0x72   : > { %2246 = vmatpush1.bf16.msra.mxu1 %v3417_v14  ;;  %v3451_v37 = vld [vmem:[%s4273_s29 + $0x7d4] ss:$40 sps:$4 sm:$0xff]   ;;  %v3453_v38 = vld [vmem:[%s4273_s29 + $0x2d0] ss:$40 sps:$4 sm:$0xff]   ;;  %v3455_v40 = vld [vmem:[%s4273_s29 + $0x324] ss:$40 sps:$4 sm:$0xff]  }
  0x73   : > { %2287 = vmatpush1.bf16.msra.mxu0 %v3418_v15  ;;  %2247 = vmatprep.subr.bf16.mxu1 %v3419_v16  ;;  %v3454_v39 = vld [vmem:[%s4273_s29 + $0x7d0] ss:$40 sps:$4 sm:$0xff]   ;;  %s2937_s8 = sshll.u32 %s4789_s19, 2  ;;  %v3457_v41 = vld [vmem:[%s4273_s29 + $0x824] ss:$40 sps:$4 sm:$0xff]  }
  0x74   : > { %2288 = vmatprep.subr.bf16.mxu0 %v3421_v17  ;;  %v3459_v42 = vld [vmem:[%s4273_s29 + $0x320] ss:$40 sps:$4 sm:$0xff]   ;;  %s288_s7 = scalar_lea.vmem %s4743_s0, %s2937_s8  ;;  %v3461_v44 = vld [vmem:[%s4273_s29 + $0x374] ss:$40 sps:$4 sm:$0xff]   ;;  %v3465_v49 = vld [vmem:[%s4273_s29 + $0x370] ss:$40 sps:$4 sm:$0xff]  }
  0x75   : > { %v3460_v43 = vld [vmem:[%s4273_s29 + $0x820] ss:$40 sps:$4 sm:$0xff]   ;;  %v3463_v45 = vld [vmem:[%s4273_s29 + $0x874] ss:$40 sps:$4 sm:$0xff]   ;;  %v3466_v50 = vld [vmem:[%s4273_s29 + $0x870] ss:$40 sps:$4 sm:$0xff]  }
  0x76   : > { %2248 = vmatpush1.bf16.msra.mxu1 %v3423_v18  ;;  %v303_v46 = vld [vmem:[%s288_s7] sm:$0xff]  ;;  %v304_v48 = vld [vmem:[%s288_s7 + $0x8] sm:$0xff]  ;;  %v3473_v56 = vld [vmem:[%s4273_s29 + $0x414] ss:$40 sps:$4 sm:$0xff]  }
  0x77   : > { %2289 = vmatpush1.bf16.msra.mxu0 %v3424_v19  ;;  %2249 = vmatprep.subr.bf16.mxu1 %v3425_v20  ;;  %v4343_v47 = vcombine.high %v303_v46, %v303_v46  ;;  %v4347_v51 = vcombine.high %v304_v48, %v304_v48  ;;  %v3467_v52 = vld [vmem:[%s4273_s29 + $0x3c4] ss:$40 sps:$4 sm:$0xff]   ;;  %v3471_v54 = vld [vmem:[%s4273_s29 + $0x3c0] ss:$40 sps:$4 sm:$0xff]   ;;  %v3475_v57 = vld [vmem:[%s4273_s29 + $0x914] ss:$40 sps:$4 sm:$0xff]   ;;  %v4369_v6 = vcombine.low %v303_v46, %v303_v46 }
  0x78   : > { %2290 = vmatprep.subr.bf16.mxu0 %v3427_v21  ;;  %v3469_v53 = vld [vmem:[%s4273_s29 + $0x8c4] ss:$40 sps:$4 sm:$0xff]   ;;  %v3472_v55 = vld [vmem:[%s4273_s29 + $0x8c0] ss:$40 sps:$4 sm:$0xff]   ;;  %v3477_v58 = vld [vmem:[%s4273_s29 + $0x410] ss:$40 sps:$4 sm:$0xff]   ;;  %v4371_v7 = vcombine.low %v304_v48, %v304_v48 }
  0x79   : > { %2271 = vmatprep.mubr.bf16.mxu1 %v4343_v47  ;;  %2312 = vmatprep.mubr.bf16.mxu0 %v4347_v51  ;;  %v3478_v59 = vld [vmem:[%s4273_s29 + $0x910] ss:$40 sps:$4 sm:$0xff]   ;;  %v3479_v60 = vld [vmem:[%s4273_s29 + $0x464] ss:$40 sps:$4 sm:$0xff]   ;;  %v3483_v62 = vld [vmem:[%s4273_s29 + $0x460] ss:$40 sps:$4 sm:$0xff]  }
  0x7a   : > { %2250 = vmatpush1.bf16.msra.mxu1 %v3429_v22  ;;  %v3481_v61 = vld [vmem:[%s4273_s29 + $0x964] ss:$40 sps:$4 sm:$0xff]   ;;  %v3484_v63 = vld [vmem:[%s4273_s29 + $0x960] ss:$40 sps:$4 sm:$0xff]   ;;  %v3485_v0 = vld [vmem:[%s4273_s29 + $0x4b4] ss:$40 sps:$4 sm:$0xff]  }
  0x7b   : > { %2291 = vmatpush1.bf16.msra.mxu0 %v3430_v23  ;;  %2251 = vmatprep.subr.bf16.mxu1 %v3431_v24  ;;  %v3487_v1 = vld [vmem:[%s4273_s29 + $0x9b4] ss:$40 sps:$4 sm:$0xff]   ;;  %v3489_v2 = vld [vmem:[%s4273_s29 + $0x4b0] ss:$40 sps:$4 sm:$0xff]   ;;  %v3506_v11 = vld [vmem:[%s4273_s29 + $0x64] ss:$40 sps:$4 sm:$0xff]  }
  0x7c   : > { %2292 = vmatprep.subr.bf16.mxu0 %v3433_v25  ;;  %v3490_v3 = vld [vmem:[%s4273_s29 + $0x9b0] ss:$40 sps:$4 sm:$0xff]   ;;  %v3497_v4 = vld [vmem:[%s4273_s29 + $0xc] ss:$40 sps:$4 sm:$0xff]   ;;  %v3503_v10 = vld [vmem:[%s4273_s29 + $0x5c] ss:$40 sps:$4 sm:$0xff]  }
  0x7d   : > { %v3500_v5 = vld [vmem:[%s4273_s29 + $0x14] ss:$40 sps:$4 sm:$0xff]   ;;  %v3495_v8 = vld [vmem:[%s4273_s29 + $0x8] ss:$40 sps:$4 sm:$0xff]   ;;  %v3501_v12 = vld [vmem:[%s4273_s29 + $0x58] ss:$40 sps:$4 sm:$0xff]  }
  0x7e   : > { %2252 = vmatpush1.bf16.msra.mxu1 %v3435_v26  ;;  %v3498_v9 = vld [vmem:[%s4273_s29 + $0x10] ss:$40 sps:$4 sm:$0xff]   ;;  %v3504_v13 = vld [vmem:[%s4273_s29 + $0x60] ss:$40 sps:$4 sm:$0xff]   ;;  %v3509_v14 = vld [vmem:[%s4273_s29 + $0xac] ss:$40 sps:$4 sm:$0xff]  }
  0x7f   : > { %2293 = vmatpush1.bf16.msra.mxu0 %v3436_v27  ;;  %2253 = vmatprep.subr.bf16.mxu1 %v3437_v28  ;;  %v3512_v15 = vld [vmem:[%s4273_s29 + $0xb4] ss:$40 sps:$4 sm:$0xff]   ;;  %v3507_v16 = vld [vmem:[%s4273_s29 + $0xa8] ss:$40 sps:$4 sm:$0xff]   ;;  %v3518_v19 = vld [vmem:[%s4273_s29 + $0x104] ss:$40 sps:$4 sm:$0xff]  }
  0x80   : > { %2294 = vmatprep.subr.bf16.mxu0 %v3439_v29  ;;  %v3510_v17 = vld [vmem:[%s4273_s29 + $0xb0] ss:$40 sps:$4 sm:$0xff]   ;;  %v3515_v18 = vld [vmem:[%s4273_s29 + $0xfc] ss:$40 sps:$4 sm:$0xff]   ;;  %v3516_v21 = vld [vmem:[%s4273_s29 + $0x100] ss:$40 sps:$4 sm:$0xff]  }
  0x81   : > { %v3513_v20 = vld [vmem:[%s4273_s29 + $0xf8] ss:$40 sps:$4 sm:$0xff]   ;;  %v3521_v22 = vld [vmem:[%s4273_s29 + $0x14c] ss:$40 sps:$4 sm:$0xff]   ;;  %v3519_v24 = vld [vmem:[%s4273_s29 + $0x148] ss:$40 sps:$4 sm:$0xff]  }
  0x82   : > { %2254 = vmatpush1.bf16.msra.mxu1 %v3441_v30  ;;  %v3524_v23 = vld [vmem:[%s4273_s29 + $0x154] ss:$40 sps:$4 sm:$0xff]   ;;  %v3522_v25 = vld [vmem:[%s4273_s29 + $0x150] ss:$40 sps:$4 sm:$0xff]   ;;  %v3530_v27 = vld [vmem:[%s4273_s29 + $0x1a4] ss:$40 sps:$4 sm:$0xff]  }
  0x83   : > { %2295 = vmatpush1.bf16.msra.mxu0 %v3442_v31  ;;  %2255 = vmatprep.subr.bf16.mxu1 %v3443_v32  ;;  %v3527_v26 = vld [vmem:[%s4273_s29 + $0x19c] ss:$40 sps:$4 sm:$0xff]   ;;  %v3525_v28 = vld [vmem:[%s4273_s29 + $0x198] ss:$40 sps:$4 sm:$0xff]   ;;  %v3533_v30 = vld [vmem:[%s4273_s29 + $0x1ec] ss:$40 sps:$4 sm:$0xff]  }
  0x84   : > { %2296 = vmatprep.subr.bf16.mxu0 %v3445_v33  ;;  %v3528_v29 = vld [vmem:[%s4273_s29 + $0x1a0] ss:$40 sps:$4 sm:$0xff]   ;;  %v3536_v31 = vld [vmem:[%s4273_s29 + $0x1f4] ss:$40 sps:$4 sm:$0xff]   ;;  %v3534_v33 = vld [vmem:[%s4273_s29 + $0x1f0] ss:$40 sps:$4 sm:$0xff]  }
  0x85   : > { %v3531_v32 = vld [vmem:[%s4273_s29 + $0x1e8] ss:$40 sps:$4 sm:$0xff]   ;;  %v3557_v46 = vld [vmem:[%s4273_s29 + $0x32c] ss:$40 sps:$4 sm:$0xff]  }
  0x86   : > { %2256 = vmatpush1.bf16.msra.mxu1 %v3447_v34  ;;  %v3539_v34 = vld [vmem:[%s4273_s29 + $0x23c] ss:$40 sps:$4 sm:$0xff]  }
  0x87   : > { %2297 = vmatpush1.bf16.msra.mxu0 %v3448_v35  ;;  %2257 = vmatprep.subr.bf16.mxu1 %v3449_v36  ;;  %v3542_v35 = vld [vmem:[%s4273_s29 + $0x244] ss:$40 sps:$4 sm:$0xff]   ;;  %v3537_v36 = vld [vmem:[%s4273_s29 + $0x238] ss:$40 sps:$4 sm:$0xff]   ;;  %v3560_v48 = vld [vmem:[%s4273_s29 + $0x334] ss:$40 sps:$4 sm:$0xff]  }
  0x88   : > { %2298 = vmatprep.subr.bf16.mxu0 %v3451_v37  ;;  %v3540_v37 = vld [vmem:[%s4273_s29 + $0x240] ss:$40 sps:$4 sm:$0xff]  }
  0x8a   : > { %2258 = vmatpush1.bf16.msra.mxu1 %v3453_v38  ;;  %v3545_v38 = vld [vmem:[%s4273_s29 + $0x28c] ss:$40 sps:$4 sm:$0xff]  }
  0x8b   : > { %2299 = vmatpush1.bf16.msra.mxu0 %v3454_v39  ;;  %2259 = vmatprep.subr.bf16.mxu1 %v3455_v40  ;;  %v3548_v39 = vld [vmem:[%s4273_s29 + $0x294] ss:$40 sps:$4 sm:$0xff]   ;;  %v3543_v40 = vld [vmem:[%s4273_s29 + $0x288] ss:$40 sps:$4 sm:$0xff]  }
  0x8c   : > { %2300 = vmatprep.subr.bf16.mxu0 %v3457_v41  ;;  %v3546_v41 = vld [vmem:[%s4273_s29 + $0x290] ss:$40 sps:$4 sm:$0xff]  }
  0x8e   : > { %2260 = vmatpush1.bf16.msra.mxu1 %v3459_v42  ;;  %v3551_v42 = vld [vmem:[%s4273_s29 + $0x2dc] ss:$40 sps:$4 sm:$0xff]  }
  0x8f   : > { %2301 = vmatpush1.bf16.msra.mxu0 %v3460_v43  ;;  %2261 = vmatprep.subr.bf16.mxu1 %v3461_v44  ;;  %v3554_v43 = vld [vmem:[%s4273_s29 + $0x2e4] ss:$40 sps:$4 sm:$0xff]   ;;  %v3549_v44 = vld [vmem:[%s4273_s29 + $0x2d8] ss:$40 sps:$4 sm:$0xff]  }
  0x90   : > { %2302 = vmatprep.subr.bf16.mxu0 %v3463_v45  ;;  %v3552_v45 = vld [vmem:[%s4273_s29 + $0x2e0] ss:$40 sps:$4 sm:$0xff]  }
  0x92   : > { %2262 = vmatpush1.bf16.msra.mxu1 %v3465_v49  ;;  %v3555_v49 = vld [vmem:[%s4273_s29 + $0x328] ss:$40 sps:$4 sm:$0xff]  }
  0x93   : > { %2303 = vmatpush1.bf16.msra.mxu0 %v3466_v50  ;;  %2263 = vmatprep.subr.bf16.mxu1 %v3467_v52  ;;  %v3558_v50 = vld [vmem:[%s4273_s29 + $0x330] ss:$40 sps:$4 sm:$0xff]   ;;  %v3563_v52 = vld [vmem:[%s4273_s29 + $0x37c] ss:$40 sps:$4 sm:$0xff]  }
  0x94   : > { %2304 = vmatprep.subr.bf16.mxu0 %v3469_v53  ;;  %v3566_v53 = vld [vmem:[%s4273_s29 + $0x384] ss:$40 sps:$4 sm:$0xff]  }
  0x96   : > { %2264 = vmatpush1.bf16.msra.mxu1 %v3471_v54  ;;  %v3561_v54 = vld [vmem:[%s4273_s29 + $0x378] ss:$40 sps:$4 sm:$0xff]  }
  0x97   : > { %2305 = vmatpush1.bf16.msra.mxu0 %v3472_v55  ;;  %2265 = vmatprep.subr.bf16.mxu1 %v3473_v56  ;;  %v3564_v55 = vld [vmem:[%s4273_s29 + $0x380] ss:$40 sps:$4 sm:$0xff]   ;;  %v3569_v56 = vld [vmem:[%s4273_s29 + $0x3cc] ss:$40 sps:$4 sm:$0xff]  }
  0x98   : > { %2306 = vmatprep.subr.bf16.mxu0 %v3475_v57  ;;  %v3572_v57 = vld [vmem:[%s4273_s29 + $0x3d4] ss:$40 sps:$4 sm:$0xff]  }
  0x9a   : > { %2266 = vmatpush1.bf16.msra.mxu1 %v3477_v58  ;;  %v3567_v58 = vld [vmem:[%s4273_s29 + $0x3c8] ss:$40 sps:$4 sm:$0xff]  }
  0x9b   : > { %2307 = vmatpush1.bf16.msra.mxu0 %v3478_v59  ;;  %2267 = vmatprep.subr.bf16.mxu1 %v3479_v60  ;;  %v3570_v59 = vld [vmem:[%s4273_s29 + $0x3d0] ss:$40 sps:$4 sm:$0xff]   ;;  %v3575_v60 = vld [vmem:[%s4273_s29 + $0x41c] ss:$40 sps:$4 sm:$0xff]  }
  0x9c   : > { %2308 = vmatprep.subr.bf16.mxu0 %v3481_v61  ;;  %v3578_v61 = vld [vmem:[%s4273_s29 + $0x424] ss:$40 sps:$4 sm:$0xff]  }
  0x9e   : > { %2268 = vmatpush1.bf16.msra.mxu1 %v3483_v62  ;;  %v3573_v62 = vld [vmem:[%s4273_s29 + $0x418] ss:$40 sps:$4 sm:$0xff]  }
  0x9f   : > { %2309 = vmatpush1.bf16.msra.mxu0 %v3484_v63  ;;  %2269 = vmatprep.subr.bf16.mxu1 %v3485_v0  ;;  %v3576_v63 = vld [vmem:[%s4273_s29 + $0x420] ss:$40 sps:$4 sm:$0xff]   ;;  %v3581_v0 = vld [vmem:[%s4273_s29 + $0x46c] ss:$40 sps:$4 sm:$0xff]  }
  0xa0   : > { %2310 = vmatprep.subr.bf16.mxu0 %v3487_v1  ;;  %v3584_v1 = vld [vmem:[%s4273_s29 + $0x474] ss:$40 sps:$4 sm:$0xff]  }
  0xa2   : > { %2270 = vmatpush1.bf16.msra.mxu1 %v3489_v2  ;;  %v3579_v2 = vld [vmem:[%s4273_s29 + $0x468] ss:$40 sps:$4 sm:$0xff]  }
  0xa3   : > { %2311 = vmatpush1.bf16.msra.mxu0 %v3490_v3  ;;  %2321 = vmatprep.subr.bf16.mxu1 %v3497_v4  ;;  %v3582_v3 = vld [vmem:[%s4273_s29 + $0x470] ss:$40 sps:$4 sm:$0xff]   ;;  %v3587_v4 = vld [vmem:[%s4273_s29 + $0x4bc] ss:$40 sps:$4 sm:$0xff]  }
  0xa4   : > { %2403 = vmatprep.subr.bf16.mxu0 %v3500_v5  ;;  %v3590_v5 = vld [vmem:[%s4273_s29 + $0x4c4] ss:$40 sps:$4 sm:$0xff]  }
  0xa5   : > { %2272 = vmatmul.mubr.bf16.vlgmr.msra.gmra.mrb[0].mxu1 %v4369_v6 }
  0xa6   : > { %2313 = vmatmul.mubr.bf16.vlgmr.msra.gmra.mrb[0].mxu0 %v4371_v7  ;;  %2322 = vmatpush1.bf16.msra.mxu1 %v3495_v8  ;;  %v3585_v8 = vld [vmem:[%s4273_s29 + $0x4b8] ss:$40 sps:$4 sm:$0xff]  }
  0xa7   : > { %2404 = vmatpush1.bf16.msra.mxu0 %v3498_v9  ;;  %2323 = vmatprep.subr.bf16.mxu1 %v3503_v10  ;;  %v3588_v9 = vld [vmem:[%s4273_s29 + $0x4c0] ss:$40 sps:$4 sm:$0xff]   ;;  %v3593_v10 = vld [vmem:[%s4273_s29 + $0x50c] ss:$40 sps:$4 sm:$0xff]  }
  0xa8   : > { %2405 = vmatprep.subr.bf16.mxu0 %v3506_v11  ;;  %2353 = vmatprep.mubr.bf16.mxu1 %v4343_v47  ;;  %v3596_v11 = vld [vmem:[%s4273_s29 + $0x514] ss:$40 sps:$4 sm:$0xff]  }
  0xa9   : > { %2435 = vmatprep.mubr.bf16.mxu0 %v4343_v47 }
  0xaa   : > { %2324 = vmatpush1.bf16.msra.mxu1 %v3501_v12  ;;  %v3591_v12 = vld [vmem:[%s4273_s29 + $0x508] ss:$40 sps:$4 sm:$0xff]  }
  0xab   : > { %2406 = vmatpush1.bf16.msra.mxu0 %v3504_v13  ;;  %2325 = vmatprep.subr.bf16.mxu1 %v3509_v14  ;;  %v3594_v13 = vld [vmem:[%s4273_s29 + $0x510] ss:$40 sps:$4 sm:$0xff]   ;;  %v3599_v14 = vld [vmem:[%s4273_s29 + $0x55c] ss:$40 sps:$4 sm:$0xff]  }
  0xac   : > { %2407 = vmatprep.subr.bf16.mxu0 %v3512_v15  ;;  %v3602_v15 = vld [vmem:[%s4273_s29 + $0x564] ss:$40 sps:$4 sm:$0xff]  }
  0xae   : > { %2326 = vmatpush1.bf16.msra.mxu1 %v3507_v16  ;;  %v3597_v16 = vld [vmem:[%s4273_s29 + $0x558] ss:$40 sps:$4 sm:$0xff]  }
  0xaf   : > { %2408 = vmatpush1.bf16.msra.mxu0 %v3510_v17  ;;  %2327 = vmatprep.subr.bf16.mxu1 %v3515_v18  ;;  %v3600_v17 = vld [vmem:[%s4273_s29 + $0x560] ss:$40 sps:$4 sm:$0xff]   ;;  %v3605_v18 = vld [vmem:[%s4273_s29 + $0x5ac] ss:$40 sps:$4 sm:$0xff]  }
  0xb0   : > { %2409 = vmatprep.subr.bf16.mxu0 %v3518_v19  ;;  %v3608_v19 = vld [vmem:[%s4273_s29 + $0x5b4] ss:$40 sps:$4 sm:$0xff]  }
  0xb2   : > { %2328 = vmatpush1.bf16.msra.mxu1 %v3513_v20  ;;  %v3603_v20 = vld [vmem:[%s4273_s29 + $0x5a8] ss:$40 sps:$4 sm:$0xff]  }
  0xb3   : > { %2410 = vmatpush1.bf16.msra.mxu0 %v3516_v21  ;;  %2329 = vmatprep.subr.bf16.mxu1 %v3521_v22  ;;  %v3606_v21 = vld [vmem:[%s4273_s29 + $0x5b0] ss:$40 sps:$4 sm:$0xff]   ;;  %v3611_v22 = vld [vmem:[%s4273_s29 + $0x5fc] ss:$40 sps:$4 sm:$0xff]  }
  0xb4   : > { %2411 = vmatprep.subr.bf16.mxu0 %v3524_v23  ;;  %v3614_v23 = vld [vmem:[%s4273_s29 + $0x604] ss:$40 sps:$4 sm:$0xff]  }
  0xb6   : > { %2330 = vmatpush1.bf16.msra.mxu1 %v3519_v24  ;;  %v3609_v24 = vld [vmem:[%s4273_s29 + $0x5f8] ss:$40 sps:$4 sm:$0xff]  }
  0xb7   : > { %2412 = vmatpush1.bf16.msra.mxu0 %v3522_v25  ;;  %2331 = vmatprep.subr.bf16.mxu1 %v3527_v26  ;;  %v3612_v25 = vld [vmem:[%s4273_s29 + $0x600] ss:$40 sps:$4 sm:$0xff]   ;;  %v3617_v26 = vld [vmem:[%s4273_s29 + $0x64c] ss:$40 sps:$4 sm:$0xff]  }
  0xb8   : > { %2413 = vmatprep.subr.bf16.mxu0 %v3530_v27  ;;  %v3620_v27 = vld [vmem:[%s4273_s29 + $0x654] ss:$40 sps:$4 sm:$0xff]  }
  0xba   : > { %2332 = vmatpush1.bf16.msra.mxu1 %v3525_v28  ;;  %v3615_v28 = vld [vmem:[%s4273_s29 + $0x648] ss:$40 sps:$4 sm:$0xff]  }
  0xbb   : > { %2414 = vmatpush1.bf16.msra.mxu0 %v3528_v29  ;;  %2333 = vmatprep.subr.bf16.mxu1 %v3533_v30  ;;  %v3618_v29 = vld [vmem:[%s4273_s29 + $0x650] ss:$40 sps:$4 sm:$0xff]   ;;  %v3623_v30 = vld [vmem:[%s4273_s29 + $0x69c] ss:$40 sps:$4 sm:$0xff]  }
  0xbc   : > { %2415 = vmatprep.subr.bf16.mxu0 %v3536_v31  ;;  %v3626_v31 = vld [vmem:[%s4273_s29 + $0x6a4] ss:$40 sps:$4 sm:$0xff]  }
  0xbe   : > { %2334 = vmatpush1.bf16.msra.mxu1 %v3531_v32  ;;  %v3621_v32 = vld [vmem:[%s4273_s29 + $0x698] ss:$40 sps:$4 sm:$0xff]  }
  0xbf   : > { %2416 = vmatpush1.bf16.msra.mxu0 %v3534_v33  ;;  %2335 = vmatprep.subr.bf16.mxu1 %v3539_v34  ;;  %v3624_v33 = vld [vmem:[%s4273_s29 + $0x6a0] ss:$40 sps:$4 sm:$0xff]   ;;  %v3629_v34 = vld [vmem:[%s4273_s29 + $0x6ec] ss:$40 sps:$4 sm:$0xff]  }
  0xc0   : > { %2417 = vmatprep.subr.bf16.mxu0 %v3542_v35  ;;  %v3632_v35 = vld [vmem:[%s4273_s29 + $0x6f4] ss:$40 sps:$4 sm:$0xff]  }
  0xc2   : > { %2336 = vmatpush1.bf16.msra.mxu1 %v3537_v36  ;;  %v3627_v36 = vld [vmem:[%s4273_s29 + $0x6e8] ss:$40 sps:$4 sm:$0xff]  }
  0xc3   : > { %2418 = vmatpush1.bf16.msra.mxu0 %v3540_v37  ;;  %2337 = vmatprep.subr.bf16.mxu1 %v3545_v38  ;;  %v3630_v37 = vld [vmem:[%s4273_s29 + $0x6f0] ss:$40 sps:$4 sm:$0xff]   ;;  %v3635_v38 = vld [vmem:[%s4273_s29 + $0x73c] ss:$40 sps:$4 sm:$0xff]  }
  0xc4   : > { %2419 = vmatprep.subr.bf16.mxu0 %v3548_v39  ;;  %v3638_v39 = vld [vmem:[%s4273_s29 + $0x744] ss:$40 sps:$4 sm:$0xff]  }
  0xc6   : > { %2338 = vmatpush1.bf16.msra.mxu1 %v3543_v40  ;;  %v3633_v40 = vld [vmem:[%s4273_s29 + $0x738] ss:$40 sps:$4 sm:$0xff]  }
  0xc7   : > { %2420 = vmatpush1.bf16.msra.mxu0 %v3546_v41  ;;  %2339 = vmatprep.subr.bf16.mxu1 %v3551_v42  ;;  %v3636_v41 = vld [vmem:[%s4273_s29 + $0x740] ss:$40 sps:$4 sm:$0xff]   ;;  %v3641_v42 = vld [vmem:[%s4273_s29 + $0x78c] ss:$40 sps:$4 sm:$0xff]  }
  0xc8   : > { %2421 = vmatprep.subr.bf16.mxu0 %v3554_v43  ;;  %v3644_v43 = vld [vmem:[%s4273_s29 + $0x794] ss:$40 sps:$4 sm:$0xff]  }
  0xca   : > { %2340 = vmatpush1.bf16.msra.mxu1 %v3549_v44  ;;  %v3639_v44 = vld [vmem:[%s4273_s29 + $0x788] ss:$40 sps:$4 sm:$0xff]  }
  0xcb   : > { %2422 = vmatpush1.bf16.msra.mxu0 %v3552_v45  ;;  %2341 = vmatprep.subr.bf16.mxu1 %v3557_v46  ;;  %v3642_v45 = vld [vmem:[%s4273_s29 + $0x790] ss:$40 sps:$4 sm:$0xff]   ;;  %v3647_v46 = vld [vmem:[%s4273_s29 + $0x7dc] ss:$40 sps:$4 sm:$0xff]  }
  0xcc   : > { %2423 = vmatprep.subr.bf16.mxu0 %v3560_v48  ;;  %v3650_v48 = vld [vmem:[%s4273_s29 + $0x7e4] ss:$40 sps:$4 sm:$0xff]  }
  0xce   : > { %2342 = vmatpush1.bf16.msra.mxu1 %v3555_v49  ;;  %v3645_v49 = vld [vmem:[%s4273_s29 + $0x7d8] ss:$40 sps:$4 sm:$0xff]  }
  0xcf   : > { %2424 = vmatpush1.bf16.msra.mxu0 %v3558_v50  ;;  %2343 = vmatprep.subr.bf16.mxu1 %v3563_v52  ;;  %v3648_v50 = vld [vmem:[%s4273_s29 + $0x7e0] ss:$40 sps:$4 sm:$0xff]   ;;  %v3653_v52 = vld [vmem:[%s4273_s29 + $0x82c] ss:$40 sps:$4 sm:$0xff]  }
  0xd0   : > { %2425 = vmatprep.subr.bf16.mxu0 %v3566_v53  ;;  %v3656_v53 = vld [vmem:[%s4273_s29 + $0x834] ss:$40 sps:$4 sm:$0xff]  }
  0xd2   : > { %2344 = vmatpush1.bf16.msra.mxu1 %v3561_v54  ;;  %v3651_v54 = vld [vmem:[%s4273_s29 + $0x828] ss:$40 sps:$4 sm:$0xff]  }
  0xd3   : > { %2426 = vmatpush1.bf16.msra.mxu0 %v3564_v55  ;;  %2345 = vmatprep.subr.bf16.mxu1 %v3569_v56  ;;  %v3654_v55 = vld [vmem:[%s4273_s29 + $0x830] ss:$40 sps:$4 sm:$0xff]   ;;  %v3659_v56 = vld [vmem:[%s4273_s29 + $0x87c] ss:$40 sps:$4 sm:$0xff]  }
  0xd4   : > { %2427 = vmatprep.subr.bf16.mxu0 %v3572_v57  ;;  %v3662_v57 = vld [vmem:[%s4273_s29 + $0x884] ss:$40 sps:$4 sm:$0xff]  }
  0xd6   : > { %2346 = vmatpush1.bf16.msra.mxu1 %v3567_v58  ;;  %v3657_v58 = vld [vmem:[%s4273_s29 + $0x878] ss:$40 sps:$4 sm:$0xff]  }
  0xd7   : > { %2428 = vmatpush1.bf16.msra.mxu0 %v3570_v59  ;;  %2347 = vmatprep.subr.bf16.mxu1 %v3575_v60  ;;  %v3660_v59 = vld [vmem:[%s4273_s29 + $0x880] ss:$40 sps:$4 sm:$0xff]   ;;  %v3665_v60 = vld [vmem:[%s4273_s29 + $0x8cc] ss:$40 sps:$4 sm:$0xff]  }
  0xd8   : > { %2429 = vmatprep.subr.bf16.mxu0 %v3578_v61  ;;  %v3668_v61 = vld [vmem:[%s4273_s29 + $0x8d4] ss:$40 sps:$4 sm:$0xff]  }
  0xda   : > { %2348 = vmatpush1.bf16.msra.mxu1 %v3573_v62  ;;  %v3663_v62 = vld [vmem:[%s4273_s29 + $0x8c8] ss:$40 sps:$4 sm:$0xff]  }
  0xdb   : > { %2430 = vmatpush1.bf16.msra.mxu0 %v3576_v63  ;;  %2349 = vmatprep.subr.bf16.mxu1 %v3581_v0  ;;  %v3666_v63 = vld [vmem:[%s4273_s29 + $0x8d0] ss:$40 sps:$4 sm:$0xff]   ;;  %v3671_v0 = vld [vmem:[%s4273_s29 + $0x91c] ss:$40 sps:$4 sm:$0xff]  }
  0xdc   : > { %2431 = vmatprep.subr.bf16.mxu0 %v3584_v1  ;;  %v3674_v1 = vld [vmem:[%s4273_s29 + $0x924] ss:$40 sps:$4 sm:$0xff]  }
  0xde   : > { %2350 = vmatpush1.bf16.msra.mxu1 %v3579_v2  ;;  %v3669_v2 = vld [vmem:[%s4273_s29 + $0x918] ss:$40 sps:$4 sm:$0xff]  }
  0xdf   : > { %2432 = vmatpush1.bf16.msra.mxu0 %v3582_v3  ;;  %2351 = vmatprep.subr.bf16.mxu1 %v3587_v4  ;;  %v3672_v3 = vld [vmem:[%s4273_s29 + $0x920] ss:$40 sps:$4 sm:$0xff]   ;;  %v3677_v4 = vld [vmem:[%s4273_s29 + $0x96c] ss:$40 sps:$4 sm:$0xff]  }
  0xe0   : > { %2433 = vmatprep.subr.bf16.mxu0 %v3590_v5  ;;  %v3680_v5 = vld [vmem:[%s4273_s29 + $0x974] ss:$40 sps:$4 sm:$0xff]  }
  0xe2   : > { %2352 = vmatpush1.bf16.msra.mxu1 %v3585_v8  ;;  %v3675_v8 = vld [vmem:[%s4273_s29 + $0x968] ss:$40 sps:$4 sm:$0xff]  }
  0xe3   : > { %2434 = vmatpush1.bf16.msra.mxu0 %v3588_v9  ;;  %2362 = vmatprep.subr.bf16.mxu1 %v3593_v10  ;;  %v3678_v9 = vld [vmem:[%s4273_s29 + $0x970] ss:$40 sps:$4 sm:$0xff]   ;;  %v3683_v10 = vld [vmem:[%s4273_s29 + $0x9bc] ss:$40 sps:$4 sm:$0xff]  }
  0xe4   : > { %2444 = vmatprep.subr.bf16.mxu0 %v3596_v11  ;;  %v3686_v11 = vld [vmem:[%s4273_s29 + $0x9c4] ss:$40 sps:$4 sm:$0xff]  }
  0xe5   : > { %2354 = vmatmul.mubr.bf16.vlgmr.msra.gmra.mrb[4].mxu1 %v4369_v6 }
  0xe6   : > { %2436 = vmatmul.mubr.bf16.vlgmr.msra.gmra.mrb[4].mxu0 %v4369_v6  ;;  %2363 = vmatpush1.bf16.msra.mxu1 %v3591_v12  ;;  %v3681_v12 = vld [vmem:[%s4273_s29 + $0x9b8] ss:$40 sps:$4 sm:$0xff]  }
  0xe7   : > { %2445 = vmatpush1.bf16.msra.mxu0 %v3594_v13  ;;  %2364 = vmatprep.subr.bf16.mxu1 %v3599_v14  ;;  %v3684_v13 = vld [vmem:[%s4273_s29 + $0x9c0] ss:$40 sps:$4 sm:$0xff]   ;;  %v3689_v14 = vld [vmem:[%s4273_s29 + $0x1c] ss:$40 sps:$4 sm:$0xff]  }
  0xe8   : > { %2446 = vmatprep.subr.bf16.mxu0 %v3602_v15  ;;  %2394 = vmatprep.mubr.bf16.mxu1 %v4347_v51  ;;  %v3692_v15 = vld [vmem:[%s4273_s29 + $0x24] ss:$40 sps:$4 sm:$0xff]  }
  0xe9   : > { %2476 = vmatprep.mubr.bf16.mxu0 %v4347_v51 }
  0xea   : > { %2365 = vmatpush1.bf16.msra.mxu1 %v3597_v16  ;;  %v3687_v16 = vld [vmem:[%s4273_s29 + $0x18] ss:$40 sps:$4 sm:$0xff]  }
  0xeb   : > { %2447 = vmatpush1.bf16.msra.mxu0 %v3600_v17  ;;  %2366 = vmatprep.subr.bf16.mxu1 %v3605_v18  ;;  %v3690_v17 = vld [vmem:[%s4273_s29 + $0x20] ss:$40 sps:$4 sm:$0xff]   ;;  %v3695_v18 = vld [vmem:[%s4273_s29 + $0x6c] ss:$40 sps:$4 sm:$0xff]  }
  0xec   : > { %2448 = vmatprep.subr.bf16.mxu0 %v3608_v19  ;;  %v3698_v19 = vld [vmem:[%s4273_s29 + $0x74] ss:$40 sps:$4 sm:$0xff]  }
  0xee   : > { %2367 = vmatpush1.bf16.msra.mxu1 %v3603_v20  ;;  %v3693_v20 = vld [vmem:[%s4273_s29 + $0x68] ss:$40 sps:$4 sm:$0xff]  }
  0xef   : > { %2449 = vmatpush1.bf16.msra.mxu0 %v3606_v21  ;;  %2368 = vmatprep.subr.bf16.mxu1 %v3611_v22  ;;  %v3696_v21 = vld [vmem:[%s4273_s29 + $0x70] ss:$40 sps:$4 sm:$0xff]   ;;  %v3701_v22 = vld [vmem:[%s4273_s29 + $0xbc] ss:$40 sps:$4 sm:$0xff]  }
  0xf0   : > { %2450 = vmatprep.subr.bf16.mxu0 %v3614_v23  ;;  %v3704_v23 = vld [vmem:[%s4273_s29 + $0xc4] ss:$40 sps:$4 sm:$0xff]  }
  0xf2   : > { %2369 = vmatpush1.bf16.msra.mxu1 %v3609_v24  ;;  %v3699_v24 = vld [vmem:[%s4273_s29 + $0xb8] ss:$40 sps:$4 sm:$0xff]  }
  0xf3   : > { %2451 = vmatpush1.bf16.msra.mxu0 %v3612_v25  ;;  %2370 = vmatprep.subr.bf16.mxu1 %v3617_v26  ;;  %v3702_v25 = vld [vmem:[%s4273_s29 + $0xc0] ss:$40 sps:$4 sm:$0xff]   ;;  %v3707_v26 = vld [vmem:[%s4273_s29 + $0x10c] ss:$40 sps:$4 sm:$0xff]  }
  0xf4   : > { %2452 = vmatprep.subr.bf16.mxu0 %v3620_v27  ;;  %v3710_v27 = vld [vmem:[%s4273_s29 + $0x114] ss:$40 sps:$4 sm:$0xff]  }
  0xf6   : > { %2371 = vmatpush1.bf16.msra.mxu1 %v3615_v28  ;;  %v3705_v28 = vld [vmem:[%s4273_s29 + $0x108] ss:$40 sps:$4 sm:$0xff]  }
  0xf7   : > { %2453 = vmatpush1.bf16.msra.mxu0 %v3618_v29  ;;  %2372 = vmatprep.subr.bf16.mxu1 %v3623_v30  ;;  %v3708_v29 = vld [vmem:[%s4273_s29 + $0x110] ss:$40 sps:$4 sm:$0xff]   ;;  %v3716_v30 = vld [vmem:[%s4273_s29 + $0x164] ss:$40 sps:$4 sm:$0xff]  }
  0xf8   : > { %2454 = vmatprep.subr.bf16.mxu0 %v3626_v31  ;;  %v3711_v31 = vld [vmem:[%s4273_s29 + $0x158] ss:$40 sps:$4 sm:$0xff]  }
  0xfa   : > { %2373 = vmatpush1.bf16.msra.mxu1 %v3621_v32  ;;  %v3714_v32 = vld [vmem:[%s4273_s29 + $0x160] ss:$40 sps:$4 sm:$0xff]  }
  0xfb   : > { %2455 = vmatpush1.bf16.msra.mxu0 %v3624_v33  ;;  %2374 = vmatprep.subr.bf16.mxu1 %v3629_v34  ;;  %v3719_v33 = vld [vmem:[%s4273_s29 + $0x1ac] ss:$40 sps:$4 sm:$0xff]  }
  0xfc   : > { %2456 = vmatprep.subr.bf16.mxu0 %v3632_v35  ;;  %v3722_v34 = vld [vmem:[%s4273_s29 + $0x1b4] ss:$40 sps:$4 sm:$0xff]   ;;  %v3717_v35 = vld [vmem:[%s4273_s29 + $0x1a8] ss:$40 sps:$4 sm:$0xff]  }
  0xfe   : > { %2375 = vmatpush1.bf16.msra.mxu1 %v3627_v36  ;;  %v3720_v36 = vld [vmem:[%s4273_s29 + $0x1b0] ss:$40 sps:$4 sm:$0xff]  }
  0xff   : > { %2457 = vmatpush1.bf16.msra.mxu0 %v3630_v37  ;;  %2376 = vmatprep.subr.bf16.mxu1 %v3635_v38  ;;  %v3725_v37 = vld [vmem:[%s4273_s29 + $0x1fc] ss:$40 sps:$4 sm:$0xff]  }
 0x100   : > { %2458 = vmatprep.subr.bf16.mxu0 %v3638_v39  ;;  %v3728_v38 = vld [vmem:[%s4273_s29 + $0x204] ss:$40 sps:$4 sm:$0xff]   ;;  %v3723_v39 = vld [vmem:[%s4273_s29 + $0x1f8] ss:$40 sps:$4 sm:$0xff]  }
 0x102   : > { %2377 = vmatpush1.bf16.msra.mxu1 %v3633_v40  ;;  %v3726_v40 = vld [vmem:[%s4273_s29 + $0x200] ss:$40 sps:$4 sm:$0xff]  }
 0x103   : > { %2459 = vmatpush1.bf16.msra.mxu0 %v3636_v41  ;;  %2378 = vmatprep.subr.bf16.mxu1 %v3641_v42  ;;  %v3731_v41 = vld [vmem:[%s4273_s29 + $0x24c] ss:$40 sps:$4 sm:$0xff]  }
 0x104   : > { %2460 = vmatprep.subr.bf16.mxu0 %v3644_v43  ;;  %v3734_v42 = vld [vmem:[%s4273_s29 + $0x254] ss:$40 sps:$4 sm:$0xff]   ;;  %v3729_v43 = vld [vmem:[%s4273_s29 + $0x248] ss:$40 sps:$4 sm:$0xff]  }
 0x106   : > { %2379 = vmatpush1.bf16.msra.mxu1 %v3639_v44  ;;  %v3732_v44 = vld [vmem:[%s4273_s29 + $0x250] ss:$40 sps:$4 sm:$0xff]  }
 0x107   : > { %2461 = vmatpush1.bf16.msra.mxu0 %v3642_v45  ;;  %2380 = vmatprep.subr.bf16.mxu1 %v3647_v46  ;;  %v3737_v45 = vld [vmem:[%s4273_s29 + $0x29c] ss:$40 sps:$4 sm:$0xff]  }
 0x108   : > { %2462 = vmatprep.subr.bf16.mxu0 %v3650_v48  ;;  %v3740_v46 = vld [vmem:[%s4273_s29 + $0x2a4] ss:$40 sps:$4 sm:$0xff]   ;;  %v3735_v48 = vld [vmem:[%s4273_s29 + $0x298] ss:$40 sps:$4 sm:$0xff]  }
 0x10a   : > { %2381 = vmatpush1.bf16.msra.mxu1 %v3645_v49  ;;  %v3738_v49 = vld [vmem:[%s4273_s29 + $0x2a0] ss:$40 sps:$4 sm:$0xff]  }
 0x10b   : > { %2463 = vmatpush1.bf16.msra.mxu0 %v3648_v50  ;;  %2382 = vmatprep.subr.bf16.mxu1 %v3653_v52  ;;  %v3743_v50 = vld [vmem:[%s4273_s29 + $0x2ec] ss:$40 sps:$4 sm:$0xff]  }
 0x10c   : > { %2464 = vmatprep.subr.bf16.mxu0 %v3656_v53  ;;  %v3746_v52 = vld [vmem:[%s4273_s29 + $0x2f4] ss:$40 sps:$4 sm:$0xff]   ;;  %v3741_v53 = vld [vmem:[%s4273_s29 + $0x2e8] ss:$40 sps:$4 sm:$0xff]  }
 0x10e   : > { %2383 = vmatpush1.bf16.msra.mxu1 %v3651_v54  ;;  %v3744_v54 = vld [vmem:[%s4273_s29 + $0x2f0] ss:$40 sps:$4 sm:$0xff]  }
 0x10f   : > { %2465 = vmatpush1.bf16.msra.mxu0 %v3654_v55  ;;  %2384 = vmatprep.subr.bf16.mxu1 %v3659_v56  ;;  %v3749_v55 = vld [vmem:[%s4273_s29 + $0x33c] ss:$40 sps:$4 sm:$0xff]  }
 0x110   : > { %2466 = vmatprep.subr.bf16.mxu0 %v3662_v57  ;;  %v3752_v56 = vld [vmem:[%s4273_s29 + $0x344] ss:$40 sps:$4 sm:$0xff]   ;;  %v3747_v57 = vld [vmem:[%s4273_s29 + $0x338] ss:$40 sps:$4 sm:$0xff]  }
 0x112   : > { %2385 = vmatpush1.bf16.msra.mxu1 %v3657_v58  ;;  %v3750_v58 = vld [vmem:[%s4273_s29 + $0x340] ss:$40 sps:$4 sm:$0xff]  }
 0x113   : > { %2467 = vmatpush1.bf16.msra.mxu0 %v3660_v59  ;;  %2386 = vmatprep.subr.bf16.mxu1 %v3665_v60  ;;  %v3755_v59 = vld [vmem:[%s4273_s29 + $0x38c] ss:$40 sps:$4 sm:$0xff]  }
 0x114   : > { %2468 = vmatprep.subr.bf16.mxu0 %v3668_v61  ;;  %v3758_v60 = vld [vmem:[%s4273_s29 + $0x394] ss:$40 sps:$4 sm:$0xff]   ;;  %v3753_v61 = vld [vmem:[%s4273_s29 + $0x388] ss:$40 sps:$4 sm:$0xff]  }
 0x116   : > { %2387 = vmatpush1.bf16.msra.mxu1 %v3663_v62  ;;  %v3756_v62 = vld [vmem:[%s4273_s29 + $0x390] ss:$40 sps:$4 sm:$0xff]  }
 0x117   : > { %2469 = vmatpush1.bf16.msra.mxu0 %v3666_v63  ;;  %2388 = vmatprep.subr.bf16.mxu1 %v3671_v0  ;;  %v3761_v63 = vld [vmem:[%s4273_s29 + $0x3dc] ss:$40 sps:$4 sm:$0xff]  }
 0x118   : > { %2470 = vmatprep.subr.bf16.mxu0 %v3674_v1  ;;  %v3764_v0 = vld [vmem:[%s4273_s29 + $0x3e4] ss:$40 sps:$4 sm:$0xff]   ;;  %v3759_v1 = vld [vmem:[%s4273_s29 + $0x3d8] ss:$40 sps:$4 sm:$0xff]  }
 0x11a   : > { %2389 = vmatpush1.bf16.msra.mxu1 %v3669_v2  ;;  %v3762_v2 = vld [vmem:[%s4273_s29 + $0x3e0] ss:$40 sps:$4 sm:$0xff]  }
 0x11b   : > { %2471 = vmatpush1.bf16.msra.mxu0 %v3672_v3  ;;  %2390 = vmatprep.subr.bf16.mxu1 %v3677_v4  ;;  %v3767_v3 = vld [vmem:[%s4273_s29 + $0x42c] ss:$40 sps:$4 sm:$0xff]  }
 0x11c   : > { %2472 = vmatprep.subr.bf16.mxu0 %v3680_v5  ;;  %v3770_v4 = vld [vmem:[%s4273_s29 + $0x434] ss:$40 sps:$4 sm:$0xff]   ;;  %v3765_v5 = vld [vmem:[%s4273_s29 + $0x428] ss:$40 sps:$4 sm:$0xff]  }
 0x11e   : > { %2391 = vmatpush1.bf16.msra.mxu1 %v3675_v8  ;;  %v3768_v8 = vld [vmem:[%s4273_s29 + $0x430] ss:$40 sps:$4 sm:$0xff]  }
 0x11f   : > { %2473 = vmatpush1.bf16.msra.mxu0 %v3678_v9  ;;  %2392 = vmatprep.subr.bf16.mxu1 %v3683_v10  ;;  %v3773_v9 = vld [vmem:[%s4273_s29 + $0x47c] ss:$40 sps:$4 sm:$0xff]  }
 0x120   : > { %2474 = vmatprep.subr.bf16.mxu0 %v3686_v11  ;;  %v3776_v10 = vld [vmem:[%s4273_s29 + $0x484] ss:$40 sps:$4 sm:$0xff]   ;;  %v3771_v11 = vld [vmem:[%s4273_s29 + $0x478] ss:$40 sps:$4 sm:$0xff]  }
 0x122   : > { %2393 = vmatpush1.bf16.msra.mxu1 %v3681_v12  ;;  %v3774_v12 = vld [vmem:[%s4273_s29 + $0x480] ss:$40 sps:$4 sm:$0xff]  }
 0x123   : > { %2475 = vmatpush1.bf16.msra.mxu0 %v3684_v13  ;;  %2485 = vmatprep.subr.bf16.mxu1 %v3689_v14  ;;  %v3779_v13 = vld [vmem:[%s4273_s29 + $0x4cc] ss:$40 sps:$4 sm:$0xff]  }
 0x124   : > { %2567 = vmatprep.subr.bf16.mxu0 %v3692_v15  ;;  %v3782_v14 = vld [vmem:[%s4273_s29 + $0x4d4] ss:$40 sps:$4 sm:$0xff]   ;;  %v3777_v15 = vld [vmem:[%s4273_s29 + $0x4c8] ss:$40 sps:$4 sm:$0xff]  }
 0x125   : > { %2395 = vmatmul.mubr.bf16.vlgmr.msra.gmra.mrb[4].mxu1 %v4371_v7 }
 0x126   : > { %2477 = vmatmul.mubr.bf16.vlgmr.msra.gmra.mrb[4].mxu0 %v4371_v7  ;;  %2486 = vmatpush1.bf16.msra.mxu1 %v3687_v16  ;;  %v3780_v16 = vld [vmem:[%s4273_s29 + $0x4d0] ss:$40 sps:$4 sm:$0xff]  }
 0x127   : > { %2568 = vmatpush1.bf16.msra.mxu0 %v3690_v17  ;;  %2487 = vmatprep.subr.bf16.mxu1 %v3695_v18  ;;  %v3785_v17 = vld [vmem:[%s4273_s29 + $0x51c] ss:$40 sps:$4 sm:$0xff]  }
 0x128   : > { %2569 = vmatprep.subr.bf16.mxu0 %v3698_v19  ;;  %2517 = vmatprep.mubr.bf16.mxu1 %v4343_v47  ;;  %v3788_v18 = vld [vmem:[%s4273_s29 + $0x524] ss:$40 sps:$4 sm:$0xff]   ;;  %v3783_v19 = vld [vmem:[%s4273_s29 + $0x518] ss:$40 sps:$4 sm:$0xff]  }
 0x129   : > { %2599 = vmatprep.mubr.bf16.mxu0 %v4343_v47  ;;  %v3713_v47 = vld [vmem:[%s4273_s29 + $0x15c] ss:$40 sps:$4 sm:$0xff]  }
 0x12a   : > { %2488 = vmatpush1.bf16.msra.mxu1 %v3693_v20  ;;  %v3786_v20 = vld [vmem:[%s4273_s29 + $0x520] ss:$40 sps:$4 sm:$0xff]  }
 0x12b   : > { %2570 = vmatpush1.bf16.msra.mxu0 %v3696_v21  ;;  %2489 = vmatprep.subr.bf16.mxu1 %v3701_v22  ;;  %v3791_v21 = vld [vmem:[%s4273_s29 + $0x56c] ss:$40 sps:$4 sm:$0xff]  }
 0x12c   : > { %2571 = vmatprep.subr.bf16.mxu0 %v3704_v23  ;;  %v3794_v22 = vld [vmem:[%s4273_s29 + $0x574] ss:$40 sps:$4 sm:$0xff]   ;;  %v3789_v23 = vld [vmem:[%s4273_s29 + $0x568] ss:$40 sps:$4 sm:$0xff]  }
 0x12e   : > { %2490 = vmatpush1.bf16.msra.mxu1 %v3699_v24  ;;  %v3792_v24 = vld [vmem:[%s4273_s29 + $0x570] ss:$40 sps:$4 sm:$0xff]  }
 0x12f   : > { %2572 = vmatpush1.bf16.msra.mxu0 %v3702_v25  ;;  %2491 = vmatprep.subr.bf16.mxu1 %v3707_v26  ;;  %v3797_v25 = vld [vmem:[%s4273_s29 + $0x5bc] ss:$40 sps:$4 sm:$0xff]  }
 0x130   : > { %2573 = vmatprep.subr.bf16.mxu0 %v3710_v27  ;;  %v3800_v26 = vld [vmem:[%s4273_s29 + $0x5c4] ss:$40 sps:$4 sm:$0xff]   ;;  %v3798_v27 = vld [vmem:[%s4273_s29 + $0x5c0] ss:$40 sps:$4 sm:$0xff]  }
 0x132   : > { %2492 = vmatpush1.bf16.msra.mxu1 %v3705_v28  ;;  %v3803_v28 = vld [vmem:[%s4273_s29 + $0x60c] ss:$40 sps:$4 sm:$0xff]  }
 0x133   : > { %2574 = vmatpush1.bf16.msra.mxu0 %v3708_v29  ;;  %2493 = vmatprep.subr.bf16.mxu1 %v3713_v47  ;;  %v3806_v29 = vld [vmem:[%s4273_s29 + $0x614] ss:$40 sps:$4 sm:$0xff]   ;;  %v3801_v47 = vld [vmem:[%s4273_s29 + $0x608] ss:$40 sps:$4 sm:$0xff]  }
 0x134   : > { %2575 = vmatprep.subr.bf16.mxu0 %v3716_v30  ;;  %v3804_v30 = vld [vmem:[%s4273_s29 + $0x610] ss:$40 sps:$4 sm:$0xff]  }
 0x136   : > { %2494 = vmatpush1.bf16.msra.mxu1 %v3711_v31  ;;  %v3812_v31 = vld [vmem:[%s4273_s29 + $0x664] ss:$40 sps:$4 sm:$0xff]  }
 0x137   : > { %2576 = vmatpush1.bf16.msra.mxu0 %v3714_v32  ;;  %2495 = vmatprep.subr.bf16.mxu1 %v3719_v33  ;;  %v3807_v32 = vld [vmem:[%s4273_s29 + $0x658] ss:$40 sps:$4 sm:$0xff]  }
 0x138   : > { %2577 = vmatprep.subr.bf16.mxu0 %v3722_v34  ;;  %v3810_v33 = vld [vmem:[%s4273_s29 + $0x660] ss:$40 sps:$4 sm:$0xff]   ;;  %v3815_v34 = vld [vmem:[%s4273_s29 + $0x6ac] ss:$40 sps:$4 sm:$0xff]  }
 0x13a   : > { %2496 = vmatpush1.bf16.msra.mxu1 %v3717_v35  ;;  %v3818_v35 = vld [vmem:[%s4273_s29 + $0x6b4] ss:$40 sps:$4 sm:$0xff]  }
 0x13b   : > { %2578 = vmatpush1.bf16.msra.mxu0 %v3720_v36  ;;  %2497 = vmatprep.subr.bf16.mxu1 %v3725_v37  ;;  %v3813_v36 = vld [vmem:[%s4273_s29 + $0x6a8] ss:$40 sps:$4 sm:$0xff]  }
 0x13c   : > { %2579 = vmatprep.subr.bf16.mxu0 %v3728_v38  ;;  %v3816_v37 = vld [vmem:[%s4273_s29 + $0x6b0] ss:$40 sps:$4 sm:$0xff]   ;;  %v3821_v38 = vld [vmem:[%s4273_s29 + $0x6fc] ss:$40 sps:$4 sm:$0xff]  }
 0x13e   : > { %2498 = vmatpush1.bf16.msra.mxu1 %v3723_v39  ;;  %v3824_v39 = vld [vmem:[%s4273_s29 + $0x704] ss:$40 sps:$4 sm:$0xff]  }
 0x13f   : > { %2580 = vmatpush1.bf16.msra.mxu0 %v3726_v40  ;;  %2499 = vmatprep.subr.bf16.mxu1 %v3731_v41 }
 0x140   : > { %2581 = vmatprep.subr.bf16.mxu0 %v3734_v42 }
 0x142   : > { %2500 = vmatpush1.bf16.msra.mxu1 %v3729_v43 }
 0x143   : > { %2582 = vmatpush1.bf16.msra.mxu0 %v3732_v44  ;;  %2501 = vmatprep.subr.bf16.mxu1 %v3737_v45 }
 0x144   : > { %2583 = vmatprep.subr.bf16.mxu0 %v3740_v46 }
 0x146   : > { %2502 = vmatpush1.bf16.msra.mxu1 %v3735_v48 }
 0x147   : > { %2584 = vmatpush1.bf16.msra.mxu0 %v3738_v49  ;;  %2503 = vmatprep.subr.bf16.mxu1 %v3743_v50  ;;  %v3819_v49 = vld [vmem:[%s4273_s29 + $0x6f8] ss:$40 sps:$4 sm:$0xff]  }
 0x148   : > { %2585 = vmatprep.subr.bf16.mxu0 %v3746_v52  ;;  %v3822_v50 = vld [vmem:[%s4273_s29 + $0x700] ss:$40 sps:$4 sm:$0xff]  }
 0x14a   : > { %2504 = vmatpush1.bf16.msra.mxu1 %v3741_v53 }
 0x14b   : > { %2586 = vmatpush1.bf16.msra.mxu0 %v3744_v54  ;;  %2505 = vmatprep.subr.bf16.mxu1 %v3749_v55  ;;  %v3827_v54 = vld [vmem:[%s4273_s29 + $0x74c] ss:$40 sps:$4 sm:$0xff]  }
 0x14c   : > { %2587 = vmatprep.subr.bf16.mxu0 %v3752_v56  ;;  %v3830_v55 = vld [vmem:[%s4273_s29 + $0x754] ss:$40 sps:$4 sm:$0xff]   ;;  %v3825_v56 = vld [vmem:[%s4273_s29 + $0x748] ss:$40 sps:$4 sm:$0xff]  }
 0x14e   : > { %2506 = vmatpush1.bf16.msra.mxu1 %v3747_v57  ;;  %v3828_v57 = vld [vmem:[%s4273_s29 + $0x750] ss:$40 sps:$4 sm:$0xff]  }
 0x14f   : > { %2588 = vmatpush1.bf16.msra.mxu0 %v3750_v58  ;;  %2507 = vmatprep.subr.bf16.mxu1 %v3755_v59  ;;  %v3833_v58 = vld [vmem:[%s4273_s29 + $0x79c] ss:$40 sps:$4 sm:$0xff]  }
 0x150   : > { %2589 = vmatprep.subr.bf16.mxu0 %v3758_v60  ;;  %v3836_v59 = vld [vmem:[%s4273_s29 + $0x7a4] ss:$40 sps:$4 sm:$0xff]   ;;  %v3831_v60 = vld [vmem:[%s4273_s29 + $0x798] ss:$40 sps:$4 sm:$0xff]  }
 0x152   : > { %2508 = vmatpush1.bf16.msra.mxu1 %v3753_v61  ;;  %v3834_v61 = vld [vmem:[%s4273_s29 + $0x7a0] ss:$40 sps:$4 sm:$0xff]  }
 0x153   : > { %2590 = vmatpush1.bf16.msra.mxu0 %v3756_v62  ;;  %2509 = vmatprep.subr.bf16.mxu1 %v3761_v63  ;;  %v3839_v62 = vld [vmem:[%s4273_s29 + $0x7ec] ss:$40 sps:$4 sm:$0xff]  }
 0x154   : > { %2591 = vmatprep.subr.bf16.mxu0 %v3764_v0  ;;  %v3842_v63 = vld [vmem:[%s4273_s29 + $0x7f4] ss:$40 sps:$4 sm:$0xff]   ;;  %v3837_v0 = vld [vmem:[%s4273_s29 + $0x7e8] ss:$40 sps:$4 sm:$0xff]  }
 0x156   : > { %2510 = vmatpush1.bf16.msra.mxu1 %v3759_v1  ;;  %v3840_v1 = vld [vmem:[%s4273_s29 + $0x7f0] ss:$40 sps:$4 sm:$0xff]  }
 0x157   : > { %2592 = vmatpush1.bf16.msra.mxu0 %v3762_v2  ;;  %2511 = vmatprep.subr.bf16.mxu1 %v3767_v3  ;;  %v3845_v2 = vld [vmem:[%s4273_s29 + $0x83c] ss:$40 sps:$4 sm:$0xff]  }
 0x158   : > { %2593 = vmatprep.subr.bf16.mxu0 %v3770_v4  ;;  %v3848_v3 = vld [vmem:[%s4273_s29 + $0x844] ss:$40 sps:$4 sm:$0xff]   ;;  %v3843_v4 = vld [vmem:[%s4273_s29 + $0x838] ss:$40 sps:$4 sm:$0xff]  }
 0x15a   : > { %2512 = vmatpush1.bf16.msra.mxu1 %v3765_v5  ;;  %v3846_v5 = vld [vmem:[%s4273_s29 + $0x840] ss:$40 sps:$4 sm:$0xff]  }
 0x15b   : > { %2594 = vmatpush1.bf16.msra.mxu0 %v3768_v8  ;;  %2513 = vmatprep.subr.bf16.mxu1 %v3773_v9  ;;  %v3851_v8 = vld [vmem:[%s4273_s29 + $0x88c] ss:$40 sps:$4 sm:$0xff]  }
 0x15c   : > { %2595 = vmatprep.subr.bf16.mxu0 %v3776_v10  ;;  %v3854_v9 = vld [vmem:[%s4273_s29 + $0x894] ss:$40 sps:$4 sm:$0xff]   ;;  %v3849_v10 = vld [vmem:[%s4273_s29 + $0x888] ss:$40 sps:$4 sm:$0xff]  }
 0x15e   : > { %2514 = vmatpush1.bf16.msra.mxu1 %v3771_v11  ;;  %v3852_v11 = vld [vmem:[%s4273_s29 + $0x890] ss:$40 sps:$4 sm:$0xff]  }
 0x15f   : > { %2596 = vmatpush1.bf16.msra.mxu0 %v3774_v12  ;;  %2515 = vmatprep.subr.bf16.mxu1 %v3779_v13  ;;  %v3857_v12 = vld [vmem:[%s4273_s29 + $0x8dc] ss:$40 sps:$4 sm:$0xff]  }
 0x160   : > { %2597 = vmatprep.subr.bf16.mxu0 %v3782_v14  ;;  %v3860_v13 = vld [vmem:[%s4273_s29 + $0x8e4] ss:$40 sps:$4 sm:$0xff]   ;;  %v3855_v14 = vld [vmem:[%s4273_s29 + $0x8d8] ss:$40 sps:$4 sm:$0xff]  }
 0x162   : > { %2516 = vmatpush1.bf16.msra.mxu1 %v3777_v15  ;;  %v3858_v15 = vld [vmem:[%s4273_s29 + $0x8e0] ss:$40 sps:$4 sm:$0xff]  }
 0x163   : > { %2598 = vmatpush1.bf16.msra.mxu0 %v3780_v16  ;;  %2526 = vmatprep.subr.bf16.mxu1 %v3785_v17  ;;  %v3863_v16 = vld [vmem:[%s4273_s29 + $0x92c] ss:$40 sps:$4 sm:$0xff]  }
 0x164   : > { %2608 = vmatprep.subr.bf16.mxu0 %v3788_v18  ;;  %v3866_v17 = vld [vmem:[%s4273_s29 + $0x934] ss:$40 sps:$4 sm:$0xff]   ;;  %v3861_v18 = vld [vmem:[%s4273_s29 + $0x928] ss:$40 sps:$4 sm:$0xff]  }
 0x165   : > { %2518 = vmatmul.mubr.bf16.vlgmr.msra.gmra.mrb[8].mxu1 %v4369_v6 }
 0x166   : > { %2600 = vmatmul.mubr.bf16.vlgmr.msra.gmra.mrb[8].mxu0 %v4369_v6  ;;  %2527 = vmatpush1.bf16.msra.mxu1 %v3783_v19  ;;  %v3795_v6 = vld [vmem:[%s4273_s29 + $0x5b8] ss:$40 sps:$4 sm:$0xff]  }
 0x167   : > { %2609 = vmatpush1.bf16.msra.mxu0 %v3786_v20  ;;  %2528 = vmatprep.subr.bf16.mxu1 %v3791_v21  ;;  %v3864_v19 = vld [vmem:[%s4273_s29 + $0x930] ss:$40 sps:$4 sm:$0xff]   ;;  %v3869_v20 = vld [vmem:[%s4273_s29 + $0x97c] ss:$40 sps:$4 sm:$0xff]  }
 0x168   : > { %2610 = vmatprep.subr.bf16.mxu0 %v3794_v22  ;;  %2558 = vmatprep.mubr.bf16.mxu1 %v4347_v51  ;;  %v3872_v21 = vld [vmem:[%s4273_s29 + $0x984] ss:$40 sps:$4 sm:$0xff]   ;;  %v3867_v22 = vld [vmem:[%s4273_s29 + $0x978] ss:$40 sps:$4 sm:$0xff]  }
 0x169   : > { %2640 = vmatprep.mubr.bf16.mxu0 %v4347_v51  ;;  %v3809_v51 = vld [vmem:[%s4273_s29 + $0x65c] ss:$40 sps:$4 sm:$0xff]  }
 0x16a   : > { %2529 = vmatpush1.bf16.msra.mxu1 %v3789_v23  ;;  %v3870_v23 = vld [vmem:[%s4273_s29 + $0x980] ss:$40 sps:$4 sm:$0xff]  }
 0x16b   : > { %2611 = vmatpush1.bf16.msra.mxu0 %v3792_v24  ;;  %2530 = vmatprep.subr.bf16.mxu1 %v3797_v25  ;;  %v3875_v24 = vld [vmem:[%s4273_s29 + $0x9cc] ss:$40 sps:$4 sm:$0xff]  }
 0x16c   : > { %2612 = vmatprep.subr.bf16.mxu0 %v3800_v26  ;;  %v3878_v25 = vld [vmem:[%s4273_s29 + $0x9d4] ss:$40 sps:$4 sm:$0xff]   ;;  %v3873_v26 = vld [vmem:[%s4273_s29 + $0x9c8] ss:$40 sps:$4 sm:$0xff]  }
 0x16e   : > { %2531 = vmatpush1.bf16.msra.mxu1 %v3795_v6  ;;  %v3876_v6 = vld [vmem:[%s4273_s29 + $0x9d0] ss:$40 sps:$4 sm:$0xff]  }
 0x16f   : > { %2613 = vmatpush1.bf16.msra.mxu0 %v3798_v27  ;;  %2532 = vmatprep.subr.bf16.mxu1 %v3803_v28 }
 0x170   : > { %2614 = vmatprep.subr.bf16.mxu0 %v3806_v29 }
 0x172   : > { %2533 = vmatpush1.bf16.msra.mxu1 %v3801_v47 }
 0x173   : > { %2615 = vmatpush1.bf16.msra.mxu0 %v3804_v30  ;;  %2534 = vmatprep.subr.bf16.mxu1 %v3809_v51 }
 0x174   : > { %2616 = vmatprep.subr.bf16.mxu0 %v3812_v31 }
 0x176   : > { %2535 = vmatpush1.bf16.msra.mxu1 %v3807_v32 }
 0x177   : > { %2617 = vmatpush1.bf16.msra.mxu0 %v3810_v33  ;;  %2536 = vmatprep.subr.bf16.mxu1 %v3815_v34 }
 0x178   : > { %2618 = vmatprep.subr.bf16.mxu0 %v3818_v35  ;;  %v2273_v40 = vpop.f32.mrb[0].mxu1 }
 0x179   : > { %v2314_v41 = vpop.f32.mrb[0].mxu0  ;;  %v2275_v43 = vpop.f32.mrb[1].mxu1 }
 0x17a   : > { %v4605_v42 = vadd.f32 %v2314_v41, %v2273_v40  ;;  %v2316_v44 = vpop.f32.mrb[1].mxu0  ;;  %v2277_v46 = vpop.f32.mrb[2].mxu1  ;;  %2537 = vmatpush1.bf16.msra.mxu1 %v3813_v36 }
 0x17b   : > { %v4607_v45 = vadd.f32 %v2316_v44, %v2275_v43  ;;  %v2318_v48 = vpop.f32.mrb[2].mxu0  ;;  %2619 = vmatpush1.bf16.msra.mxu0 %v3816_v37  ;;  %v2278_v52 = vpop.f32.mrb[3].mxu1  ;;  %2538 = vmatprep.subr.bf16.mxu1 %v3821_v38 }
 0x17c   : > { %v2319_v53 = vpop.f32.mrb[3].mxu0  ;;  %2620 = vmatprep.subr.bf16.mxu0 %v3824_v39  ;;  %2653 = vst [vmem:[%s4291_s28] sm:$0xff] (!%p3263_p4), %v4605_v42 }
 0x17d   : > { %2654 = vst [vmem:[%s4291_s28 + $0x8] sm:$0xff] (!%p3263_p4), %v4607_v45 }
 0x17e   : > { %2539 = vmatpush1.bf16.msra.mxu1 %v3819_v49 }
 0x17f   : > { %2621 = vmatpush1.bf16.msra.mxu0 %v3822_v50  ;;  %2540 = vmatprep.subr.bf16.mxu1 %v3827_v54 }
 0x180   : > { %2622 = vmatprep.subr.bf16.mxu0 %v3830_v55 }
 0x182   : > { %2541 = vmatpush1.bf16.msra.mxu1 %v3825_v56 }
 0x183   : > { %2623 = vmatpush1.bf16.msra.mxu0 %v3828_v57  ;;  %2542 = vmatprep.subr.bf16.mxu1 %v3833_v58 }
 0x184   : > { %2624 = vmatprep.subr.bf16.mxu0 %v3836_v59 }
 0x186   : > { %2543 = vmatpush1.bf16.msra.mxu1 %v3831_v60 }
 0x187   : > { %2625 = vmatpush1.bf16.msra.mxu0 %v3834_v61  ;;  %2544 = vmatprep.subr.bf16.mxu1 %v3839_v62 }
 0x188   : > { %2626 = vmatprep.subr.bf16.mxu0 %v3842_v63 }
 0x18a   : > { %2545 = vmatpush1.bf16.msra.mxu1 %v3837_v0 }
 0x18b   : > { %2627 = vmatpush1.bf16.msra.mxu0 %v3840_v1  ;;  %2546 = vmatprep.subr.bf16.mxu1 %v3845_v2 }
 0x18c   : > { %2628 = vmatprep.subr.bf16.mxu0 %v3848_v3 }
 0x18e   : > { %2547 = vmatpush1.bf16.msra.mxu1 %v3843_v4 }
 0x18f   : > { %2629 = vmatpush1.bf16.msra.mxu0 %v3846_v5  ;;  %2548 = vmatprep.subr.bf16.mxu1 %v3851_v8 }
 0x190   : > { %2630 = vmatprep.subr.bf16.mxu0 %v3854_v9 }
 0x192   : > { %2549 = vmatpush1.bf16.msra.mxu1 %v3849_v10 }
 0x193   : > { %2631 = vmatpush1.bf16.msra.mxu0 %v3852_v11  ;;  %2550 = vmatprep.subr.bf16.mxu1 %v3857_v12 }
 0x194   : > { %2632 = vmatprep.subr.bf16.mxu0 %v3860_v13 }
 0x196   : > { %2551 = vmatpush1.bf16.msra.mxu1 %v3855_v14 }
 0x197   : > { %2633 = vmatpush1.bf16.msra.mxu0 %v3858_v15  ;;  %2552 = vmatprep.subr.bf16.mxu1 %v3863_v16 }
 0x198   : > { %2634 = vmatprep.subr.bf16.mxu0 %v3866_v17 }
 0x19a   : > { %2553 = vmatpush1.bf16.msra.mxu1 %v3861_v18 }
 0x19b   : > { %2635 = vmatpush1.bf16.msra.mxu0 %v3864_v19  ;;  %2554 = vmatprep.subr.bf16.mxu1 %v3869_v20 }
 0x19c   : > { %2636 = vmatprep.subr.bf16.mxu0 %v3872_v21 }
 0x19e   : > { %2555 = vmatpush1.bf16.msra.mxu1 %v3867_v22 }
 0x19f   : > { %2637 = vmatpush1.bf16.msra.mxu0 %v3870_v23  ;;  %2556 = vmatprep.subr.bf16.mxu1 %v3875_v24 }
 0x1a0   : > { %2638 = vmatprep.subr.bf16.mxu0 %v3878_v25 }
 0x1a2   : > { %2557 = vmatpush1.bf16.msra.mxu1 %v3873_v26 }
 0x1a3   : > { %2639 = vmatpush1.bf16.msra.mxu0 %v3876_v6 }
 0x1a5   : > { %2559 = vmatmul.mubr.bf16.vlgmr.msra.gmra.mrb[8].mxu1 %v4371_v7 }
 0x1a6   : > { %2641 = vmatmul.mubr.bf16.vlgmr.msra.gmra.mrb[8].mxu0 %v4371_v7 }
 0x1f8   : > { %v2396_v27 = vpop.f32.mrb[4].mxu1 }
 0x1f9   : > { %v2478_v28 = vpop.f32.mrb[4].mxu0  ;;  %v2398_v29 = vpop.f32.mrb[5].mxu1  ;;  %2655 = vst [vmem:[%s4291_s28 + $0x10] sm:$0xff] (!%p3263_p4), %v2396_v27 }
 0x1fa   : > { %v2480_v47 = vpop.f32.mrb[5].mxu0  ;;  %v2400_v30 = vpop.f32.mrb[6].mxu1  ;;  %2656 = vst [vmem:[%s4291_s28 + $0x18] sm:$0xff] (!%p3263_p4), %v2398_v29  ;;  %2657 = vst [vmem:[%s4291_s28 + $0x20] sm:$0xff] (!%p3263_p4), %v2478_v28 }
 0x1fb   : > { %v2482_v51 = vpop.f32.mrb[6].mxu0  ;;  %v2401_v31 = vpop.f32.mrb[7].mxu1  ;;  %2658 = vst [vmem:[%s4291_s28 + $0x28] sm:$0xff] (!%p3263_p4), %v2480_v47 }
 0x1fc   : > { %v2483_v32 = vpop.f32.mrb[7].mxu0 }
 0x276   : > { %2652 = sbr.rel (%p3263_p4) target bundleno = 637 (0x27d), region = 44 }
 0x278   : > { %v2560_v33 = vpop.f32.mrb[8].mxu1 }
 0x279   : > { %v2642_v34 = vpop.f32.mrb[8].mxu0  ;;  %v2562_v35 = vpop.f32.mrb[9].mxu1  ;;  %2659 = vst [vmem:[%s4291_s28 + $0x30] sm:$0xff] (!%p3263_p4), %v2560_v33 }
 0x27a   : > { %v2644_v36 = vpop.f32.mrb[9].mxu0  ;;  %v2564_v37 = vpop.f32.mrb[10].mxu1  ;;  %2660 = vst [vmem:[%s4291_s28 + $0x38] sm:$0xff] (!%p3263_p4), %v2562_v35  ;;  %2661 = vst [vmem:[%s4291_s28 + $0x40] sm:$0xff] (!%p3263_p4), %v2642_v34 }
 0x27b   : > { %v2646_v38 = vpop.f32.mrb[10].mxu0  ;;  %v2565_v39 = vpop.f32.mrb[11].mxu1  ;;  %2662 = vst [vmem:[%s4291_s28 + $0x48] sm:$0xff] (!%p3263_p4), %v2644_v36 }
 0x27c   : > { %v2647_v40 = vpop.f32.mrb[11].mxu0 }
 0x27d PF: > { %p3264_p0 = scmp.le.s32.totalorder %s4017_s18, 0 }
 0x27e   : > { %v2667_v7 = vld [vmem:[%s4291_s28] sm:$0xff] (!%p3264_p0)  ;;  %v2668_v41 = vld [vmem:[%s4291_s28 + $0x8] sm:$0xff] (!%p3264_p0)  ;;  %v2669_v43 = vld [vmem:[%s4291_s28 + $0x10] sm:$0xff] (!%p3264_p0) }
 0x27f   : > { %2666 = sbr.rel (%p3264_p0) target bundleno = 646 (0x286), region = 48  ;;  %v2677_v44 = vadd.f32 (!%p3264_p0), %v2667_v7, %v4605_v42  ;;  %v2678_v46 = vadd.f32 (!%p3264_p0), %v2668_v41, %v4607_v45  ;;  %v2679_v48 = vadd.f32 (!%p3264_p0), %v2669_v43, %v2396_v27  ;;  %v2670_v49 = vld [vmem:[%s4291_s28 + $0x18] sm:$0xff] (!%p3264_p0)  ;;  %v2671_v50 = vld [vmem:[%s4291_s28 + $0x20] sm:$0xff] (!%p3264_p0)  ;;  %v2672_v52 = vld [vmem:[%s4291_s28 + $0x28] sm:$0xff] (!%p3264_p0) }
 0x280   : > { %v2680_v53 = vadd.f32 (!%p3264_p0), %v2670_v49, %v2398_v29  ;;  %v2681_v54 = vadd.f32 (!%p3264_p0), %v2671_v50, %v2478_v28  ;;  %v2682_v55 = vadd.f32 (!%p3264_p0), %v2672_v52, %v2480_v47  ;;  %v2673_v56 = vld [vmem:[%s4291_s28 + $0x30] sm:$0xff] (!%p3264_p0) }
 0x281   : > { %v2674_v57 = vld [vmem:[%s4291_s28 + $0x38] sm:$0xff] (!%p3264_p0)  ;;  %v2675_v42 = vld [vmem:[%s4291_s28 + $0x40] sm:$0xff] (!%p3264_p0)  ;;  %2687 = vst [vmem:[%s4291_s28] sm:$0xff] (!%p3264_p0), %v2677_v44  ;;  %2688 = vst [vmem:[%s4291_s28 + $0x8] sm:$0xff] (!%p3264_p0), %v2678_v46  ;;  %v2683_v45 = vadd.f32 (!%p3264_p0), %v2673_v56, %v2560_v33 }
 0x282   : > { %2689 = vst [vmem:[%s4291_s28 + $0x10] sm:$0xff] (!%p3264_p0), %v2679_v48  ;;  %v2684_v58 = vadd.f32 (!%p3264_p0), %v2674_v57, %v2562_v35  ;;  %v2685_v59 = vadd.f32 (!%p3264_p0), %v2675_v42, %v2642_v34  ;;  %v2676_v60 = vld [vmem:[%s4291_s28 + $0x48] sm:$0xff] (!%p3264_p0)  ;;  %2690 = vst [vmem:[%s4291_s28 + $0x18] sm:$0xff] (!%p3264_p0), %v2680_v53 }
 0x283   : > { %2691 = vst [vmem:[%s4291_s28 + $0x20] sm:$0xff] (!%p3264_p0), %v2681_v54  ;;  %2692 = vst [vmem:[%s4291_s28 + $0x28] sm:$0xff] (!%p3264_p0), %v2682_v55  ;;  %v2686_v61 = vadd.f32 (!%p3264_p0), %v2676_v60, %v2644_v36 }
 0x284   : > { %2693 = vst [vmem:[%s4291_s28 + $0x30] sm:$0xff] (!%p3264_p0), %v2683_v45  ;;  %2694 = vst [vmem:[%s4291_s28 + $0x38] sm:$0xff] (!%p3264_p0), %v2684_v58 }
 0x285   : > { %2695 = vst [vmem:[%s4291_s28 + $0x40] sm:$0xff] (!%p3264_p0), %v2685_v59  ;;  %2696 = vst [vmem:[%s4291_s28 + $0x48] sm:$0xff] (!%p3264_p0), %v2686_v61 }
 0x286 PF: > { %p3265_p11 = scmp.ne.s32.totalorder %s4017_s18, 3 }
 0x287   : > { %v2715_v62 = vlaneseq (!%p3265_p11)  ;;  %v2711_v1 = vld [vmem:[%s239_s30] sm:$0xff] (!%p3265_p11)  ;;  %v2712_v6 = vld [vmem:[%s239_s30 + $0x8] sm:$0x3] (!%p3265_p11) }
 0x288   : > { %2700 = sbr.rel (%p3265_p11) target bundleno = 662 (0x296), region = 52  ;;  %v2701_v0 = vld [vmem:[%s4291_s28] sm:$0xff] (!%p3265_p11)  ;;  %v2702_v3 = vld [vmem:[%s4291_s28 + $0x8] sm:$0xff] (!%p3265_p11) }
 0x289   : > { %v2716_v63 = vshrl.u32 (!%p3265_p11), %v2715_v62, 7  ;;  %v2703_v5 = vld [vmem:[%s4291_s28 + $0x10] sm:$0xff] (!%p3265_p11)  ;;  %v2704_v10 = vld [vmem:[%s4291_s28 + $0x18] sm:$0xff] (!%p3265_p11) }
 0x28a   : > { %v2705_v11 = vld [vmem:[%s4291_s28 + $0x20] sm:$0xff] (!%p3265_p11)  ;;  %v2706_v20 = vld [vmem:[%s4291_s28 + $0x28] sm:$0xff] (!%p3265_p11) }
 0x28b   : > { %v2717_v2 = vsub.s32 (!%p3265_p11), 0, %v2716_v63  ;;  %v2721_v4 = vsub.s32 (!%p3265_p11), 1, %v2716_v63  ;;  %v2725_v8 = vsub.s32 (!%p3265_p11), 2, %v2716_v63  ;;  %v2729_v9 = vsub.s32 (!%p3265_p11), 3, %v2716_v63  ;;  %v2707_v21 = vld [vmem:[%s4291_s28 + $0x30] sm:$0xff] (!%p3265_p11)  ;;  %v2708_v22 = vld [vmem:[%s4291_s28 + $0x38] sm:$0xff] (!%p3265_p11) }
 0x28c   : > { %v2733_v12 = vsub.s32 (!%p3265_p11), 4, %v2716_v63  ;;  %v2737_v13 = vsub.s32 (!%p3265_p11), 5, %v2716_v63  ;;  %v2741_v14 = vsub.s32 (!%p3265_p11), 6, %v2716_v63  ;;  %v2745_v15 = vsub.s32 (!%p3265_p11), 7, %v2716_v63  ;;  %v2709_v33 = vld [vmem:[%s4291_s28 + $0x40] sm:$0xff] (!%p3265_p11)  ;;  %v2710_v34 = vld [vmem:[%s4291_s28 + $0x48] sm:$0xff] (!%p3265_p11) }
 0x28d   : > { %v2718_v16 = vrot.slane (!%p3265_p11), %v2711_v1, %v2717_v2  ;;  %v2722_v17 = vrot.slane (!%p3265_p11), %v2711_v1, %v2721_v4  ;;  %v2726_v18 = vrot.slane (!%p3265_p11), %v2711_v1, %v2725_v8  ;;  %v2730_v19 = vrot.slane (!%p3265_p11), %v2711_v1, %v2729_v9 }
 0x28e   : > { %v2734_v23 = vrot.slane (!%p3265_p11), %v2711_v1, %v2733_v12  ;;  %v2738_v24 = vrot.slane (!%p3265_p11), %v2711_v1, %v2737_v13  ;;  %v2742_v25 = vrot.slane (!%p3265_p11), %v2711_v1, %v2741_v14  ;;  %v2746_v26 = vrot.slane (!%p3265_p11), %v2711_v1, %v2745_v15 }
 0x28f   : > { %v2765_v27 = vadd.f32 %v2718_v16, %v2701_v0  ;;  %v2766_v28 = vadd.f32 %v2722_v17, %v2702_v3  ;;  %v2767_v29 = vadd.f32 %v2726_v18, %v2703_v5  ;;  %v2768_v47 = vadd.f32 %v2730_v19, %v2704_v10 }
 0x290   : > { %v2769_v30 = vadd.f32 %v2734_v23, %v2705_v11  ;;  %v2770_v51 = vadd.f32 %v2738_v24, %v2706_v20  ;;  %v2771_v31 = vadd.f32 %v2742_v25, %v2707_v21  ;;  %v2772_v32 = vadd.f32 %v2746_v26, %v2708_v22 }
 0x291   : > { %2775 = vst [vmem:[%s4291_s28] sm:$0xff] %v2765_v27  ;;  %2776 = vst [vmem:[%s4291_s28 + $0x8] sm:$0xff] %v2766_v28  ;;  %v2750_v35 = vrot.slane %v2712_v6, %v2717_v2  ;;  %v2754_v36 = vrot.slane %v2712_v6, %v2721_v4 }
 0x292   : > { %2777 = vst [vmem:[%s4291_s28 + $0x10] sm:$0xff] %v2767_v29  ;;  %2778 = vst [vmem:[%s4291_s28 + $0x18] sm:$0xff] %v2768_v47 }
 0x293   : > { %2779 = vst [vmem:[%s4291_s28 + $0x20] sm:$0xff] %v2769_v30  ;;  %2780 = vst [vmem:[%s4291_s28 + $0x28] sm:$0xff] %v2770_v51  ;;  %v2773_v37 = vadd.f32 %v2750_v35, %v2709_v33  ;;  %v2774_v38 = vadd.f32 %v2754_v36, %v2710_v34 }
 0x294   : > { %2781 = vst [vmem:[%s4291_s28 + $0x30] sm:$0xff] %v2771_v31  ;;  %2782 = vst [vmem:[%s4291_s28 + $0x38] sm:$0xff] %v2772_v32 }
 0x295   : > { %2783 = vst [vmem:[%s4291_s28 + $0x40] sm:$0xff] %v2773_v37  ;;  %2784 = vst [vmem:[%s4291_s28 + $0x48] sm:$0xff] %v2774_v38 }
 0x296 PF: > { %s19_s22 = sadd.s32 1, %s4033_s22   ;;  %s4769_s10 = sld [smem:[#allocation8_spill]] }
 0x297   : > { %p16_p12 = scmp.ge.s32.totalorder %s19_s22, 10   ;;  %s4770_s12 = smov %s3997_s13 }
 0x298   : > { %s4771_s13 = smov %s4001_s14  ;;  %s4772_s14 = smov %s4224_s9 }
 0x299   : > { %s4773_s15 = smov %s4009_s16  ;;  %s4774_s16 = smov %s4013_s17 }
 0x29a   : > { %s4775_s17 = smov %s4229_s26  ;;  %s4776_s18 = smov %s4025_s20 }
 0x29b   : > { %s4777_s19 = smov %s4029_s21  ;;  %s4778_s20 = smov %s4781_s23 }
 0x29c   : > { %s4779_s21 = smov %s4769_s10  ;;  %18 = sbr.rel (!%p16_p12) target bundleno = 11 (0xb), region = 100 }
 0x2a3   :  { %2815 = vsyncpa [#allocation3], 1 }
 0x2a4   :  { %2817 = vsyncpa [#allocation3 + $0x1], 1 }
 0x2a5   :  { %2818 = vsyncpa [#allocation5], 1 }
 0x2a6   :  { %2820 = vsyncpa [#allocation5 + $0x1], 1 }

</bundles_post_ra>
